<compile_context>
chip_gen: v7x
topology: tpu7x:2x2x1
jax: 0.10.0
libtpu: 0.0.40
codegen_flags: <defaults>
</compile_context>

<pallas_src>
import functools

import jax
import jax.numpy as jnp
from jax import lax
from jax.experimental import pallas as pl
from jax.experimental.pallas import tpu as pltpu

GN_EPS = 1e-5     # nn.GroupNorm default eps
WS_EPS = 1e-10    # WeightStandardizedConv2d eps (BiT)


def _default_vmem_limit():
    # v5e/v6e (128 MiB) -> ~96 MiB, v7x (64 MiB) -> ~48 MiB.
    try:
        cap = pltpu.get_tpu_info().vmem_capacity_bytes
        return min(int(cap * 3 // 4), 100 * 1024 * 1024)
    except Exception:
        return 64 * 1024 * 1024


VMEM_LIMIT = _default_vmem_limit()


def _row_tile(length, target=2048):
    """Largest divisor of `length` that is <= target and a multiple of 8 (else full)."""
    if length <= target:
        return length
    for cand in (target, 1024, 512, 256, 128, 64, 32, 16, 8):
        if cand <= target and length % cand == 0:
            return cand
    return length


# ---------------------------------------------------------------------------
# GroupNorm stats kernel: per-(sample, channel) scale/shift (apply is fused downstream)
# ---------------------------------------------------------------------------
def _gn_stats_kernel(x_ref, gamma_ref, beta_ref, mask_ref, scale_ref, shift_ref, *,
                     inv_count):
    # x_ref block: (1, L, C); mask_ref: (G, C) group membership.
    x = x_ref[0].astype(jnp.float32)                          # (L, C)
    mask = mask_ref[...]                                      # (G, C)
    # Two-pass stats (mean first, then centered second moment) for accuracy.
    s1 = jnp.sum(x, axis=0, keepdims=True)                    # (1, C)
    mean_g = jnp.sum(s1 * mask, axis=1, keepdims=True) * inv_count   # (G, 1)
    mean_c = jnp.sum(mask * mean_g, axis=0, keepdims=True)    # (1, C)
    d = x - mean_c
    s2 = jnp.sum(d * d, axis=0, keepdims=True)                # (1, C)
    var_g = jnp.sum(s2 * mask, axis=1, keepdims=True) * inv_count    # (G, 1)
    inv_g = lax.rsqrt(var_g + GN_EPS)                         # (G, 1)
    inv_c = jnp.sum(mask * inv_g, axis=0, keepdims=True)      # (1, C)
    scale = inv_c * gamma_ref[...]                            # (1, C)
    shift = beta_ref[...] - mean_c * scale                    # (1, C)
    scale_ref[0] = scale
    shift_ref[0] = shift


def gn_scale_shift(x_nlc, gamma, beta, num_groups):
    """Per-(sample, channel) GN scale/shift so y = x*scale + shift == GroupNorm(x)."""
    N, L, C = x_nlc.shape
    G = num_groups
    Cg = C // G
    inv_count = 1.0 / float(Cg * L)
    gamma2 = gamma.astype(jnp.float32).reshape(1, C)
    beta2 = beta.astype(jnp.float32).reshape(1, C)
    mask = (jnp.arange(C)[None, :] // Cg == jnp.arange(G)[:, None]).astype(jnp.float32)

    kernel = functools.partial(_gn_stats_kernel, inv_count=inv_count)
    # TODO(synk): tile L with an "arbitrary" reduction axis for very large samples.
    scale, shift = pl.pallas_call(
        kernel,
        out_shape=(jax.ShapeDtypeStruct((N, 1, C), jnp.float32),
                   jax.ShapeDtypeStruct((N, 1, C), jnp.float32)),
        grid=(N,),
        in_specs=[
            pl.BlockSpec((1, L, C), lambda n: (n, 0, 0)),
            pl.BlockSpec((1, C), lambda n: (0, 0)),
            pl.BlockSpec((1, C), lambda n: (0, 0)),
            pl.BlockSpec((G, C), lambda n: (0, 0)),
        ],
        out_specs=(pl.BlockSpec((1, 1, C), lambda n: (n, 0, 0)),
                   pl.BlockSpec((1, 1, C), lambda n: (n, 0, 0))),
        compiler_params=pltpu.CompilerParams(
            dimension_semantics=("parallel",), vmem_limit_bytes=VMEM_LIMIT),
    )(x_nlc, gamma2, beta2, mask)
    return scale, shift


# ---------------------------------------------------------------------------
# conv1 (1x1): GN1+ReLU fused on the A-side, resident weight, grid over (sample, rows)
# ---------------------------------------------------------------------------
def _gn_mm_kernel(x_ref, s_ref, b_ref, w_ref, o_ref):
    a = x_ref[0].astype(jnp.float32)                          # (tl, C)
    a = jnp.maximum(a * s_ref[0] + b_ref[0], 0.0)             # GN+ReLU applied in f32
    o_ref[0] = jnp.dot(a.astype(jnp.bfloat16), w_ref[...],
                       preferred_element_type=jnp.float32).astype(o_ref.dtype)


def gn_relu_matmul(x_nlc, scale, shift, w, out_dtype=jnp.bfloat16):
    N, L, C = x_nlc.shape
    Cout = w.shape[1]
    tl = _row_tile(L)
    return pl.pallas_call(
        _gn_mm_kernel,
        out_shape=jax.ShapeDtypeStruct((N, L, Cout), out_dtype),
        grid=(N, L // tl),
        in_specs=[
            pl.BlockSpec((1, tl, C), lambda n, l: (n, l, 0)),
            pl.BlockSpec((1, 1, C), lambda n, l: (n, 0, 0)),
            pl.BlockSpec((1, 1, C), lambda n, l: (n, 0, 0)),
            pl.BlockSpec((C, Cout), lambda n, l: (0, 0)),      # resident weight
        ],
        out_specs=pl.BlockSpec((1, tl, Cout), lambda n, l: (n, l, 0)),
        compiler_params=pltpu.CompilerParams(
            dimension_semantics=("parallel", "parallel"),
            vmem_limit_bytes=VMEM_LIMIT),
    )(x_nlc, scale, shift, w)


# ---------------------------------------------------------------------------
# conv2 (3x3, stride s, pad 1): GN2+ReLU fused in-kernel, 9 taps summed in VMEM
# ---------------------------------------------------------------------------
def _conv3x3_gn_kernel(x_ref, s_ref, b_ref, mask_ref, w_ref, o_ref, y_ref, *,
                       stride, Ho, Wo):
    # x_ref: (1, s*s, Hq, Wq, C) RAW (un-normalized) polyphase-split padded sample.
    # mask_ref: (1, s*s, Hq, Wq, 1) is 1 on real pixels, 0 on the conv zero-padding,
    # so the padding stays exactly zero after the fused GN affine + ReLU.
    s = stride
    Cout = w_ref.shape[-1]
    C = x_ref.shape[-1]
    x = x_ref[0].astype(jnp.float32)                          # (s*s, Hq, Wq, C)
    y = jnp.maximum(x * s_ref[0] + b_ref[0], 0.0) * mask_ref[0]
    y_ref[...] = y.astype(y_ref.dtype)                        # GN'd activation in VMEM

    acc = jnp.zeros((Ho * Wo, Cout), jnp.float32)
    for t in range(9):
        dy, dx = t // 3, t % 3
        py, oy = dy % s, dy // s
        px, ox = dx % s, dx // s
        xs = y_ref[py * s + px, oy:oy + Ho, ox:ox + Wo, :]    # (Ho, Wo, C)
        acc = acc + jnp.dot(xs.reshape(Ho * Wo, C), w_ref[t],
                            preferred_element_type=jnp.float32)
    o_ref[0] = acc.reshape(Ho, Wo, Cout).astype(o_ref.dtype)


def conv3x3_gn(x_nhwc, scale, shift, w_std, stride=1, out_dtype=jnp.bfloat16):
    """relu(x*scale+shift) -> 3x3 conv (pad 1, stride s); one sample per grid step."""
    N, H, W, C = x_nhwc.shape
    Cout = w_std.shape[0]
    s = stride
    Ho = (H - 1) // s + 1
    Wo = (W - 1) // s + 1
    Hp, Wp = H + 2, W + 2
    Hq, Wq = -(-Hp // s), -(-Wp // s)

    # Pad + (for stride>1) polyphase-split the RAW activation; GN2+ReLU happens
    # in-kernel, `mask` restores the zero padding after the affine.
    # TODO(synk): replace the wrapper-side polyphase relayout with in-kernel
    # pl.ds(..., stride=s) reads from an unpadded block to remove this HBM pass.
    xp = jnp.pad(x_nhwc.astype(jnp.bfloat16), ((0, 0), (1, 1), (1, 1), (0, 0)))
    mk = jnp.pad(jnp.ones((H, W), jnp.float32), ((1, 1), (1, 1)))
    if s > 1:
        xp = jnp.pad(xp, ((0, 0), (0, Hq * s - Hp), (0, Wq * s - Wp), (0, 0)))
        xp = xp.reshape(N, Hq, s, Wq, s, C).transpose(0, 2, 4, 1, 3, 5)
        xp = xp.reshape(N, s * s, Hq, Wq, C)
        mk = jnp.pad(mk, ((0, Hq * s - Hp), (0, Wq * s - Wp)))
        mk = mk.reshape(Hq, s, Wq, s).transpose(1, 3, 0, 2).reshape(s * s, Hq, Wq)
    else:
        xp = xp.reshape(N, 1, Hp, Wp, C)
        mk = mk.reshape(1, Hp, Wp)
    mk = mk[None, :, :, :, None]                               # (1, s*s, Hq, Wq, 1)

    wm = jnp.transpose(w_std, (2, 3, 1, 0)).reshape(9, C, Cout).astype(jnp.bfloat16)
    kernel = functools.partial(_conv3x3_gn_kernel, stride=s, Ho=Ho, Wo=Wo)
    # TODO(synk): tile (Ho, Cout) for very large stages so the whole-sample block and
    # f32 accumulator stay within v7x's 64 MiB VMEM and both v7x cores get work.
    return pl.pallas_call(
        kernel,
        out_shape=jax.ShapeDtypeStruct((N, Ho, Wo, Cout), out_dtype),
        grid=(N,),
        in_specs=[
            pl.BlockSpec((1, s * s, Hq, Wq, C), lambda n: (n, 0, 0, 0, 0)),
            pl.BlockSpec((1, 1, C), lambda n: (n, 0, 0)),
            pl.BlockSpec((1, 1, C), lambda n: (n, 0, 0)),
            pl.BlockSpec((1, s * s, Hq, Wq, 1), lambda n: (0, 0, 0, 0, 0)),
            pl.BlockSpec((9, C, Cout), lambda n: (0, 0, 0)),   # resident tap weights
        ],
        out_specs=pl.BlockSpec((1, Ho, Wo, Cout), lambda n: (n, 0, 0, 0)),
        scratch_shapes=[pltpu.VMEM((s * s, Hq, Wq, C), jnp.bfloat16)],
        compiler_params=pltpu.CompilerParams(
            dimension_semantics=("parallel",), vmem_limit_bytes=VMEM_LIMIT),
    )(xp, scale, shift, mk, wm)


# ---------------------------------------------------------------------------
# Final fused kernel: GN3+ReLU -> conv3 (1x1), plus the residual path
# (downsample 1x1 stride-s conv, or identity), all in one f32 accumulator.
# ---------------------------------------------------------------------------
def _conv3_residual_ds_kernel(o2_ref, s3_ref, b3_ref, w3_ref,
                              x_ref, s1_ref, b1_ref, wd_ref, o_ref, *, cin):
    # Main path: relu(gn3(o2)) @ w3.
    a = jnp.maximum(o2_ref[0].astype(jnp.float32) * s3_ref[0] + b3_ref[0], 0.0)
    acc = jnp.dot(a.astype(jnp.bfloat16), w3_ref[...],
                  preferred_element_type=jnp.float32)          # (Lo, Cout)
    # Residual path: phase-0 rows are delivered by the BlockSpec; take the phase-0
    # columns (first `cin` lanes of the lane-merged (s*cin) groups), re-apply GN1+ReLU
    # and matmul with the downsample weight -- no residual ever hits HBM.
    xs = x_ref[0, :, 0, :, :]                                  # (Ho, Wo, s*cin)
    xs = xs[:, :, :cin]                                        # (Ho, Wo, cin)
    ho, wo = xs.shape[0], xs.shape[1]
    r = xs.reshape(ho * wo, cin).astype(jnp.float32)
    r = jnp.maximum(r * s1_ref[0] + b1_ref[0], 0.0)
    acc = acc + jnp.dot(r.astype(jnp.bfloat16), wd_ref[...],
                        preferred_element_type=jnp.float32)
    o_ref[0] = acc.astype(o_ref.dtype)


def _conv3_residual_id_kernel(o2_ref, s3_ref, b3_ref, w3_ref,
                              x_ref, s1_ref, b1_ref, o_ref):
    a = jnp.maximum(o2_ref[0].astype(jnp.float32) * s3_ref[0] + b3_ref[0], 0.0)
    acc = jnp.dot(a.astype(jnp.bfloat16), w3_ref[...],
                  preferred_element_type=jnp.float32)
    r = jnp.maximum(x_ref[0].astype(jnp.float32) * s1_ref[0] + b1_ref[0], 0.0)
    o_ref[0] = (acc + r).astype(o_ref.dtype)


def conv3_residual_downsample(o2_nlc, scale3, shift3, w3, x_ph, scale1, shift1, wds,
                              out_dtype=jnp.float32):
    N, Lo, Cb = o2_nlc.shape
    Cout = w3.shape[1]
    _, Ho, s, Wo, sc = x_ph.shape
    cin = sc // s
    kernel = functools.partial(_conv3_residual_ds_kernel, cin=cin)
    return pl.pallas_call(
        kernel,
        out_shape=jax.ShapeDtypeStruct((N, Lo, Cout), out_dtype),
        grid=(N,),
        in_specs=[
            pl.BlockSpec((1, Lo, Cb), lambda n: (n, 0, 0)),
            pl.BlockSpec((1, 1, Cb), lambda n: (n, 0, 0)),
            pl.BlockSpec((1, 1, Cb), lambda n: (n, 0, 0)),
            pl.BlockSpec((Cb, Cout), lambda n: (0, 0)),        # resident w3
            # size-1 block on the row-phase dim -> DMA fetches only phase-0 rows.
            pl.BlockSpec((1, Ho, 1, Wo, sc), lambda n: (n, 0, 0, 0, 0)),
            pl.BlockSpec((1, 1, cin), lambda n: (n, 0, 0)),
            pl.BlockSpec((1, 1, cin), lambda n: (n, 0, 0)),
            pl.BlockSpec((cin, Cout), lambda n: (0, 0)),       # resident downsample w
        ],
        out_specs=pl.BlockSpec((1, Lo, Cout), lambda n: (n, 0, 0)),
        compiler_params=pltpu.CompilerParams(
            dimension_semantics=("parallel",), vmem_limit_bytes=VMEM_LIMIT),
    )(o2_nlc, scale3, shift3, w3, x_ph, scale1, shift1, wds)


def conv3_residual_identity(o2_nlc, scale3, shift3, w3, x_nlc, scale1, shift1,
                            out_dtype=jnp.float32):
    N, Lo, Cb = o2_nlc.shape
    Cout = w3.shape[1]
    _, L, Cin = x_nlc.shape
    return pl.pallas_call(
        _conv3_residual_id_kernel,
        out_shape=jax.ShapeDtypeStruct((N, Lo, Cout), out_dtype),
        grid=(N,),
        in_specs=[
            pl.BlockSpec((1, Lo, Cb), lambda n: (n, 0, 0)),
            pl.BlockSpec((1, 1, Cb), lambda n: (n, 0, 0)),
            pl.BlockSpec((1, 1, Cb), lambda n: (n, 0, 0)),
            pl.BlockSpec((Cb, Cout), lambda n: (0, 0)),
            pl.BlockSpec((1, L, Cin), lambda n: (n, 0, 0)),
            pl.BlockSpec((1, 1, Cin), lambda n: (n, 0, 0)),
            pl.BlockSpec((1, 1, Cin), lambda n: (n, 0, 0)),
        ],
        out_specs=pl.BlockSpec((1, Lo, Cout), lambda n: (n, 0, 0)),
        compiler_params=pltpu.CompilerParams(
            dimension_semantics=("parallel",), vmem_limit_bytes=VMEM_LIMIT),
    )(o2_nlc, scale3, shift3, w3, x_nlc, scale1, shift1)


# ---------------------------------------------------------------------------
# Weight standardization (BiT WeightStandardizedConv2d)
# ---------------------------------------------------------------------------
def standardize_weight(w):
    m = jnp.mean(w, axis=(1, 2, 3), keepdims=True)
    v = jnp.mean(jnp.square(w - m), axis=(1, 2, 3), keepdims=True)
    return (w - m) / jnp.sqrt(v + WS_EPS)


# ---------------------------------------------------------------------------
# Full ResNetV2Block forward
# ---------------------------------------------------------------------------
def resnetv2_block(x_nchw, params, num_groups, downsample_stride):
    N, Cin, H, W = x_nchw.shape
    s = downsample_stride
    L = H * W
    # Single NCHW -> channels-last conversion (bf16 intermediates from here on).
    x = jnp.transpose(x_nchw, (0, 2, 3, 1)).reshape(N, L, Cin).astype(jnp.bfloat16)

    # GN1 stats; the affine+ReLU itself is applied inside the consumers (conv1 and the
    # residual path), so relu(gn1(x)) never round-trips to HBM.
    scale1, shift1 = gn_scale_shift(x, params["gn1_w"], params["gn1_b"], num_groups)

    w1 = standardize_weight(params["conv1_w"])[:, :, 0, 0].T.astype(jnp.bfloat16)   # (Cin, Cb)
    Cb = w1.shape[1]
    o1 = gn_relu_matmul(x, scale1, shift1, w1)                                      # (N, L, Cb)

    scale2, shift2 = gn_scale_shift(o1, params["gn2_w"], params["gn2_b"], num_groups)
    o2 = conv3x3_gn(o1.reshape(N, H, W, Cb), scale2, shift2,
                    standardize_weight(params["conv2_w"]), stride=s)                # (N, Ho, Wo, Cb)
    _, Ho, Wo, _ = o2.shape
    Lo = Ho * Wo

    scale3, shift3 = gn_scale_shift(o2.reshape(N, Lo, Cb),
                                    params["gn3_w"], params["gn3_b"], num_groups)

    w3 = standardize_weight(params["conv3_w"])[:, :, 0, 0].T.astype(jnp.bfloat16)   # (Cb, Cout)
    Cout = w3.shape[1]

    if params.get("ds_w") is not None:
        wds = standardize_weight(params["ds_w"])[:, :, 0, 0].T.astype(jnp.bfloat16)  # (Cin, Cout)
        # Phase view of x for the strided 1x1 downsample -- a pure reshape (no HBM
        # pass) when H, W divide the stride; the final kernel reads only phase 0.
        Hs, Ws = Ho * s, Wo * s
        x_img = x.reshape(N, H, W, Cin)
        if (Hs, Ws) != (H, W):
            x_img = jnp.pad(x_img, ((0, 0), (0, Hs - H), (0, Ws - W), (0, 0)))
        x_ph = x_img.reshape(N, Ho, s, Wo, s * Cin)
        y = conv3_residual_downsample(o2.reshape(N, Lo, Cb), scale3, shift3, w3,
                                      x_ph, scale1, shift1, wds)                    # (N, Lo, Cout) f32
    else:
        assert s == 1 and Cin == Cout, "identity shortcut requires stride=1, Cin==Cout"
        y = conv3_residual_identity(o2.reshape(N, Lo, Cb), scale3, shift3, w3,
                                    x, scale1, shift1)                              # (N, Lo, Cout) f32

    y = y.reshape(N, Ho, Wo, Cout)
    # Module contract is NCHW f32; the NHWC->NCHW relayout is XLA glue at the boundary.
    return jnp.transpose(y, (0, 3, 1, 2))


# ---------------------------------------------------------------------------
# Pure-JAX reference (sanity check of the Pallas path)
# ---------------------------------------------------------------------------
def ref_block(x_nchw, params, num_groups, stride):
    def gn(x, w, b):
        N, C, H, W = x.shape
        xg = x.reshape(N, num_groups, C // num_groups, H, W)
        m = jnp.mean(xg, axis=(2, 3, 4), keepdims=True)
        v = jnp.mean(jnp.square(xg - m), axis=(2, 3, 4), keepdims=True)
        xn = ((xg - m) / jnp.sqrt(v + GN_EPS)).reshape(N, C, H, W)
        return xn * w[None, :, None, None] + b[None, :, None, None]

    def conv(x, w, s, padding):
        return lax.conv_general_dilated(
            x, standardize_weight(w), (s, s), padding,
            dimension_numbers=("NCHW", "OIHW", "NCHW"))

    relu = lambda t: jnp.maximum(t, 0.0)
    inp = relu(gn(x_nchw, params["gn1_w"], params["gn1_b"]))
    o = conv(inp, params["conv1_w"], 1, "VALID")
    o = conv(relu(gn(o, params["gn2_w"], params["gn2_b"])),
             params["conv2_w"], stride, ((1, 1), (1, 1)))
    o = conv(relu(gn(o, params["gn3_w"], params["gn3_b"])),
             params["conv3_w"], 1, "VALID")
    if params.get("ds_w") is not None:
        resid = conv(inp, params["ds_w"], stride, "VALID")
    else:
        resid = inp
    return o + resid


# ---------------------------------------------------------------------------
if __name__ == "__main__":
    N, Cin, H, W = 2, 8, 16, 16
    Cout, Cb, G, S = 16, 4, 2, 2   # out_channels, bottleneck_channels, num_groups, stride

    key = jax.random.PRNGKey(0)
    ks = jax.random.split(key, 11)
    params = dict(
        gn1_w=1.0 + 0.1 * jax.random.normal(ks[0], (Cin,), jnp.float32),
        gn1_b=0.1 * jax.random.normal(ks[1], (Cin,), jnp.float32),
        conv1_w=jax.random.normal(ks[2], (Cb, Cin, 1, 1), jnp.float32),
        gn2_w=1.0 + 0.1 * jax.random.normal(ks[3], (Cb,), jnp.float32),
        gn2_b=0.1 * jax.random.normal(ks[4], (Cb,), jnp.float32),
        conv2_w=jax.random.normal(ks[5], (Cb, Cb, 3, 3), jnp.float32),
        gn3_w=1.0 + 0.1 * jax.random.normal(ks[6], (Cb,), jnp.float32),
        gn3_b=0.1 * jax.random.normal(ks[7], (Cb,), jnp.float32),
        conv3_w=jax.random.normal(ks[8], (Cout, Cb, 1, 1), jnp.float32),
        ds_w=jax.random.normal(ks[9], (Cout, Cin, 1, 1), jnp.float32),  # in != out -> downsample
    )
    x = jax.random.normal(ks[10], (N, Cin, H, W), jnp.float32)

    block_fn = jax.jit(functools.partial(resnetv2_block, num_groups=G, downsample_stride=S))
    y = jax.block_until_ready(block_fn(x, params))

    assert y.shape == (N, Cout, H // S, W // S), y.shape
    y_ref = ref_block(x, params, G, S)
    max_err = float(jnp.max(jnp.abs(y - y_ref)))
    # bf16 operands / intermediates with f32 accumulation -> modest tolerance.
    assert bool(jnp.allclose(y, y_ref, rtol=2e-1, atol=2e-1)), max_err

    print("KERNEL_OK")
</pallas_src>

<mosaic_0001>
module attributes {stable_mosaic.version = 11 : i64} {
  func.func @_gn_mm_kernel(%arg0: i32, %arg1: i32, %arg2: memref<1x256x8xbf16, #tpu.memory_space<vmem>>, %arg3: memref<1x1x8xf32, #tpu.memory_space<vmem>>, %arg4: memref<1x1x8xf32, #tpu.memory_space<vmem>>, %arg5: memref<8x4xbf16, #tpu.memory_space<vmem>>, %arg6: memref<1x256x4xbf16, #tpu.memory_space<vmem>>) attributes {dimension_semantics = [#tpu.dimension_semantics<parallel>, #tpu.dimension_semantics<parallel>], iteration_bounds = array<i64: 2, 1>, scalar_prefetch = 0 : i64, scratch_operands = 0 : i64, tpu.core_type = #tpu.core_type<tc>, window_params = [{transform_indices = @transform_0, window_bounds = array<i64: 1, 256, 8>}, {transform_indices = @transform_1, window_bounds = array<i64: 1, 1, 8>}, {transform_indices = @transform_2, window_bounds = array<i64: 1, 1, 8>}, {pipeline_mode = #tpu.pipeline_mode<synchronous>, transform_indices = @transform_3, window_bounds = array<i64: 8, 4>}, {transform_indices = @transform_4, window_bounds = array<i64: 1, 256, 4>}]} {
    %c0 = arith.constant 0 : index
    %c0_0 = arith.constant 0 : index
    %c0_1 = arith.constant 0 : index
    %0 = vector.load %arg2[%c0, %c0_0, %c0_1] : memref<1x256x8xbf16, #tpu.memory_space<vmem>>, vector<1x256x8xbf16>
    %1 = vector.shape_cast %0 : vector<1x256x8xbf16> to vector<256x8xbf16>
    %2 = arith.extf %1 : vector<256x8xbf16> to vector<256x8xf32>
    %c0_2 = arith.constant 0 : index
    %c0_3 = arith.constant 0 : index
    %c0_4 = arith.constant 0 : index
    %3 = vector.load %arg3[%c0_2, %c0_3, %c0_4] : memref<1x1x8xf32, #tpu.memory_space<vmem>>, vector<1x1x8xf32>
    %4 = vector.shape_cast %3 : vector<1x1x8xf32> to vector<1x8xf32>
    %5 = vector.broadcast %4 : vector<1x8xf32> to vector<256x8xf32>
    %6 = arith.mulf %2, %5 : vector<256x8xf32>
    %c0_5 = arith.constant 0 : index
    %c0_6 = arith.constant 0 : index
    %c0_7 = arith.constant 0 : index
    %7 = vector.load %arg4[%c0_5, %c0_6, %c0_7] : memref<1x1x8xf32, #tpu.memory_space<vmem>>, vector<1x1x8xf32>
    %8 = vector.shape_cast %7 : vector<1x1x8xf32> to vector<1x8xf32>
    %9 = vector.broadcast %8 : vector<1x8xf32> to vector<256x8xf32>
    %10 = arith.addf %6, %9 : vector<256x8xf32>
    %cst = arith.constant 0.000000e+00 : f32
    %11 = vector.broadcast %cst : f32 to vector<256x8xf32>
    %12 = arith.maximumf %10, %11 : vector<256x8xf32>
    %13 = arith.truncf %12 : vector<256x8xf32> to vector<256x8xbf16>
    %c0_8 = arith.constant 0 : index
    %c0_9 = arith.constant 0 : index
    %14 = vector.load %arg5[%c0_8, %c0_9] : memref<8x4xbf16, #tpu.memory_space<vmem>>, vector<8x4xbf16>
    %cst_10 = arith.constant dense<0.000000e+00> : vector<256x4xf32>
    %15 = tpu.matmul %13, %14, %cst_10 {dimension_numbers = #tpu.dot_dimension_numbers<[1], [0], [0], [1], [0, 0, 1, 1], [], []>} : vector<256x8xbf16>, vector<8x4xbf16>, vector<256x4xf32> -> vector<256x4xf32>
    %16 = arith.truncf %15 : vector<256x4xf32> to vector<256x4xbf16>
    %c0_11 = arith.constant 0 : index
    %c0_12 = arith.constant 0 : index
    %c0_13 = arith.constant 0 : index
    %17 = vector.load %arg6[%c0_11, %c0_12, %c0_13] : memref<1x256x4xbf16, #tpu.memory_space<vmem>>, vector<1x256x4xbf16>
    %18 = vector.shape_cast %17 : vector<1x256x4xbf16> to vector<256x4xbf16>
    %19 = vector.shape_cast %16 : vector<256x4xbf16> to vector<1x256x4xbf16>
    tpu.vector_store %arg6[%c0_11, %c0_12, %c0_13], %19 {strides = array<i32>} : memref<1x256x4xbf16, #tpu.memory_space<vmem>>, vector<1x256x4xbf16>,
    return
  }
  func.func @transform_0(%arg0: i32, %arg1: i32) -> (i32, i32, i32) {
    %c0_i32 = arith.constant 0 : i32
    %c0_i32_0 = arith.constant 0 : i32
    return %arg0, %arg1, %c0_i32 : i32, i32, i32
  }
  func.func @transform_1(%arg0: i32, %arg1: i32) -> (i32, i32, i32) {
    %c0_i32 = arith.constant 0 : i32
    %c0_i32_0 = arith.constant 0 : i32
    %c0_i32_1 = arith.constant 0 : i32
    return %arg0, %c0_i32, %c0_i32_0 : i32, i32, i32
  }
  func.func @transform_2(%arg0: i32, %arg1: i32) -> (i32, i32, i32) {
    %c0_i32 = arith.constant 0 : i32
    %c0_i32_0 = arith.constant 0 : i32
    %c0_i32_1 = arith.constant 0 : i32
    return %arg0, %c0_i32, %c0_i32_0 : i32, i32, i32
  }
  func.func @transform_3(%arg0: i32, %arg1: i32) -> (i32, i32) {
    %c0_i32 = arith.constant 0 : i32
    %c0_i32_0 = arith.constant 0 : i32
    %c0_i32_1 = arith.constant 0 : i32
    return %c0_i32, %c0_i32_0 : i32, i32
  }
  func.func @transform_4(%arg0: i32, %arg1: i32) -> (i32, i32, i32) {
    %c0_i32 = arith.constant 0 : i32
    %c0_i32_0 = arith.constant 0 : i32
    return %arg0, %arg1, %c0_i32 : i32, i32, i32
  }
}

module attributes {stable_mosaic.version = 11 : i64} {
  func.func @_gn_stats_kernel(%arg0: i32, %arg1: memref<1x256x8xbf16, #tpu.memory_space<vmem>>, %arg2: memref<1x8xf32, #tpu.memory_space<vmem>>, %arg3: memref<1x8xf32, #tpu.memory_space<vmem>>, %arg4: memref<2x8xf32, #tpu.memory_space<vmem>>, %arg5: memref<1x1x8xf32, #tpu.memory_space<vmem>>, %arg6: memref<1x1x8xf32, #tpu.memory_space<vmem>>) attributes {dimension_semantics = [#tpu.dimension_semantics<parallel>], iteration_bounds = array<i64: 2>, scalar_prefetch = 0 : i64, scratch_operands = 0 : i64, tpu.core_type = #tpu.core_type<tc>, window_params = [{transform_indices = @transform_0, window_bounds = array<i64: 1, 256, 8>}, {pipeline_mode = #tpu.pipeline_mode<synchronous>, transform_indices = @transform_1, window_bounds = array<i64: 1, 8>}, {pipeline_mode = #tpu.pipeline_mode<synchronous>, transform_indices = @transform_2, window_bounds = array<i64: 1, 8>}, {pipeline_mode = #tpu.pipeline_mode<synchronous>, transform_indices = @transform_3, window_bounds = array<i64: 2, 8>}, {transform_indices = @transform_4, window_bounds = array<i64: 1, 1, 8>}, {transform_indices = @transform_5, window_bounds = array<i64: 1, 1, 8>}]} {
    %c0 = arith.constant 0 : index
    %c0_0 = arith.constant 0 : index
    %c0_1 = arith.constant 0 : index
    %0 = vector.load %arg1[%c0, %c0_0, %c0_1] : memref<1x256x8xbf16, #tpu.memory_space<vmem>>, vector<1x256x8xbf16>
    %1 = vector.shape_cast %0 : vector<1x256x8xbf16> to vector<256x8xbf16>
    %2 = arith.extf %1 : vector<256x8xbf16> to vector<256x8xf32>
    %c0_2 = arith.constant 0 : index
    %c0_3 = arith.constant 0 : index
    %3 = vector.load %arg4[%c0_2, %c0_3] : memref<2x8xf32, #tpu.memory_space<vmem>>, vector<2x8xf32>
    %cst = arith.constant dense<0.000000e+00> : vector<8xf32>
    %4 = vector.multi_reduction <add>, %2, %cst [0] : vector<256x8xf32> to vector<8xf32>
    %5 = vector.shape_cast %4 : vector<8xf32> to vector<1x8xf32>
    %6 = vector.broadcast %5 : vector<1x8xf32> to vector<2x8xf32>
    %7 = arith.mulf %6, %3 : vector<2x8xf32>
    %cst_4 = arith.constant dense<0.000000e+00> : vector<2xf32>
    %8 = vector.multi_reduction <add>, %7, %cst_4 [1] : vector<2x8xf32> to vector<2xf32>
    %9 = vector.shape_cast %8 : vector<2xf32> to vector<2x1xf32>
    %cst_5 = arith.constant 9.765625E-4 : f32
    %10 = vector.broadcast %cst_5 : f32 to vector<2x1xf32>
    %11 = arith.mulf %9, %10 : vector<2x1xf32>
    %12 = vector.broadcast %11 : vector<2x1xf32> to vector<2x8xf32>
    %13 = arith.mulf %3, %12 : vector<2x8xf32>
    %cst_6 = arith.constant dense<0.000000e+00> : vector<8xf32>
    %14 = vector.multi_reduction <add>, %13, %cst_6 [0] : vector<2x8xf32> to vector<8xf32>
    %15 = vector.shape_cast %14 : vector<8xf32> to vector<1x8xf32>
    %16 = vector.broadcast %15 : vector<1x8xf32> to vector<256x8xf32>
    %17 = arith.subf %2, %16 : vector<256x8xf32>
    %18 = arith.mulf %17, %17 : vector<256x8xf32>
    %cst_7 = arith.constant dense<0.000000e+00> : vector<8xf32>
    %19 = vector.multi_reduction <add>, %18, %cst_7 [0] : vector<256x8xf32> to vector<8xf32>
    %20 = vector.shape_cast %19 : vector<8xf32> to vector<1x8xf32>
    %21 = vector.broadcast %20 : vector<1x8xf32> to vector<2x8xf32>
    %22 = arith.mulf %21, %3 : vector<2x8xf32>
    %cst_8 = arith.constant dense<0.000000e+00> : vector<2xf32>
    %23 = vector.multi_reduction <add>, %22, %cst_8 [1] : vector<2x8xf32> to vector<2xf32>
    %24 = vector.shape_cast %23 : vector<2xf32> to vector<2x1xf32>
    %cst_9 = arith.constant 9.765625E-4 : f32
    %25 = vector.broadcast %cst_9 : f32 to vector<2x1xf32>
    %26 = arith.mulf %24, %25 : vector<2x1xf32>
    %cst_10 = arith.constant 9.99999974E-6 : f32
    %27 = vector.broadcast %cst_10 : f32 to vector<2x1xf32>
    %28 = arith.addf %26, %27 : vector<2x1xf32>
    %29 = math.rsqrt %28 : vector<2x1xf32>
    %30 = vector.broadcast %29 : vector<2x1xf32> to vector<2x8xf32>
    %31 = arith.mulf %3, %30 : vector<2x8xf32>
    %cst_11 = arith.constant dense<0.000000e+00> : vector<8xf32>
    %32 = vector.multi_reduction <add>, %31, %cst_11 [0] : vector<2x8xf32> to vector<8xf32>
    %33 = vector.shape_cast %32 : vector<8xf32> to vector<1x8xf32>
    %c0_12 = arith.constant 0 : index
    %c0_13 = arith.constant 0 : index
    %34 = vector.load %arg2[%c0_12, %c0_13] : memref<1x8xf32, #tpu.memory_space<vmem>>, vector<1x8xf32>
    %35 = arith.mulf %33, %34 : vector<1x8xf32>
    %c0_14 = arith.constant 0 : index
    %c0_15 = arith.constant 0 : index
    %36 = vector.load %arg3[%c0_14, %c0_15] : memref<1x8xf32, #tpu.memory_space<vmem>>, vector<1x8xf32>
    %37 = arith.mulf %15, %35 : vector<1x8xf32>
    %38 = arith.subf %36, %37 : vector<1x8xf32>
    %c0_16 = arith.constant 0 : index
    %c0_17 = arith.constant 0 : index
    %c0_18 = arith.constant 0 : index
    %39 = vector.load %arg5[%c0_16, %c0_17, %c0_18] : memref<1x1x8xf32, #tpu.memory_space<vmem>>, vector<1x1x8xf32>
    %40 = vector.shape_cast %39 : vector<1x1x8xf32> to vector<1x8xf32>
    %41 = vector.shape_cast %35 : vector<1x8xf32> to vector<1x1x8xf32>
    tpu.vector_store %arg5[%c0_16, %c0_17, %c0_18], %41 {strides = array<i32>} : memref<1x1x8xf32, #tpu.memory_space<vmem>>, vector<1x1x8xf32>,
    %c0_19 = arith.constant 0 : index
    %c0_20 = arith.constant 0 : index
    %c0_21 = arith.constant 0 : index
    %42 = vector.load %arg6[%c0_19, %c0_20, %c0_21] : memref<1x1x8xf32, #tpu.memory_space<vmem>>, vector<1x1x8xf32>
    %43 = vector.shape_cast %42 : vector<1x1x8xf32> to vector<1x8xf32>
    %44 = vector.shape_cast %38 : vector<1x8xf32> to vector<1x1x8xf32>
    tpu.vector_store %arg6[%c0_19, %c0_20, %c0_21], %44 {strides = array<i32>} : memref<1x1x8xf32, #tpu.memory_space<vmem>>, vector<1x1x8xf32>,
    return
  }
  func.func @transform_0(%arg0: i32) -> (i32, i32, i32) {
    %c0_i32 = arith.constant 0 : i32
    %c0_i32_0 = arith.constant 0 : i32
    %c0_i32_1 = arith.constant 0 : i32
    return %arg0, %c0_i32, %c0_i32_0 : i32, i32, i32
  }
  func.func @transform_1(%arg0: i32) -> (i32, i32) {
    %c0_i32 = arith.constant 0 : i32
    %c0_i32_0 = arith.constant 0 : i32
    %c0_i32_1 = arith.constant 0 : i32
    return %c0_i32, %c0_i32_0 : i32, i32
  }
  func.func @transform_2(%arg0: i32) -> (i32, i32) {
    %c0_i32 = arith.constant 0 : i32
    %c0_i32_0 = arith.constant 0 : i32
    %c0_i32_1 = arith.constant 0 : i32
    return %c0_i32, %c0_i32_0 : i32, i32
  }
  func.func @transform_3(%arg0: i32) -> (i32, i32) {
    %c0_i32 = arith.constant 0 : i32
    %c0_i32_0 = arith.constant 0 : i32
    %c0_i32_1 = arith.constant 0 : i32
    return %c0_i32, %c0_i32_0 : i32, i32
  }
  func.func @transform_4(%arg0: i32) -> (i32, i32, i32) {
    %c0_i32 = arith.constant 0 : i32
    %c0_i32_0 = arith.constant 0 : i32
    %c0_i32_1 = arith.constant 0 : i32
    return %arg0, %c0_i32, %c0_i32_0 : i32, i32, i32
  }
  func.func @transform_5(%arg0: i32) -> (i32, i32, i32) {
    %c0_i32 = arith.constant 0 : i32
    %c0_i32_0 = arith.constant 0 : i32
    %c0_i32_1 = arith.constant 0 : i32
    return %arg0, %c0_i32, %c0_i32_0 : i32, i32, i32
  }
}

module attributes {stable_mosaic.version = 11 : i64} {
  func.func @_gn_stats_kernel(%arg0: i32, %arg1: memref<1x256x4xbf16, #tpu.memory_space<vmem>>, %arg2: memref<1x4xf32, #tpu.memory_space<vmem>>, %arg3: memref<1x4xf32, #tpu.memory_space<vmem>>, %arg4: memref<2x4xf32, #tpu.memory_space<vmem>>, %arg5: memref<1x1x4xf32, #tpu.memory_space<vmem>>, %arg6: memref<1x1x4xf32, #tpu.memory_space<vmem>>) attributes {dimension_semantics = [#tpu.dimension_semantics<parallel>], iteration_bounds = array<i64: 2>, scalar_prefetch = 0 : i64, scratch_operands = 0 : i64, tpu.core_type = #tpu.core_type<tc>, window_params = [{transform_indices = @transform_0, window_bounds = array<i64: 1, 256, 4>}, {pipeline_mode = #tpu.pipeline_mode<synchronous>, transform_indices = @transform_1, window_bounds = array<i64: 1, 4>}, {pipeline_mode = #tpu.pipeline_mode<synchronous>, transform_indices = @transform_2, window_bounds = array<i64: 1, 4>}, {pipeline_mode = #tpu.pipeline_mode<synchronous>, transform_indices = @transform_3, window_bounds = array<i64: 2, 4>}, {transform_indices = @transform_4, window_bounds = array<i64: 1, 1, 4>}, {transform_indices = @transform_5, window_bounds = array<i64: 1, 1, 4>}]} {
    %c0 = arith.constant 0 : index
    %c0_0 = arith.constant 0 : index
    %c0_1 = arith.constant 0 : index
    %0 = vector.load %arg1[%c0, %c0_0, %c0_1] : memref<1x256x4xbf16, #tpu.memory_space<vmem>>, vector<1x256x4xbf16>
    %1 = vector.shape_cast %0 : vector<1x256x4xbf16> to vector<256x4xbf16>
    %2 = arith.extf %1 : vector<256x4xbf16> to vector<256x4xf32>
    %c0_2 = arith.constant 0 : index
    %c0_3 = arith.constant 0 : index
    %3 = vector.load %arg4[%c0_2, %c0_3] : memref<2x4xf32, #tpu.memory_space<vmem>>, vector<2x4xf32>
    %cst = arith.constant dense<0.000000e+00> : vector<4xf32>
    %4 = vector.multi_reduction <add>, %2, %cst [0] : vector<256x4xf32> to vector<4xf32>
    %5 = vector.shape_cast %4 : vector<4xf32> to vector<1x4xf32>
    %6 = vector.broadcast %5 : vector<1x4xf32> to vector<2x4xf32>
    %7 = arith.mulf %6, %3 : vector<2x4xf32>
    %cst_4 = arith.constant dense<0.000000e+00> : vector<2xf32>
    %8 = vector.multi_reduction <add>, %7, %cst_4 [1] : vector<2x4xf32> to vector<2xf32>
    %9 = vector.shape_cast %8 : vector<2xf32> to vector<2x1xf32>
    %cst_5 = arith.constant 0.001953125 : f32
    %10 = vector.broadcast %cst_5 : f32 to vector<2x1xf32>
    %11 = arith.mulf %9, %10 : vector<2x1xf32>
    %12 = vector.broadcast %11 : vector<2x1xf32> to vector<2x4xf32>
    %13 = arith.mulf %3, %12 : vector<2x4xf32>
    %cst_6 = arith.constant dense<0.000000e+00> : vector<4xf32>
    %14 = vector.multi_reduction <add>, %13, %cst_6 [0] : vector<2x4xf32> to vector<4xf32>
    %15 = vector.shape_cast %14 : vector<4xf32> to vector<1x4xf32>
    %16 = vector.broadcast %15 : vector<1x4xf32> to vector<256x4xf32>
    %17 = arith.subf %2, %16 : vector<256x4xf32>
    %18 = arith.mulf %17, %17 : vector<256x4xf32>
    %cst_7 = arith.constant dense<0.000000e+00> : vector<4xf32>
    %19 = vector.multi_reduction <add>, %18, %cst_7 [0] : vector<256x4xf32> to vector<4xf32>
    %20 = vector.shape_cast %19 : vector<4xf32> to vector<1x4xf32>
    %21 = vector.broadcast %20 : vector<1x4xf32> to vector<2x4xf32>
    %22 = arith.mulf %21, %3 : vector<2x4xf32>
    %cst_8 = arith.constant dense<0.000000e+00> : vector<2xf32>
    %23 = vector.multi_reduction <add>, %22, %cst_8 [1] : vector<2x4xf32> to vector<2xf32>
    %24 = vector.shape_cast %23 : vector<2xf32> to vector<2x1xf32>
    %cst_9 = arith.constant 0.001953125 : f32
    %25 = vector.broadcast %cst_9 : f32 to vector<2x1xf32>
    %26 = arith.mulf %24, %25 : vector<2x1xf32>
    %cst_10 = arith.constant 9.99999974E-6 : f32
    %27 = vector.broadcast %cst_10 : f32 to vector<2x1xf32>
    %28 = arith.addf %26, %27 : vector<2x1xf32>
    %29 = math.rsqrt %28 : vector<2x1xf32>
    %30 = vector.broadcast %29 : vector<2x1xf32> to vector<2x4xf32>
    %31 = arith.mulf %3, %30 : vector<2x4xf32>
    %cst_11 = arith.constant dense<0.000000e+00> : vector<4xf32>
    %32 = vector.multi_reduction <add>, %31, %cst_11 [0] : vector<2x4xf32> to vector<4xf32>
    %33 = vector.shape_cast %32 : vector<4xf32> to vector<1x4xf32>
    %c0_12 = arith.constant 0 : index
    %c0_13 = arith.constant 0 : index
    %34 = vector.load %arg2[%c0_12, %c0_13] : memref<1x4xf32, #tpu.memory_space<vmem>>, vector<1x4xf32>
    %35 = arith.mulf %33, %34 : vector<1x4xf32>
    %c0_14 = arith.constant 0 : index
    %c0_15 = arith.constant 0 : index
    %36 = vector.load %arg3[%c0_14, %c0_15] : memref<1x4xf32, #tpu.memory_space<vmem>>, vector<1x4xf32>
    %37 = arith.mulf %15, %35 : vector<1x4xf32>
    %38 = arith.subf %36, %37 : vector<1x4xf32>
    %c0_16 = arith.constant 0 : index
    %c0_17 = arith.constant 0 : index
    %c0_18 = arith.constant 0 : index
    %39 = vector.load %arg5[%c0_16, %c0_17, %c0_18] : memref<1x1x4xf32, #tpu.memory_space<vmem>>, vector<1x1x4xf32>
    %40 = vector.shape_cast %39 : vector<1x1x4xf32> to vector<1x4xf32>
    %41 = vector.shape_cast %35 : vector<1x4xf32> to vector<1x1x4xf32>
    tpu.vector_store %arg5[%c0_16, %c0_17, %c0_18], %41 {strides = array<i32>} : memref<1x1x4xf32, #tpu.memory_space<vmem>>, vector<1x1x4xf32>,
    %c0_19 = arith.constant 0 : index
    %c0_20 = arith.constant 0 : index
    %c0_21 = arith.constant 0 : index
    %42 = vector.load %arg6[%c0_19, %c0_20, %c0_21] : memref<1x1x4xf32, #tpu.memory_space<vmem>>, vector<1x1x4xf32>
    %43 = vector.shape_cast %42 : vector<1x1x4xf32> to vector<1x4xf32>
    %44 = vector.shape_cast %38 : vector<1x4xf32> to vector<1x1x4xf32>
    tpu.vector_store %arg6[%c0_19, %c0_20, %c0_21], %44 {strides = array<i32>} : memref<1x1x4xf32, #tpu.memory_space<vmem>>, vector<1x1x4xf32>,
    return
  }
  func.func @transform_0(%arg0: i32) -> (i32, i32, i32) {
    %c0_i32 = arith.constant 0 : i32
    %c0_i32_0 = arith.constant 0 : i32
    %c0_i32_1 = arith.constant 0 : i32
    return %arg0, %c0_i32, %c0_i32_0 : i32, i32, i32
  }
  func.func @transform_1(%arg0: i32) -> (i32, i32) {
    %c0_i32 = arith.constant 0 : i32
    %c0_i32_0 = arith.constant 0 : i32
    %c0_i32_1 = arith.constant 0 : i32
    return %c0_i32, %c0_i32_0 : i32, i32
  }
  func.func @transform_2(%arg0: i32) -> (i32, i32) {
    %c0_i32 = arith.constant 0 : i32
    %c0_i32_0 = arith.constant 0 : i32
    %c0_i32_1 = arith.constant 0 : i32
    return %c0_i32, %c0_i32_0 : i32, i32
  }
  func.func @transform_3(%arg0: i32) -> (i32, i32) {
    %c0_i32 = arith.constant 0 : i32
    %c0_i32_0 = arith.constant 0 : i32
    %c0_i32_1 = arith.constant 0 : i32
    return %c0_i32, %c0_i32_0 : i32, i32
  }
  func.func @transform_4(%arg0: i32) -> (i32, i32, i32) {
    %c0_i32 = arith.constant 0 : i32
    %c0_i32_0 = arith.constant 0 : i32
    %c0_i32_1 = arith.constant 0 : i32
    return %arg0, %c0_i32, %c0_i32_0 : i32, i32, i32
  }
  func.func @transform_5(%arg0: i32) -> (i32, i32, i32) {
    %c0_i32 = arith.constant 0 : i32
    %c0_i32_0 = arith.constant 0 : i32
    %c0_i32_1 = arith.constant 0 : i32
    return %arg0, %c0_i32, %c0_i32_0 : i32, i32, i32
  }
}

module attributes {stable_mosaic.version = 11 : i64} {
  func.func @_conv3x3_gn_kernel(%arg0: i32, %arg1: memref<1x4x9x9x4xbf16, #tpu.memory_space<vmem>>, %arg2: memref<1x1x4xf32, #tpu.memory_space<vmem>>, %arg3: memref<1x1x4xf32, #tpu.memory_space<vmem>>, %arg4: memref<1x4x9x9x1xf32, #tpu.memory_space<vmem>>, %arg5: memref<9x4x4xbf16, #tpu.memory_space<vmem>>, %arg6: memref<1x8x8x4xbf16, #tpu.memory_space<vmem>>, %arg7: memref<4x9x9x4xbf16, #tpu.memory_space<vmem>>) attributes {dimension_semantics = [#tpu.dimension_semantics<parallel>], iteration_bounds = array<i64: 2>, scalar_prefetch = 0 : i64, scratch_operands = 1 : i64, tpu.core_type = #tpu.core_type<tc>, window_params = [{transform_indices = @transform_0, window_bounds = array<i64: 1, 4, 9, 9, 4>}, {transform_indices = @transform_1, window_bounds = array<i64: 1, 1, 4>}, {transform_indices = @transform_2, window_bounds = array<i64: 1, 1, 4>}, {pipeline_mode = #tpu.pipeline_mode<synchronous>, transform_indices = @transform_3, window_bounds = array<i64: 1, 4, 9, 9, 1>}, {pipeline_mode = #tpu.pipeline_mode<synchronous>, transform_indices = @transform_4, window_bounds = array<i64: 9, 4, 4>}, {transform_indices = @transform_5, window_bounds = array<i64: 1, 8, 8, 4>}]} {
    %c0 = arith.constant 0 : index
    %c0_0 = arith.constant 0 : index
    %c0_1 = arith.constant 0 : index
    %c0_2 = arith.constant 0 : index
    %c0_3 = arith.constant 0 : index
    %0 = vector.load %arg1[%c0, %c0_0, %c0_1, %c0_2, %c0_3] : memref<1x4x9x9x4xbf16, #tpu.memory_space<vmem>>, vector<1x4x9x9x4xbf16>
    %1 = vector.shape_cast %0 : vector<1x4x9x9x4xbf16> to vector<4x9x9x4xbf16>
    %2 = arith.extf %1 : vector<4x9x9x4xbf16> to vector<4x9x9x4xf32>
    %c0_4 = arith.constant 0 : index
    %c0_5 = arith.constant 0 : index
    %c0_6 = arith.constant 0 : index
    %3 = vector.load %arg2[%c0_4, %c0_5, %c0_6] : memref<1x1x4xf32, #tpu.memory_space<vmem>>, vector<1x1x4xf32>
    %4 = vector.shape_cast %3 : vector<1x1x4xf32> to vector<1x4xf32>
    %5 = vector.shape_cast %4 : vector<1x4xf32> to vector<1x1x1x4xf32>
    %6 = vector.broadcast %5 : vector<1x1x1x4xf32> to vector<4x9x9x4xf32>
    %7 = arith.mulf %2, %6 : vector<4x9x9x4xf32>
    %c0_7 = arith.constant 0 : index
    %c0_8 = arith.constant 0 : index
    %c0_9 = arith.constant 0 : index
    %8 = vector.load %arg3[%c0_7, %c0_8, %c0_9] : memref<1x1x4xf32, #tpu.memory_space<vmem>>, vector<1x1x4xf32>
    %9 = vector.shape_cast %8 : vector<1x1x4xf32> to vector<1x4xf32>
    %10 = vector.shape_cast %9 : vector<1x4xf32> to vector<1x1x1x4xf32>
    %11 = vector.broadcast %10 : vector<1x1x1x4xf32> to vector<4x9x9x4xf32>
    %12 = arith.addf %7, %11 : vector<4x9x9x4xf32>
    %cst = arith.constant 0.000000e+00 : f32
    %13 = vector.broadcast %cst : f32 to vector<4x9x9x4xf32>
    %14 = arith.maximumf %12, %13 : vector<4x9x9x4xf32>
    %c0_10 = arith.constant 0 : index
    %c0_11 = arith.constant 0 : index
    %c0_12 = arith.constant 0 : index
    %c0_13 = arith.constant 0 : index
    %c0_14 = arith.constant 0 : index
    %15 = vector.load %arg4[%c0_10, %c0_11, %c0_12, %c0_13, %c0_14] : memref<1x4x9x9x1xf32, #tpu.memory_space<vmem>>, vector<1x4x9x9x1xf32>
    %16 = vector.shape_cast %15 : vector<1x4x9x9x1xf32> to vector<4x9x9x1xf32>
    %17 = vector.broadcast %16 : vector<4x9x9x1xf32> to vector<4x9x9x4xf32>
    %18 = arith.mulf %14, %17 : vector<4x9x9x4xf32>
    %19 = arith.truncf %18 : vector<4x9x9x4xf32> to vector<4x9x9x4xbf16>
    %c0_15 = arith.constant 0 : index
    %c0_16 = arith.constant 0 : index
    %c0_17 = arith.constant 0 : index
    %c0_18 = arith.constant 0 : index
    %20 = vector.load %arg7[%c0_15, %c0_16, %c0_17, %c0_18] : memref<4x9x9x4xbf16, #tpu.memory_space<vmem>>, vector<4x9x9x4xbf16>
    tpu.vector_store %arg7[%c0_15, %c0_16, %c0_17, %c0_18], %19 {strides = array<i32>} : memref<4x9x9x4xbf16, #tpu.memory_space<vmem>>, vector<4x9x9x4xbf16>,
    %cst_19 = arith.constant 0.000000e+00 : f32
    %21 = vector.broadcast %cst_19 : f32 to vector<64x4xf32>
    %c0_20 = arith.constant 0 : index
    %c0_21 = arith.constant 0 : index
    %c0_22 = arith.constant 0 : index
    %c0_23 = arith.constant 0 : index
    %22 = vector.load %arg7[%c0_20, %c0_21, %c0_22, %c0_23] : memref<4x9x9x4xbf16, #tpu.memory_space<vmem>>, vector<1x8x8x4xbf16>
    %23 = vector.shape_cast %22 : vector<1x8x8x4xbf16> to vector<8x8x4xbf16>
    %24 = vector.shape_cast %23 : vector<8x8x4xbf16> to vector<64x4xbf16>
    %c0_24 = arith.constant 0 : index
    %c0_25 = arith.constant 0 : index
    %c0_26 = arith.constant 0 : index
    %25 = vector.load %arg5[%c0_24, %c0_25, %c0_26] : memref<9x4x4xbf16, #tpu.memory_space<vmem>>, vector<1x4x4xbf16>
    %26 = vector.shape_cast %25 : vector<1x4x4xbf16> to vector<4x4xbf16>
    %cst_27 = arith.constant dense<0.000000e+00> : vector<64x4xf32>
    %27 = tpu.matmul %24, %26, %cst_27 {dimension_numbers = #tpu.dot_dimension_numbers<[1], [0], [0], [1], [0, 0, 1, 1], [], []>} : vector<64x4xbf16>, vector<4x4xbf16>, vector<64x4xf32> -> vector<64x4xf32>
    %28 = arith.addf %21, %27 : vector<64x4xf32>
    %c1 = arith.constant 1 : index
    %c0_28 = arith.constant 0 : index
    %c0_29 = arith.constant 0 : index
    %c0_30 = arith.constant 0 : index
    %29 = vector.load %arg7[%c1, %c0_28, %c0_29, %c0_30] : memref<4x9x9x4xbf16, #tpu.memory_space<vmem>>, vector<1x8x8x4xbf16>
    %30 = vector.shape_cast %29 : vector<1x8x8x4xbf16> to vector<8x8x4xbf16>
    %31 = vector.shape_cast %30 : vector<8x8x4xbf16> to vector<64x4xbf16>
    %c1_31 = arith.constant 1 : index
    %c0_32 = arith.constant 0 : index
    %c0_33 = arith.constant 0 : index
    %32 = vector.load %arg5[%c1_31, %c0_32, %c0_33] : memref<9x4x4xbf16, #tpu.memory_space<vmem>>, vector<1x4x4xbf16>
    %33 = vector.shape_cast %32 : vector<1x4x4xbf16> to vector<4x4xbf16>
    %cst_34 = arith.constant dense<0.000000e+00> : vector<64x4xf32>
    %34 = tpu.matmul %31, %33, %cst_34 {dimension_numbers = #tpu.dot_dimension_numbers<[1], [0], [0], [1], [0, 0, 1, 1], [], []>} : vector<64x4xbf16>, vector<4x4xbf16>, vector<64x4xf32> -> vector<64x4xf32>
    %35 = arith.addf %28, %34 : vector<64x4xf32>
    %c0_35 = arith.constant 0 : index
    %c0_36 = arith.constant 0 : index
    %c1_37 = arith.constant 1 : index
    %c0_38 = arith.constant 0 : index
    %36 = vector.load %arg7[%c0_35, %c0_36, %c1_37, %c0_38] : memref<4x9x9x4xbf16, #tpu.memory_space<vmem>>, vector<1x8x8x4xbf16>
    %37 = vector.shape_cast %36 : vector<1x8x8x4xbf16> to vector<8x8x4xbf16>
    %38 = vector.shape_cast %37 : vector<8x8x4xbf16> to vector<64x4xbf16>
    %c2 = arith.constant 2 : index
    %c0_39 = arith.constant 0 : index
    %c0_40 = arith.constant 0 : index
    %39 = vector.load %arg5[%c2, %c0_39, %c0_40] : memref<9x4x4xbf16, #tpu.memory_space<vmem>>, vector<1x4x4xbf16>
    %40 = vector.shape_cast %39 : vector<1x4x4xbf16> to vector<4x4xbf16>
    %cst_41 = arith.constant dense<0.000000e+00> : vector<64x4xf32>
    %41 = tpu.matmul %38, %40, %cst_41 {dimension_numbers = #tpu.dot_dimension_numbers<[1], [0], [0], [1], [0, 0, 1, 1], [], []>} : vector<64x4xbf16>, vector<4x4xbf16>, vector<64x4xf32> -> vector<64x4xf32>
    %42 = arith.addf %35, %41 : vector<64x4xf32>
    %c2_42 = arith.constant 2 : index
    %c0_43 = arith.constant 0 : index
    %c0_44 = arith.constant 0 : index
    %c0_45 = arith.constant 0 : index
    %43 = vector.load %arg7[%c2_42, %c0_43, %c0_44, %c0_45] : memref<4x9x9x4xbf16, #tpu.memory_space<vmem>>, vector<1x8x8x4xbf16>
    %44 = vector.shape_cast %43 : vector<1x8x8x4xbf16> to vector<8x8x4xbf16>
    %45 = vector.shape_cast %44 : vector<8x8x4xbf16> to vector<64x4xbf16>
    %c3 = arith.constant 3 : index
    %c0_46 = arith.constant 0 : index
    %c0_47 = arith.constant 0 : index
    %46 = vector.load %arg5[%c3, %c0_46, %c0_47] : memref<9x4x4xbf16, #tpu.memory_space<vmem>>, vector<1x4x4xbf16>
    %47 = vector.shape_cast %46 : vector<1x4x4xbf16> to vector<4x4xbf16>
    %cst_48 = arith.constant dense<0.000000e+00> : vector<64x4xf32>
    %48 = tpu.matmul %45, %47, %cst_48 {dimension_numbers = #tpu.dot_dimension_numbers<[1], [0], [0], [1], [0, 0, 1, 1], [], []>} : vector<64x4xbf16>, vector<4x4xbf16>, vector<64x4xf32> -> vector<64x4xf32>
    %49 = arith.addf %42, %48 : vector<64x4xf32>
    %c3_49 = arith.constant 3 : index
    %c0_50 = arith.constant 0 : index
    %c0_51 = arith.constant 0 : index
    %c0_52 = arith.constant 0 : index
    %50 = vector.load %arg7[%c3_49, %c0_50, %c0_51, %c0_52] : memref<4x9x9x4xbf16, #tpu.memory_space<vmem>>, vector<1x8x8x4xbf16>
    %51 = vector.shape_cast %50 : vector<1x8x8x4xbf16> to vector<8x8x4xbf16>
    %52 = vector.shape_cast %51 : vector<8x8x4xbf16> to vector<64x4xbf16>
    %c4 = arith.constant 4 : index
    %c0_53 = arith.constant 0 : index
    %c0_54 = arith.constant 0 : index
    %53 = vector.load %arg5[%c4, %c0_53, %c0_54] : memref<9x4x4xbf16, #tpu.memory_space<vmem>>, vector<1x4x4xbf16>
    %54 = vector.shape_cast %53 : vector<1x4x4xbf16> to vector<4x4xbf16>
    %cst_55 = arith.constant dense<0.000000e+00> : vector<64x4xf32>
    %55 = tpu.matmul %52, %54, %cst_55 {dimension_numbers = #tpu.dot_dimension_numbers<[1], [0], [0], [1], [0, 0, 1, 1], [], []>} : vector<64x4xbf16>, vector<4x4xbf16>, vector<64x4xf32> -> vector<64x4xf32>
    %56 = arith.addf %49, %55 : vector<64x4xf32>
    %c2_56 = arith.constant 2 : index
    %c0_57 = arith.constant 0 : index
    %c1_58 = arith.constant 1 : index
    %c0_59 = arith.constant 0 : index
    %57 = vector.load %arg7[%c2_56, %c0_57, %c1_58, %c0_59] : memref<4x9x9x4xbf16, #tpu.memory_space<vmem>>, vector<1x8x8x4xbf16>
    %58 = vector.shape_cast %57 : vector<1x8x8x4xbf16> to vector<8x8x4xbf16>
    %59 = vector.shape_cast %58 : vector<8x8x4xbf16> to vector<64x4xbf16>
    %c5 = arith.constant 5 : index
    %c0_60 = arith.constant 0 : index
    %c0_61 = arith.constant 0 : index
    %60 = vector.load %arg5[%c5, %c0_60, %c0_61] : memref<9x4x4xbf16, #tpu.memory_space<vmem>>, vector<1x4x4xbf16>
    %61 = vector.shape_cast %60 : vector<1x4x4xbf16> to vector<4x4xbf16>
    %cst_62 = arith.constant dense<0.000000e+00> : vector<64x4xf32>
    %62 = tpu.matmul %59, %61, %cst_62 {dimension_numbers = #tpu.dot_dimension_numbers<[1], [0], [0], [1], [0, 0, 1, 1], [], []>} : vector<64x4xbf16>, vector<4x4xbf16>, vector<64x4xf32> -> vector<64x4xf32>
    %63 = arith.addf %56, %62 : vector<64x4xf32>
    %c0_63 = arith.constant 0 : index
    %c1_64 = arith.constant 1 : index
    %c0_65 = arith.constant 0 : index
    %c0_66 = arith.constant 0 : index
    %64 = vector.load %arg7[%c0_63, %c1_64, %c0_65, %c0_66] : memref<4x9x9x4xbf16, #tpu.memory_space<vmem>>, vector<1x8x8x4xbf16>
    %65 = vector.shape_cast %64 : vector<1x8x8x4xbf16> to vector<8x8x4xbf16>
    %66 = vector.shape_cast %65 : vector<8x8x4xbf16> to vector<64x4xbf16>
    %c6 = arith.constant 6 : index
    %c0_67 = arith.constant 0 : index
    %c0_68 = arith.constant 0 : index
    %67 = vector.load %arg5[%c6, %c0_67, %c0_68] : memref<9x4x4xbf16, #tpu.memory_space<vmem>>, vector<1x4x4xbf16>
    %68 = vector.shape_cast %67 : vector<1x4x4xbf16> to vector<4x4xbf16>
    %cst_69 = arith.constant dense<0.000000e+00> : vector<64x4xf32>
    %69 = tpu.matmul %66, %68, %cst_69 {dimension_numbers = #tpu.dot_dimension_numbers<[1], [0], [0], [1], [0, 0, 1, 1], [], []>} : vector<64x4xbf16>, vector<4x4xbf16>, vector<64x4xf32> -> vector<64x4xf32>
    %70 = arith.addf %63, %69 : vector<64x4xf32>
    %c1_70 = arith.constant 1 : index
    %c1_71 = arith.constant 1 : index
    %c0_72 = arith.constant 0 : index
    %c0_73 = arith.constant 0 : index
    %71 = vector.load %arg7[%c1_70, %c1_71, %c0_72, %c0_73] : memref<4x9x9x4xbf16, #tpu.memory_space<vmem>>, vector<1x8x8x4xbf16>
    %72 = vector.shape_cast %71 : vector<1x8x8x4xbf16> to vector<8x8x4xbf16>
    %73 = vector.shape_cast %72 : vector<8x8x4xbf16> to vector<64x4xbf16>
    %c7 = arith.constant 7 : index
    %c0_74 = arith.constant 0 : index
    %c0_75 = arith.constant 0 : index
    %74 = vector.load %arg5[%c7, %c0_74, %c0_75] : memref<9x4x4xbf16, #tpu.memory_space<vmem>>, vector<1x4x4xbf16>
    %75 = vector.shape_cast %74 : vector<1x4x4xbf16> to vector<4x4xbf16>
    %cst_76 = arith.constant dense<0.000000e+00> : vector<64x4xf32>
    %76 = tpu.matmul %73, %75, %cst_76 {dimension_numbers = #tpu.dot_dimension_numbers<[1], [0], [0], [1], [0, 0, 1, 1], [], []>} : vector<64x4xbf16>, vector<4x4xbf16>, vector<64x4xf32> -> vector<64x4xf32>
    %77 = arith.addf %70, %76 : vector<64x4xf32>
    %c0_77 = arith.constant 0 : index
    %c1_78 = arith.constant 1 : index
    %c1_79 = arith.constant 1 : index
    %c0_80 = arith.constant 0 : index
    %78 = vector.load %arg7[%c0_77, %c1_78, %c1_79, %c0_80] : memref<4x9x9x4xbf16, #tpu.memory_space<vmem>>, vector<1x8x8x4xbf16>
    %79 = vector.shape_cast %78 : vector<1x8x8x4xbf16> to vector<8x8x4xbf16>
    %80 = vector.shape_cast %79 : vector<8x8x4xbf16> to vector<64x4xbf16>
    %c8 = arith.constant 8 : index
    %c0_81 = arith.constant 0 : index
    %c0_82 = arith.constant 0 : index
    %81 = vector.load %arg5[%c8, %c0_81, %c0_82] : memref<9x4x4xbf16, #tpu.memory_space<vmem>>, vector<1x4x4xbf16>
    %82 = vector.shape_cast %81 : vector<1x4x4xbf16> to vector<4x4xbf16>
    %cst_83 = arith.constant dense<0.000000e+00> : vector<64x4xf32>
    %83 = tpu.matmul %80, %82, %cst_83 {dimension_numbers = #tpu.dot_dimension_numbers<[1], [0], [0], [1], [0, 0, 1, 1], [], []>} : vector<64x4xbf16>, vector<4x4xbf16>, vector<64x4xf32> -> vector<64x4xf32>
    %84 = arith.addf %77, %83 : vector<64x4xf32>
    %85 = vector.shape_cast %84 : vector<64x4xf32> to vector<8x8x4xf32>
    %86 = arith.truncf %85 : vector<8x8x4xf32> to vector<8x8x4xbf16>
    %c0_84 = arith.constant 0 : index
    %c0_85 = arith.constant 0 : index
    %c0_86 = arith.constant 0 : index
    %c0_87 = arith.constant 0 : index
    %87 = vector.load %arg6[%c0_84, %c0_85, %c0_86, %c0_87] : memref<1x8x8x4xbf16, #tpu.memory_space<vmem>>, vector<1x8x8x4xbf16>
    %88 = vector.shape_cast %87 : vector<1x8x8x4xbf16> to vector<8x8x4xbf16>
    %89 = vector.shape_cast %86 : vector<8x8x4xbf16> to vector<1x8x8x4xbf16>
    tpu.vector_store %arg6[%c0_84, %c0_85, %c0_86, %c0_87], %89 {strides = array<i32>} : memref<1x8x8x4xbf16, #tpu.memory_space<vmem>>, vector<1x8x8x4xbf16>,
    return
  }
  func.func @transform_0(%arg0: i32) -> (i32, i32, i32, i32, i32) {
    %c0_i32 = arith.constant 0 : i32
    %c0_i32_0 = arith.constant 0 : i32
    %c0_i32_1 = arith.constant 0 : i32
    %c0_i32_2 = arith.constant 0 : i32
    %c0_i32_3 = arith.constant 0 : i32
    return %arg0, %c0_i32, %c0_i32_0, %c0_i32_1, %c0_i32_2 : i32, i32, i32, i32, i32
  }
  func.func @transform_1(%arg0: i32) -> (i32, i32, i32) {
    %c0_i32 = arith.constant 0 : i32
    %c0_i32_0 = arith.constant 0 : i32
    %c0_i32_1 = arith.constant 0 : i32
    return %arg0, %c0_i32, %c0_i32_0 : i32, i32, i32
  }
  func.func @transform_2(%arg0: i32) -> (i32, i32, i32) {
    %c0_i32 = arith.constant 0 : i32
    %c0_i32_0 = arith.constant 0 : i32
    %c0_i32_1 = arith.constant 0 : i32
    return %arg0, %c0_i32, %c0_i32_0 : i32, i32, i32
  }
  func.func @transform_3(%arg0: i32) -> (i32, i32, i32, i32, i32) {
    %c0_i32 = arith.constant 0 : i32
    %c0_i32_0 = arith.constant 0 : i32
    %c0_i32_1 = arith.constant 0 : i32
    %c0_i32_2 = arith.constant 0 : i32
    %c0_i32_3 = arith.constant 0 : i32
    %c0_i32_4 = arith.constant 0 : i32
    return %c0_i32, %c0_i32_0, %c0_i32_1, %c0_i32_2, %c0_i32_3 : i32, i32, i32, i32, i32
  }
  func.func @transform_4(%arg0: i32) -> (i32, i32, i32) {
    %c0_i32 = arith.constant 0 : i32
    %c0_i32_0 = arith.constant 0 : i32
    %c0_i32_1 = arith.constant 0 : i32
    %c0_i32_2 = arith.constant 0 : i32
    return %c0_i32, %c0_i32_0, %c0_i32_1 : i32, i32, i32
  }
  func.func @transform_5(%arg0: i32) -> (i32, i32, i32, i32) {
    %c0_i32 = arith.constant 0 : i32
    %c0_i32_0 = arith.constant 0 : i32
    %c0_i32_1 = arith.constant 0 : i32
    %c0_i32_2 = arith.constant 0 : i32
    return %arg0, %c0_i32, %c0_i32_0, %c0_i32_1 : i32, i32, i32, i32
  }
}

module attributes {stable_mosaic.version = 11 : i64} {
  func.func @_gn_stats_kernel(%arg0: i32, %arg1: memref<1x64x4xbf16, #tpu.memory_space<vmem>>, %arg2: memref<1x4xf32, #tpu.memory_space<vmem>>, %arg3: memref<1x4xf32, #tpu.memory_space<vmem>>, %arg4: memref<2x4xf32, #tpu.memory_space<vmem>>, %arg5: memref<1x1x4xf32, #tpu.memory_space<vmem>>, %arg6: memref<1x1x4xf32, #tpu.memory_space<vmem>>) attributes {dimension_semantics = [#tpu.dimension_semantics<parallel>], iteration_bounds = array<i64: 2>, scalar_prefetch = 0 : i64, scratch_operands = 0 : i64, tpu.core_type = #tpu.core_type<tc>, window_params = [{transform_indices = @transform_0, window_bounds = array<i64: 1, 64, 4>}, {pipeline_mode = #tpu.pipeline_mode<synchronous>, transform_indices = @transform_1, window_bounds = array<i64: 1, 4>}, {pipeline_mode = #tpu.pipeline_mode<synchronous>, transform_indices = @transform_2, window_bounds = array<i64: 1, 4>}, {pipeline_mode = #tpu.pipeline_mode<synchronous>, transform_indices = @transform_3, window_bounds = array<i64: 2, 4>}, {transform_indices = @transform_4, window_bounds = array<i64: 1, 1, 4>}, {transform_indices = @transform_5, window_bounds = array<i64: 1, 1, 4>}]} {
    %c0 = arith.constant 0 : index
    %c0_0 = arith.constant 0 : index
    %c0_1 = arith.constant 0 : index
    %0 = vector.load %arg1[%c0, %c0_0, %c0_1] : memref<1x64x4xbf16, #tpu.memory_space<vmem>>, vector<1x64x4xbf16>
    %1 = vector.shape_cast %0 : vector<1x64x4xbf16> to vector<64x4xbf16>
    %2 = arith.extf %1 : vector<64x4xbf16> to vector<64x4xf32>
    %c0_2 = arith.constant 0 : index
    %c0_3 = arith.constant 0 : index
    %3 = vector.load %arg4[%c0_2, %c0_3] : memref<2x4xf32, #tpu.memory_space<vmem>>, vector<2x4xf32>
    %cst = arith.constant dense<0.000000e+00> : vector<4xf32>
    %4 = vector.multi_reduction <add>, %2, %cst [0] : vector<64x4xf32> to vector<4xf32>
    %5 = vector.shape_cast %4 : vector<4xf32> to vector<1x4xf32>
    %6 = vector.broadcast %5 : vector<1x4xf32> to vector<2x4xf32>
    %7 = arith.mulf %6, %3 : vector<2x4xf32>
    %cst_4 = arith.constant dense<0.000000e+00> : vector<2xf32>
    %8 = vector.multi_reduction <add>, %7, %cst_4 [1] : vector<2x4xf32> to vector<2xf32>
    %9 = vector.shape_cast %8 : vector<2xf32> to vector<2x1xf32>
    %cst_5 = arith.constant 7.812500e-03 : f32
    %10 = vector.broadcast %cst_5 : f32 to vector<2x1xf32>
    %11 = arith.mulf %9, %10 : vector<2x1xf32>
    %12 = vector.broadcast %11 : vector<2x1xf32> to vector<2x4xf32>
    %13 = arith.mulf %3, %12 : vector<2x4xf32>
    %cst_6 = arith.constant dense<0.000000e+00> : vector<4xf32>
    %14 = vector.multi_reduction <add>, %13, %cst_6 [0] : vector<2x4xf32> to vector<4xf32>
    %15 = vector.shape_cast %14 : vector<4xf32> to vector<1x4xf32>
    %16 = vector.broadcast %15 : vector<1x4xf32> to vector<64x4xf32>
    %17 = arith.subf %2, %16 : vector<64x4xf32>
    %18 = arith.mulf %17, %17 : vector<64x4xf32>
    %cst_7 = arith.constant dense<0.000000e+00> : vector<4xf32>
    %19 = vector.multi_reduction <add>, %18, %cst_7 [0] : vector<64x4xf32> to vector<4xf32>
    %20 = vector.shape_cast %19 : vector<4xf32> to vector<1x4xf32>
    %21 = vector.broadcast %20 : vector<1x4xf32> to vector<2x4xf32>
    %22 = arith.mulf %21, %3 : vector<2x4xf32>
    %cst_8 = arith.constant dense<0.000000e+00> : vector<2xf32>
    %23 = vector.multi_reduction <add>, %22, %cst_8 [1] : vector<2x4xf32> to vector<2xf32>
    %24 = vector.shape_cast %23 : vector<2xf32> to vector<2x1xf32>
    %cst_9 = arith.constant 7.812500e-03 : f32
    %25 = vector.broadcast %cst_9 : f32 to vector<2x1xf32>
    %26 = arith.mulf %24, %25 : vector<2x1xf32>
    %cst_10 = arith.constant 9.99999974E-6 : f32
    %27 = vector.broadcast %cst_10 : f32 to vector<2x1xf32>
    %28 = arith.addf %26, %27 : vector<2x1xf32>
    %29 = math.rsqrt %28 : vector<2x1xf32>
    %30 = vector.broadcast %29 : vector<2x1xf32> to vector<2x4xf32>
    %31 = arith.mulf %3, %30 : vector<2x4xf32>
    %cst_11 = arith.constant dense<0.000000e+00> : vector<4xf32>
    %32 = vector.multi_reduction <add>, %31, %cst_11 [0] : vector<2x4xf32> to vector<4xf32>
    %33 = vector.shape_cast %32 : vector<4xf32> to vector<1x4xf32>
    %c0_12 = arith.constant 0 : index
    %c0_13 = arith.constant 0 : index
    %34 = vector.load %arg2[%c0_12, %c0_13] : memref<1x4xf32, #tpu.memory_space<vmem>>, vector<1x4xf32>
    %35 = arith.mulf %33, %34 : vector<1x4xf32>
    %c0_14 = arith.constant 0 : index
    %c0_15 = arith.constant 0 : index
    %36 = vector.load %arg3[%c0_14, %c0_15] : memref<1x4xf32, #tpu.memory_space<vmem>>, vector<1x4xf32>
    %37 = arith.mulf %15, %35 : vector<1x4xf32>
    %38 = arith.subf %36, %37 : vector<1x4xf32>
    %c0_16 = arith.constant 0 : index
    %c0_17 = arith.constant 0 : index
    %c0_18 = arith.constant 0 : index
    %39 = vector.load %arg5[%c0_16, %c0_17, %c0_18] : memref<1x1x4xf32, #tpu.memory_space<vmem>>, vector<1x1x4xf32>
    %40 = vector.shape_cast %39 : vector<1x1x4xf32> to vector<1x4xf32>
    %41 = vector.shape_cast %35 : vector<1x4xf32> to vector<1x1x4xf32>
    tpu.vector_store %arg5[%c0_16, %c0_17, %c0_18], %41 {strides = array<i32>} : memref<1x1x4xf32, #tpu.memory_space<vmem>>, vector<1x1x4xf32>,
    %c0_19 = arith.constant 0 : index
    %c0_20 = arith.constant 0 : index
    %c0_21 = arith.constant 0 : index
    %42 = vector.load %arg6[%c0_19, %c0_20, %c0_21] : memref<1x1x4xf32, #tpu.memory_space<vmem>>, vector<1x1x4xf32>
    %43 = vector.shape_cast %42 : vector<1x1x4xf32> to vector<1x4xf32>
    %44 = vector.shape_cast %38 : vector<1x4xf32> to vector<1x1x4xf32>
    tpu.vector_store %arg6[%c0_19, %c0_20, %c0_21], %44 {strides = array<i32>} : memref<1x1x4xf32, #tpu.memory_space<vmem>>, vector<1x1x4xf32>,
    return
  }
  func.func @transform_0(%arg0: i32) -> (i32, i32, i32) {
    %c0_i32 = arith.constant 0 : i32
    %c0_i32_0 = arith.constant 0 : i32
    %c0_i32_1 = arith.constant 0 : i32
    return %arg0, %c0_i32, %c0_i32_0 : i32, i32, i32
  }
  func.func @transform_1(%arg0: i32) -> (i32, i32) {
    %c0_i32 = arith.constant 0 : i32
    %c0_i32_0 = arith.constant 0 : i32
    %c0_i32_1 = arith.constant 0 : i32
    return %c0_i32, %c0_i32_0 : i32, i32
  }
  func.func @transform_2(%arg0: i32) -> (i32, i32) {
    %c0_i32 = arith.constant 0 : i32
    %c0_i32_0 = arith.constant 0 : i32
    %c0_i32_1 = arith.constant 0 : i32
    return %c0_i32, %c0_i32_0 : i32, i32
  }
  func.func @transform_3(%arg0: i32) -> (i32, i32) {
    %c0_i32 = arith.constant 0 : i32
    %c0_i32_0 = arith.constant 0 : i32
    %c0_i32_1 = arith.constant 0 : i32
    return %c0_i32, %c0_i32_0 : i32, i32
  }
  func.func @transform_4(%arg0: i32) -> (i32, i32, i32) {
    %c0_i32 = arith.constant 0 : i32
    %c0_i32_0 = arith.constant 0 : i32
    %c0_i32_1 = arith.constant 0 : i32
    return %arg0, %c0_i32, %c0_i32_0 : i32, i32, i32
  }
  func.func @transform_5(%arg0: i32) -> (i32, i32, i32) {
    %c0_i32 = arith.constant 0 : i32
    %c0_i32_0 = arith.constant 0 : i32
    %c0_i32_1 = arith.constant 0 : i32
    return %arg0, %c0_i32, %c0_i32_0 : i32, i32, i32
  }
}

module attributes {stable_mosaic.version = 11 : i64} {
  func.func @_conv3_residual_ds_kernel(%arg0: i32, %arg1: memref<1x64x4xbf16, #tpu.memory_space<vmem>>, %arg2: memref<1x1x4xf32, #tpu.memory_space<vmem>>, %arg3: memref<1x1x4xf32, #tpu.memory_space<vmem>>, %arg4: memref<4x16xbf16, #tpu.memory_space<vmem>>, %arg5: memref<1x8x1x8x16xbf16, #tpu.memory_space<vmem>>, %arg6: memref<1x1x8xf32, #tpu.memory_space<vmem>>, %arg7: memref<1x1x8xf32, #tpu.memory_space<vmem>>, %arg8: memref<8x16xbf16, #tpu.memory_space<vmem>>, %arg9: memref<1x64x16xf32, #tpu.memory_space<vmem>>) attributes {dimension_semantics = [#tpu.dimension_semantics<parallel>], iteration_bounds = array<i64: 2>, scalar_prefetch = 0 : i64, scratch_operands = 0 : i64, tpu.core_type = #tpu.core_type<tc>, window_params = [{transform_indices = @transform_0, window_bounds = array<i64: 1, 64, 4>}, {transform_indices = @transform_1, window_bounds = array<i64: 1, 1, 4>}, {transform_indices = @transform_2, window_bounds = array<i64: 1, 1, 4>}, {pipeline_mode = #tpu.pipeline_mode<synchronous>, transform_indices = @transform_3, window_bounds = array<i64: 4, 16>}, {transform_indices = @transform_4, window_bounds = array<i64: 1, 8, 1, 8, 16>}, {transform_indices = @transform_5, window_bounds = array<i64: 1, 1, 8>}, {transform_indices = @transform_6, window_bounds = array<i64: 1, 1, 8>}, {pipeline_mode = #tpu.pipeline_mode<synchronous>, transform_indices = @transform_7, window_bounds = array<i64: 8, 16>}, {transform_indices = @transform_8, window_bounds = array<i64: 1, 64, 16>}]} {
    %c0 = arith.constant 0 : index
    %c0_0 = arith.constant 0 : index
    %c0_1 = arith.constant 0 : index
    %0 = vector.load %arg1[%c0, %c0_0, %c0_1] : memref<1x64x4xbf16, #tpu.memory_space<vmem>>, vector<1x64x4xbf16>
    %1 = vector.shape_cast %0 : vector<1x64x4xbf16> to vector<64x4xbf16>
    %2 = arith.extf %1 : vector<64x4xbf16> to vector<64x4xf32>
    %c0_2 = arith.constant 0 : index
    %c0_3 = arith.constant 0 : index
    %c0_4 = arith.constant 0 : index
    %3 = vector.load %arg2[%c0_2, %c0_3, %c0_4] : memref<1x1x4xf32, #tpu.memory_space<vmem>>, vector<1x1x4xf32>
    %4 = vector.shape_cast %3 : vector<1x1x4xf32> to vector<1x4xf32>
    %5 = vector.broadcast %4 : vector<1x4xf32> to vector<64x4xf32>
    %6 = arith.mulf %2, %5 : vector<64x4xf32>
    %c0_5 = arith.constant 0 : index
    %c0_6 = arith.constant 0 : index
    %c0_7 = arith.constant 0 : index
    %7 = vector.load %arg3[%c0_5, %c0_6, %c0_7] : memref<1x1x4xf32, #tpu.memory_space<vmem>>, vector<1x1x4xf32>
    %8 = vector.shape_cast %7 : vector<1x1x4xf32> to vector<1x4xf32>
    %9 = vector.broadcast %8 : vector<1x4xf32> to vector<64x4xf32>
    %10 = arith.addf %6, %9 : vector<64x4xf32>
    %cst = arith.constant 0.000000e+00 : f32
    %11 = vector.broadcast %cst : f32 to vector<64x4xf32>
    %12 = arith.maximumf %10, %11 : vector<64x4xf32>
    %13 = arith.truncf %12 : vector<64x4xf32> to vector<64x4xbf16>
    %c0_8 = arith.constant 0 : index
    %c0_9 = arith.constant 0 : index
    %14 = vector.load %arg4[%c0_8, %c0_9] : memref<4x16xbf16, #tpu.memory_space<vmem>>, vector<4x16xbf16>
    %cst_10 = arith.constant dense<0.000000e+00> : vector<64x16xf32>
    %15 = tpu.matmul %13, %14, %cst_10 {dimension_numbers = #tpu.dot_dimension_numbers<[1], [0], [0], [1], [0, 0, 1, 1], [], []>} : vector<64x4xbf16>, vector<4x16xbf16>, vector<64x16xf32> -> vector<64x16xf32>
    %c0_11 = arith.constant 0 : index
    %c0_12 = arith.constant 0 : index
    %c0_13 = arith.constant 0 : index
    %c0_14 = arith.constant 0 : index
    %c0_15 = arith.constant 0 : index
    %16 = vector.load %arg5[%c0_11, %c0_12, %c0_13, %c0_14, %c0_15] : memref<1x8x1x8x16xbf16, #tpu.memory_space<vmem>>, vector<1x8x1x8x16xbf16>
    %17 = vector.shape_cast %16 : vector<1x8x1x8x16xbf16> to vector<8x8x16xbf16>
    %18 = vector.extract_strided_slice %17 {offsets = [0, 0, 0], sizes = [8, 8, 8], strides = [1, 1, 1]} : vector<8x8x16xbf16> to vector<8x8x8xbf16>
    %19 = vector.shape_cast %18 : vector<8x8x8xbf16> to vector<64x8xbf16>
    %20 = arith.extf %19 : vector<64x8xbf16> to vector<64x8xf32>
    %c0_16 = arith.constant 0 : index
    %c0_17 = arith.constant 0 : index
    %c0_18 = arith.constant 0 : index
    %21 = vector.load %arg6[%c0_16, %c0_17, %c0_18] : memref<1x1x8xf32, #tpu.memory_space<vmem>>, vector<1x1x8xf32>
    %22 = vector.shape_cast %21 : vector<1x1x8xf32> to vector<1x8xf32>
    %23 = vector.broadcast %22 : vector<1x8xf32> to vector<64x8xf32>
    %24 = arith.mulf %20, %23 : vector<64x8xf32>
    %c0_19 = arith.constant 0 : index
    %c0_20 = arith.constant 0 : index
    %c0_21 = arith.constant 0 : index
    %25 = vector.load %arg7[%c0_19, %c0_20, %c0_21] : memref<1x1x8xf32, #tpu.memory_space<vmem>>, vector<1x1x8xf32>
    %26 = vector.shape_cast %25 : vector<1x1x8xf32> to vector<1x8xf32>
    %27 = vector.broadcast %26 : vector<1x8xf32> to vector<64x8xf32>
    %28 = arith.addf %24, %27 : vector<64x8xf32>
    %cst_22 = arith.constant 0.000000e+00 : f32
    %29 = vector.broadcast %cst_22 : f32 to vector<64x8xf32>
    %30 = arith.maximumf %28, %29 : vector<64x8xf32>
    %31 = arith.truncf %30 : vector<64x8xf32> to vector<64x8xbf16>
    %c0_23 = arith.constant 0 : index
    %c0_24 = arith.constant 0 : index
    %32 = vector.load %arg8[%c0_23, %c0_24] : memref<8x16xbf16, #tpu.memory_space<vmem>>, vector<8x16xbf16>
    %cst_25 = arith.constant dense<0.000000e+00> : vector<64x16xf32>
    %33 = tpu.matmul %31, %32, %cst_25 {dimension_numbers = #tpu.dot_dimension_numbers<[1], [0], [0], [1], [0, 0, 1, 1], [], []>} : vector<64x8xbf16>, vector<8x16xbf16>, vector<64x16xf32> -> vector<64x16xf32>
    %34 = arith.addf %15, %33 : vector<64x16xf32>
    %c0_26 = arith.constant 0 : index
    %c0_27 = arith.constant 0 : index
    %c0_28 = arith.constant 0 : index
    %35 = vector.load %arg9[%c0_26, %c0_27, %c0_28] : memref<1x64x16xf32, #tpu.memory_space<vmem>>, vector<1x64x16xf32>
    %36 = vector.shape_cast %35 : vector<1x64x16xf32> to vector<64x16xf32>
    %37 = vector.shape_cast %34 : vector<64x16xf32> to vector<1x64x16xf32>
    tpu.vector_store %arg9[%c0_26, %c0_27, %c0_28], %37 {strides = array<i32>} : memref<1x64x16xf32, #tpu.memory_space<vmem>>, vector<1x64x16xf32>,
    return
  }
  func.func @transform_0(%arg0: i32) -> (i32, i32, i32) {
    %c0_i32 = arith.constant 0 : i32
    %c0_i32_0 = arith.constant 0 : i32
    %c0_i32_1 = arith.constant 0 : i32
    return %arg0, %c0_i32, %c0_i32_0 : i32, i32, i32
  }
  func.func @transform_1(%arg0: i32) -> (i32, i32, i32) {
    %c0_i32 = arith.constant 0 : i32
    %c0_i32_0 = arith.constant 0 : i32
    %c0_i32_1 = arith.constant 0 : i32
    return %arg0, %c0_i32, %c0_i32_0 : i32, i32, i32
  }
  func.func @transform_2(%arg0: i32) -> (i32, i32, i32) {
    %c0_i32 = arith.constant 0 : i32
    %c0_i32_0 = arith.constant 0 : i32
    %c0_i32_1 = arith.constant 0 : i32
    return %arg0, %c0_i32, %c0_i32_0 : i32, i32, i32
  }
  func.func @transform_3(%arg0: i32) -> (i32, i32) {
    %c0_i32 = arith.constant 0 : i32
    %c0_i32_0 = arith.constant 0 : i32
    %c0_i32_1 = arith.constant 0 : i32
    return %c0_i32, %c0_i32_0 : i32, i32
  }
  func.func @transform_4(%arg0: i32) -> (i32, i32, i32, i32, i32) {
    %c0_i32 = arith.constant 0 : i32
    %c0_i32_0 = arith.constant 0 : i32
    %c0_i32_1 = arith.constant 0 : i32
    %c0_i32_2 = arith.constant 0 : i32
    %c0_i32_3 = arith.constant 0 : i32
    return %arg0, %c0_i32, %c0_i32_0, %c0_i32_1, %c0_i32_2 : i32, i32, i32, i32, i32
  }
  func.func @transform_5(%arg0: i32) -> (i32, i32, i32) {
    %c0_i32 = arith.constant 0 : i32
    %c0_i32_0 = arith.constant 0 : i32
    %c0_i32_1 = arith.constant 0 : i32
    return %arg0, %c0_i32, %c0_i32_0 : i32, i32, i32
  }
  func.func @transform_6(%arg0: i32) -> (i32, i32, i32) {
    %c0_i32 = arith.constant 0 : i32
    %c0_i32_0 = arith.constant 0 : i32
    %c0_i32_1 = arith.constant 0 : i32
    return %arg0, %c0_i32, %c0_i32_0 : i32, i32, i32
  }
  func.func @transform_7(%arg0: i32) -> (i32, i32) {
    %c0_i32 = arith.constant 0 : i32
    %c0_i32_0 = arith.constant 0 : i32
    %c0_i32_1 = arith.constant 0 : i32
    return %c0_i32, %c0_i32_0 : i32, i32
  }
  func.func @transform_8(%arg0: i32) -> (i32, i32, i32) {
    %c0_i32 = arith.constant 0 : i32
    %c0_i32_0 = arith.constant 0 : i32
    %c0_i32_1 = arith.constant 0 : i32
    return %arg0, %c0_i32, %c0_i32_0 : i32, i32, i32
  }
}

</mosaic_0001>

<bundles_post_ra>
// kernel: resnetv2_block.6
= control target key start
LH: loop header
LB: loop body
LE: loop exit
PB: predicated region body
PF: predicated region fallthrough
CT: control target
= control target key end

     0   :  { %11 = vsyncpa [#allocation3], 0  ;;  %s1810_s0 = inlined_call_operand.hbm [shape: bf16[2,256,8], index: 0, kind: input, shape index: {}]   ;;  %s1811_s1 = inlined_call_operand.hbm [shape: f32[1,8], index: 1, kind: input, shape index: {}]   ;;  %s1812_s2 = inlined_call_operand.hbm [shape: f32[1,8], index: 2, kind: input, shape index: {}]   ;;  %s1813_s3 = inlined_call_operand.hbm [shape: f32[2,8], index: 3, kind: input, shape index: {}]   ;;  %s1814_s4 = inlined_call_operand.hbm [shape: f32[2,1,8], index: 4, kind: output, shape index: {0}]   ;;  %s1815_s5 = inlined_call_operand.hbm [shape: f32[2,1,8], index: 5, kind: output, shape index: {1}]  }
   0x1   :  { %13 = vsyncpa [#allocation3 + $0x1], 0 }
   0x2   :  { %14 = vsyncpa [#allocation6], 0 }
   0x3   :  { %15 = vsyncpa [#allocation9], 0 }
   0x4   :  { %16 = vsyncpa [#allocation4], 0 }
   0x5   :  { %18 = vsyncpa [#allocation4 + $0x1], 0 }
   0x6   :  { %19 = vsyncpa [#allocation12], 0 }
   0x7   :  { %21 = vsyncpa [#allocation12 + $0x1], 0  ;;  %s1192_s18 = smov 0   ;;  %s1194_s19 = smov 0  }
   0x8   :  { %s1196_s20 = smov 0   ;;  %s1198_s21 = smov 0  }
   0x9 LB: > { %s1213_s22 = sadd.s32 4294967295, %s1152_s21   ;;  %s748_s23 = sadd.s32 4294967294, %s1152_s21   ;;  %s1152_s21 = sphi %s1198_s21, %s1840_s21   ;;  %s1148_s20 = sphi %s1196_s20, %s1839_s20   ;;  %s1144_s19 = sphi %s1194_s19, %s1838_s19   ;;  %s1140_s18 = sphi %s1192_s18, %s1837_s18  }
   0xa   : > { %p47_p0 = scmp.ne.s32.totalorder %s1144_s19, %s1140_s18  ;;  %p1816_p1 = scmp.eq.s32.totalorder %s1213_s22, 0 }
   0xb   : > { %p140_p3 = scmp.eq.s32.totalorder %s748_s23, 1  ;;  %p749_p5 = scmp.ge.s32.totalorder %s1152_s21, 1 }
   0xc   : > { %p1222_p4 = por %p1816_p1, %p47_p0  ;;  %p173_p7 = scmp.lt.s32.totalorder %s1152_s21, 3 }
   0xd   : > { %p1227_p6 = por %p140_p3, %p47_p0  ;;  %s1154_s27 = smov [#allocation5]  }
   0xe   : > { %s1820_s24 = scalar_select %p1222_p4, 1, 0 }
   0xf   : > { %s1821_s25 = scalar_select %p1227_p6, 1, 0 }
  0x10   : > { %p1232_p8 = pnand %p749_p5, %p173_p7  ;;  %s186_s28 = sshll.u32 %s1154_s27, 4  ;;  %s187_s28 = int_to_ptr.vmem [resolvable:$true] %s186_s28 }
  0x11   : > { %s1155_s29 = smov [#allocation7]   ;;  %s1156_s7 = smov [#allocation8]  }
  0x12   : > { %s1822_s26 = scalar_select %p1232_p8, 1, 0 }
  0x13   : > { %p864_p10 = pneg %p1232_p8  ;;  %s197_s30 = sshll.u32 %s1155_s29, 4  ;;  %s1245_s30 = int_to_ptr.vmem [resolvable:$true] %s197_s30 }
  0x14   : > { %s208_s8 = sshll.u32 %s1156_s7, 4  ;;  %s932_s11 = scalar_lea.hbm %s1811_s1, 16  ;;  %s1247_s8 = int_to_ptr.vmem [resolvable:$true] %s208_s8 }
  0x15   : > { %p1241_p11 = pnand %p864_p10, %p1816_p1  ;;  %p933_p12 = scmp.ne.s32.totalorder %s1811_s1, %s932_s11 }
  0x16   : > { %p939_p5 = scmp.lt.u32.totalorder %s932_s11, %s1811_s1 }
  0x17   : > { %p1257_p13 = pneg %p1241_p11 }
  0x19   : > { %p935_p0 = pnand %p1257_p13, %p933_p12 }
  0x1b   : > { %p936_p3 = pneg %p935_p0 }
  0x1d   : > { %p941_p7 = pnand %p939_p5, %p936_p3 }
  0x1f   : > { %944 = shalt.err (!%p941_p7)
}
  0x20   : > { %s945_s17 = scalar_lea.vmem %s187_s28, 16  ;;  %s952_s23 = scalar_lea.vmem %s187_s28, 32 }
  0x21   : > { %p946_p10 = scmp.ne.s32.totalorder %s187_s28, %s945_s17  ;;  %p953_p2 = scmp.lt.s32.totalorder %s187_s28, %s187_s28 }
  0x22   : > { %p954_p6 = scmp.lt.s32.totalorder %s952_s23, %s945_s17 }
  0x23   : > { %p948_p9 = pnand %p946_p10, %p1257_p13 }
  0x24   : > { %p955_p4 = por %p954_p6, %p953_p2 }
  0x25   : > { %p949_p1 = pneg %p948_p9 }
  0x27   : > { %p956_p8 = pnand %p955_p4, %p949_p1 }
  0x29   : > { %959 = shalt.err (!%p956_p8)
}
  0x2a   : > { %867 = dma.hbm_to_vmem [thread:$0]  (!%p1241_p11), %s1811_s1, 16, %s187_s28, [#allocation6]  }
  0x2b   : > { %s960_s10 = scalar_lea.hbm %s1812_s2, 16 }
  0x2c   : > { %p961_p9 = scmp.ne.s32.totalorder %s1812_s2, %s960_s10  ;;  %p967_p1 = scmp.lt.u32.totalorder %s960_s10, %s1812_s2 }
  0x2e   : > { %p963_p12 = pnand %p961_p9, %p1257_p13 }
  0x30   : > { %p964_p2 = pneg %p963_p12 }
  0x32   : > { %p969_p4 = pnand %p967_p1, %p964_p2 }
  0x34   : > { %972 = shalt.err (!%p969_p4)
}
  0x35   : > { %s973_s28 = scalar_lea.vmem %s1245_s30, 16  ;;  %s980_s16 = scalar_lea.vmem %s1245_s30, 32 }
  0x36   : > { %p974_p6 = scmp.ne.s32.totalorder %s1245_s30, %s973_s28  ;;  %p981_p3 = scmp.lt.s32.totalorder %s1245_s30, %s1245_s30 }
  0x37   : > { %p982_p5 = scmp.lt.s32.totalorder %s980_s16, %s973_s28 }
  0x38   : > { %p976_p8 = pnand %p974_p6, %p1257_p13 }
  0x39   : > { %p983_p7 = por %p982_p5, %p981_p3 }
  0x3a   : > { %p977_p0 = pneg %p976_p8 }
  0x3c   : > { %p984_p10 = pnand %p983_p7, %p977_p0 }
  0x3e   : > { %987 = shalt.err (!%p984_p10)
}
  0x3f   : > { %870 = dma.hbm_to_vmem [thread:$0]  (!%p1241_p11), %s1812_s2, 16, %s1245_s30, [#allocation6]  }
  0x40   : > { %s988_s7 = scalar_lea.hbm %s1813_s3, 32 }
  0x41   : > { %p989_p9 = scmp.ne.s32.totalorder %s1813_s3, %s988_s7  ;;  %p995_p1 = scmp.lt.u32.totalorder %s988_s7, %s1813_s3 }
  0x43   : > { %p991_p12 = pnand %p989_p9, %p1257_p13 }
  0x45   : > { %p992_p2 = pneg %p991_p12 }
  0x47   : > { %p997_p4 = pnand %p995_p1, %p992_p2 }
  0x49   : > { %1000 = shalt.err (!%p997_p4)
}
  0x4a   : > { %s1001_s30 = scalar_lea.vmem %s1247_s8, 32  ;;  %p1009_p3 = scmp.lt.s32.totalorder %s1247_s8, %s1247_s8 }
  0x4b   : > { %p1002_p6 = scmp.ne.s32.totalorder %s1247_s8, %s1001_s30  ;;  %p1010_p5 = scmp.lt.s32.totalorder %s1001_s30, %s1001_s30 }
  0x4d   : > { %p1004_p8 = pnand %p1002_p6, %p1257_p13  ;;  %p1011_p7 = por %p1010_p5, %p1009_p3 }
  0x4f   : > { %p1005_p0 = pneg %p1004_p8 }
  0x51   : > { %p1012_p10 = pnand %p1011_p7, %p1005_p0 }
  0x53   : > { %1015 = shalt.err (!%p1012_p10)
}
  0x54   : > { %873 = dma.hbm_to_vmem [thread:$0]  (!%p1241_p11), %s1813_s3, 32, %s1247_s8, [#allocation9]  }
  0x55   : > { %s1321_s14 = sadd.s32 1, %s1152_s21   ;;  %s34_s28 = sadd.s32 1, %s1148_s20 }
  0x56   : > { %s31_s6 = ssub.s32 %s1152_s21, %s1321_s14  ;;  %p41_p9 = scmp.ne.s32.totalorder %s1148_s20, %s1144_s19 }
  0x57   : > { %p32_p13 = scmp.eq.s32.totalorder %s31_s6, 0  ;;  %p42_p12 = scmp.eq.s32.totalorder %s1152_s21, 0 }
  0x58   : > { %p888_p2 = scmp.lt.s32.totalorder %s1152_s21, 2  ;;  %p1825_p4 = scmp.eq.s32.totalorder %s1213_s22, 1 }
  0x59   : > { %s1331_s16 = scalar_select %p32_p13, %s1148_s20, %s34_s28  }
  0x5a   : > { %p43_p1 = por %p42_p12, %p41_p9  ;;  %p1335_p6 = por %p1825_p4, %p41_p9 }
  0x5b   : > { %s219_s23 = sand.u32 1, %s1148_s20   ;;  %s766_s27 = sshll.u32 %s1152_s21, 11 }
  0x5c   : > { %s754_s8 = sshll.u32 %s219_s23, 7  ;;  %s1344_s9 = scalar_lea.hbm %s1810_s0, %s766_s27 }
  0x5d   : > { %s223_s10 = scalar_lea.vmem [#allocation2], %s754_s8  ;;  %p1346_p11 = pnand %p888_p2, %p43_p1 }
  0x5e   : > { %s230_s11 = sshll.u32 %s223_s10, 4  ;;  %s1352_s30 = scalar_lea.sflag [#allocation3], %s219_s23  ;;  %s1350_s11 = int_to_ptr.vmem [resolvable:$true] %s230_s11 }
  0x5f   : > { %s1016_s13 = scalar_lea.hbm %s1344_s9, 2048  ;;  %p1018_p0 = pneg %p1346_p11 }
  0x60   : > { %p1017_p8 = scmp.ne.s32.totalorder %s1344_s9, %s1016_s13  ;;  %s1021_s28 = scalar_lea.hbm %s1810_s0, 4096 }
  0x61   : > { %p1022_p7 = scmp.lt.u32.totalorder %s1344_s9, %s1810_s0  ;;  %p1023_p10 = scmp.lt.u32.totalorder %s1021_s28, %s1016_s13 }
  0x62   : > { %p1019_p3 = pnand %p1018_p0, %p1017_p8  ;;  %p1025_p9 = scmp.lt.u32.totalorder %s1016_s13, %s1344_s9 }
  0x63   : > { %p1024_p13 = por %p1023_p10, %p1022_p7 }
  0x64   : > { %p1020_p5 = pneg %p1019_p3 }
  0x65   : > { %p1026_p12 = por %p1025_p9, %p1024_p13 }
  0x67   : > { %p1027_p2 = pnand %p1026_p12, %p1020_p5 }
  0x69   : > { %1030 = shalt.err (!%p1027_p2)
}
  0x6a   : > { %s1031_s23 = scalar_lea.vmem %s1350_s11, 2048  ;;  %s1157_s29 = smov [#allocation2]  }
  0x6b   : > { %p1032_p1 = scmp.ne.s32.totalorder %s1350_s11, %s1031_s23  ;;  %s1036_s7 = sshll.u32 %s1157_s29, 4  ;;  %s1037_s7 = int_to_ptr.vmem [resolvable:$false] %s1036_s7 }
  0x6c   : > { %s1038_s10 = scalar_lea.vmem %s1037_s7, 4096  ;;  %p1039_p3 = scmp.lt.s32.totalorder %s1350_s11, %s1037_s7 }
  0x6d   : > { %p1034_p4 = pnand %p1032_p1, %p1018_p0  ;;  %p1040_p7 = scmp.lt.s32.totalorder %s1038_s10, %s1031_s23 }
  0x6f   : > { %p1035_p8 = pneg %p1034_p4  ;;  %p1041_p10 = por %p1040_p7, %p1039_p3 }
  0x71   : > { %p1042_p13 = pnand %p1041_p10, %p1035_p8 }
  0x73   : > { %1045 = shalt.err (!%p1042_p13)
}
  0x74   : > { %s1158_s13 = smov 64   ;;  %s1159_s15 = smov 4  }
  0x75   : > { %877 = dma.hbm_to_vmem [thread:$0]  (!%p1346_p11), %s1344_s9, 2048, %s1350_s11, %s1352_s30, %s1158_s13, %s1158_s13, %s1159_s15  }
  0x76   : > { %p1828_p0 = scmp.ne.s32.totalorder %s1822_s26, 0 }
  0x77   : > { %s1383_s6 = sand.u32 (!%p1828_p0), 1, %s1144_s19   ;;  %p1829_p5 = scmp.ne.s32.totalorder (!%p1828_p0), %s1820_s24, 0 }
  0x78   : > { %242 = sbr.rel (%p1828_p0) target bundleno = 668 (0x29c), region = 36  ;;  %s758_s28 = sshll.u32 (!%p1828_p0), %s1383_s6, 7 }
  0x79   : > { %s245_s27 = scalar_lea.sflag (!%p1828_p0), [#allocation3], %s1383_s6  ;;  %s1387_s8 = scalar_lea.vmem (!%p1828_p0), [#allocation2], %s758_s28 }
  0x7f   : > { %1119 = dma.done.wait (%p1829_p5), %s245_s27, 2048  }
  0x80   : > { %1121 = vsyncadd (%p1829_p5), %s245_s27, 4294965248  ;;  %p1830_p11 = scmp.eq.s32.totalorder %s1213_s22, 0 }
  0x82   : > { %1123 = dma.done.wait (%p1830_p11), [#allocation6], 32   ;;  %p1831_p9 = pmov %p1830_p11 }
  0x84   : > { %1125 = vsyncadd (%p1831_p9), [#allocation6], 4294967264  ;;  %p1832_p12 = pmov %p1831_p9 }
  0x85   : > { %p1833_p2 = pmov %p1831_p9 }
  0x86   : > { %1127 = dma.done.wait (%p1832_p12), [#allocation9], 32  }
  0x87   : > { %1129 = vsyncadd (%p1833_p2), [#allocation9], 4294967264  ;;  %v1402_v0 = vld [vmem:[%s1387_s8] sm:$0xff]   ;;  %v1405_v1 = vld [vmem:[%s1387_s8 + $0x8] sm:$0xff]   ;;  %vm355_vm0 = vcmask 64512   ;;  %vm426_vm1 = vcmask 58368  }
  0x88   : > { %v769_v2 = vunpack.c.l.bf16 %v1402_v0  ;;  %v770_v3 = vunpack.c.h.bf16 %v1402_v0  ;;  %v773_v4 = vunpack.c.l.bf16 %v1405_v1  ;;  %v1411_v5 = vld [vmem:[%s1387_s8 + $0x10] sm:$0xff]   ;;  %v774_v6 = vunpack.c.h.bf16 %v1405_v1  ;;  %v1425_v11 = vld [vmem:[%s1387_s8 + $0x18] sm:$0xff]   ;;  %v1436_v18 = vld [vmem:[%s1387_s8 + $0x20] sm:$0xff]   ;;  %s762_s24 = sshll.u32 %s1213_s22, 4  ;;  %s283_s26 = scalar_lea.vmem [#allocation10], %s1383_s6 }
  0x89   : > { %v777_v7 = vunpack.c.l.bf16 %v1411_v5  ;;  %v778_v13 = vunpack.c.h.bf16 %v1411_v5  ;;  %v781_v16 = vunpack.c.l.bf16 %v1425_v11  ;;  %v782_v20 = vunpack.c.h.bf16 %v1425_v11  ;;  %v1447_v25 = vld [vmem:[%s1387_s8 + $0x28] sm:$0xff]   ;;  %v1458_v32 = vld [vmem:[%s1387_s8 + $0x30] sm:$0xff]   ;;  %v1469_v39 = vld [vmem:[%s1387_s8 + $0x38] sm:$0xff]   ;;  %s612_s9 = sshll.u32 %s283_s26, 4  ;;  %s1724_s30 = scalar_lea.hbm %s1814_s4, %s762_s24  ;;  %s1726_s9 = int_to_ptr.vmem [resolvable:$true] %s612_s9 }
  0x8a   : > { %v356_v8 = vsel %vm355_vm0, %v769_v2, 0.0  ;;  %v357_v9 = vsel %vm355_vm0, %v770_v3, 0.0  ;;  %v359_v10 = vsel %vm355_vm0, %v773_v4, 0.0  ;;  %v361_v14 = vsel %vm355_vm0, %v774_v6, 0.0  ;;  %v1480_v46 = vld [vmem:[%s1387_s8 + $0x40] sm:$0xff]   ;;  %v1491_v53 = vld [vmem:[%s1387_s8 + $0x48] sm:$0xff]  }
  0x8b   : > { %v358_v12 = vadd.f32 %v357_v9, %v356_v8  ;;  %v363_v17 = vsel %vm355_vm0, %v777_v7, 0.0  ;;  %v365_v21 = vsel %vm355_vm0, %v778_v13, 0.0  ;;  %v785_v23 = vunpack.c.l.bf16 %v1436_v18  ;;  %v1502_v60 = vld [vmem:[%s1387_s8 + $0x50] sm:$0xff]   ;;  %s289_s23 = scalar_lea.vmem [#allocation11], %s1383_s6  ;;  %s596_s7 = scalar_lea.sflag [#allocation4], %s1383_s6 }
  0x8c   : > { %v367_v24 = vsel %vm355_vm0, %v781_v16, 0.0  ;;  %v786_v27 = vunpack.c.h.bf16 %v1436_v18  ;;  %v369_v28 = vsel %vm355_vm0, %v782_v20, 0.0  ;;  %v789_v30 = vunpack.c.l.bf16 %v1447_v25  ;;  %s1731_s29 = sshll.u32 %s289_s23, 4  ;;  %s1046_s10 = scalar_lea.vmem %s1726_s9, 16  ;;  %s1765_s29 = int_to_ptr.vmem [resolvable:$true] %s1731_s29 }
  0x8d   : > { %v360_v15 = vadd.f32 %v359_v10, %v358_v12  ;;  %v371_v31 = vsel %vm355_vm0, %v785_v23, 0.0  ;;  %v790_v34 = vunpack.c.h.bf16 %v1447_v25  ;;  %v793_v37 = vunpack.c.l.bf16 %v1458_v32  ;;  %v1513_v12 = vld [vmem:[%s1387_s8 + $0x58] sm:$0xff]   ;;  %p1047_p1 = scmp.ne.s32.totalorder %s1726_s9, %s1046_s10  ;;  %s1160_s13 = smov [#allocation10]  }
  0x8e   : > { %v373_v35 = vsel %vm355_vm0, %v786_v27, 0.0  ;;  %v375_v38 = vsel %vm355_vm0, %v789_v30, 0.0  ;;  %v794_v41 = vunpack.c.h.bf16 %v1458_v32  ;;  %v797_v44 = vunpack.c.l.bf16 %v1469_v39  ;;  %s1050_s15 = sshll.u32 %s1160_s13, 4  ;;  %s1051_s15 = int_to_ptr.vmem [resolvable:$false] %s1050_s15 }
  0x8f   : > { %v362_v19 = vadd.f32 %v361_v14, %v360_v15  ;;  %v377_v42 = vsel %vm355_vm0, %v790_v34, 0.0  ;;  %v379_v45 = vsel %vm355_vm0, %v793_v37, 0.0  ;;  %v798_v48 = vunpack.c.h.bf16 %v1469_v39  ;;  %p1048_p4 = pnand %p1047_p1, %p1335_p6  ;;  %s1052_s28 = scalar_lea.vmem %s1051_s15, 32 }
  0x90   : > { %v381_v49 = vsel %vm355_vm0, %v794_v41, 0.0  ;;  %v801_v51 = vunpack.c.l.bf16 %v1480_v46  ;;  %v383_v52 = vsel %vm355_vm0, %v797_v44, 0.0  ;;  %v802_v55 = vunpack.c.h.bf16 %v1480_v46  ;;  %p1053_p3 = scmp.lt.s32.totalorder %s1726_s9, %s1051_s15  ;;  %p1054_p7 = scmp.lt.s32.totalorder %s1052_s28, %s1046_s10 }
  0x91   : > { %v364_v22 = vadd.f32 %v363_v17, %v362_v19  ;;  %v385_v56 = vsel %vm355_vm0, %v798_v48, 0.0  ;;  %v805_v58 = vunpack.c.l.bf16 %v1491_v53  ;;  %v806_v62 = vunpack.c.h.bf16 %v1491_v53  ;;  %p1049_p8 = pneg %p1048_p4 }
  0x92   : > { %v387_v59 = vsel %vm355_vm0, %v801_v51, 0.0  ;;  %v389_v63 = vsel %vm355_vm0, %v802_v55, 0.0  ;;  %v809_v9 = vunpack.c.l.bf16 %v1502_v60  ;;  %v810_v15 = vunpack.c.h.bf16 %v1502_v60  ;;  %p1055_p10 = por %p1054_p7, %p1053_p3 }
  0x93   : > { %v366_v26 = vadd.f32 %v365_v21, %v364_v22  ;;  %v391_v10 = vsel %vm355_vm0, %v805_v58, 0.0  ;;  %v393_v17 = vsel %vm355_vm0, %v806_v62, 0.0  ;;  %v813_v21 = vunpack.c.l.bf16 %v1513_v12 }
  0x94   : > { %v395_v22 = vsel %vm355_vm0, %v809_v9, 0.0  ;;  %vm592_vm2 = vcmask 57344   ;;  %p1056_p13 = pnand %p1055_p10, %p1049_p8 }
  0x95   : > { %v368_v29 = vadd.f32 %v367_v24, %v366_v26  ;;  %v1524_v24 = vld [vmem:[%s1387_s8 + $0x60] sm:$0xff]  }
  0x97   : > { %v370_v33 = vadd.f32 %v369_v28, %v368_v29  ;;  %v814_v28 = vunpack.c.h.bf16 %v1513_v12  ;;  %v397_v29 = vsel %vm355_vm0, %v810_v15, 0.0 }
  0x99   : > { %v372_v36 = vadd.f32 %v371_v31, %v370_v33  ;;  %v817_v33 = vunpack.c.l.bf16 %v1524_v24 }
  0x9b   : > { %v374_v40 = vadd.f32 %v373_v35, %v372_v36  ;;  %v399_v35 = vsel %vm355_vm0, %v813_v21, 0.0  ;;  %v1535_v36 = vld [vmem:[%s1387_s8 + $0x68] sm:$0xff]  }
  0x9d   : > { %v376_v43 = vadd.f32 %v375_v38, %v374_v40  ;;  %v818_v40 = vunpack.c.h.bf16 %v1524_v24 }
  0x9f   : > { %v378_v47 = vadd.f32 %v377_v42, %v376_v43  ;;  %v401_v42 = vsel %vm355_vm0, %v814_v28, 0.0 }
  0xa1   : > { %v380_v50 = vadd.f32 %v379_v45, %v378_v47  ;;  %v821_v45 = vunpack.c.l.bf16 %v1535_v36  ;;  %v403_v47 = vsel %vm355_vm0, %v817_v33, 0.0 }
  0xa3   : > { %v382_v54 = vadd.f32 %v381_v49, %v380_v50  ;;  %v1546_v49 = vld [vmem:[%s1387_s8 + $0x70] sm:$0xff]  }
  0xa5   : > { %v384_v57 = vadd.f32 %v383_v52, %v382_v54  ;;  %v822_v52 = vunpack.c.h.bf16 %v1535_v36  ;;  %v405_v54 = vsel %vm355_vm0, %v818_v40, 0.0 }
  0xa7   : > { %v386_v61 = vadd.f32 %v385_v56, %v384_v57  ;;  %v825_v57 = vunpack.c.l.bf16 %v1546_v49 }
  0xa9   : > { %v388_v8 = vadd.f32 %v387_v59, %v386_v61  ;;  %v407_v59 = vsel %vm355_vm0, %v821_v45, 0.0  ;;  %v1557_v61 = vld [vmem:[%s1387_s8 + $0x78] sm:$0xff]  }
  0xab   : > { %v390_v14 = vadd.f32 %v389_v63, %v388_v8  ;;  %v826_v8 = vunpack.c.h.bf16 %v1546_v49 }
  0xad   : > { %v392_v19 = vadd.f32 %v391_v10, %v390_v14  ;;  %v409_v10 = vsel %vm355_vm0, %v822_v52, 0.0 }
  0xaf   : > { %v394_v26 = vadd.f32 %v393_v17, %v392_v19  ;;  %v829_v17 = vunpack.c.l.bf16 %v1557_v61  ;;  %v411_v19 = vsel %vm355_vm0, %v825_v57, 0.0 }
  0xb1   : > { %v396_v31 = vadd.f32 %v395_v22, %v394_v26  ;;  %v1819_v26 = vunpack.c.h.bf16 %v1557_v61 }
  0xb3   : > { %v398_v38 = vadd.f32 %v397_v29, %v396_v31  ;;  %v413_v29 = vsel %vm355_vm0, %v826_v8, 0.0 }
  0xb5   : > { %v400_v43 = vadd.f32 %v399_v35, %v398_v38  ;;  %v415_v35 = vsel %vm355_vm0, %v829_v17, 0.0 }
  0xb7   : > { %v402_v50 = vadd.f32 %v401_v42, %v400_v43  ;;  %v417_v42 = vsel %vm355_vm0, %v1819_v26, 0.0 }
  0xb9   : > { %v404_v56 = vadd.f32 %v403_v47, %v402_v50 }
  0xbb   : > { %v406_v63 = vadd.f32 %v405_v54, %v404_v56 }
  0xbd   : > { %v408_v14 = vadd.f32 %v407_v59, %v406_v63 }
  0xbf   : > { %v410_v22 = vadd.f32 %v409_v10, %v408_v14  ;;  %v1577_v10 = vld [vmem:[#allocation8] sm:$0x3] }
  0xc1   : > { %v412_v31 = vadd.f32 %v411_v19, %v410_v22 }
  0xc3   : > { %v414_v38 = vadd.f32 %v413_v29, %v412_v31 }
  0xc5   : > { %v416_v43 = vadd.f32 %v415_v35, %v414_v38 }
  0xc7   : > { %v418_v47 = vadd.f32 %v417_v42, %v416_v43 }
  0xc9   : > { %v419_v50 = vrot.slane %v418_v47, 4 }
  0xcb   : > { %v420_v54 = vadd.f32 %v419_v50, %v418_v47 }
  0xcd   : > { %v421_v56 = vrot.slane %v420_v54, 2 }
  0xcf   : > { %v422_v59 = vadd.f32 %v421_v56, %v420_v54 }
  0xd1   : > { %v423_v63 = vrot.slane %v422_v59, 1 }
  0xd3   : > { %v424_v14 = vadd.f32 %v423_v63, %v422_v59 }
  0xd5   : > { %v425_v19 = vmul.f32 %v424_v14, %v1577_v10 }
  0xd7   : > { %v427_v22 = vsel %vm426_vm1, %v425_v19, 0.0 }
  0xd8   : > { %428 = vadd.xlane.f32.xlu0 %v427_v22 }
 0x165   : > { %v429_v29 = vpop.xlane.xlu0 %428 }
 0x166   : > { %v430_v31 = vmul.f32 0.0009765625, %v429_v29 }
 0x168   : > { %v431_v26 = vmul.f32 %v430_v31, %v1577_v10 }
 0x16a   : > { %v432_v35 = vsel %vm426_vm1, %v431_v26, 0.0 }
 0x16b   : > { %v433_v38 = vrot.slane %v432_v35, 4 }
 0x16d   : > { %v434_v42 = vadd.f32 %v433_v38, %v432_v35 }
 0x16f   : > { %v435_v43 = vrot.slane %v434_v42, 2 }
 0x171   : > { %v436_v47 = vadd.f32 %v435_v43, %v434_v42 }
 0x173   : > { %v437_v50 = vrot.slane %v436_v47, 1 }
 0x175   : > { %v1583_v54 = vadd.f32 %v437_v50, %v436_v47 }
 0x177   : > { %v439_v56 = vsub.f32 %v769_v2, %v1583_v54  ;;  %v440_v59 = vsub.f32 %v770_v3, %v1583_v54  ;;  %v441_v63 = vsub.f32 %v773_v4, %v1583_v54  ;;  %v442_v26 = vsub.f32 %v774_v6, %v1583_v54 }
 0x178   : > { %v443_v22 = vsub.f32 %v777_v7, %v1583_v54  ;;  %v444_v0 = vsub.f32 %v778_v13, %v1583_v54  ;;  %v445_v1 = vsub.f32 %v781_v16, %v1583_v54  ;;  %v446_v7 = vsub.f32 %v782_v20, %v1583_v54 }
 0x179   : > { %v471_v14 = vmul.f32 %v439_v56, %v439_v56  ;;  %v472_v19 = vmul.f32 %v440_v59, %v440_v59  ;;  %v473_v29 = vmul.f32 %v441_v63, %v441_v63  ;;  %v474_v2 = vmul.f32 %v442_v26, %v442_v26 }
 0x17a   : > { %v475_v6 = vmul.f32 %v443_v22, %v443_v22  ;;  %v476_v5 = vmul.f32 %v444_v0, %v444_v0  ;;  %v447_v43 = vsub.f32 %v785_v23, %v1583_v54  ;;  %v477_v47 = vmul.f32 %v445_v1, %v445_v1 }
 0x17b   : > { %v503_v3 = vsel %vm355_vm0, %v471_v14, 0.0  ;;  %v504_v4 = vsel %vm355_vm0, %v472_v19, 0.0  ;;  %v506_v35 = vsel %vm355_vm0, %v473_v29, 0.0  ;;  %v508_v13 = vsel %vm355_vm0, %v474_v2, 0.0 }
 0x17c   : > { %v505_v31 = vadd.f32 %v504_v4, %v503_v3  ;;  %v510_v50 = vsel %vm355_vm0, %v475_v6, 0.0  ;;  %v448_v56 = vsub.f32 %v786_v27, %v1583_v54  ;;  %v478_v59 = vmul.f32 %v446_v7, %v446_v7 }
 0x17d   : > { %v512_v11 = vsel %vm355_vm0, %v476_v5, 0.0  ;;  %v449_v63 = vsub.f32 %v789_v30, %v1583_v54  ;;  %v479_v26 = vmul.f32 %v447_v43, %v447_v43  ;;  %v514_v14 = vsel %vm355_vm0, %v477_v47, 0.0 }
 0x17e   : > { %v507_v38 = vadd.f32 %v506_v35, %v505_v31  ;;  %v450_v19 = vsub.f32 %v790_v34, %v1583_v54  ;;  %v480_v22 = vmul.f32 %v448_v56, %v448_v56  ;;  %v516_v18 = vsel %vm355_vm0, %v478_v59, 0.0 }
 0x17f   : > { %v451_v29 = vsub.f32 %v793_v37, %v1583_v54  ;;  %v481_v0 = vmul.f32 %v449_v63, %v449_v63  ;;  %v518_v2 = vsel %vm355_vm0, %v479_v26, 0.0  ;;  %v452_v3 = vsub.f32 %v794_v41, %v1583_v54 }
 0x180   : > { %v509_v42 = vadd.f32 %v508_v13, %v507_v38  ;;  %v482_v4 = vmul.f32 %v450_v19, %v450_v19  ;;  %v520_v25 = vsel %vm355_vm0, %v480_v22, 0.0  ;;  %v453_v31 = vsub.f32 %v797_v44, %v1583_v54 }
 0x181   : > { %v483_v1 = vmul.f32 %v451_v29, %v451_v29  ;;  %v522_v6 = vsel %vm355_vm0, %v481_v0, 0.0  ;;  %v454_v35 = vsub.f32 %v798_v48, %v1583_v54  ;;  %v484_v38 = vmul.f32 %v452_v3, %v452_v3 }
 0x182   : > { %v511_v16 = vadd.f32 %v510_v50, %v509_v42  ;;  %v524_v32 = vsel %vm355_vm0, %v482_v4, 0.0  ;;  %v455_v7 = vsub.f32 %v801_v51, %v1583_v54  ;;  %v485_v5 = vmul.f32 %v453_v31, %v453_v31 }
 0x183   : > { %v526_v13 = vsel %vm355_vm0, %v483_v1, 0.0  ;;  %v456_v42 = vsub.f32 %v802_v55, %v1583_v54  ;;  %v486_v43 = vmul.f32 %v454_v35, %v454_v35  ;;  %v528_v39 = vsel %vm355_vm0, %v484_v38, 0.0 }
 0x184   : > { %v513_v20 = vadd.f32 %v512_v11, %v511_v16  ;;  %v457_v47 = vsub.f32 %v805_v58, %v1583_v54  ;;  %v487_v50 = vmul.f32 %v455_v7, %v455_v7  ;;  %v530_v16 = vsel %vm355_vm0, %v485_v5, 0.0 }
 0x185   : > { %v458_v56 = vsub.f32 %v806_v62, %v1583_v54  ;;  %v488_v59 = vmul.f32 %v456_v42, %v456_v42  ;;  %v532_v46 = vsel %vm355_vm0, %v486_v43, 0.0  ;;  %v459_v11 = vsub.f32 %v809_v9, %v1583_v54 }
 0x186   : > { %v515_v23 = vadd.f32 %v514_v14, %v513_v20  ;;  %v489_v20 = vmul.f32 %v457_v47, %v457_v47  ;;  %v534_v63 = vsel %vm355_vm0, %v487_v50, 0.0  ;;  %v460_v26 = vsub.f32 %v810_v15, %v1583_v54 }
 0x187   : > { %v490_v14 = vmul.f32 %v458_v56, %v458_v56  ;;  %v536_v53 = vsel %vm355_vm0, %v488_v59, 0.0  ;;  %v491_v19 = vmul.f32 %v459_v11, %v459_v11  ;;  %v463_v29 = vsub.f32 %v817_v33, %v1583_v54 }
 0x188   : > { %v517_v27 = vadd.f32 %v516_v18, %v515_v23  ;;  %v461_v23 = vsub.f32 %v813_v21, %v1583_v54  ;;  %v538_v22 = vsel %vm355_vm0, %v489_v20, 0.0  ;;  %v462_v18 = vsub.f32 %v814_v28, %v1583_v54 }
 0x189   : > { %v540_v60 = vsel %vm355_vm0, %v490_v14, 0.0  ;;  %v465_v4 = vsub.f32 %v821_v45, %v1583_v54  ;;  %v466_v31 = vsub.f32 %v822_v52, %v1583_v54  ;;  %v468_v38 = vsub.f32 %v826_v8, %v1583_v54 }
 0x18a   : > { %v519_v30 = vadd.f32 %v518_v2, %v517_v27  ;;  %v492_v27 = vmul.f32 %v460_v26, %v460_v26  ;;  %v493_v0 = vmul.f32 %v461_v23, %v461_v23  ;;  %v542_v2 = vsel %vm355_vm0, %v491_v19, 0.0 }
 0x18b   : > { %v494_v3 = vmul.f32 %v462_v18, %v462_v18  ;;  %v500_v42 = vmul.f32 %v468_v38, %v468_v38 }
 0x18c   : > { %v521_v34 = vadd.f32 %v520_v25, %v519_v30  ;;  %v464_v30 = vsub.f32 %v818_v40, %v1583_v54  ;;  %v544_v12 = vsel %vm355_vm0, %v492_v27, 0.0  ;;  %v495_v25 = vmul.f32 %v463_v29, %v463_v29  ;;  %v587_v29 = vld [vmem:[#allocation5] sm:$0x1] }
 0x18d   : > { %v548_v24 = vsel %vm355_vm0, %v494_v3, 0.0  ;;  %v560_v50 = vsel %vm355_vm0, %v500_v42, 0.0 }
 0x18e   : > { %v523_v37 = vadd.f32 %v522_v6, %v521_v34  ;;  %v546_v34 = vsel %vm355_vm0, %v493_v0, 0.0  ;;  %v496_v1 = vmul.f32 %v464_v30, %v464_v30  ;;  %v467_v6 = vsub.f32 %v825_v57, %v1583_v54 }
 0x18f   : > { %v550_v35 = vsel %vm355_vm0, %v495_v25, 0.0 }
 0x190   : > { %v525_v41 = vadd.f32 %v524_v32, %v523_v37  ;;  %v497_v37 = vmul.f32 %v465_v4, %v465_v4  ;;  %v498_v32 = vmul.f32 %v466_v31, %v466_v31  ;;  %v552_v36 = vsel %vm355_vm0, %v496_v1, 0.0 }
 0x191   : > { %v499_v7 = vmul.f32 %v467_v6, %v467_v6 }
 0x192   : > { %v527_v44 = vadd.f32 %v526_v13, %v525_v41  ;;  %v469_v41 = vsub.f32 %v829_v17, %v1583_v54  ;;  %v554_v5 = vsel %vm355_vm0, %v497_v37, 0.0  ;;  %v1834_v13 = vunpack.c.h.bf16 %v1557_v61 }
 0x193   : > { %v556_v49 = vsel %vm355_vm0, %v498_v32, 0.0 }
 0x194   : > { %v529_v48 = vadd.f32 %v528_v39, %v527_v44  ;;  %v470_v44 = vsub.f32 %v1834_v13, %v1583_v54  ;;  %v501_v43 = vmul.f32 %v469_v41, %v469_v41  ;;  %v558_v39 = vsel %vm355_vm0, %v499_v7, 0.0 }
 0x196   : > { %v531_v51 = vadd.f32 %v530_v16, %v529_v48  ;;  %v502_v47 = vmul.f32 %v470_v44, %v470_v44  ;;  %v562_v16 = vsel %vm355_vm0, %v501_v43, 0.0 }
 0x198   : > { %v533_v55 = vadd.f32 %v532_v46, %v531_v51  ;;  %v564_v56 = vsel %vm355_vm0, %v502_v47, 0.0 }
 0x19a   : > { %v535_v58 = vadd.f32 %v534_v63, %v533_v55 }
 0x19c   : > { %v537_v62 = vadd.f32 %v536_v53, %v535_v58 }
 0x19e   : > { %v539_v9 = vadd.f32 %v538_v22, %v537_v62 }
 0x1a0   : > { %v541_v15 = vadd.f32 %v540_v60, %v539_v9 }
 0x1a2   : > { %v543_v21 = vadd.f32 %v542_v2, %v541_v15 }
 0x1a4   : > { %v545_v28 = vadd.f32 %v544_v12, %v543_v21 }
 0x1a6   : > { %v547_v33 = vadd.f32 %v546_v34, %v545_v28 }
 0x1a8   : > { %v549_v40 = vadd.f32 %v548_v24, %v547_v33 }
 0x1aa   : > { %v551_v45 = vadd.f32 %v550_v35, %v549_v40 }
 0x1ac   : > { %v553_v52 = vadd.f32 %v552_v36, %v551_v45 }
 0x1ae   : > { %v555_v57 = vadd.f32 %v554_v5, %v553_v52 }
 0x1b0   : > { %v557_v8 = vadd.f32 %v556_v49, %v555_v57 }
 0x1b2   : > { %v559_v48 = vadd.f32 %v558_v39, %v557_v8 }
 0x1b4   : > { %v561_v17 = vadd.f32 %v560_v50, %v559_v48 }
 0x1b6   : > { %v563_v51 = vadd.f32 %v562_v16, %v561_v17 }
 0x1b8   : > { %v565_v59 = vadd.f32 %v564_v56, %v563_v51 }
 0x1ba   : > { %v566_v61 = vrot.slane %v565_v59, 4 }
 0x1bc   : > { %v567_v46 = vadd.f32 %v566_v61, %v565_v59 }
 0x1be   : > { %v568_v55 = vrot.slane %v567_v46, 2 }
 0x1c0   : > { %v569_v11 = vadd.f32 %v568_v55, %v567_v46 }
 0x1c2   : > { %v570_v20 = vrot.slane %v569_v11, 1 }
 0x1c4   : > { %v571_v63 = vadd.f32 %v570_v20, %v569_v11 }
 0x1c6   : > { %v572_v58 = vmul.f32 %v571_v63, %v1577_v10 }
 0x1c8   : > { %v573_v26 = vsel %vm426_vm1, %v572_v58, 0.0 }
 0x1c9   : > { %574 = vadd.xlane.f32.xlu0 %v573_v26 }
 0x256   : > { %v575_v14 = vpop.xlane.xlu0 %574 }
 0x257   : > { %v576_v53 = vmul.f32 0.0009765625, %v575_v14 }
 0x259   : > { %v577_v62 = vadd.f32 1e-05, %v576_v53 }
 0x25b   : > { %930 = vrsqrt.f32 %v577_v62 }
 0x265   : > { %v931_v23 = vpop.eup %930 }
 0x266   : > { %v579_v19 = vmul.f32 %v931_v23, %v1577_v10  ;;  %v589_v10 = vld [vmem:[#allocation7] sm:$0x1] }
 0x268   : > { %v580_v22 = vsel %vm426_vm1, %v579_v19, 0.0 }
 0x269   : > { %v581_v9 = vrot.slane %v580_v22, 4 }
 0x26b   : > { %v582_v18 = vadd.f32 %v581_v9, %v580_v22 }
 0x26d   : > { %v583_v27 = vrot.slane %v582_v18, 2 }
 0x26f   : > { %v584_v60 = vadd.f32 %v583_v27, %v582_v18 }
 0x271   : > { %v585_v15 = vrot.slane %v584_v60, 1 }
 0x273   : > { %v586_v0 = vadd.f32 %v585_v15, %v584_v60 }
 0x275   : > { %v588_v2 = vmul.f32 %v587_v29, %v586_v0 }
 0x277   : > { %593 = vst.msk [vmem:[%s283_s26] sm:$0x1] %vm592_vm2, %v588_v2  ;;  %v590_v21 = vmul.f32 %v588_v2, %v1583_v54 }
 0x278   : > { %1059 = shalt.err (!%p1056_p13)
}
 0x279   : > { %s1060_s27 = scalar_lea.hbm %s1724_s30, 16  ;;  %s1064_s11 = scalar_lea.hbm %s1814_s4, 32 }
 0x27a   : > { %p1061_p0 = scmp.ne.s32.totalorder %s1724_s30, %s1060_s27  ;;  %p1065_p9 = scmp.lt.u32.totalorder %s1724_s30, %s1814_s4 }
 0x27b   : > { %p1066_p12 = scmp.lt.u32.totalorder %s1064_s11, %s1060_s27  ;;  %p1068_p1 = scmp.lt.u32.totalorder %s1060_s27, %s1724_s30 }
 0x27c   : > { %p1062_p5 = pnand %p1061_p0, %p1335_p6 }
 0x27d   : > { %p1067_p2 = por %p1066_p12, %p1065_p9 }
 0x27e   : > { %p1063_p11 = pneg %p1062_p5 }
 0x27f   : > { %p1069_p4 = por %p1068_p1, %p1067_p2 }
 0x281   : > { %p1070_p8 = pnand %p1069_p4, %p1063_p11 }
 0x283   : > { %1073 = shalt.err (!%p1070_p8)
}
 0x284   : > { %860 = dma.vmem_to_hbm [thread:$0]  (%p1335_p6), %s1726_s9, 16, %s1724_s30, %s596_s7   ;;  %v591_v54 = vsub.f32 %v589_v10, %v590_v21 }
 0x285   : > { %s1762_s28 = scalar_lea.hbm %s1815_s5, %s762_s24  ;;  %s600_s27 = scalar_lea.sflag [#allocation12], %s1383_s6 }
 0x286   : > { %594 = vst.msk [vmem:[%s289_s23] sm:$0x1] %vm592_vm2, %v591_v54  ;;  %s1074_s8 = scalar_lea.vmem %s1765_s29, 16  ;;  %s1161_s22 = smov [#allocation11]  }
 0x287   : > { %p1075_p3 = scmp.ne.s32.totalorder %s1765_s29, %s1074_s8  ;;  %s1078_s9 = sshll.u32 %s1161_s22, 4  ;;  %s1079_s9 = int_to_ptr.vmem [resolvable:$false] %s1078_s9 }
 0x288   : > { %s1080_s30 = scalar_lea.vmem %s1079_s9, 32  ;;  %p1081_p13 = scmp.lt.s32.totalorder %s1765_s29, %s1079_s9 }
 0x289   : > { %p1076_p7 = pnand %p1075_p3, %p1335_p6  ;;  %p1082_p0 = scmp.lt.s32.totalorder %s1080_s30, %s1074_s8 }
 0x28b   : > { %p1077_p10 = pneg %p1076_p7  ;;  %p1083_p5 = por %p1082_p0, %p1081_p13 }
 0x28d   : > { %p1084_p11 = pnand %p1083_p5, %p1077_p10 }
 0x28f   : > { %1087 = shalt.err (!%p1084_p11)
}
 0x290   : > { %s1088_s6 = scalar_lea.hbm %s1762_s28, 16  ;;  %s1092_s7 = scalar_lea.hbm %s1815_s5, 32 }
 0x291   : > { %p1089_p9 = scmp.ne.s32.totalorder %s1762_s28, %s1088_s6  ;;  %p1093_p1 = scmp.lt.u32.totalorder %s1762_s28, %s1815_s5 }
 0x292   : > { %p1094_p4 = scmp.lt.u32.totalorder %s1092_s7, %s1088_s6  ;;  %p1096_p3 = scmp.lt.u32.totalorder %s1088_s6, %s1762_s28 }
 0x293   : > { %p1090_p12 = pnand %p1089_p9, %p1335_p6 }
 0x294   : > { %p1095_p8 = por %p1094_p4, %p1093_p1 }
 0x295   : > { %p1091_p2 = pneg %p1090_p12 }
 0x296   : > { %p1097_p7 = por %p1096_p3, %p1095_p8 }
 0x298   : > { %p1098_p10 = pnand %p1097_p7, %p1091_p2 }
 0x29a   : > { %1101 = shalt.err (!%p1098_p10)
}
 0x29b   : > { %861 = dma.vmem_to_hbm [thread:$0]  (%p1335_p6), %s1765_s29, 16, %s1762_s28, %s600_s27  }
 0x29c PF: > { %s637_s12 = sand.u32 1, %s1140_s18   ;;  %p1835_p13 = scmp.ne.s32.totalorder %s1821_s25, 0 }
 0x29d   : > { %p1836_p0 = scmp.ge.s32.totalorder %s1152_s21, 2  ;;  %s638_s13 = scalar_lea.sflag [#allocation4], %s637_s12 }
 0x29f   : > { %p879_p5 = pnand %p1836_p0, %p1835_p13 }
 0x2a1   : > { %1131 = dma.done.wait (!%p879_p5), %s638_s13, 16  }
 0x2a2   : > { %1133 = vsyncadd (!%p879_p5), %s638_s13, 4294967280  ;;  %s646_s10 = scalar_lea.sflag [#allocation12], %s637_s12 }
 0x2a3   : > { %1135 = dma.done.wait (!%p879_p5), %s646_s10, 16  }
 0x2a4   : > { %1137 = vsyncadd (!%p879_p5), %s646_s10, 4294967280  ;;  %p24_p6 = scmp.ge.s32.totalorder %s1321_s14, 4   ;;  %s1837_s18 = smov %s1144_s19 }
 0x2a5   : > { %s1838_s19 = smov %s1148_s20  ;;  %s1839_s20 = smov %s1331_s16 }
 0x2a6   : > { %s1840_s21 = smov %s1321_s14  ;;  %26 = sbr.rel (!%p24_p6) target bundleno = 9 (0x9), region = 110 }
 0x2ad   :  { %650 = vsyncpa [#allocation3], 1 }
 0x2ae   :  { %652 = vsyncpa [#allocation3 + $0x1], 1 }
 0x2af   :  { %653 = vsyncpa [#allocation6], 1 }
 0x2b0   :  { %654 = vsyncpa [#allocation9], 1 }
 0x2b1   :  { %655 = vsyncpa [#allocation4], 1 }
 0x2b2   :  { %657 = vsyncpa [#allocation4 + $0x1], 1 }
 0x2b3   :  { %658 = vsyncpa [#allocation12], 1 }
 0x2b4   :  { %660 = vsyncpa [#allocation12 + $0x1], 1 }

// kernel: resnetv2_block.7
= control target key start
LH: loop header
LB: loop body
LE: loop exit
PB: predicated region body
PF: predicated region fallthrough
CT: control target
= control target key end

     0   :  { %s2059_s0 = inlined_call_operand.hbm [shape: bf16[2,256,8], index: 0, kind: input, shape index: {}]   ;;  %s2060_s1 = inlined_call_operand.hbm [shape: f32[2,1,8], index: 1, kind: input, shape index: {}]   ;;  %s2061_s2 = inlined_call_operand.hbm [shape: f32[2,1,8], index: 2, kind: input, shape index: {}]   ;;  %s2062_s3 = inlined_call_operand.hbm [shape: bf16[8,4], index: 3, kind: input, shape index: {}]   ;;  %s2063_s4 = inlined_call_operand.hbm [shape: bf16[2,256,4], index: 4, kind: output, shape index: {}]  }
   0x1   :  { %2078 = sst [smem:[#allocation20_spill]] %s2060_s1 }
   0x2   :  { %9 = vsyncpa [#allocation3], 0 }
   0x3   :  { %11 = vsyncpa [#allocation3 + $0x1], 0 }
   0x4   :  { %12 = vsyncpa [#allocation6], 0 }
   0x5   :  { %14 = vsyncpa [#allocation6 + $0x1], 0 }
   0x6   :  { %15 = vsyncpa [#allocation9], 0 }
   0x7   :  { %16 = vsyncpa [#allocation4], 0 }
   0x8   :  { %18 = vsyncpa [#allocation4 + $0x1], 0  ;;  %s1599_s15 = smov 0   ;;  %s1601_s16 = smov 0  }
   0x9   :  { %s1603_s17 = smov 0   ;;  %s1605_s18 = smov 0  }
   0xa   :  { %s1607_s19 = smov 0   ;;  %s1609_s20 = smov 0  }
   0xb LB: > { %2079 = sst [smem:[#allocation15_spill]] %s1551_s17  ;;  %s36_s21 = sadd.s32 1, %s1559_s19  ;;  %s1563_s20 = sphi %s1609_s20, %s24_s20   ;;  %s1559_s19 = sphi %s1607_s19, %s2107_s19   ;;  %s1555_s18 = sphi %s1605_s18, %s2106_s18   ;;  %s1551_s17 = sphi %s1603_s17, %s2105_s17   ;;  %s1547_s16 = sphi %s1601_s16, %s2109_s16   ;;  %s1543_s15 = sphi %s1599_s15, %s2108_s15  }
   0xc   : > { %2080 = sst [smem:[#allocation16_spill]] %s1559_s19  ;;  %s45_s22 = sadd.s32 1, %s1551_s17 }
   0xd   : > { %2081 = sst [smem:[#allocation17_spill]] %s1563_s20  ;;  %p38_p0 = scmp.ge.s32.totalorder %s36_s21, 2 }
   0xe   : > { %p2064_p1 = scmp.ne.s32.totalorder %s1551_s17, %s1547_s16  ;;  %p53_p2 = scmp.eq.s32.totalorder %s1563_s20, 0 }
   0xf   : > { %s2111_s21 = smov (%p38_p0, %s36_s21), 0  ;;  %p1299_p5 = scmp.lt.s32.totalorder %s1563_s20, 2 }
  0x10   : > { %2082 = sst [smem:[#allocation18_spill]] %s2111_s21  ;;  %p54_p4 = por %p53_p2, %p2064_p1 }
  0x11   : > { %s40_s23 = ssub.s32 %s1559_s19, %s2111_s21  ;;  %s1644_s24 = sand.u32 1, %s1551_s17  }
  0x12   : > { %p43_p6 = scmp.eq.s32.totalorder %s40_s23, 0  ;;  %p1646_p7 = pnand %p1299_p5, %p54_p4 }
  0x13   : > { %s217_s26 = sand.u32 1, %s1563_s20   ;;  %s1039_s28 = sshll.u32 %s1559_s19, 4 }
  0x14   : > { %s2083_s25 = scalar_select %p1646_p7, 1, 0 }
  0x15   : > { %s1652_s27 = scalar_select %p43_p6, %s1551_s17, %s45_s22  }
  0x16   : > { %s220_s29 = scalar_lea.vmem [#allocation5], %s1644_s24  ;;  %s2085_s1 = sld [smem:[#allocation20_spill]] }
  0x17   : > { %2084 = sst [smem:[#allocation19_spill]] %s1652_s27  ;;  %s227_s30 = sshll.u32 %s220_s29, 4  ;;  %s1663_s30 = int_to_ptr.vmem [resolvable:$true] %s227_s30 }
  0x18   : > { %s1665_s8 = scalar_lea.sflag [#allocation6], %s217_s26  ;;  %p1671_p9 = pneg %p1646_p7 }
  0x1a   : > { %s2086_s10 = scalar_select %p1671_p9, 1, 0 }
  0x1c   : > { %s1661_s7 = scalar_lea.hbm %s2085_s1, %s1039_s28  ;;  %s1360_s13 = scalar_lea.hbm %s2085_s1, 32 }
  0x1d   : > { %s1355_s9 = scalar_lea.hbm %s1661_s7, 16  ;;  %p1361_p12 = scmp.lt.u32.totalorder %s1661_s7, %s2085_s1 }
  0x1e   : > { %p1356_p8 = scmp.ne.s32.totalorder %s1661_s7, %s1355_s9  ;;  %p1362_p13 = scmp.lt.u32.totalorder %s1360_s13, %s1355_s9 }
  0x1f   : > { %p1364_p2 = scmp.lt.u32.totalorder %s1355_s9, %s1661_s7 }
  0x20   : > { %p1358_p10 = pnand %p1671_p9, %p1356_p8  ;;  %p1363_p0 = por %p1362_p13, %p1361_p12 }
  0x22   : > { %p1359_p11 = pneg %p1358_p10  ;;  %p1365_p4 = por %p1364_p2, %p1363_p0 }
  0x24   : > { %p1366_p5 = pnand %p1365_p4, %p1359_p11 }
  0x26   : > { %1369 = shalt.err (!%p1366_p5)
}
  0x27   : > { %s1370_s23 = scalar_lea.vmem %s1663_s30, 16  ;;  %s1565_s26 = smov [#allocation5]  }
  0x28   : > { %p1371_p6 = scmp.ne.s32.totalorder %s1663_s30, %s1370_s23  ;;  %s1375_s29 = sshll.u32 %s1565_s26, 4  ;;  %s1376_s29 = int_to_ptr.vmem [resolvable:$false] %s1375_s29 }
  0x29   : > { %s1377_s5 = scalar_lea.vmem %s1376_s29, 32  ;;  %p1378_p3 = scmp.lt.s32.totalorder %s1663_s30, %s1376_s29 }
  0x2a   : > { %p1373_p8 = pnand %p1371_p6, %p1671_p9  ;;  %p1379_p1 = scmp.lt.s32.totalorder %s1377_s5, %s1370_s23 }
  0x2c   : > { %p1374_p10 = pneg %p1373_p8  ;;  %p1380_p12 = por %p1379_p1, %p1378_p3 }
  0x2e   : > { %p1381_p13 = pnand %p1380_p12, %p1374_p10 }
  0x30   : > { %1384 = shalt.err (!%p1381_p13)
}
  0x31   : > { %1290 = dma.hbm_to_vmem [thread:$0]  (!%p1646_p7), %s1661_s7, 16, %s1663_s30, %s1665_s8  }
  0x32   : > { %s1700_s11 = scalar_lea.hbm %s2061_s2, %s1039_s28  ;;  %s1703_s12 = sadd.s32 4294967295, %s1563_s20  }
  0x33   : > { %s1032_s13 = sadd.s32 4294967294, %s1563_s20   ;;  %p58_p1 = scmp.ne.s32.totalorder %s1547_s16, %s1543_s15 }
  0x34   : > { %p2070_p3 = scmp.eq.s32.totalorder %s1703_s12, 0  ;;  %p157_p11 = scmp.eq.s32.totalorder %s1703_s12, 1 }
  0x35   : > { %p163_p0 = scmp.eq.s32.totalorder %s1032_s13, 1  ;;  %p1033_p2 = scmp.ge.s32.totalorder %s1563_s20, 1 }
  0x36   : > { %p1713_p4 = por %p2070_p3, %p58_p1  ;;  %p2088_p5 = scmp.ne.s32.totalorder %s1551_s17, %s1547_s16 }
  0x37   : > { %p1724_p8 = por %p163_p0, %p58_p1  ;;  %p170_p10 = scmp.lt.s32.totalorder %s1563_s20, 3 }
  0x38   : > { %s2087_s30 = scalar_select %p1713_p4, 1, 0 }
  0x39   : > { %p1720_p6 = por %p157_p11, %p2088_p5  ;;  %p1729_p12 = pnand %p1033_p2, %p170_p10 }
  0x3a   : > { %s2090_s7 = scalar_select %p1724_p8, 1, 0 }
  0x3b   : > { %s2089_s28 = scalar_select %p1720_p6, 1, 0 }
  0x3c   : > { %s2091_s14 = scalar_select %p1729_p12, 1, 0 }
  0x3d   : > { %s1566_s22 = smov [#allocation8]   ;;  %p1280_p13 = pneg %p1729_p12 }
  0x3e   : > { %s183_s23 = sshll.u32 %s1566_s22, 4  ;;  %s1036_s26 = sshll.u32 %s1644_s24, 7  ;;  %s184_s23 = int_to_ptr.vmem [resolvable:$true] %s183_s23 }
  0x3f   : > { %s1100_s29 = sshll.u32 %s1559_s19, 11  ;;  %p1739_p11 = pnand %p1280_p13, %p2070_p3 }
  0x40   : > { %s1746_s13 = scalar_lea.hbm %s2059_s0, %s1100_s29  ;;  %s198_s1 = scalar_lea.vmem [#allocation2], %s1036_s26 }
  0x41   : > { %s207_s21 = sshll.u32 %s198_s1, 4  ;;  %s1385_s17 = scalar_lea.hbm %s2062_s3, 64  ;;  %s1748_s21 = int_to_ptr.vmem [resolvable:$true] %s207_s21 }
  0x42   : > { %p1386_p1 = scmp.ne.s32.totalorder %s2062_s3, %s1385_s17  ;;  %p1387_p0 = pneg %p1739_p11 }
  0x43   : > { %p1392_p10 = scmp.lt.u32.totalorder %s1385_s17, %s2062_s3 }
  0x44   : > { %p1388_p2 = pnand %p1387_p0, %p1386_p1 }
  0x46   : > { %p1389_p5 = pneg %p1388_p2 }
  0x48   : > { %p1394_p13 = pnand %p1392_p10, %p1389_p5 }
  0x4a   : > { %1397 = shalt.err (!%p1394_p13)
}
  0x4b   : > { %s1398_s1 = scalar_lea.vmem %s184_s23, 64  ;;  %p1406_p4 = scmp.lt.s32.totalorder %s184_s23, %s184_s23 }
  0x4c   : > { %p1399_p3 = scmp.ne.s32.totalorder %s184_s23, %s1398_s1  ;;  %p1407_p12 = scmp.lt.s32.totalorder %s1398_s1, %s1398_s1 }
  0x4e   : > { %p1401_p8 = pnand %p1399_p3, %p1387_p0  ;;  %p1408_p7 = por %p1407_p12, %p1406_p4 }
  0x50   : > { %p1402_p6 = pneg %p1401_p8 }
  0x52   : > { %p1409_p9 = pnand %p1408_p7, %p1402_p6 }
  0x54   : > { %1412 = shalt.err (!%p1409_p9)
}
  0x55   : > { %1283 = dma.hbm_to_vmem [thread:$0]  (!%p1739_p11), %s2062_s3, 64, %s184_s23, [#allocation9]  }
  0x56   : > { %s195_s17 = scalar_lea.sflag [#allocation3], %s1644_s24  ;;  %s1413_s27 = scalar_lea.hbm %s1746_s13, 2048 }
  0x57   : > { %p1414_p3 = scmp.ne.s32.totalorder %s1746_s13, %s1413_s27  ;;  %p2093_p8 = scmp.ne.s32.totalorder %s2086_s10, 0 }
  0x58   : > { %s1418_s5 = scalar_lea.hbm %s2059_s0, 4096  ;;  %p1419_p7 = scmp.lt.u32.totalorder %s1746_s13, %s2059_s0 }
  0x59   : > { %p1416_p1 = pnand %p1414_p3, %p2093_p8  ;;  %p1420_p9 = scmp.lt.u32.totalorder %s1418_s5, %s1413_s27 }
  0x5a   : > { %p1422_p12 = scmp.lt.u32.totalorder %s1413_s27, %s1746_s13 }
  0x5b   : > { %p1417_p4 = pneg %p1416_p1  ;;  %p1421_p6 = por %p1420_p9, %p1419_p7 }
  0x5d   : > { %p1423_p0 = por %p1422_p12, %p1421_p6 }
  0x5f   : > { %p1424_p2 = pnand %p1423_p0, %p1417_p4 }
  0x61   : > { %1427 = shalt.err (!%p1424_p2)
}
  0x62   : > { %s1428_s23 = scalar_lea.vmem %s1748_s21, 2048  ;;  %s1567_s9 = smov [#allocation2]  }
  0x63   : > { %p1429_p11 = scmp.ne.s32.totalorder %s1748_s21, %s1428_s23  ;;  %s1433_s1 = sshll.u32 %s1567_s9, 4  ;;  %s1434_s1 = int_to_ptr.vmem [resolvable:$false] %s1433_s1 }
  0x64   : > { %s1435_s19 = scalar_lea.vmem %s1434_s1, 4096  ;;  %p1436_p13 = scmp.lt.s32.totalorder %s1748_s21, %s1434_s1 }
  0x65   : > { %p1431_p5 = pnand %p1429_p11, %p2093_p8  ;;  %p1437_p3 = scmp.lt.s32.totalorder %s1435_s19, %s1428_s23 }
  0x67   : > { %p1432_p10 = pneg %p1431_p5  ;;  %p1438_p1 = por %p1437_p3, %p1436_p13 }
  0x69   : > { %p1439_p7 = pnand %p1438_p1, %p1432_p10 }
  0x6b   : > { %1442 = shalt.err (!%p1439_p7)
}
  0x6c   : > { %s1568_s20 = smov 64   ;;  %s1569_s27 = smov 4  }
  0x6d   : > { %p2094_p4 = scmp.ne.s32.totalorder %s2083_s25, 0  ;;  %s237_s26 = scalar_lea.vmem [#allocation7], %s1644_s24 }
  0x6e   : > { %s244_s29 = sshll.u32 %s237_s26, 4  ;;  %s1443_s5 = scalar_lea.hbm %s1700_s11, 16  ;;  %s245_s29 = int_to_ptr.vmem [resolvable:$true] %s244_s29 }
  0x6f   : > { %1287 = dma.hbm_to_vmem [thread:$0]  (!%p2094_p4), %s1746_s13, 2048, %s1748_s21, %s195_s17, %s1568_s20, %s1568_s20, %s1569_s27  }
  0x70   : > { %p1444_p9 = scmp.ne.s32.totalorder %s1700_s11, %s1443_s5  ;;  %s1448_s23 = scalar_lea.hbm %s2061_s2, 32 }
  0x71   : > { %p1449_p0 = scmp.lt.u32.totalorder %s1700_s11, %s2061_s2  ;;  %p1450_p2 = scmp.lt.u32.totalorder %s1448_s23, %s1443_s5 }
  0x72   : > { %p1446_p6 = pnand %p1444_p9, %p2093_p8  ;;  %p1452_p5 = scmp.lt.u32.totalorder %s1443_s5, %s1700_s11 }
  0x73   : > { %p1451_p11 = por %p1450_p2, %p1449_p0 }
  0x74   : > { %p1447_p12 = pneg %p1446_p6 }
  0x75   : > { %p1453_p10 = por %p1452_p5, %p1451_p11 }
  0x77   : > { %p1454_p13 = pnand %p1453_p10, %p1447_p12 }
  0x79   : > { %1457 = shalt.err (!%p1454_p13)
}
  0x7a   : > { %s1458_s21 = scalar_lea.vmem %s245_s29, 16  ;;  %s1570_s24 = smov [#allocation7]  }
  0x7b   : > { %p1459_p3 = scmp.ne.s32.totalorder %s245_s29, %s1458_s21  ;;  %s1463_s13 = sshll.u32 %s1570_s24, 4  ;;  %s1464_s13 = int_to_ptr.vmem [resolvable:$false] %s1463_s13 }
  0x7c   : > { %s1465_s17 = scalar_lea.vmem %s1464_s13, 32  ;;  %p1466_p9 = scmp.lt.s32.totalorder %s245_s29, %s1464_s13 }
  0x7d   : > { %p1461_p1 = pnand %p1459_p3, %p2093_p8  ;;  %p1467_p6 = scmp.lt.s32.totalorder %s1465_s17, %s1458_s21 }
  0x7f   : > { %p1462_p7 = pneg %p1461_p1  ;;  %p1468_p4 = por %p1467_p6, %p1466_p9 }
  0x81   : > { %p1469_p0 = pnand %p1468_p4, %p1462_p7 }
  0x83   : > { %1472 = shalt.err (!%p1469_p0)
}
  0x84   : > { %p2095_p2 = scmp.ne.s32.totalorder %s2083_s25, 0  ;;  %p2096_p12 = scmp.ne.s32.totalorder %s2091_s14, 0 }
  0x85   : > { %s1812_s10 = sand.u32 (!%p2096_p12), 1, %s1547_s16   ;;  %p2097_p8 = scmp.ne.s32.totalorder (!%p2096_p12), %s2087_s30, 0 }
  0x86   : > { %1293 = dma.hbm_to_vmem [thread:$0]  (!%p2095_p2), %s1700_s11, 16, %s245_s29, %s1665_s8  }
  0x87   : > { %253 = sbr.rel (%p2096_p12) target bundleno = 424 (0x1a8), region = 36  ;;  %s1042_s19 = sshll.u32 (!%p2096_p12), %s1812_s10, 7 }
  0x88   : > { %s256_s20 = scalar_lea.sflag (!%p2096_p12), [#allocation3], %s1812_s10  ;;  %s1818_s27 = scalar_lea.vmem (!%p2096_p12), [#allocation2], %s1042_s19 }
  0x8e   : > { %1526 = dma.done.wait (%p2097_p8), %s256_s20, 2048  }
  0x8f   : > { %1528 = vsyncadd (%p2097_p8), %s256_s20, 4294965248  ;;  %s264_s25 = sand.u32 1, %s1703_s12   ;;  %s267_s11 = scalar_lea.vmem [#allocation5], %s1812_s10 }
  0x90   : > { %s265_s8 = scalar_lea.sflag [#allocation6], %s264_s25 }
  0x91   : > { %1530 = dma.done.wait (%p2097_p8), %s265_s8, 32  }
  0x92   : > { %1532 = vsyncadd (%p2097_p8), %s265_s8, 4294967264  ;;  %s275_s14 = scalar_lea.vmem [#allocation7], %s1812_s10  ;;  %p2098_p4 = scmp.eq.s32.totalorder %s1703_s12, 0 }
  0x94   : > { %1534 = dma.done.wait (%p2098_p4), [#allocation9], 64   ;;  %p2099_p11 = pmov %p2098_p4 }
  0x95   : > { %vm555_vm0 = vcmask 1043456   ;;  %v505_v0 = vld [vmem:[#allocation8] sm:$0xf]  ;;  %v1836_v2 = vld [vmem:[%s267_s11] ss:$0 sm:$0xff]  ;;  %vm506_vm1 = vcmask 64512  }
  0x96   : > { %1536 = vsyncadd (%p2099_p11), [#allocation9], 4294967232  ;;  %v1135_v1 = vld [vmem:[%s1818_s27] sm:$0xff]   ;;  %1266 = vmatprep.subr.msk.bf16.mxu0 %vm555_vm0, %v505_v0  ;;  %1267 = vmatprep.subr.msk.bf16.mxu1 %vm555_vm0, %v505_v0  ;;  %v557_v3 = vsel %vm555_vm0, %v505_v0, 0  ;;  %v1198_v7 = vld [vmem:[%s1818_s27 + $0x8] sm:$0xff]   ;;  %vm848_vm2 = vcmask 27648  }
  0x97   : > { %v1136_v4 = vunpack.c.l.bf16 %v1135_v1  ;;  %v1137_v5 = vunpack.c.h.bf16 %v1135_v1  ;;  %v1205_v6 = vld [vmem:[%s1818_s27 + $0x40] sm:$0xff]   ;;  %1231 = vmatpush3.bf16.msra.mxu0 %v557_v3  ;;  %1265 = vmatpush3.bf16.msra.mxu1 %v557_v3  ;;  %v1140_v11 = vunpack.c.l.bf16 %v1198_v7  ;;  %v1141_v12 = vunpack.c.h.bf16 %v1198_v7  ;;  %v1206_v13 = vld [vmem:[%s1818_s27 + $0x48] sm:$0xff]   ;;  %v1199_v30 = vld [vmem:[%s1818_s27 + $0x10] sm:$0xff]   ;;  %s1937_s12 = scalar_lea.vmem [#allocation10], %s1042_s19  ;;  %s1133_s30 = sshll.u32 %s1555_s18, 11 }
  0x98   : > { %v1840_v8 = vld [vmem:[%s275_s14] ss:$0 sm:$0xff]  ;;  %v1168_v9 = vunpack.c.l.bf16 %v1205_v6  ;;  %v1169_v10 = vunpack.c.h.bf16 %v1205_v6  ;;  %v1172_v16 = vunpack.c.l.bf16 %v1206_v13  ;;  %v1173_v17 = vunpack.c.h.bf16 %v1206_v13  ;;  %v1207_v35 = vld [vmem:[%s1818_s27 + $0x50] sm:$0xff]   ;;  %v1200_v40 = vld [vmem:[%s1818_s27 + $0x18] sm:$0xff]   ;;  %s897_s26 = sshll.u32 %s1937_s12, 4  ;;  %s2002_s5 = scalar_lea.hbm %s2063_s4, %s1133_s30  ;;  %s2004_s26 = int_to_ptr.vmem [resolvable:$true] %s897_s26 }
  0x99   : > { %v386_v14 = vmul.f32 %v1136_v4, %v1836_v2  ;;  %v387_v15 = vmul.f32 %v1137_v5, %v1836_v2  ;;  %v388_v20 = vmul.f32 %v1140_v11, %v1836_v2  ;;  %v389_v21 = vmul.f32 %v1141_v12, %v1836_v2  ;;  %v1208_v45 = vld [vmem:[%s1818_s27 + $0x58] sm:$0xff]   ;;  %v1201_v3 = vld [vmem:[%s1818_s27 + $0x20] sm:$0xff]   ;;  %s882_s22 = scalar_lea.sflag [#allocation4], %s1812_s10  ;;  %s1473_s6 = scalar_lea.vmem %s2004_s26, 2048 }
  0x9a   : > { %v402_v18 = vmul.f32 %v1168_v9, %v1836_v2  ;;  %v403_v19 = vmul.f32 %v1169_v10, %v1836_v2  ;;  %v404_v24 = vmul.f32 %v1172_v16, %v1836_v2  ;;  %v405_v25 = vmul.f32 %v1173_v17, %v1836_v2  ;;  %v1209_v13 = vld [vmem:[%s1818_s27 + $0x60] sm:$0xff]   ;;  %p1474_p5 = scmp.ne.s32.totalorder %s2004_s26, %s1473_s6  ;;  %p2100_p10 = scmp.ne.s32.totalorder %s2089_s28, 0 }
  0x9b   : > { %v425_v22 = vadd.f32 %v1840_v8, %v386_v14  ;;  %v426_v23 = vadd.f32 %v1840_v8, %v387_v15  ;;  %v427_v28 = vadd.f32 %v1840_v8, %v388_v20  ;;  %v428_v29 = vadd.f32 %v1840_v8, %v389_v21  ;;  %s1571_s23 = smov [#allocation10]  }
  0x9c   : > { %v441_v26 = vadd.f32 %v1840_v8, %v402_v18  ;;  %v442_v27 = vadd.f32 %v1840_v8, %v403_v19  ;;  %v443_v33 = vadd.f32 %v1840_v8, %v404_v24  ;;  %v444_v34 = vadd.f32 %v1840_v8, %v405_v25  ;;  %v1202_v18 = vld [vmem:[%s1818_s27 + $0x28] sm:$0xff]   ;;  %p1475_p13 = pnand %p1474_p5, %p2100_p10  ;;  %s1477_s9 = sshll.u32 %s1571_s23, 4  ;;  %s1478_s9 = int_to_ptr.vmem [resolvable:$false] %s1477_s9 }
  0x9d   : > { %v457_v31 = vmax.f32 %v425_v22, 0.0  ;;  %v458_v32 = vmax.f32 %v426_v23, 0.0  ;;  %v459_v38 = vmax.f32 %v427_v28, 0.0  ;;  %v460_v39 = vmax.f32 %v428_v29, 0.0  ;;  %s1479_s1 = scalar_lea.vmem %s1478_s9, 4096  ;;  %p1480_p1 = scmp.lt.s32.totalorder %s2004_s26, %s1478_s9 }
  0x9e   : > { %v473_v36 = vmax.f32 %v441_v26, 0.0  ;;  %v474_v37 = vmax.f32 %v442_v27, 0.0  ;;  %v475_v42 = vmax.f32 %v443_v33, 0.0  ;;  %v476_v43 = vmax.f32 %v444_v34, 0.0  ;;  %v1210_v27 = vld [vmem:[%s1818_s27 + $0x68] sm:$0xff]   ;;  %p1476_p3 = pneg %p1475_p13  ;;  %p1481_p7 = scmp.lt.s32.totalorder %s1479_s1, %s1473_s6 }
  0x9f   : > { %v489_v41 = vpack.c.bf16 %v458_v32, %v457_v31  ;;  %v1144_v44 = vunpack.c.l.bf16 %v1199_v30  ;;  %v490_v47 = vpack.c.bf16 %v460_v39, %v459_v38  ;;  %v1145_v48 = vunpack.c.h.bf16 %v1199_v30 }
  0xa0   : > { %v497_v46 = vpack.c.bf16 %v474_v37, %v473_v36  ;;  %v1176_v49 = vunpack.c.l.bf16 %v1207_v35  ;;  %v498_v50 = vpack.c.bf16 %v476_v43, %v475_v42  ;;  %v1177_v52 = vunpack.c.h.bf16 %v1207_v35  ;;  %p1482_p9 = por %p1481_p7, %p1480_p1 }
  0xa1   : > { %1232 = vmatprep.mubr.msk.bf16.mxu0 %vm506_vm1, %v489_v41  ;;  %v390_v51 = vmul.f32 %v1144_v44, %v1836_v2  ;;  %v1148_v53 = vunpack.c.l.bf16 %v1200_v40  ;;  %v391_v54 = vmul.f32 %v1145_v48, %v1836_v2  ;;  %v1149_v56 = vunpack.c.h.bf16 %v1200_v40  ;;  %v1203_v40 = vld [vmem:[%s1818_s27 + $0x30] sm:$0xff]  }
  0xa2   : > { %1248 = vmatprep.mubr.msk.bf16.mxu1 %vm506_vm1, %v497_v46  ;;  %1233 = vmatmul.mubr.msk.bf16.vlgmr.msra.gmra.mrb[0].mxu0 %vm506_vm1, %v490_v47  ;;  %v406_v55 = vmul.f32 %v1176_v49, %v1836_v2  ;;  %v1180_v57 = vunpack.c.l.bf16 %v1208_v45  ;;  %v407_v59 = vmul.f32 %v1177_v52, %v1836_v2  ;;  %v1181_v61 = vunpack.c.h.bf16 %v1208_v45  ;;  %p1483_p6 = pnand %p1482_p9, %p1476_p3 }
  0xa3   : > { %1249 = vmatmul.mubr.msk.bf16.vlgmr.msra.gmra.mrb[0].mxu1 %vm506_vm1, %v498_v50  ;;  %v429_v58 = vadd.f32 %v1840_v8, %v390_v51  ;;  %v392_v60 = vmul.f32 %v1148_v53, %v1836_v2  ;;  %v430_v62 = vadd.f32 %v1840_v8, %v391_v54  ;;  %v393_v0 = vmul.f32 %v1149_v56, %v1836_v2  ;;  %v1211_v53 = vld [vmem:[%s1818_s27 + $0x70] sm:$0xff]  }
  0xa4   : > { %v445_v63 = vadd.f32 %v1840_v8, %v406_v55  ;;  %v408_v1 = vmul.f32 %v1180_v57, %v1836_v2  ;;  %v446_v5 = vadd.f32 %v1840_v8, %v407_v59  ;;  %v409_v7 = vmul.f32 %v1181_v61, %v1836_v2 }
  0xa5   : > { %v461_v4 = vmax.f32 %v429_v58, 0.0  ;;  %v431_v6 = vadd.f32 %v1840_v8, %v392_v60  ;;  %v462_v9 = vmax.f32 %v430_v62, 0.0  ;;  %v432_v11 = vadd.f32 %v1840_v8, %v393_v0  ;;  %v1204_v62 = vld [vmem:[%s1818_s27 + $0x38] sm:$0xff]  }
  0xa6   : > { %v477_v10 = vmax.f32 %v445_v63, 0.0  ;;  %v447_v12 = vadd.f32 %v1840_v8, %v408_v1  ;;  %v478_v14 = vmax.f32 %v446_v5, 0.0  ;;  %v448_v16 = vadd.f32 %v1840_v8, %v409_v7 }
  0xa7   : > { %v463_v15 = vmax.f32 %v431_v6, 0.0  ;;  %v1152_v17 = vunpack.c.l.bf16 %v1201_v3  ;;  %v491_v19 = vpack.c.bf16 %v462_v9, %v461_v4  ;;  %v464_v20 = vmax.f32 %v432_v11, 0.0  ;;  %v1212_v4 = vld [vmem:[%s1818_s27 + $0x78] sm:$0xff]  }
  0xa8   : > { %v479_v21 = vmax.f32 %v447_v12, 0.0  ;;  %v1153_v22 = vunpack.c.h.bf16 %v1201_v3  ;;  %v499_v23 = vpack.c.bf16 %v478_v14, %v477_v10  ;;  %v480_v24 = vmax.f32 %v448_v16, 0.0 }
  0xa9   : > { %v394_v25 = vmul.f32 %v1152_v17, %v1836_v2  ;;  %v1184_v26 = vunpack.c.l.bf16 %v1209_v13  ;;  %1236 = vmatprep.mubr.msk.bf16.mxu0 %vm506_vm1, %v491_v19  ;;  %v492_v28 = vpack.c.bf16 %v464_v20, %v463_v15  ;;  %v1185_v30 = vunpack.c.h.bf16 %v1209_v13 }
  0xaa   : > { %v395_v29 = vmul.f32 %v1153_v22, %v1836_v2  ;;  %v1156_v31 = vunpack.c.l.bf16 %v1202_v18  ;;  %1252 = vmatprep.mubr.msk.bf16.mxu1 %vm506_vm1, %v499_v23  ;;  %v500_v32 = vpack.c.bf16 %v480_v24, %v479_v21  ;;  %v1157_v35 = vunpack.c.h.bf16 %v1202_v18 }
  0xab   : > { %v433_v33 = vadd.f32 %v1840_v8, %v394_v25  ;;  %v410_v34 = vmul.f32 %v1184_v26, %v1836_v2  ;;  %1237 = vmatmul.mubr.msk.bf16.gmra.mrb[4].mxu0 %vm506_vm1, %v492_v28  ;;  %v411_v37 = vmul.f32 %v1185_v30, %v1836_v2  ;;  %v1188_v39 = vunpack.c.l.bf16 %v1210_v27 }
  0xac   : > { %v434_v36 = vadd.f32 %v1840_v8, %v395_v29  ;;  %v396_v38 = vmul.f32 %v1156_v31, %v1836_v2  ;;  %1253 = vmatmul.mubr.msk.bf16.gmra.mrb[4].mxu1 %vm506_vm1, %v500_v32  ;;  %v397_v43 = vmul.f32 %v1157_v35, %v1836_v2  ;;  %v1189_v44 = vunpack.c.h.bf16 %v1210_v27 }
  0xad   : > { %v465_v41 = vmax.f32 %v433_v33, 0.0  ;;  %v449_v42 = vadd.f32 %v1840_v8, %v410_v34  ;;  %v450_v46 = vadd.f32 %v1840_v8, %v411_v37  ;;  %v412_v48 = vmul.f32 %v1188_v39, %v1836_v2 }
  0xae   : > { %v466_v45 = vmax.f32 %v434_v36, 0.0  ;;  %v435_v47 = vadd.f32 %v1840_v8, %v396_v38  ;;  %v436_v50 = vadd.f32 %v1840_v8, %v397_v43  ;;  %v413_v51 = vmul.f32 %v1189_v44, %v1836_v2 }
  0xaf   : > { %v481_v49 = vmax.f32 %v449_v42, 0.0  ;;  %v1160_v52 = vunpack.c.l.bf16 %v1203_v40  ;;  %v482_v55 = vmax.f32 %v450_v46, 0.0  ;;  %v451_v57 = vadd.f32 %v1840_v8, %v412_v48 }
  0xb0   : > { %v493_v54 = vpack.c.bf16 %v466_v45, %v465_v41  ;;  %v467_v56 = vmax.f32 %v435_v47, 0.0  ;;  %v468_v58 = vmax.f32 %v436_v50, 0.0  ;;  %v452_v59 = vadd.f32 %v1840_v8, %v413_v51 }
  0xb1   : > { %v1161_v60 = vunpack.c.h.bf16 %v1203_v40  ;;  %v398_v61 = vmul.f32 %v1160_v52, %v1836_v2  ;;  %v501_v63 = vpack.c.bf16 %v482_v55, %v481_v49  ;;  %v483_v0 = vmax.f32 %v451_v57, 0.0 }
  0xb2   : > { %1240 = vmatprep.mubr.msk.bf16.mxu0 %vm506_vm1, %v493_v54  ;;  %v1192_v1 = vunpack.c.l.bf16 %v1211_v53  ;;  %v1193_v3 = vunpack.c.h.bf16 %v1211_v53  ;;  %v494_v5 = vpack.c.bf16 %v468_v58, %v467_v56  ;;  %v484_v6 = vmax.f32 %v452_v59, 0.0 }
  0xb3   : > { %v399_v7 = vmul.f32 %v1161_v60, %v1836_v2  ;;  %v437_v9 = vadd.f32 %v1840_v8, %v398_v61  ;;  %1256 = vmatprep.mubr.msk.bf16.mxu1 %vm506_vm1, %v501_v63  ;;  %v1164_v12 = vunpack.c.l.bf16 %v1204_v62  ;;  %v1165_v13 = vunpack.c.h.bf16 %v1204_v62 }
  0xb4   : > { %v414_v10 = vmul.f32 %v1192_v1, %v1836_v2  ;;  %v415_v11 = vmul.f32 %v1193_v3, %v1836_v2  ;;  %1241 = vmatmul.mubr.msk.bf16.gmra.mrb[8].mxu0 %vm506_vm1, %v494_v5  ;;  %v502_v14 = vpack.c.bf16 %v484_v6, %v483_v0  ;;  %v1196_v17 = vunpack.c.l.bf16 %v1212_v4 }
  0xb5   : > { %v438_v15 = vadd.f32 %v1840_v8, %v399_v7  ;;  %v469_v16 = vmax.f32 %v437_v9, 0.0  ;;  %v400_v20 = vmul.f32 %v1164_v12, %v1836_v2  ;;  %v401_v21 = vmul.f32 %v1165_v13, %v1836_v2 }
  0xb6   : > { %v453_v18 = vadd.f32 %v1840_v8, %v414_v10  ;;  %v454_v19 = vadd.f32 %v1840_v8, %v415_v11  ;;  %1257 = vmatmul.mubr.msk.bf16.gmra.mrb[8].mxu1 %vm506_vm1, %v502_v14  ;;  %v1197_v23 = vunpack.c.h.bf16 %v1212_v4  ;;  %v416_v24 = vmul.f32 %v1196_v17, %v1836_v2 }
  0xb7   : > { %v470_v22 = vmax.f32 %v438_v15, 0.0  ;;  %v439_v27 = vadd.f32 %v1840_v8, %v400_v20  ;;  %v440_v28 = vadd.f32 %v1840_v8, %v401_v21 }
  0xb8   : > { %v485_v25 = vmax.f32 %v453_v18, 0.0  ;;  %v486_v26 = vmax.f32 %v454_v19, 0.0  ;;  %v417_v30 = vmul.f32 %v1197_v23, %v1836_v2  ;;  %v455_v31 = vadd.f32 %v1840_v8, %v416_v24 }
  0xb9   : > { %v495_v29 = vpack.c.bf16 %v470_v22, %v469_v16  ;;  %v471_v33 = vmax.f32 %v439_v27, 0.0  ;;  %v472_v34 = vmax.f32 %v440_v28, 0.0 }
  0xba   : > { %v503_v32 = vpack.c.bf16 %v486_v26, %v485_v25  ;;  %v456_v35 = vadd.f32 %v1840_v8, %v417_v30  ;;  %v487_v36 = vmax.f32 %v455_v31, 0.0 }
  0xbb   : > { %1244 = vmatprep.mubr.msk.bf16.mxu0 %vm506_vm1, %v495_v29  ;;  %v496_v37 = vpack.c.bf16 %v472_v34, %v471_v33 }
  0xbc   : > { %1260 = vmatprep.mubr.msk.bf16.mxu1 %vm506_vm1, %v503_v32  ;;  %v488_v38 = vmax.f32 %v456_v35, 0.0 }
  0xbd   : > { %1245 = vmatmul.mubr.msk.bf16.gmra.mrb[12].mxu0 %vm506_vm1, %v496_v37 }
  0xbe   : > { %v504_v39 = vpack.c.bf16 %v488_v38, %v487_v36 }
  0xc0   : > { %1261 = vmatmul.mubr.msk.bf16.gmra.mrb[12].mxu1 %vm506_vm1, %v504_v39 }
 0x175   : > { %v1234_v2 = vpop.f32.mrb[0].mxu0 }
 0x176   : > { %v1103_v40 = vpack.c.bf16 %v1234_v2, %v1234_v2  ;;  %v1250_v41 = vpop.f32.mrb[0].mxu1  ;;  %v593_v42 = vpop.f32.mrb[1].mxu0 }
 0x177   : > { %v1119_v43 = vpack.c.bf16 %v1250_v41, %v1250_v41  ;;  %v1101_v44 = vpack.c.bf16 %v593_v42, %v593_v42  ;;  %v657_v45 = vpop.f32.mrb[1].mxu1  ;;  %v1235_v8 = vpop.f32.mrb[2].mxu0 }
 0x178   : > { %851 = vst.msk [vmem:[%s1937_s12 + $0x8] sm:$0xf] %vm848_vm2, %v1103_v40  ;;  %v1117_v46 = vpack.c.bf16 %v657_v45, %v657_v45  ;;  %v1104_v47 = vpack.c.bf16 %v1235_v8, %v1235_v8  ;;  %v1251_v48 = vpop.f32.mrb[2].mxu1  ;;  %v596_v49 = vpop.f32.mrb[3].mxu0 }
 0x179   : > { %867 = vst.msk [vmem:[%s1937_s12 + $0x48] sm:$0xf] %vm848_vm2, %v1119_v43  ;;  %849 = vst.msk [vmem:[%s1937_s12] sm:$0xf] %vm848_vm2, %v1101_v44  ;;  %v1120_v50 = vpack.c.bf16 %v1251_v48, %v1251_v48  ;;  %v1102_v51 = vpack.c.bf16 %v596_v49, %v596_v49  ;;  %v660_v52 = vpop.f32.mrb[3].mxu1 }
 0x17a   : > { %865 = vst.msk [vmem:[%s1937_s12 + $0x40] sm:$0xf] %vm848_vm2, %v1117_v46  ;;  %852 = vst.msk [vmem:[%s1937_s12 + $0xc] sm:$0xf] %vm848_vm2, %v1104_v47  ;;  %v1118_v53 = vpack.c.bf16 %v660_v52, %v660_v52 }
 0x17b   : > { %868 = vst.msk [vmem:[%s1937_s12 + $0x4c] sm:$0xf] %vm848_vm2, %v1120_v50  ;;  %850 = vst.msk [vmem:[%s1937_s12 + $0x4] sm:$0xf] %vm848_vm2, %v1102_v51 }
 0x17c   : > { %866 = vst.msk [vmem:[%s1937_s12 + $0x44] sm:$0xf] %vm848_vm2, %v1118_v53 }
 0x17e   : > { %v1238_v54 = vpop.f32.mrb[4].mxu0 }
 0x17f   : > { %v1107_v55 = vpack.c.bf16 %v1238_v54, %v1238_v54  ;;  %v1254_v56 = vpop.f32.mrb[4].mxu1  ;;  %v609_v57 = vpop.f32.mrb[5].mxu0 }
 0x180   : > { %v1123_v58 = vpack.c.bf16 %v1254_v56, %v1254_v56  ;;  %v1105_v59 = vpack.c.bf16 %v609_v57, %v609_v57  ;;  %v673_v60 = vpop.f32.mrb[5].mxu1  ;;  %v1239_v61 = vpop.f32.mrb[6].mxu0 }
 0x181   : > { %855 = vst.msk [vmem:[%s1937_s12 + $0x18] sm:$0xf] %vm848_vm2, %v1107_v55  ;;  %v1121_v62 = vpack.c.bf16 %v673_v60, %v673_v60  ;;  %v1108_v63 = vpack.c.bf16 %v1239_v61, %v1239_v61  ;;  %v1255_v0 = vpop.f32.mrb[6].mxu1  ;;  %v612_v1 = vpop.f32.mrb[7].mxu0 }
 0x182   : > { %871 = vst.msk [vmem:[%s1937_s12 + $0x58] sm:$0xf] %vm848_vm2, %v1123_v58  ;;  %853 = vst.msk [vmem:[%s1937_s12 + $0x10] sm:$0xf] %vm848_vm2, %v1105_v59  ;;  %v1124_v3 = vpack.c.bf16 %v1255_v0, %v1255_v0  ;;  %v1106_v4 = vpack.c.bf16 %v612_v1, %v612_v1  ;;  %v676_v5 = vpop.f32.mrb[7].mxu1 }
 0x183   : > { %869 = vst.msk [vmem:[%s1937_s12 + $0x50] sm:$0xf] %vm848_vm2, %v1121_v62  ;;  %856 = vst.msk [vmem:[%s1937_s12 + $0x1c] sm:$0xf] %vm848_vm2, %v1108_v63  ;;  %v1122_v6 = vpack.c.bf16 %v676_v5, %v676_v5 }
 0x184   : > { %872 = vst.msk [vmem:[%s1937_s12 + $0x5c] sm:$0xf] %vm848_vm2, %v1124_v3  ;;  %854 = vst.msk [vmem:[%s1937_s12 + $0x14] sm:$0xf] %vm848_vm2, %v1106_v4 }
 0x185   : > { %870 = vst.msk [vmem:[%s1937_s12 + $0x54] sm:$0xf] %vm848_vm2, %v1122_v6 }
 0x187   : > { %v1242_v7 = vpop.f32.mrb[8].mxu0 }
 0x188   : > { %v1111_v9 = vpack.c.bf16 %v1242_v7, %v1242_v7  ;;  %v625_v10 = vpop.f32.mrb[9].mxu0 }
 0x189   : > { %v1258_v11 = vpop.f32.mrb[8].mxu1  ;;  %v1109_v12 = vpack.c.bf16 %v625_v10, %v625_v10  ;;  %v1243_v13 = vpop.f32.mrb[10].mxu0 }
 0x18a   : > { %859 = vst.msk [vmem:[%s1937_s12 + $0x28] sm:$0xf] %vm848_vm2, %v1111_v9  ;;  %v1127_v14 = vpack.c.bf16 %v1258_v11, %v1258_v11  ;;  %v689_v15 = vpop.f32.mrb[9].mxu1  ;;  %v1112_v16 = vpack.c.bf16 %v1243_v13, %v1243_v13  ;;  %v628_v17 = vpop.f32.mrb[11].mxu0 }
 0x18b   : > { %857 = vst.msk [vmem:[%s1937_s12 + $0x20] sm:$0xf] %vm848_vm2, %v1109_v12  ;;  %v1125_v18 = vpack.c.bf16 %v689_v15, %v689_v15  ;;  %v1259_v19 = vpop.f32.mrb[10].mxu1  ;;  %v1110_v20 = vpack.c.bf16 %v628_v17, %v628_v17 }
 0x18c   : > { %875 = vst.msk [vmem:[%s1937_s12 + $0x68] sm:$0xf] %vm848_vm2, %v1127_v14  ;;  %860 = vst.msk [vmem:[%s1937_s12 + $0x2c] sm:$0xf] %vm848_vm2, %v1112_v16  ;;  %v1128_v21 = vpack.c.bf16 %v1259_v19, %v1259_v19  ;;  %v692_v22 = vpop.f32.mrb[11].mxu1 }
 0x18d   : > { %873 = vst.msk [vmem:[%s1937_s12 + $0x60] sm:$0xf] %vm848_vm2, %v1125_v18  ;;  %858 = vst.msk [vmem:[%s1937_s12 + $0x24] sm:$0xf] %vm848_vm2, %v1110_v20  ;;  %v1126_v23 = vpack.c.bf16 %v692_v22, %v692_v22 }
 0x18e   : > { %876 = vst.msk [vmem:[%s1937_s12 + $0x6c] sm:$0xf] %vm848_vm2, %v1128_v21 }
 0x18f   : > { %874 = vst.msk [vmem:[%s1937_s12 + $0x64] sm:$0xf] %vm848_vm2, %v1126_v23 }
 0x190   : > { %v1246_v24 = vpop.f32.mrb[12].mxu0 }
 0x191   : > { %v1115_v25 = vpack.c.bf16 %v1246_v24, %v1246_v24  ;;  %v641_v26 = vpop.f32.mrb[13].mxu0 }
 0x192   : > { %v1113_v27 = vpack.c.bf16 %v641_v26, %v641_v26  ;;  %v1247_v28 = vpop.f32.mrb[14].mxu0 }
 0x193   : > { %863 = vst.msk [vmem:[%s1937_s12 + $0x38] sm:$0xf] %vm848_vm2, %v1115_v25  ;;  %v1262_v29 = vpop.f32.mrb[12].mxu1  ;;  %v1116_v30 = vpack.c.bf16 %v1247_v28, %v1247_v28  ;;  %v644_v31 = vpop.f32.mrb[15].mxu0 }
 0x194   : > { %v1131_v32 = vpack.c.bf16 %v1262_v29, %v1262_v29  ;;  %861 = vst.msk [vmem:[%s1937_s12 + $0x30] sm:$0xf] %vm848_vm2, %v1113_v27  ;;  %v705_v33 = vpop.f32.mrb[13].mxu1  ;;  %v1114_v34 = vpack.c.bf16 %v644_v31, %v644_v31 }
 0x195   : > { %v1129_v35 = vpack.c.bf16 %v705_v33, %v705_v33  ;;  %864 = vst.msk [vmem:[%s1937_s12 + $0x3c] sm:$0xf] %vm848_vm2, %v1116_v30  ;;  %v1263_v36 = vpop.f32.mrb[14].mxu1 }
 0x196   : > { %879 = vst.msk [vmem:[%s1937_s12 + $0x78] sm:$0xf] %vm848_vm2, %v1131_v32  ;;  %v1132_v37 = vpack.c.bf16 %v1263_v36, %v1263_v36  ;;  %862 = vst.msk [vmem:[%s1937_s12 + $0x34] sm:$0xf] %vm848_vm2, %v1114_v34  ;;  %v708_v38 = vpop.f32.mrb[15].mxu1 }
 0x197   : > { %877 = vst.msk [vmem:[%s1937_s12 + $0x70] sm:$0xf] %vm848_vm2, %v1129_v35  ;;  %v1130_v39 = vpack.c.bf16 %v708_v38, %v708_v38 }
 0x198   : > { %880 = vst.msk [vmem:[%s1937_s12 + $0x7c] sm:$0xf] %vm848_vm2, %v1132_v37 }
 0x199   : > { %878 = vst.msk [vmem:[%s1937_s12 + $0x74] sm:$0xf] %vm848_vm2, %v1130_v39 }
 0x19a   : > { %1486 = shalt.err (!%p1483_p6)
}
 0x19b   : > { %s1487_s21 = scalar_lea.hbm %s2002_s5, 2048  ;;  %s1491_s17 = scalar_lea.hbm %s2063_s4, 4096 }
 0x19c   : > { %p1488_p0 = scmp.ne.s32.totalorder %s2002_s5, %s1487_s21  ;;  %p1492_p8 = scmp.lt.u32.totalorder %s2002_s5, %s2063_s4 }
 0x19d   : > { %p1493_p4 = scmp.lt.u32.totalorder %s1491_s17, %s1487_s21  ;;  %p1495_p5 = scmp.lt.u32.totalorder %s1487_s21, %s2002_s5 }
 0x19e   : > { %p1489_p2 = pnand %p1488_p0, %p2100_p10 }
 0x19f   : > { %p1494_p11 = por %p1493_p4, %p1492_p8 }
 0x1a0   : > { %p1490_p12 = pneg %p1489_p2 }
 0x1a1   : > { %p1496_p13 = por %p1495_p5, %p1494_p11 }
 0x1a3   : > { %p1497_p3 = pnand %p1496_p13, %p1490_p12 }
 0x1a5   : > { %1500 = shalt.err (!%p1497_p3)
}
 0x1a6   : > { %s1572_s27 = smov 64   ;;  %s1573_s25 = smov 4  }
 0x1a7   : > { %1278 = dma.vmem_to_hbm [thread:$0]  (%p2100_p10), %s2004_s26, 2048, %s2002_s5, %s882_s22, %s1572_s27, %s1572_s27, %s1573_s25  }
 0x1a8 PF: > { %s2101_s8 = sld [smem:[#allocation17_spill]]  ;;  %s912_s11 = sand.u32 1, %s1543_s15  }
 0x1a9   : > { %p2102_p1 = scmp.ne.s32.totalorder %s2090_s7, 0  ;;  %s913_s14 = scalar_lea.sflag [#allocation4], %s912_s11 }
 0x1ae   : > { %p2103_p7 = scmp.ge.s32.totalorder %s2101_s8, 2 }
 0x1b0   : > { %p1295_p9 = pnand %p2103_p7, %p2102_p1 }
 0x1b2   : > { %1538 = dma.done.wait (!%p1295_p9), %s913_s14, 2048  }
 0x1b3   : > { %1540 = vsyncadd (!%p1295_p9), %s913_s14, 4294965248  ;;  %s24_s20 = sadd.s32 1, %s2101_s8   ;;  %s2104_s12 = sld [smem:[#allocation15_spill]] }
 0x1b4   : > { %p21_p6 = scmp.ge.s32.totalorder %s24_s20, 4   ;;  %s2105_s17 = sld [smem:[#allocation19_spill]] }
 0x1b5   : > { %s2106_s18 = sld [smem:[#allocation16_spill]]  ;;  %s2107_s19 = sld [smem:[#allocation18_spill]] }
 0x1b6   : > { %s2108_s15 = smov %s1547_s16  ;;  %23 = sbr.rel (!%p21_p6) target bundleno = 11 (0xb), region = 109 }
 0x1b9   : > { %s2109_s16 = smov %s2104_s12 }
 0x1bd   :  { %918 = vsyncpa [#allocation3], 1 }
 0x1be   :  { %920 = vsyncpa [#allocation3 + $0x1], 1 }
 0x1bf   :  { %921 = vsyncpa [#allocation6], 1 }
 0x1c0   :  { %923 = vsyncpa [#allocation6 + $0x1], 1 }
 0x1c1   :  { %924 = vsyncpa [#allocation9], 1 }
 0x1c2   :  { %925 = vsyncpa [#allocation4], 1 }
 0x1c3   :  { %927 = vsyncpa [#allocation4 + $0x1], 1 }

// kernel: resnetv2_block.8
= control target key start
LH: loop header
LB: loop body
LE: loop exit
PB: predicated region body
PF: predicated region fallthrough
CT: control target
= control target key end

     0   :  { %11 = vsyncpa [#allocation3], 0  ;;  %s1810_s0 = inlined_call_operand.hbm [shape: bf16[2,256,4], index: 0, kind: input, shape index: {}]   ;;  %s1811_s1 = inlined_call_operand.hbm [shape: f32[1,4], index: 1, kind: input, shape index: {}]   ;;  %s1812_s2 = inlined_call_operand.hbm [shape: f32[1,4], index: 2, kind: input, shape index: {}]   ;;  %s1813_s3 = inlined_call_operand.hbm [shape: f32[2,4], index: 3, kind: input, shape index: {}]   ;;  %s1814_s4 = inlined_call_operand.hbm [shape: f32[2,1,4], index: 4, kind: output, shape index: {0}]   ;;  %s1815_s5 = inlined_call_operand.hbm [shape: f32[2,1,4], index: 5, kind: output, shape index: {1}]  }
   0x1   :  { %13 = vsyncpa [#allocation3 + $0x1], 0 }
   0x2   :  { %14 = vsyncpa [#allocation6], 0 }
   0x3   :  { %15 = vsyncpa [#allocation9], 0 }
   0x4   :  { %16 = vsyncpa [#allocation4], 0 }
   0x5   :  { %18 = vsyncpa [#allocation4 + $0x1], 0 }
   0x6   :  { %19 = vsyncpa [#allocation12], 0 }
   0x7   :  { %21 = vsyncpa [#allocation12 + $0x1], 0  ;;  %s1192_s18 = smov 0   ;;  %s1194_s19 = smov 0  }
   0x8   :  { %s1196_s20 = smov 0   ;;  %s1198_s21 = smov 0  }
   0x9 LB: > { %s1213_s22 = sadd.s32 4294967295, %s1152_s21   ;;  %s748_s23 = sadd.s32 4294967294, %s1152_s21   ;;  %s1152_s21 = sphi %s1198_s21, %s1840_s21   ;;  %s1148_s20 = sphi %s1196_s20, %s1839_s20   ;;  %s1144_s19 = sphi %s1194_s19, %s1838_s19   ;;  %s1140_s18 = sphi %s1192_s18, %s1837_s18  }
   0xa   : > { %p47_p0 = scmp.ne.s32.totalorder %s1144_s19, %s1140_s18  ;;  %p1816_p1 = scmp.eq.s32.totalorder %s1213_s22, 0 }
   0xb   : > { %p140_p3 = scmp.eq.s32.totalorder %s748_s23, 1  ;;  %p749_p5 = scmp.ge.s32.totalorder %s1152_s21, 1 }
   0xc   : > { %p1222_p4 = por %p1816_p1, %p47_p0  ;;  %p173_p7 = scmp.lt.s32.totalorder %s1152_s21, 3 }
   0xd   : > { %p1227_p6 = por %p140_p3, %p47_p0  ;;  %s1154_s27 = smov [#allocation5]  }
   0xe   : > { %s1820_s24 = scalar_select %p1222_p4, 1, 0 }
   0xf   : > { %s1821_s25 = scalar_select %p1227_p6, 1, 0 }
  0x10   : > { %p1232_p8 = pnand %p749_p5, %p173_p7  ;;  %s186_s28 = sshll.u32 %s1154_s27, 4  ;;  %s187_s28 = int_to_ptr.vmem [resolvable:$true] %s186_s28 }
  0x11   : > { %s1155_s29 = smov [#allocation7]   ;;  %s1156_s7 = smov [#allocation8]  }
  0x12   : > { %s1822_s26 = scalar_select %p1232_p8, 1, 0 }
  0x13   : > { %p864_p10 = pneg %p1232_p8  ;;  %s197_s30 = sshll.u32 %s1155_s29, 4  ;;  %s1245_s30 = int_to_ptr.vmem [resolvable:$true] %s197_s30 }
  0x14   : > { %s208_s8 = sshll.u32 %s1156_s7, 4  ;;  %s932_s11 = scalar_lea.hbm %s1811_s1, 16  ;;  %s1247_s8 = int_to_ptr.vmem [resolvable:$true] %s208_s8 }
  0x15   : > { %p1241_p11 = pnand %p864_p10, %p1816_p1  ;;  %p933_p12 = scmp.ne.s32.totalorder %s1811_s1, %s932_s11 }
  0x16   : > { %p939_p5 = scmp.lt.u32.totalorder %s932_s11, %s1811_s1 }
  0x17   : > { %p1257_p13 = pneg %p1241_p11 }
  0x19   : > { %p935_p0 = pnand %p1257_p13, %p933_p12 }
  0x1b   : > { %p936_p3 = pneg %p935_p0 }
  0x1d   : > { %p941_p7 = pnand %p939_p5, %p936_p3 }
  0x1f   : > { %944 = shalt.err (!%p941_p7)
}
  0x20   : > { %s945_s17 = scalar_lea.vmem %s187_s28, 16  ;;  %s952_s23 = scalar_lea.vmem %s187_s28, 32 }
  0x21   : > { %p946_p10 = scmp.ne.s32.totalorder %s187_s28, %s945_s17  ;;  %p953_p2 = scmp.lt.s32.totalorder %s187_s28, %s187_s28 }
  0x22   : > { %p954_p6 = scmp.lt.s32.totalorder %s952_s23, %s945_s17 }
  0x23   : > { %p948_p9 = pnand %p946_p10, %p1257_p13 }
  0x24   : > { %p955_p4 = por %p954_p6, %p953_p2 }
  0x25   : > { %p949_p1 = pneg %p948_p9 }
  0x27   : > { %p956_p8 = pnand %p955_p4, %p949_p1 }
  0x29   : > { %959 = shalt.err (!%p956_p8)
}
  0x2a   : > { %867 = dma.hbm_to_vmem [thread:$0]  (!%p1241_p11), %s1811_s1, 16, %s187_s28, [#allocation6]  }
  0x2b   : > { %s960_s10 = scalar_lea.hbm %s1812_s2, 16 }
  0x2c   : > { %p961_p9 = scmp.ne.s32.totalorder %s1812_s2, %s960_s10  ;;  %p967_p1 = scmp.lt.u32.totalorder %s960_s10, %s1812_s2 }
  0x2e   : > { %p963_p12 = pnand %p961_p9, %p1257_p13 }
  0x30   : > { %p964_p2 = pneg %p963_p12 }
  0x32   : > { %p969_p4 = pnand %p967_p1, %p964_p2 }
  0x34   : > { %972 = shalt.err (!%p969_p4)
}
  0x35   : > { %s973_s28 = scalar_lea.vmem %s1245_s30, 16  ;;  %s980_s16 = scalar_lea.vmem %s1245_s30, 32 }
  0x36   : > { %p974_p6 = scmp.ne.s32.totalorder %s1245_s30, %s973_s28  ;;  %p981_p3 = scmp.lt.s32.totalorder %s1245_s30, %s1245_s30 }
  0x37   : > { %p982_p5 = scmp.lt.s32.totalorder %s980_s16, %s973_s28 }
  0x38   : > { %p976_p8 = pnand %p974_p6, %p1257_p13 }
  0x39   : > { %p983_p7 = por %p982_p5, %p981_p3 }
  0x3a   : > { %p977_p0 = pneg %p976_p8 }
  0x3c   : > { %p984_p10 = pnand %p983_p7, %p977_p0 }
  0x3e   : > { %987 = shalt.err (!%p984_p10)
}
  0x3f   : > { %870 = dma.hbm_to_vmem [thread:$0]  (!%p1241_p11), %s1812_s2, 16, %s1245_s30, [#allocation6]  }
  0x40   : > { %s988_s7 = scalar_lea.hbm %s1813_s3, 32 }
  0x41   : > { %p989_p9 = scmp.ne.s32.totalorder %s1813_s3, %s988_s7  ;;  %p995_p1 = scmp.lt.u32.totalorder %s988_s7, %s1813_s3 }
  0x43   : > { %p991_p12 = pnand %p989_p9, %p1257_p13 }
  0x45   : > { %p992_p2 = pneg %p991_p12 }
  0x47   : > { %p997_p4 = pnand %p995_p1, %p992_p2 }
  0x49   : > { %1000 = shalt.err (!%p997_p4)
}
  0x4a   : > { %s1001_s30 = scalar_lea.vmem %s1247_s8, 32  ;;  %p1009_p3 = scmp.lt.s32.totalorder %s1247_s8, %s1247_s8 }
  0x4b   : > { %p1002_p6 = scmp.ne.s32.totalorder %s1247_s8, %s1001_s30  ;;  %p1010_p5 = scmp.lt.s32.totalorder %s1001_s30, %s1001_s30 }
  0x4d   : > { %p1004_p8 = pnand %p1002_p6, %p1257_p13  ;;  %p1011_p7 = por %p1010_p5, %p1009_p3 }
  0x4f   : > { %p1005_p0 = pneg %p1004_p8 }
  0x51   : > { %p1012_p10 = pnand %p1011_p7, %p1005_p0 }
  0x53   : > { %1015 = shalt.err (!%p1012_p10)
}
  0x54   : > { %873 = dma.hbm_to_vmem [thread:$0]  (!%p1241_p11), %s1813_s3, 32, %s1247_s8, [#allocation9]  }
  0x55   : > { %s1321_s14 = sadd.s32 1, %s1152_s21   ;;  %s34_s28 = sadd.s32 1, %s1148_s20 }
  0x56   : > { %s31_s6 = ssub.s32 %s1152_s21, %s1321_s14  ;;  %p41_p9 = scmp.ne.s32.totalorder %s1148_s20, %s1144_s19 }
  0x57   : > { %p32_p13 = scmp.eq.s32.totalorder %s31_s6, 0  ;;  %p42_p12 = scmp.eq.s32.totalorder %s1152_s21, 0 }
  0x58   : > { %p888_p2 = scmp.lt.s32.totalorder %s1152_s21, 2  ;;  %p1825_p4 = scmp.eq.s32.totalorder %s1213_s22, 1 }
  0x59   : > { %s1331_s16 = scalar_select %p32_p13, %s1148_s20, %s34_s28  }
  0x5a   : > { %p43_p1 = por %p42_p12, %p41_p9  ;;  %p1335_p6 = por %p1825_p4, %p41_p9 }
  0x5b   : > { %s219_s23 = sand.u32 1, %s1148_s20   ;;  %s766_s27 = sshll.u32 %s1152_s21, 11 }
  0x5c   : > { %s754_s8 = sshll.u32 %s219_s23, 7  ;;  %s1344_s9 = scalar_lea.hbm %s1810_s0, %s766_s27 }
  0x5d   : > { %s223_s10 = scalar_lea.vmem [#allocation2], %s754_s8  ;;  %p1346_p11 = pnand %p888_p2, %p43_p1 }
  0x5e   : > { %s230_s11 = sshll.u32 %s223_s10, 4  ;;  %s1352_s30 = scalar_lea.sflag [#allocation3], %s219_s23  ;;  %s1350_s11 = int_to_ptr.vmem [resolvable:$true] %s230_s11 }
  0x5f   : > { %s1016_s13 = scalar_lea.hbm %s1344_s9, 2048  ;;  %p1018_p0 = pneg %p1346_p11 }
  0x60   : > { %p1017_p8 = scmp.ne.s32.totalorder %s1344_s9, %s1016_s13  ;;  %s1021_s28 = scalar_lea.hbm %s1810_s0, 4096 }
  0x61   : > { %p1022_p7 = scmp.lt.u32.totalorder %s1344_s9, %s1810_s0  ;;  %p1023_p10 = scmp.lt.u32.totalorder %s1021_s28, %s1016_s13 }
  0x62   : > { %p1019_p3 = pnand %p1018_p0, %p1017_p8  ;;  %p1025_p9 = scmp.lt.u32.totalorder %s1016_s13, %s1344_s9 }
  0x63   : > { %p1024_p13 = por %p1023_p10, %p1022_p7 }
  0x64   : > { %p1020_p5 = pneg %p1019_p3 }
  0x65   : > { %p1026_p12 = por %p1025_p9, %p1024_p13 }
  0x67   : > { %p1027_p2 = pnand %p1026_p12, %p1020_p5 }
  0x69   : > { %1030 = shalt.err (!%p1027_p2)
}
  0x6a   : > { %s1031_s23 = scalar_lea.vmem %s1350_s11, 2048  ;;  %s1157_s29 = smov [#allocation2]  }
  0x6b   : > { %p1032_p1 = scmp.ne.s32.totalorder %s1350_s11, %s1031_s23  ;;  %s1036_s7 = sshll.u32 %s1157_s29, 4  ;;  %s1037_s7 = int_to_ptr.vmem [resolvable:$false] %s1036_s7 }
  0x6c   : > { %s1038_s10 = scalar_lea.vmem %s1037_s7, 4096  ;;  %p1039_p3 = scmp.lt.s32.totalorder %s1350_s11, %s1037_s7 }
  0x6d   : > { %p1034_p4 = pnand %p1032_p1, %p1018_p0  ;;  %p1040_p7 = scmp.lt.s32.totalorder %s1038_s10, %s1031_s23 }
  0x6f   : > { %p1035_p8 = pneg %p1034_p4  ;;  %p1041_p10 = por %p1040_p7, %p1039_p3 }
  0x71   : > { %p1042_p13 = pnand %p1041_p10, %p1035_p8 }
  0x73   : > { %1045 = shalt.err (!%p1042_p13)
}
  0x74   : > { %s1158_s13 = smov 64   ;;  %s1159_s15 = smov 4  }
  0x75   : > { %877 = dma.hbm_to_vmem [thread:$0]  (!%p1346_p11), %s1344_s9, 2048, %s1350_s11, %s1352_s30, %s1158_s13, %s1158_s13, %s1159_s15  }
  0x76   : > { %p1828_p0 = scmp.ne.s32.totalorder %s1822_s26, 0 }
  0x77   : > { %s1383_s6 = sand.u32 (!%p1828_p0), 1, %s1144_s19   ;;  %p1829_p5 = scmp.ne.s32.totalorder (!%p1828_p0), %s1820_s24, 0 }
  0x78   : > { %242 = sbr.rel (%p1828_p0) target bundleno = 668 (0x29c), region = 36  ;;  %s758_s28 = sshll.u32 (!%p1828_p0), %s1383_s6, 7 }
  0x79   : > { %s245_s27 = scalar_lea.sflag (!%p1828_p0), [#allocation3], %s1383_s6  ;;  %s1387_s8 = scalar_lea.vmem (!%p1828_p0), [#allocation2], %s758_s28 }
  0x7f   : > { %1119 = dma.done.wait (%p1829_p5), %s245_s27, 2048  }
  0x80   : > { %1121 = vsyncadd (%p1829_p5), %s245_s27, 4294965248  ;;  %p1830_p11 = scmp.eq.s32.totalorder %s1213_s22, 0 }
  0x82   : > { %1123 = dma.done.wait (%p1830_p11), [#allocation6], 32   ;;  %p1831_p9 = pmov %p1830_p11 }
  0x84   : > { %1125 = vsyncadd (%p1831_p9), [#allocation6], 4294967264  ;;  %p1832_p12 = pmov %p1831_p9 }
  0x85   : > { %p1833_p2 = pmov %p1831_p9 }
  0x86   : > { %1127 = dma.done.wait (%p1832_p12), [#allocation9], 32  }
  0x87   : > { %1129 = vsyncadd (%p1833_p2), [#allocation9], 4294967264  ;;  %v1402_v0 = vld [vmem:[%s1387_s8] sm:$0xff]   ;;  %v1405_v1 = vld [vmem:[%s1387_s8 + $0x8] sm:$0xff]   ;;  %vm355_vm0 = vcmask 31744   ;;  %vm426_vm1 = vcmask 25600  }
  0x88   : > { %v769_v2 = vunpack.c.l.bf16 %v1402_v0  ;;  %v770_v3 = vunpack.c.h.bf16 %v1402_v0  ;;  %v773_v4 = vunpack.c.l.bf16 %v1405_v1  ;;  %v1411_v5 = vld [vmem:[%s1387_s8 + $0x10] sm:$0xff]   ;;  %v774_v6 = vunpack.c.h.bf16 %v1405_v1  ;;  %v1425_v11 = vld [vmem:[%s1387_s8 + $0x18] sm:$0xff]   ;;  %v1436_v18 = vld [vmem:[%s1387_s8 + $0x20] sm:$0xff]   ;;  %s762_s24 = sshll.u32 %s1213_s22, 4  ;;  %s283_s26 = scalar_lea.vmem [#allocation10], %s1383_s6 }
  0x89   : > { %v777_v7 = vunpack.c.l.bf16 %v1411_v5  ;;  %v778_v13 = vunpack.c.h.bf16 %v1411_v5  ;;  %v781_v16 = vunpack.c.l.bf16 %v1425_v11  ;;  %v782_v20 = vunpack.c.h.bf16 %v1425_v11  ;;  %v1447_v25 = vld [vmem:[%s1387_s8 + $0x28] sm:$0xff]   ;;  %v1458_v32 = vld [vmem:[%s1387_s8 + $0x30] sm:$0xff]   ;;  %v1469_v39 = vld [vmem:[%s1387_s8 + $0x38] sm:$0xff]   ;;  %s612_s9 = sshll.u32 %s283_s26, 4  ;;  %s1724_s30 = scalar_lea.hbm %s1814_s4, %s762_s24  ;;  %s1726_s9 = int_to_ptr.vmem [resolvable:$true] %s612_s9 }
  0x8a   : > { %v356_v8 = vsel %vm355_vm0, %v769_v2, 0.0  ;;  %v357_v9 = vsel %vm355_vm0, %v770_v3, 0.0  ;;  %v359_v10 = vsel %vm355_vm0, %v773_v4, 0.0  ;;  %v361_v14 = vsel %vm355_vm0, %v774_v6, 0.0  ;;  %v1480_v46 = vld [vmem:[%s1387_s8 + $0x40] sm:$0xff]   ;;  %v1491_v53 = vld [vmem:[%s1387_s8 + $0x48] sm:$0xff]  }
  0x8b   : > { %v358_v12 = vadd.f32 %v357_v9, %v356_v8  ;;  %v363_v17 = vsel %vm355_vm0, %v777_v7, 0.0  ;;  %v365_v21 = vsel %vm355_vm0, %v778_v13, 0.0  ;;  %v785_v23 = vunpack.c.l.bf16 %v1436_v18  ;;  %v1502_v60 = vld [vmem:[%s1387_s8 + $0x50] sm:$0xff]   ;;  %s289_s23 = scalar_lea.vmem [#allocation11], %s1383_s6  ;;  %s596_s7 = scalar_lea.sflag [#allocation4], %s1383_s6 }
  0x8c   : > { %v367_v24 = vsel %vm355_vm0, %v781_v16, 0.0  ;;  %v786_v27 = vunpack.c.h.bf16 %v1436_v18  ;;  %v369_v28 = vsel %vm355_vm0, %v782_v20, 0.0  ;;  %v789_v30 = vunpack.c.l.bf16 %v1447_v25  ;;  %s1731_s29 = sshll.u32 %s289_s23, 4  ;;  %s1046_s10 = scalar_lea.vmem %s1726_s9, 16  ;;  %s1765_s29 = int_to_ptr.vmem [resolvable:$true] %s1731_s29 }
  0x8d   : > { %v360_v15 = vadd.f32 %v359_v10, %v358_v12  ;;  %v371_v31 = vsel %vm355_vm0, %v785_v23, 0.0  ;;  %v790_v34 = vunpack.c.h.bf16 %v1447_v25  ;;  %v793_v37 = vunpack.c.l.bf16 %v1458_v32  ;;  %v1513_v12 = vld [vmem:[%s1387_s8 + $0x58] sm:$0xff]   ;;  %p1047_p1 = scmp.ne.s32.totalorder %s1726_s9, %s1046_s10  ;;  %s1160_s13 = smov [#allocation10]  }
  0x8e   : > { %v373_v35 = vsel %vm355_vm0, %v786_v27, 0.0  ;;  %v375_v38 = vsel %vm355_vm0, %v789_v30, 0.0  ;;  %v794_v41 = vunpack.c.h.bf16 %v1458_v32  ;;  %v797_v44 = vunpack.c.l.bf16 %v1469_v39  ;;  %s1050_s15 = sshll.u32 %s1160_s13, 4  ;;  %s1051_s15 = int_to_ptr.vmem [resolvable:$false] %s1050_s15 }
  0x8f   : > { %v362_v19 = vadd.f32 %v361_v14, %v360_v15  ;;  %v377_v42 = vsel %vm355_vm0, %v790_v34, 0.0  ;;  %v379_v45 = vsel %vm355_vm0, %v793_v37, 0.0  ;;  %v798_v48 = vunpack.c.h.bf16 %v1469_v39  ;;  %p1048_p4 = pnand %p1047_p1, %p1335_p6  ;;  %s1052_s28 = scalar_lea.vmem %s1051_s15, 32 }
  0x90   : > { %v381_v49 = vsel %vm355_vm0, %v794_v41, 0.0  ;;  %v801_v51 = vunpack.c.l.bf16 %v1480_v46  ;;  %v383_v52 = vsel %vm355_vm0, %v797_v44, 0.0  ;;  %v802_v55 = vunpack.c.h.bf16 %v1480_v46  ;;  %p1053_p3 = scmp.lt.s32.totalorder %s1726_s9, %s1051_s15  ;;  %p1054_p7 = scmp.lt.s32.totalorder %s1052_s28, %s1046_s10 }
  0x91   : > { %v364_v22 = vadd.f32 %v363_v17, %v362_v19  ;;  %v385_v56 = vsel %vm355_vm0, %v798_v48, 0.0  ;;  %v805_v58 = vunpack.c.l.bf16 %v1491_v53  ;;  %v806_v62 = vunpack.c.h.bf16 %v1491_v53  ;;  %p1049_p8 = pneg %p1048_p4 }
  0x92   : > { %v387_v59 = vsel %vm355_vm0, %v801_v51, 0.0  ;;  %v389_v63 = vsel %vm355_vm0, %v802_v55, 0.0  ;;  %v809_v9 = vunpack.c.l.bf16 %v1502_v60  ;;  %v810_v15 = vunpack.c.h.bf16 %v1502_v60  ;;  %p1055_p10 = por %p1054_p7, %p1053_p3 }
  0x93   : > { %v366_v26 = vadd.f32 %v365_v21, %v364_v22  ;;  %v391_v10 = vsel %vm355_vm0, %v805_v58, 0.0  ;;  %v393_v17 = vsel %vm355_vm0, %v806_v62, 0.0  ;;  %v813_v21 = vunpack.c.l.bf16 %v1513_v12 }
  0x94   : > { %v395_v22 = vsel %vm355_vm0, %v809_v9, 0.0  ;;  %vm592_vm2 = vcmask 24576   ;;  %p1056_p13 = pnand %p1055_p10, %p1049_p8 }
  0x95   : > { %v368_v29 = vadd.f32 %v367_v24, %v366_v26  ;;  %v1524_v24 = vld [vmem:[%s1387_s8 + $0x60] sm:$0xff]  }
  0x97   : > { %v370_v33 = vadd.f32 %v369_v28, %v368_v29  ;;  %v814_v28 = vunpack.c.h.bf16 %v1513_v12  ;;  %v397_v29 = vsel %vm355_vm0, %v810_v15, 0.0 }
  0x99   : > { %v372_v36 = vadd.f32 %v371_v31, %v370_v33  ;;  %v817_v33 = vunpack.c.l.bf16 %v1524_v24 }
  0x9b   : > { %v374_v40 = vadd.f32 %v373_v35, %v372_v36  ;;  %v399_v35 = vsel %vm355_vm0, %v813_v21, 0.0  ;;  %v1535_v36 = vld [vmem:[%s1387_s8 + $0x68] sm:$0xff]  }
  0x9d   : > { %v376_v43 = vadd.f32 %v375_v38, %v374_v40  ;;  %v818_v40 = vunpack.c.h.bf16 %v1524_v24 }
  0x9f   : > { %v378_v47 = vadd.f32 %v377_v42, %v376_v43  ;;  %v401_v42 = vsel %vm355_vm0, %v814_v28, 0.0 }
  0xa1   : > { %v380_v50 = vadd.f32 %v379_v45, %v378_v47  ;;  %v821_v45 = vunpack.c.l.bf16 %v1535_v36  ;;  %v403_v47 = vsel %vm355_vm0, %v817_v33, 0.0 }
  0xa3   : > { %v382_v54 = vadd.f32 %v381_v49, %v380_v50  ;;  %v1546_v49 = vld [vmem:[%s1387_s8 + $0x70] sm:$0xff]  }
  0xa5   : > { %v384_v57 = vadd.f32 %v383_v52, %v382_v54  ;;  %v822_v52 = vunpack.c.h.bf16 %v1535_v36  ;;  %v405_v54 = vsel %vm355_vm0, %v818_v40, 0.0 }
  0xa7   : > { %v386_v61 = vadd.f32 %v385_v56, %v384_v57  ;;  %v825_v57 = vunpack.c.l.bf16 %v1546_v49 }
  0xa9   : > { %v388_v8 = vadd.f32 %v387_v59, %v386_v61  ;;  %v407_v59 = vsel %vm355_vm0, %v821_v45, 0.0  ;;  %v1557_v61 = vld [vmem:[%s1387_s8 + $0x78] sm:$0xff]  }
  0xab   : > { %v390_v14 = vadd.f32 %v389_v63, %v388_v8  ;;  %v826_v8 = vunpack.c.h.bf16 %v1546_v49 }
  0xad   : > { %v392_v19 = vadd.f32 %v391_v10, %v390_v14  ;;  %v409_v10 = vsel %vm355_vm0, %v822_v52, 0.0 }
  0xaf   : > { %v394_v26 = vadd.f32 %v393_v17, %v392_v19  ;;  %v829_v17 = vunpack.c.l.bf16 %v1557_v61  ;;  %v411_v19 = vsel %vm355_vm0, %v825_v57, 0.0 }
  0xb1   : > { %v396_v31 = vadd.f32 %v395_v22, %v394_v26  ;;  %v1819_v26 = vunpack.c.h.bf16 %v1557_v61 }
  0xb3   : > { %v398_v38 = vadd.f32 %v397_v29, %v396_v31  ;;  %v413_v29 = vsel %vm355_vm0, %v826_v8, 0.0 }
  0xb5   : > { %v400_v43 = vadd.f32 %v399_v35, %v398_v38  ;;  %v415_v35 = vsel %vm355_vm0, %v829_v17, 0.0 }
  0xb7   : > { %v402_v50 = vadd.f32 %v401_v42, %v400_v43  ;;  %v417_v42 = vsel %vm355_vm0, %v1819_v26, 0.0 }
  0xb9   : > { %v404_v56 = vadd.f32 %v403_v47, %v402_v50 }
  0xbb   : > { %v406_v63 = vadd.f32 %v405_v54, %v404_v56 }
  0xbd   : > { %v408_v14 = vadd.f32 %v407_v59, %v406_v63 }
  0xbf   : > { %v410_v22 = vadd.f32 %v409_v10, %v408_v14  ;;  %v1577_v10 = vld [vmem:[#allocation8] sm:$0x3] }
  0xc1   : > { %v412_v31 = vadd.f32 %v411_v19, %v410_v22 }
  0xc3   : > { %v414_v38 = vadd.f32 %v413_v29, %v412_v31 }
  0xc5   : > { %v416_v43 = vadd.f32 %v415_v35, %v414_v38 }
  0xc7   : > { %v418_v47 = vadd.f32 %v417_v42, %v416_v43 }
  0xc9   : > { %v419_v50 = vrot.slane %v418_v47, 4 }
  0xcb   : > { %v420_v54 = vadd.f32 %v419_v50, %v418_v47 }
  0xcd   : > { %v421_v56 = vrot.slane %v420_v54, 2 }
  0xcf   : > { %v422_v59 = vadd.f32 %v421_v56, %v420_v54 }
  0xd1   : > { %v423_v63 = vrot.slane %v422_v59, 1 }
  0xd3   : > { %v424_v14 = vadd.f32 %v423_v63, %v422_v59 }
  0xd5   : > { %v425_v19 = vmul.f32 %v424_v14, %v1577_v10 }
  0xd7   : > { %v427_v22 = vsel %vm426_vm1, %v425_v19, 0.0 }
  0xd8   : > { %428 = vadd.xlane.f32.xlu0 %v427_v22 }
 0x165   : > { %v429_v29 = vpop.xlane.xlu0 %428 }
 0x166   : > { %v430_v31 = vmul.f32 0.001953125, %v429_v29 }
 0x168   : > { %v431_v26 = vmul.f32 %v430_v31, %v1577_v10 }
 0x16a   : > { %v432_v35 = vsel %vm426_vm1, %v431_v26, 0.0 }
 0x16b   : > { %v433_v38 = vrot.slane %v432_v35, 4 }
 0x16d   : > { %v434_v42 = vadd.f32 %v433_v38, %v432_v35 }
 0x16f   : > { %v435_v43 = vrot.slane %v434_v42, 2 }
 0x171   : > { %v436_v47 = vadd.f32 %v435_v43, %v434_v42 }
 0x173   : > { %v437_v50 = vrot.slane %v436_v47, 1 }
 0x175   : > { %v1583_v54 = vadd.f32 %v437_v50, %v436_v47 }
 0x177   : > { %v439_v56 = vsub.f32 %v769_v2, %v1583_v54  ;;  %v440_v59 = vsub.f32 %v770_v3, %v1583_v54  ;;  %v441_v63 = vsub.f32 %v773_v4, %v1583_v54  ;;  %v442_v26 = vsub.f32 %v774_v6, %v1583_v54 }
 0x178   : > { %v443_v22 = vsub.f32 %v777_v7, %v1583_v54  ;;  %v444_v0 = vsub.f32 %v778_v13, %v1583_v54  ;;  %v445_v1 = vsub.f32 %v781_v16, %v1583_v54  ;;  %v446_v7 = vsub.f32 %v782_v20, %v1583_v54 }
 0x179   : > { %v471_v14 = vmul.f32 %v439_v56, %v439_v56  ;;  %v472_v19 = vmul.f32 %v440_v59, %v440_v59  ;;  %v473_v29 = vmul.f32 %v441_v63, %v441_v63  ;;  %v474_v2 = vmul.f32 %v442_v26, %v442_v26 }
 0x17a   : > { %v475_v6 = vmul.f32 %v443_v22, %v443_v22  ;;  %v476_v5 = vmul.f32 %v444_v0, %v444_v0  ;;  %v447_v43 = vsub.f32 %v785_v23, %v1583_v54  ;;  %v477_v47 = vmul.f32 %v445_v1, %v445_v1 }
 0x17b   : > { %v503_v3 = vsel %vm355_vm0, %v471_v14, 0.0  ;;  %v504_v4 = vsel %vm355_vm0, %v472_v19, 0.0  ;;  %v506_v35 = vsel %vm355_vm0, %v473_v29, 0.0  ;;  %v508_v13 = vsel %vm355_vm0, %v474_v2, 0.0 }
 0x17c   : > { %v505_v31 = vadd.f32 %v504_v4, %v503_v3  ;;  %v510_v50 = vsel %vm355_vm0, %v475_v6, 0.0  ;;  %v448_v56 = vsub.f32 %v786_v27, %v1583_v54  ;;  %v478_v59 = vmul.f32 %v446_v7, %v446_v7 }
 0x17d   : > { %v512_v11 = vsel %vm355_vm0, %v476_v5, 0.0  ;;  %v449_v63 = vsub.f32 %v789_v30, %v1583_v54  ;;  %v479_v26 = vmul.f32 %v447_v43, %v447_v43  ;;  %v514_v14 = vsel %vm355_vm0, %v477_v47, 0.0 }
 0x17e   : > { %v507_v38 = vadd.f32 %v506_v35, %v505_v31  ;;  %v450_v19 = vsub.f32 %v790_v34, %v1583_v54  ;;  %v480_v22 = vmul.f32 %v448_v56, %v448_v56  ;;  %v516_v18 = vsel %vm355_vm0, %v478_v59, 0.0 }
 0x17f   : > { %v451_v29 = vsub.f32 %v793_v37, %v1583_v54  ;;  %v481_v0 = vmul.f32 %v449_v63, %v449_v63  ;;  %v518_v2 = vsel %vm355_vm0, %v479_v26, 0.0  ;;  %v452_v3 = vsub.f32 %v794_v41, %v1583_v54 }
 0x180   : > { %v509_v42 = vadd.f32 %v508_v13, %v507_v38  ;;  %v482_v4 = vmul.f32 %v450_v19, %v450_v19  ;;  %v520_v25 = vsel %vm355_vm0, %v480_v22, 0.0  ;;  %v453_v31 = vsub.f32 %v797_v44, %v1583_v54 }
 0x181   : > { %v483_v1 = vmul.f32 %v451_v29, %v451_v29  ;;  %v522_v6 = vsel %vm355_vm0, %v481_v0, 0.0  ;;  %v454_v35 = vsub.f32 %v798_v48, %v1583_v54  ;;  %v484_v38 = vmul.f32 %v452_v3, %v452_v3 }
 0x182   : > { %v511_v16 = vadd.f32 %v510_v50, %v509_v42  ;;  %v524_v32 = vsel %vm355_vm0, %v482_v4, 0.0  ;;  %v455_v7 = vsub.f32 %v801_v51, %v1583_v54  ;;  %v485_v5 = vmul.f32 %v453_v31, %v453_v31 }
 0x183   : > { %v526_v13 = vsel %vm355_vm0, %v483_v1, 0.0  ;;  %v456_v42 = vsub.f32 %v802_v55, %v1583_v54  ;;  %v486_v43 = vmul.f32 %v454_v35, %v454_v35  ;;  %v528_v39 = vsel %vm355_vm0, %v484_v38, 0.0 }
 0x184   : > { %v513_v20 = vadd.f32 %v512_v11, %v511_v16  ;;  %v457_v47 = vsub.f32 %v805_v58, %v1583_v54  ;;  %v487_v50 = vmul.f32 %v455_v7, %v455_v7  ;;  %v530_v16 = vsel %vm355_vm0, %v485_v5, 0.0 }
 0x185   : > { %v458_v56 = vsub.f32 %v806_v62, %v1583_v54  ;;  %v488_v59 = vmul.f32 %v456_v42, %v456_v42  ;;  %v532_v46 = vsel %vm355_vm0, %v486_v43, 0.0  ;;  %v459_v11 = vsub.f32 %v809_v9, %v1583_v54 }
 0x186   : > { %v515_v23 = vadd.f32 %v514_v14, %v513_v20  ;;  %v489_v20 = vmul.f32 %v457_v47, %v457_v47  ;;  %v534_v63 = vsel %vm355_vm0, %v487_v50, 0.0  ;;  %v460_v26 = vsub.f32 %v810_v15, %v1583_v54 }
 0x187   : > { %v490_v14 = vmul.f32 %v458_v56, %v458_v56  ;;  %v536_v53 = vsel %vm355_vm0, %v488_v59, 0.0  ;;  %v491_v19 = vmul.f32 %v459_v11, %v459_v11  ;;  %v463_v29 = vsub.f32 %v817_v33, %v1583_v54 }
 0x188   : > { %v517_v27 = vadd.f32 %v516_v18, %v515_v23  ;;  %v461_v23 = vsub.f32 %v813_v21, %v1583_v54  ;;  %v538_v22 = vsel %vm355_vm0, %v489_v20, 0.0  ;;  %v462_v18 = vsub.f32 %v814_v28, %v1583_v54 }
 0x189   : > { %v540_v60 = vsel %vm355_vm0, %v490_v14, 0.0  ;;  %v465_v4 = vsub.f32 %v821_v45, %v1583_v54  ;;  %v466_v31 = vsub.f32 %v822_v52, %v1583_v54  ;;  %v468_v38 = vsub.f32 %v826_v8, %v1583_v54 }
 0x18a   : > { %v519_v30 = vadd.f32 %v518_v2, %v517_v27  ;;  %v492_v27 = vmul.f32 %v460_v26, %v460_v26  ;;  %v493_v0 = vmul.f32 %v461_v23, %v461_v23  ;;  %v542_v2 = vsel %vm355_vm0, %v491_v19, 0.0 }
 0x18b   : > { %v494_v3 = vmul.f32 %v462_v18, %v462_v18  ;;  %v500_v42 = vmul.f32 %v468_v38, %v468_v38 }
 0x18c   : > { %v521_v34 = vadd.f32 %v520_v25, %v519_v30  ;;  %v464_v30 = vsub.f32 %v818_v40, %v1583_v54  ;;  %v544_v12 = vsel %vm355_vm0, %v492_v27, 0.0  ;;  %v495_v25 = vmul.f32 %v463_v29, %v463_v29  ;;  %v587_v29 = vld [vmem:[#allocation5] sm:$0x1] }
 0x18d   : > { %v548_v24 = vsel %vm355_vm0, %v494_v3, 0.0  ;;  %v560_v50 = vsel %vm355_vm0, %v500_v42, 0.0 }
 0x18e   : > { %v523_v37 = vadd.f32 %v522_v6, %v521_v34  ;;  %v546_v34 = vsel %vm355_vm0, %v493_v0, 0.0  ;;  %v496_v1 = vmul.f32 %v464_v30, %v464_v30  ;;  %v467_v6 = vsub.f32 %v825_v57, %v1583_v54 }
 0x18f   : > { %v550_v35 = vsel %vm355_vm0, %v495_v25, 0.0 }
 0x190   : > { %v525_v41 = vadd.f32 %v524_v32, %v523_v37  ;;  %v497_v37 = vmul.f32 %v465_v4, %v465_v4  ;;  %v498_v32 = vmul.f32 %v466_v31, %v466_v31  ;;  %v552_v36 = vsel %vm355_vm0, %v496_v1, 0.0 }
 0x191   : > { %v499_v7 = vmul.f32 %v467_v6, %v467_v6 }
 0x192   : > { %v527_v44 = vadd.f32 %v526_v13, %v525_v41  ;;  %v469_v41 = vsub.f32 %v829_v17, %v1583_v54  ;;  %v554_v5 = vsel %vm355_vm0, %v497_v37, 0.0  ;;  %v1834_v13 = vunpack.c.h.bf16 %v1557_v61 }
 0x193   : > { %v556_v49 = vsel %vm355_vm0, %v498_v32, 0.0 }
 0x194   : > { %v529_v48 = vadd.f32 %v528_v39, %v527_v44  ;;  %v470_v44 = vsub.f32 %v1834_v13, %v1583_v54  ;;  %v501_v43 = vmul.f32 %v469_v41, %v469_v41  ;;  %v558_v39 = vsel %vm355_vm0, %v499_v7, 0.0 }
 0x196   : > { %v531_v51 = vadd.f32 %v530_v16, %v529_v48  ;;  %v502_v47 = vmul.f32 %v470_v44, %v470_v44  ;;  %v562_v16 = vsel %vm355_vm0, %v501_v43, 0.0 }
 0x198   : > { %v533_v55 = vadd.f32 %v532_v46, %v531_v51  ;;  %v564_v56 = vsel %vm355_vm0, %v502_v47, 0.0 }
 0x19a   : > { %v535_v58 = vadd.f32 %v534_v63, %v533_v55 }
 0x19c   : > { %v537_v62 = vadd.f32 %v536_v53, %v535_v58 }
 0x19e   : > { %v539_v9 = vadd.f32 %v538_v22, %v537_v62 }
 0x1a0   : > { %v541_v15 = vadd.f32 %v540_v60, %v539_v9 }
 0x1a2   : > { %v543_v21 = vadd.f32 %v542_v2, %v541_v15 }
 0x1a4   : > { %v545_v28 = vadd.f32 %v544_v12, %v543_v21 }
 0x1a6   : > { %v547_v33 = vadd.f32 %v546_v34, %v545_v28 }
 0x1a8   : > { %v549_v40 = vadd.f32 %v548_v24, %v547_v33 }
 0x1aa   : > { %v551_v45 = vadd.f32 %v550_v35, %v549_v40 }
 0x1ac   : > { %v553_v52 = vadd.f32 %v552_v36, %v551_v45 }
 0x1ae   : > { %v555_v57 = vadd.f32 %v554_v5, %v553_v52 }
 0x1b0   : > { %v557_v8 = vadd.f32 %v556_v49, %v555_v57 }
 0x1b2   : > { %v559_v48 = vadd.f32 %v558_v39, %v557_v8 }
 0x1b4   : > { %v561_v17 = vadd.f32 %v560_v50, %v559_v48 }
 0x1b6   : > { %v563_v51 = vadd.f32 %v562_v16, %v561_v17 }
 0x1b8   : > { %v565_v59 = vadd.f32 %v564_v56, %v563_v51 }
 0x1ba   : > { %v566_v61 = vrot.slane %v565_v59, 4 }
 0x1bc   : > { %v567_v46 = vadd.f32 %v566_v61, %v565_v59 }
 0x1be   : > { %v568_v55 = vrot.slane %v567_v46, 2 }
 0x1c0   : > { %v569_v11 = vadd.f32 %v568_v55, %v567_v46 }
 0x1c2   : > { %v570_v20 = vrot.slane %v569_v11, 1 }
 0x1c4   : > { %v571_v63 = vadd.f32 %v570_v20, %v569_v11 }
 0x1c6   : > { %v572_v58 = vmul.f32 %v571_v63, %v1577_v10 }
 0x1c8   : > { %v573_v26 = vsel %vm426_vm1, %v572_v58, 0.0 }
 0x1c9   : > { %574 = vadd.xlane.f32.xlu0 %v573_v26 }
 0x256   : > { %v575_v14 = vpop.xlane.xlu0 %574 }
 0x257   : > { %v576_v53 = vmul.f32 0.001953125, %v575_v14 }
 0x259   : > { %v577_v62 = vadd.f32 1e-05, %v576_v53 }
 0x25b   : > { %930 = vrsqrt.f32 %v577_v62 }
 0x265   : > { %v931_v23 = vpop.eup %930 }
 0x266   : > { %v579_v19 = vmul.f32 %v931_v23, %v1577_v10  ;;  %v589_v10 = vld [vmem:[#allocation7] sm:$0x1] }
 0x268   : > { %v580_v22 = vsel %vm426_vm1, %v579_v19, 0.0 }
 0x269   : > { %v581_v9 = vrot.slane %v580_v22, 4 }
 0x26b   : > { %v582_v18 = vadd.f32 %v581_v9, %v580_v22 }
 0x26d   : > { %v583_v27 = vrot.slane %v582_v18, 2 }
 0x26f   : > { %v584_v60 = vadd.f32 %v583_v27, %v582_v18 }
 0x271   : > { %v585_v15 = vrot.slane %v584_v60, 1 }
 0x273   : > { %v586_v0 = vadd.f32 %v585_v15, %v584_v60 }
 0x275   : > { %v588_v2 = vmul.f32 %v587_v29, %v586_v0 }
 0x277   : > { %593 = vst.msk [vmem:[%s283_s26] sm:$0x1] %vm592_vm2, %v588_v2  ;;  %v590_v21 = vmul.f32 %v588_v2, %v1583_v54 }
 0x278   : > { %1059 = shalt.err (!%p1056_p13)
}
 0x279   : > { %s1060_s27 = scalar_lea.hbm %s1724_s30, 16  ;;  %s1064_s11 = scalar_lea.hbm %s1814_s4, 32 }
 0x27a   : > { %p1061_p0 = scmp.ne.s32.totalorder %s1724_s30, %s1060_s27  ;;  %p1065_p9 = scmp.lt.u32.totalorder %s1724_s30, %s1814_s4 }
 0x27b   : > { %p1066_p12 = scmp.lt.u32.totalorder %s1064_s11, %s1060_s27  ;;  %p1068_p1 = scmp.lt.u32.totalorder %s1060_s27, %s1724_s30 }
 0x27c   : > { %p1062_p5 = pnand %p1061_p0, %p1335_p6 }
 0x27d   : > { %p1067_p2 = por %p1066_p12, %p1065_p9 }
 0x27e   : > { %p1063_p11 = pneg %p1062_p5 }
 0x27f   : > { %p1069_p4 = por %p1068_p1, %p1067_p2 }
 0x281   : > { %p1070_p8 = pnand %p1069_p4, %p1063_p11 }
 0x283   : > { %1073 = shalt.err (!%p1070_p8)
}
 0x284   : > { %860 = dma.vmem_to_hbm [thread:$0]  (%p1335_p6), %s1726_s9, 16, %s1724_s30, %s596_s7   ;;  %v591_v54 = vsub.f32 %v589_v10, %v590_v21 }
 0x285   : > { %s1762_s28 = scalar_lea.hbm %s1815_s5, %s762_s24  ;;  %s600_s27 = scalar_lea.sflag [#allocation12], %s1383_s6 }
 0x286   : > { %594 = vst.msk [vmem:[%s289_s23] sm:$0x1] %vm592_vm2, %v591_v54  ;;  %s1074_s8 = scalar_lea.vmem %s1765_s29, 16  ;;  %s1161_s22 = smov [#allocation11]  }
 0x287   : > { %p1075_p3 = scmp.ne.s32.totalorder %s1765_s29, %s1074_s8  ;;  %s1078_s9 = sshll.u32 %s1161_s22, 4  ;;  %s1079_s9 = int_to_ptr.vmem [resolvable:$false] %s1078_s9 }
 0x288   : > { %s1080_s30 = scalar_lea.vmem %s1079_s9, 32  ;;  %p1081_p13 = scmp.lt.s32.totalorder %s1765_s29, %s1079_s9 }
 0x289   : > { %p1076_p7 = pnand %p1075_p3, %p1335_p6  ;;  %p1082_p0 = scmp.lt.s32.totalorder %s1080_s30, %s1074_s8 }
 0x28b   : > { %p1077_p10 = pneg %p1076_p7  ;;  %p1083_p5 = por %p1082_p0, %p1081_p13 }
 0x28d   : > { %p1084_p11 = pnand %p1083_p5, %p1077_p10 }
 0x28f   : > { %1087 = shalt.err (!%p1084_p11)
}
 0x290   : > { %s1088_s6 = scalar_lea.hbm %s1762_s28, 16  ;;  %s1092_s7 = scalar_lea.hbm %s1815_s5, 32 }
 0x291   : > { %p1089_p9 = scmp.ne.s32.totalorder %s1762_s28, %s1088_s6  ;;  %p1093_p1 = scmp.lt.u32.totalorder %s1762_s28, %s1815_s5 }
 0x292   : > { %p1094_p4 = scmp.lt.u32.totalorder %s1092_s7, %s1088_s6  ;;  %p1096_p3 = scmp.lt.u32.totalorder %s1088_s6, %s1762_s28 }
 0x293   : > { %p1090_p12 = pnand %p1089_p9, %p1335_p6 }
 0x294   : > { %p1095_p8 = por %p1094_p4, %p1093_p1 }
 0x295   : > { %p1091_p2 = pneg %p1090_p12 }
 0x296   : > { %p1097_p7 = por %p1096_p3, %p1095_p8 }
 0x298   : > { %p1098_p10 = pnand %p1097_p7, %p1091_p2 }
 0x29a   : > { %1101 = shalt.err (!%p1098_p10)
}
 0x29b   : > { %861 = dma.vmem_to_hbm [thread:$0]  (%p1335_p6), %s1765_s29, 16, %s1762_s28, %s600_s27  }
 0x29c PF: > { %s637_s12 = sand.u32 1, %s1140_s18   ;;  %p1835_p13 = scmp.ne.s32.totalorder %s1821_s25, 0 }
 0x29d   : > { %p1836_p0 = scmp.ge.s32.totalorder %s1152_s21, 2  ;;  %s638_s13 = scalar_lea.sflag [#allocation4], %s637_s12 }
 0x29f   : > { %p879_p5 = pnand %p1836_p0, %p1835_p13 }
 0x2a1   : > { %1131 = dma.done.wait (!%p879_p5), %s638_s13, 16  }
 0x2a2   : > { %1133 = vsyncadd (!%p879_p5), %s638_s13, 4294967280  ;;  %s646_s10 = scalar_lea.sflag [#allocation12], %s637_s12 }
 0x2a3   : > { %1135 = dma.done.wait (!%p879_p5), %s646_s10, 16  }
 0x2a4   : > { %1137 = vsyncadd (!%p879_p5), %s646_s10, 4294967280  ;;  %p24_p6 = scmp.ge.s32.totalorder %s1321_s14, 4   ;;  %s1837_s18 = smov %s1144_s19 }
 0x2a5   : > { %s1838_s19 = smov %s1148_s20  ;;  %s1839_s20 = smov %s1331_s16 }
 0x2a6   : > { %s1840_s21 = smov %s1321_s14  ;;  %26 = sbr.rel (!%p24_p6) target bundleno = 9 (0x9), region = 110 }
 0x2ad   :  { %650 = vsyncpa [#allocation3], 1 }
 0x2ae   :  { %652 = vsyncpa [#allocation3 + $0x1], 1 }
 0x2af   :  { %653 = vsyncpa [#allocation6], 1 }
 0x2b0   :  { %654 = vsyncpa [#allocation9], 1 }
 0x2b1   :  { %655 = vsyncpa [#allocation4], 1 }
 0x2b2   :  { %657 = vsyncpa [#allocation4 + $0x1], 1 }
 0x2b3   :  { %658 = vsyncpa [#allocation12], 1 }
 0x2b4   :  { %660 = vsyncpa [#allocation12 + $0x1], 1 }

// kernel: resnetv2_block.10
= control target key start
LH: loop header
LB: loop body
LE: loop exit
PB: predicated region body
PF: predicated region fallthrough
CT: control target
= control target key end

     0   :  { %11 = vsyncpa [#allocation3], 0  ;;  %s1270_s0 = inlined_call_operand.hbm [shape: bf16[2,64,4], index: 0, kind: input, shape index: {}]   ;;  %s1271_s1 = inlined_call_operand.hbm [shape: f32[1,4], index: 1, kind: input, shape index: {}]   ;;  %s1272_s2 = inlined_call_operand.hbm [shape: f32[1,4], index: 2, kind: input, shape index: {}]   ;;  %s1273_s3 = inlined_call_operand.hbm [shape: f32[2,4], index: 3, kind: input, shape index: {}]   ;;  %s1274_s4 = inlined_call_operand.hbm [shape: f32[2,1,4], index: 4, kind: output, shape index: {0}]   ;;  %s1275_s5 = inlined_call_operand.hbm [shape: f32[2,1,4], index: 5, kind: output, shape index: {1}]  }
   0x1   :  { %13 = vsyncpa [#allocation3 + $0x1], 0 }
   0x2   :  { %14 = vsyncpa [#allocation6], 0 }
   0x3   :  { %15 = vsyncpa [#allocation9], 0 }
   0x4   :  { %16 = vsyncpa [#allocation4], 0 }
   0x5   :  { %18 = vsyncpa [#allocation4 + $0x1], 0 }
   0x6   :  { %19 = vsyncpa [#allocation12], 0 }
   0x7   :  { %21 = vsyncpa [#allocation12 + $0x1], 0  ;;  %s940_s18 = smov 0   ;;  %s942_s19 = smov 0  }
   0x8   :  { %s944_s20 = smov 0   ;;  %s946_s21 = smov 0  }
   0x9 LB: > { %s961_s22 = sadd.s32 4294967295, %s900_s21   ;;  %s556_s23 = sadd.s32 4294967294, %s900_s21   ;;  %s900_s21 = sphi %s946_s21, %s1298_s21   ;;  %s896_s20 = sphi %s944_s20, %s1297_s20   ;;  %s892_s19 = sphi %s942_s19, %s1296_s19   ;;  %s888_s18 = sphi %s940_s18, %s1295_s18  }
   0xa   : > { %p47_p0 = scmp.ne.s32.totalorder %s892_s19, %s888_s18  ;;  %p1276_p1 = scmp.eq.s32.totalorder %s961_s22, 0 }
   0xb   : > { %p140_p3 = scmp.eq.s32.totalorder %s556_s23, 1  ;;  %p557_p5 = scmp.ge.s32.totalorder %s900_s21, 1 }
   0xc   : > { %p970_p4 = por %p1276_p1, %p47_p0  ;;  %p173_p7 = scmp.lt.s32.totalorder %s900_s21, 3 }
   0xd   : > { %p975_p6 = por %p140_p3, %p47_p0  ;;  %s902_s27 = smov [#allocation5]  }
   0xe   : > { %s1279_s24 = scalar_select %p970_p4, 1, 0 }
   0xf   : > { %s1280_s25 = scalar_select %p975_p6, 1, 0 }
  0x10   : > { %p980_p8 = pnand %p557_p5, %p173_p7  ;;  %s186_s28 = sshll.u32 %s902_s27, 4  ;;  %s187_s28 = int_to_ptr.vmem [resolvable:$true] %s186_s28 }
  0x11   : > { %s903_s29 = smov [#allocation7]   ;;  %s904_s7 = smov [#allocation8]  }
  0x12   : > { %s1281_s26 = scalar_select %p980_p8, 1, 0 }
  0x13   : > { %p612_p10 = pneg %p980_p8  ;;  %s197_s30 = sshll.u32 %s903_s29, 4  ;;  %s993_s30 = int_to_ptr.vmem [resolvable:$true] %s197_s30 }
  0x14   : > { %s208_s8 = sshll.u32 %s904_s7, 4  ;;  %s680_s11 = scalar_lea.hbm %s1271_s1, 16  ;;  %s995_s8 = int_to_ptr.vmem [resolvable:$true] %s208_s8 }
  0x15   : > { %p989_p11 = pnand %p612_p10, %p1276_p1  ;;  %p681_p12 = scmp.ne.s32.totalorder %s1271_s1, %s680_s11 }
  0x16   : > { %p687_p5 = scmp.lt.u32.totalorder %s680_s11, %s1271_s1 }
  0x17   : > { %p1005_p13 = pneg %p989_p11 }
  0x19   : > { %p683_p0 = pnand %p1005_p13, %p681_p12 }
  0x1b   : > { %p684_p3 = pneg %p683_p0 }
  0x1d   : > { %p689_p7 = pnand %p687_p5, %p684_p3 }
  0x1f   : > { %692 = shalt.err (!%p689_p7)
}
  0x20   : > { %s693_s17 = scalar_lea.vmem %s187_s28, 16  ;;  %s700_s23 = scalar_lea.vmem %s187_s28, 32 }
  0x21   : > { %p694_p10 = scmp.ne.s32.totalorder %s187_s28, %s693_s17  ;;  %p701_p2 = scmp.lt.s32.totalorder %s187_s28, %s187_s28 }
  0x22   : > { %p702_p6 = scmp.lt.s32.totalorder %s700_s23, %s693_s17 }
  0x23   : > { %p696_p9 = pnand %p694_p10, %p1005_p13 }
  0x24   : > { %p703_p4 = por %p702_p6, %p701_p2 }
  0x25   : > { %p697_p1 = pneg %p696_p9 }
  0x27   : > { %p704_p8 = pnand %p703_p4, %p697_p1 }
  0x29   : > { %707 = shalt.err (!%p704_p8)
}
  0x2a   : > { %615 = dma.hbm_to_vmem [thread:$0]  (!%p989_p11), %s1271_s1, 16, %s187_s28, [#allocation6]  }
  0x2b   : > { %s708_s10 = scalar_lea.hbm %s1272_s2, 16 }
  0x2c   : > { %p709_p9 = scmp.ne.s32.totalorder %s1272_s2, %s708_s10  ;;  %p715_p1 = scmp.lt.u32.totalorder %s708_s10, %s1272_s2 }
  0x2e   : > { %p711_p12 = pnand %p709_p9, %p1005_p13 }
  0x30   : > { %p712_p2 = pneg %p711_p12 }
  0x32   : > { %p717_p4 = pnand %p715_p1, %p712_p2 }
  0x34   : > { %720 = shalt.err (!%p717_p4)
}
  0x35   : > { %s721_s28 = scalar_lea.vmem %s993_s30, 16  ;;  %s728_s16 = scalar_lea.vmem %s993_s30, 32 }
  0x36   : > { %p722_p6 = scmp.ne.s32.totalorder %s993_s30, %s721_s28  ;;  %p729_p3 = scmp.lt.s32.totalorder %s993_s30, %s993_s30 }
  0x37   : > { %p730_p5 = scmp.lt.s32.totalorder %s728_s16, %s721_s28 }
  0x38   : > { %p724_p8 = pnand %p722_p6, %p1005_p13 }
  0x39   : > { %p731_p7 = por %p730_p5, %p729_p3 }
  0x3a   : > { %p725_p0 = pneg %p724_p8 }
  0x3c   : > { %p732_p10 = pnand %p731_p7, %p725_p0 }
  0x3e   : > { %735 = shalt.err (!%p732_p10)
}
  0x3f   : > { %618 = dma.hbm_to_vmem [thread:$0]  (!%p989_p11), %s1272_s2, 16, %s993_s30, [#allocation6]  }
  0x40   : > { %s736_s7 = scalar_lea.hbm %s1273_s3, 32 }
  0x41   : > { %p737_p9 = scmp.ne.s32.totalorder %s1273_s3, %s736_s7  ;;  %p743_p1 = scmp.lt.u32.totalorder %s736_s7, %s1273_s3 }
  0x43   : > { %p739_p12 = pnand %p737_p9, %p1005_p13 }
  0x45   : > { %p740_p2 = pneg %p739_p12 }
  0x47   : > { %p745_p4 = pnand %p743_p1, %p740_p2 }
  0x49   : > { %748 = shalt.err (!%p745_p4)
}
  0x4a   : > { %s749_s30 = scalar_lea.vmem %s995_s8, 32  ;;  %p757_p3 = scmp.lt.s32.totalorder %s995_s8, %s995_s8 }
  0x4b   : > { %p750_p6 = scmp.ne.s32.totalorder %s995_s8, %s749_s30  ;;  %p758_p5 = scmp.lt.s32.totalorder %s749_s30, %s749_s30 }
  0x4d   : > { %p752_p8 = pnand %p750_p6, %p1005_p13  ;;  %p759_p7 = por %p758_p5, %p757_p3 }
  0x4f   : > { %p753_p0 = pneg %p752_p8 }
  0x51   : > { %p760_p10 = pnand %p759_p7, %p753_p0 }
  0x53   : > { %763 = shalt.err (!%p760_p10)
}
  0x54   : > { %621 = dma.hbm_to_vmem [thread:$0]  (!%p989_p11), %s1273_s3, 32, %s995_s8, [#allocation9]  }
  0x55   : > { %s1069_s14 = sadd.s32 1, %s900_s21   ;;  %s34_s28 = sadd.s32 1, %s896_s20 }
  0x56   : > { %s31_s6 = ssub.s32 %s900_s21, %s1069_s14  ;;  %p41_p9 = scmp.ne.s32.totalorder %s896_s20, %s892_s19 }
  0x57   : > { %p32_p13 = scmp.eq.s32.totalorder %s31_s6, 0  ;;  %p42_p12 = scmp.eq.s32.totalorder %s900_s21, 0 }
  0x58   : > { %p636_p2 = scmp.lt.s32.totalorder %s900_s21, 2  ;;  %p1284_p4 = scmp.eq.s32.totalorder %s961_s22, 1 }
  0x59   : > { %s1079_s16 = scalar_select %p32_p13, %s896_s20, %s34_s28  }
  0x5a   : > { %p43_p1 = por %p42_p12, %p41_p9  ;;  %p1083_p6 = por %p1284_p4, %p41_p9 }
  0x5b   : > { %s219_s23 = sand.u32 1, %s896_s20   ;;  %s574_s27 = sshll.u32 %s900_s21, 9 }
  0x5c   : > { %s562_s8 = sshll.u32 %s219_s23, 5  ;;  %s1092_s9 = scalar_lea.hbm %s1270_s0, %s574_s27 }
  0x5d   : > { %s223_s10 = scalar_lea.vmem [#allocation2], %s562_s8  ;;  %p1094_p11 = pnand %p636_p2, %p43_p1 }
  0x5e   : > { %s230_s11 = sshll.u32 %s223_s10, 4  ;;  %s1100_s30 = scalar_lea.sflag [#allocation3], %s219_s23  ;;  %s1098_s11 = int_to_ptr.vmem [resolvable:$true] %s230_s11 }
  0x5f   : > { %s764_s13 = scalar_lea.hbm %s1092_s9, 512  ;;  %p766_p0 = pneg %p1094_p11 }
  0x60   : > { %p765_p8 = scmp.ne.s32.totalorder %s1092_s9, %s764_s13  ;;  %s769_s28 = scalar_lea.hbm %s1270_s0, 1024 }
  0x61   : > { %p770_p7 = scmp.lt.u32.totalorder %s1092_s9, %s1270_s0  ;;  %p771_p10 = scmp.lt.u32.totalorder %s769_s28, %s764_s13 }
  0x62   : > { %p767_p3 = pnand %p766_p0, %p765_p8  ;;  %p773_p9 = scmp.lt.u32.totalorder %s764_s13, %s1092_s9 }
  0x63   : > { %p772_p13 = por %p771_p10, %p770_p7 }
  0x64   : > { %p768_p5 = pneg %p767_p3 }
  0x65   : > { %p774_p12 = por %p773_p9, %p772_p13 }
  0x67   : > { %p775_p2 = pnand %p774_p12, %p768_p5 }
  0x69   : > { %778 = shalt.err (!%p775_p2)
}
  0x6a   : > { %s779_s23 = scalar_lea.vmem %s1098_s11, 512  ;;  %s905_s29 = smov [#allocation2]  }
  0x6b   : > { %p780_p1 = scmp.ne.s32.totalorder %s1098_s11, %s779_s23  ;;  %s784_s7 = sshll.u32 %s905_s29, 4  ;;  %s785_s7 = int_to_ptr.vmem [resolvable:$false] %s784_s7 }
  0x6c   : > { %s786_s10 = scalar_lea.vmem %s785_s7, 1024  ;;  %p787_p3 = scmp.lt.s32.totalorder %s1098_s11, %s785_s7 }
  0x6d   : > { %p782_p4 = pnand %p780_p1, %p766_p0  ;;  %p788_p7 = scmp.lt.s32.totalorder %s786_s10, %s779_s23 }
  0x6f   : > { %p783_p8 = pneg %p782_p4  ;;  %p789_p10 = por %p788_p7, %p787_p3 }
  0x71   : > { %p790_p13 = pnand %p789_p10, %p783_p8 }
  0x73   : > { %793 = shalt.err (!%p790_p13)
}
  0x74   : > { %s906_s13 = smov 64   ;;  %s907_s15 = smov 4  }
  0x75   : > { %625 = dma.hbm_to_vmem [thread:$0]  (!%p1094_p11), %s1092_s9, 512, %s1098_s11, %s1100_s30, %s906_s13, %s906_s13, %s907_s15  }
  0x76   : > { %p1287_p0 = scmp.ne.s32.totalorder %s1281_s26, 0 }
  0x77   : > { %s1131_s6 = sand.u32 (!%p1287_p0), 1, %s892_s19   ;;  %p1288_p5 = scmp.ne.s32.totalorder (!%p1287_p0), %s1279_s24, 0 }
  0x78   : > { %242 = sbr.rel (%p1287_p0) target bundleno = 571 (0x23b), region = 36  ;;  %s566_s28 = sshll.u32 (!%p1287_p0), %s1131_s6, 5 }
  0x79   : > { %s245_s27 = scalar_lea.sflag (!%p1287_p0), [#allocation3], %s1131_s6  ;;  %s248_s8 = scalar_lea.vmem (!%p1287_p0), [#allocation2], %s566_s28 }
  0x7f   : > { %867 = dma.done.wait (%p1288_p5), %s245_s27, 512  }
  0x80   : > { %869 = vsyncadd (%p1288_p5), %s245_s27, 4294966784  ;;  %p1289_p9 = scmp.eq.s32.totalorder %s961_s22, 0 }
  0x82   : > { %871 = dma.done.wait (%p1289_p9), [#allocation6], 32   ;;  %p1290_p11 = pmov %p1289_p9 }
  0x83   : > { %p1291_p12 = pmov %p1289_p9 }
  0x84   : > { %873 = vsyncadd (%p1290_p11), [#allocation6], 4294967264 }
  0x85   : > { %875 = dma.done.wait (%p1291_p12), [#allocation9], 32   ;;  %p1292_p2 = pmov %p1289_p9 }
  0x86   : > { %v576_v0 = vld [vmem:[%s248_s8] sm:$0xff]   ;;  %v591_v1 = vld [vmem:[%s248_s8 + $0x8] sm:$0xff]   ;;  %v592_v2 = vld [vmem:[%s248_s8 + $0x10] sm:$0xff]   ;;  %vm307_vm0 = vcmask 31744   ;;  %vm330_vm1 = vcmask 25600   ;;  %s570_s24 = sshll.u32 %s961_s22, 4 }
  0x87   : > { %877 = vsyncadd (%p1292_p2), [#allocation9], 4294967264  ;;  %v577_v3 = vunpack.c.l.bf16 %v576_v0  ;;  %v578_v4 = vunpack.c.h.bf16 %v576_v0  ;;  %v581_v5 = vunpack.c.l.bf16 %v591_v1  ;;  %v582_v6 = vunpack.c.h.bf16 %v591_v1  ;;  %v593_v11 = vld [vmem:[%s248_s8 + $0x18] sm:$0xff]   ;;  %v306_v32 = vld [vmem:[#allocation8] sm:$0x3]  ;;  %s283_s26 = scalar_lea.vmem [#allocation10], %s1131_s6  ;;  %s1184_s30 = scalar_lea.hbm %s1274_s4, %s570_s24 }
  0x88   : > { %v585_v7 = vunpack.c.l.bf16 %v592_v2  ;;  %v586_v13 = vunpack.c.h.bf16 %v592_v2  ;;  %v589_v16 = vunpack.c.l.bf16 %v593_v11  ;;  %v590_v19 = vunpack.c.h.bf16 %v593_v11  ;;  %s420_s9 = sshll.u32 %s283_s26, 4  ;;  %s289_s23 = scalar_lea.vmem [#allocation11], %s1131_s6  ;;  %s1186_s9 = int_to_ptr.vmem [resolvable:$true] %s420_s9 }
  0x89   : > { %v308_v8 = vsel %vm307_vm0, %v577_v3, 0.0  ;;  %v309_v9 = vsel %vm307_vm0, %v578_v4, 0.0  ;;  %v311_v10 = vsel %vm307_vm0, %v581_v5, 0.0  ;;  %v313_v14 = vsel %vm307_vm0, %v582_v6, 0.0  ;;  %s1191_s29 = sshll.u32 %s289_s23, 4  ;;  %s404_s7 = scalar_lea.sflag [#allocation4], %s1131_s6  ;;  %s1225_s29 = int_to_ptr.vmem [resolvable:$true] %s1191_s29 }
  0x8a   : > { %v310_v12 = vadd.f32 %v309_v9, %v308_v8  ;;  %v315_v17 = vsel %vm307_vm0, %v585_v7, 0.0  ;;  %v317_v20 = vsel %vm307_vm0, %v586_v13, 0.0  ;;  %v319_v22 = vsel %vm307_vm0, %v589_v16, 0.0  ;;  %s794_s10 = scalar_lea.vmem %s1186_s9, 16  ;;  %s908_s13 = smov [#allocation10]  }
  0x8b   : > { %v321_v24 = vsel %vm307_vm0, %v590_v19, 0.0  ;;  %vm400_vm2 = vcmask 24576   ;;  %p795_p1 = scmp.ne.s32.totalorder %s1186_s9, %s794_s10  ;;  %s798_s15 = sshll.u32 %s908_s13, 4  ;;  %s799_s15 = int_to_ptr.vmem [resolvable:$false] %s798_s15 }
  0x8c   : > { %v312_v15 = vadd.f32 %v311_v10, %v310_v12  ;;  %s800_s28 = scalar_lea.vmem %s799_s15, 32  ;;  %p801_p3 = scmp.lt.s32.totalorder %s1186_s9, %s799_s15 }
  0x8d   : > { %p796_p4 = pnand %p795_p1, %p1083_p6  ;;  %p802_p7 = scmp.lt.s32.totalorder %s800_s28, %s794_s10 }
  0x8e   : > { %v314_v18 = vadd.f32 %v313_v14, %v312_v15 }
  0x8f   : > { %p797_p8 = pneg %p796_p4  ;;  %p803_p10 = por %p802_p7, %p801_p3 }
  0x90   : > { %v316_v21 = vadd.f32 %v315_v17, %v314_v18 }
  0x91   : > { %p804_p13 = pnand %p803_p10, %p797_p8 }
  0x92   : > { %v318_v23 = vadd.f32 %v317_v20, %v316_v21 }
  0x94   : > { %v320_v25 = vadd.f32 %v319_v22, %v318_v23 }
  0x96   : > { %v322_v26 = vadd.f32 %v321_v24, %v320_v25 }
  0x98   : > { %v323_v27 = vrot.slane %v322_v26, 4 }
  0x9a   : > { %v324_v28 = vadd.f32 %v323_v27, %v322_v26 }
  0x9c   : > { %v325_v29 = vrot.slane %v324_v28, 2 }
  0x9e   : > { %v326_v30 = vadd.f32 %v325_v29, %v324_v28 }
  0xa0   : > { %v327_v31 = vrot.slane %v326_v30, 1 }
  0xa2   : > { %v328_v33 = vadd.f32 %v327_v31, %v326_v30 }
  0xa4   : > { %v329_v34 = vmul.f32 %v328_v33, %v306_v32  ;;  %v395_v33 = vld [vmem:[#allocation5] sm:$0x1] }
  0xa6   : > { %v331_v35 = vsel %vm330_vm1, %v329_v34, 0.0 }
  0xa7   : > { %332 = vadd.xlane.f32.xlu0 %v331_v35 }
 0x134   : > { %v333_v36 = vpop.xlane.xlu0 %332 }
 0x135   : > { %v334_v37 = vmul.f32 0.0078125, %v333_v36 }
 0x137   : > { %v335_v38 = vmul.f32 %v334_v37, %v306_v32 }
 0x139   : > { %v336_v39 = vsel %vm330_vm1, %v335_v38, 0.0 }
 0x13a   : > { %v337_v40 = vrot.slane %v336_v39, 4 }
 0x13c   : > { %v338_v41 = vadd.f32 %v337_v40, %v336_v39 }
 0x13e   : > { %v339_v42 = vrot.slane %v338_v41, 2 }
 0x140   : > { %v340_v43 = vadd.f32 %v339_v42, %v338_v41 }
 0x142   : > { %v341_v44 = vrot.slane %v340_v43, 1 }
 0x144   : > { %v1157_v45 = vadd.f32 %v341_v44, %v340_v43 }
 0x146   : > { %v343_v46 = vsub.f32 %v577_v3, %v1157_v45  ;;  %v344_v47 = vsub.f32 %v578_v4, %v1157_v45  ;;  %v345_v48 = vsub.f32 %v581_v5, %v1157_v45  ;;  %v346_v49 = vsub.f32 %v582_v6, %v1157_v45 }
 0x147   : > { %v347_v50 = vsub.f32 %v585_v7, %v1157_v45  ;;  %v348_v54 = vsub.f32 %v586_v13, %v1157_v45  ;;  %v349_v59 = vsub.f32 %v589_v16, %v1157_v45  ;;  %v350_v63 = vsub.f32 %v590_v19, %v1157_v45 }
 0x148   : > { %v351_v51 = vmul.f32 %v343_v46, %v343_v46  ;;  %v352_v52 = vmul.f32 %v344_v47, %v344_v47  ;;  %v353_v53 = vmul.f32 %v345_v48, %v345_v48  ;;  %v354_v55 = vmul.f32 %v346_v49, %v346_v49 }
 0x149   : > { %v355_v60 = vmul.f32 %v347_v50, %v347_v50  ;;  %v356_v0 = vmul.f32 %v348_v54, %v348_v54  ;;  %v357_v3 = vmul.f32 %v349_v59, %v349_v59  ;;  %v358_v6 = vmul.f32 %v350_v63, %v350_v63 }
 0x14a   : > { %v359_v56 = vsel %vm307_vm0, %v351_v51, 0.0  ;;  %v360_v57 = vsel %vm307_vm0, %v352_v52, 0.0  ;;  %v362_v61 = vsel %vm307_vm0, %v353_v53, 0.0  ;;  %v364_v1 = vsel %vm307_vm0, %v354_v55, 0.0 }
 0x14b   : > { %v361_v58 = vadd.f32 %v360_v57, %v359_v56  ;;  %v366_v4 = vsel %vm307_vm0, %v355_v60, 0.0  ;;  %v368_v7 = vsel %vm307_vm0, %v356_v0, 0.0  ;;  %v370_v9 = vsel %vm307_vm0, %v357_v3, 0.0 }
 0x14c   : > { %v372_v11 = vsel %vm307_vm0, %v358_v6, 0.0 }
 0x14d   : > { %v363_v62 = vadd.f32 %v362_v61, %v361_v58 }
 0x14f   : > { %v365_v2 = vadd.f32 %v364_v1, %v363_v62 }
 0x151   : > { %v367_v5 = vadd.f32 %v366_v4, %v365_v2 }
 0x153   : > { %v369_v8 = vadd.f32 %v368_v7, %v367_v5 }
 0x155   : > { %v371_v10 = vadd.f32 %v370_v9, %v369_v8 }
 0x157   : > { %v373_v12 = vadd.f32 %v372_v11, %v371_v10 }
 0x159   : > { %v374_v13 = vrot.slane %v373_v12, 4 }
 0x15b   : > { %v375_v14 = vadd.f32 %v374_v13, %v373_v12 }
 0x15d   : > { %v376_v15 = vrot.slane %v375_v14, 2 }
 0x15f   : > { %v377_v16 = vadd.f32 %v376_v15, %v375_v14 }
 0x161   : > { %v378_v17 = vrot.slane %v377_v16, 1 }
 0x163   : > { %v379_v18 = vadd.f32 %v378_v17, %v377_v16 }
 0x165   : > { %v380_v19 = vmul.f32 %v379_v18, %v306_v32 }
 0x167   : > { %v381_v20 = vsel %vm330_vm1, %v380_v19, 0.0 }
 0x168   : > { %382 = vadd.xlane.f32.xlu0 %v381_v20 }
 0x1f5   : > { %v383_v21 = vpop.xlane.xlu0 %382 }
 0x1f6   : > { %v384_v22 = vmul.f32 0.0078125, %v383_v21 }
 0x1f8   : > { %v385_v23 = vadd.f32 1e-05, %v384_v22 }
 0x1fa   : > { %678 = vrsqrt.f32 %v385_v23 }
 0x204   : > { %v679_v24 = vpop.eup %678 }
 0x205   : > { %v387_v25 = vmul.f32 %v679_v24, %v306_v32  ;;  %v397_v32 = vld [vmem:[#allocation7] sm:$0x1] }
 0x207   : > { %v388_v26 = vsel %vm330_vm1, %v387_v25, 0.0 }
 0x208   : > { %v389_v27 = vrot.slane %v388_v26, 4 }
 0x20a   : > { %v390_v28 = vadd.f32 %v389_v27, %v388_v26 }
 0x20c   : > { %v391_v29 = vrot.slane %v390_v28, 2 }
 0x20e   : > { %v392_v30 = vadd.f32 %v391_v29, %v390_v28 }
 0x210   : > { %v393_v31 = vrot.slane %v392_v30, 1 }
 0x212   : > { %v394_v34 = vadd.f32 %v393_v31, %v392_v30 }
 0x214   : > { %v396_v35 = vmul.f32 %v395_v33, %v394_v34 }
 0x216   : > { %401 = vst.msk [vmem:[%s283_s26] sm:$0x1] %vm400_vm2, %v396_v35  ;;  %v398_v36 = vmul.f32 %v396_v35, %v1157_v45 }
 0x217   : > { %807 = shalt.err (!%p804_p13)
}
 0x218   : > { %s808_s27 = scalar_lea.hbm %s1184_s30, 16  ;;  %s812_s11 = scalar_lea.hbm %s1274_s4, 32 }
 0x219   : > { %p809_p0 = scmp.ne.s32.totalorder %s1184_s30, %s808_s27  ;;  %p813_p11 = scmp.lt.u32.totalorder %s1184_s30, %s1274_s4 }
 0x21a   : > { %p814_p12 = scmp.lt.u32.totalorder %s812_s11, %s808_s27  ;;  %p816_p1 = scmp.lt.u32.totalorder %s808_s27, %s1184_s30 }
 0x21b   : > { %p810_p5 = pnand %p809_p0, %p1083_p6 }
 0x21c   : > { %p815_p2 = por %p814_p12, %p813_p11 }
 0x21d   : > { %p811_p9 = pneg %p810_p5 }
 0x21e   : > { %p817_p4 = por %p816_p1, %p815_p2 }
 0x220   : > { %p818_p8 = pnand %p817_p4, %p811_p9 }
 0x222   : > { %821 = shalt.err (!%p818_p8)
}
 0x223   : > { %608 = dma.vmem_to_hbm [thread:$0]  (%p1083_p6), %s1186_s9, 16, %s1184_s30, %s404_s7   ;;  %v399_v37 = vsub.f32 %v397_v32, %v398_v36 }
 0x224   : > { %s1222_s28 = scalar_lea.hbm %s1275_s5, %s570_s24  ;;  %s408_s27 = scalar_lea.sflag [#allocation12], %s1131_s6 }
 0x225   : > { %402 = vst.msk [vmem:[%s289_s23] sm:$0x1] %vm400_vm2, %v399_v37  ;;  %s822_s8 = scalar_lea.vmem %s1225_s29, 16  ;;  %s909_s22 = smov [#allocation11]  }
 0x226   : > { %p823_p3 = scmp.ne.s32.totalorder %s1225_s29, %s822_s8  ;;  %s826_s9 = sshll.u32 %s909_s22, 4  ;;  %s827_s9 = int_to_ptr.vmem [resolvable:$false] %s826_s9 }
 0x227   : > { %s828_s30 = scalar_lea.vmem %s827_s9, 32  ;;  %p829_p13 = scmp.lt.s32.totalorder %s1225_s29, %s827_s9 }
 0x228   : > { %p824_p7 = pnand %p823_p3, %p1083_p6  ;;  %p830_p0 = scmp.lt.s32.totalorder %s828_s30, %s822_s8 }
 0x22a   : > { %p825_p10 = pneg %p824_p7  ;;  %p831_p5 = por %p830_p0, %p829_p13 }
 0x22c   : > { %p832_p9 = pnand %p831_p5, %p825_p10 }
 0x22e   : > { %835 = shalt.err (!%p832_p9)
}
 0x22f   : > { %s836_s6 = scalar_lea.hbm %s1222_s28, 16  ;;  %s840_s7 = scalar_lea.hbm %s1275_s5, 32 }
 0x230   : > { %p837_p11 = scmp.ne.s32.totalorder %s1222_s28, %s836_s6  ;;  %p841_p1 = scmp.lt.u32.totalorder %s1222_s28, %s1275_s5 }
 0x231   : > { %p842_p4 = scmp.lt.u32.totalorder %s840_s7, %s836_s6  ;;  %p844_p3 = scmp.lt.u32.totalorder %s836_s6, %s1222_s28 }
 0x232   : > { %p838_p12 = pnand %p837_p11, %p1083_p6 }
 0x233   : > { %p843_p8 = por %p842_p4, %p841_p1 }
 0x234   : > { %p839_p2 = pneg %p838_p12 }
 0x235   : > { %p845_p7 = por %p844_p3, %p843_p8 }
 0x237   : > { %p846_p10 = pnand %p845_p7, %p839_p2 }
 0x239   : > { %849 = shalt.err (!%p846_p10)
}
 0x23a   : > { %609 = dma.vmem_to_hbm [thread:$0]  (%p1083_p6), %s1225_s29, 16, %s1222_s28, %s408_s27  }
 0x23b PF: > { %s445_s12 = sand.u32 1, %s888_s18   ;;  %p1293_p13 = scmp.ne.s32.totalorder %s1280_s25, 0 }
 0x23c   : > { %p1294_p0 = scmp.ge.s32.totalorder %s900_s21, 2  ;;  %s446_s13 = scalar_lea.sflag [#allocation4], %s445_s12 }
 0x23e   : > { %p627_p5 = pnand %p1294_p0, %p1293_p13 }
 0x240   : > { %879 = dma.done.wait (!%p627_p5), %s446_s13, 16  }
 0x241   : > { %881 = vsyncadd (!%p627_p5), %s446_s13, 4294967280  ;;  %s454_s10 = scalar_lea.sflag [#allocation12], %s445_s12 }
 0x242   : > { %883 = dma.done.wait (!%p627_p5), %s454_s10, 16  }
 0x243   : > { %885 = vsyncadd (!%p627_p5), %s454_s10, 4294967280  ;;  %p24_p6 = scmp.ge.s32.totalorder %s1069_s14, 4   ;;  %s1295_s18 = smov %s892_s19 }
 0x244   : > { %s1296_s19 = smov %s896_s20  ;;  %s1297_s20 = smov %s1079_s16 }
 0x245   : > { %s1298_s21 = smov %s1069_s14  ;;  %26 = sbr.rel (!%p24_p6) target bundleno = 9 (0x9), region = 110 }
 0x24c   :  { %458 = vsyncpa [#allocation3], 1 }
 0x24d   :  { %460 = vsyncpa [#allocation3 + $0x1], 1 }
 0x24e   :  { %461 = vsyncpa [#allocation6], 1 }
 0x24f   :  { %462 = vsyncpa [#allocation9], 1 }
 0x250   :  { %463 = vsyncpa [#allocation4], 1 }
 0x251   :  { %465 = vsyncpa [#allocation4 + $0x1], 1 }
 0x252   :  { %466 = vsyncpa [#allocation12], 1 }
 0x253   :  { %468 = vsyncpa [#allocation12 + $0x1], 1 }

// kernel: resnetv2_block.11
= control target key start
LH: loop header
LB: loop body
LE: loop exit
PB: predicated region body
PF: predicated region fallthrough
CT: control target
= control target key end

     0   :  { %s2080_s0 = inlined_call_operand.hbm [shape: bf16[2,64,4], index: 0, kind: input, shape index: {}]   ;;  %s2081_s1 = inlined_call_operand.hbm [shape: f32[2,1,4], index: 1, kind: input, shape index: {}]   ;;  %s2082_s2 = inlined_call_operand.hbm [shape: f32[2,1,4], index: 2, kind: input, shape index: {}]   ;;  %s2083_s3 = inlined_call_operand.hbm [shape: bf16[4,16], index: 3, kind: input, shape index: {}]   ;;  %s2084_s4 = inlined_call_operand.hbm [shape: bf16[2,8,2,8,16], index: 4, kind: input, shape index: {}]   ;;  %s2085_s5 = inlined_call_operand.hbm [shape: f32[2,1,8], index: 5, kind: input, shape index: {}]   ;;  %s2086_s6 = inlined_call_operand.hbm [shape: f32[2,1,8], index: 6, kind: input, shape index: {}]   ;;  %s2087_s7 = inlined_call_operand.hbm [shape: bf16[8,16], index: 7, kind: input, shape index: {}]   ;;  %s2088_s8 = inlined_call_operand.hbm [shape: f32[2,64,16], index: 8, kind: output, shape index: {}]  }
   0x1   :  { %2112 = sst [smem:[#allocation29_spill]] %s2080_s0 }
   0x2   :  { %2113 = sst [smem:[#allocation30_spill]] %s2081_s1 }
   0x3   :  { %2114 = sst [smem:[#allocation31_spill]] %s2082_s2 }
   0x4   :  { %2115 = sst [smem:[#allocation32_spill]] %s2087_s7 }
   0x5   :  { %2116 = sst [smem:[#allocation33_spill]] %s2088_s8 }
   0x6   :  { %13 = vsyncpa [#allocation3], 0 }
   0x7   :  { %15 = vsyncpa [#allocation3 + $0x1], 0 }
   0x8   :  { %16 = vsyncpa [#allocation6], 0 }
   0x9   :  { %18 = vsyncpa [#allocation6 + $0x1], 0 }
   0xa   :  { %19 = vsyncpa [#allocation9], 0 }
   0xb   :  { %20 = vsyncpa [#allocation4], 0 }
   0xc   :  { %22 = vsyncpa [#allocation4 + $0x1], 0  ;;  %s1605_s27 = smov 0   ;;  %s1607_s28 = smov 0  }
   0xd   :  { %s1609_s29 = smov 0   ;;  %s1611_s30 = smov 0  }
   0xe LB: > { %2117 = sst [smem:[#allocation23_spill]] %s1532_s27  ;;  %s1626_s9 = sadd.s32 4294967295, %s1544_s30   ;;  %s1544_s30 = sphi %s1611_s30, %s2163_s30   ;;  %s1540_s29 = sphi %s1609_s29, %s2165_s29   ;;  %s1536_s28 = sphi %s1607_s28, %s2167_s28   ;;  %s1532_s27 = sphi %s1605_s27, %s2166_s27  }
   0xf   : > { %2118 = sst [smem:[#allocation24_spill]] %s1540_s29  ;;  %s1002_s10 = sadd.s32 4294967294, %s1544_s30  }
  0x10   : > { %s1630_s11 = sadd.s32 1, %s1544_s30   ;;  %s35_s12 = sadd.s32 1, %s1540_s29 }
  0x11   : > { %2119 = sst [smem:[#allocation25_spill]] %s1630_s11  ;;  %s32_s13 = ssub.s32 %s1544_s30, %s1630_s11 }
  0x12   : > { %p42_p0 = scmp.ne.s32.totalorder %s1540_s29, %s1536_s28  ;;  %p33_p1 = scmp.eq.s32.totalorder %s32_s13, 0 }
  0x13   : > { %p43_p2 = scmp.eq.s32.totalorder %s1544_s30, 0  ;;  %p48_p3 = scmp.ne.s32.totalorder %s1536_s28, %s1532_s27 }
  0x14   : > { %p2089_p4 = scmp.eq.s32.totalorder %s1626_s9, 0  ;;  %p244_p7 = scmp.eq.s32.totalorder %s1626_s9, 1 }
  0x15   : > { %s1642_s14 = scalar_select %p33_p1, %s1540_s29, %s35_s12  }
  0x16   : > { %p1644_p5 = por %p43_p2, %p42_p0  ;;  %p1650_p6 = por %p2089_p4, %p48_p3 }
  0x17   : > { %2120 = sst [smem:[#allocation26_spill]] %s1642_s14  ;;  %p250_p8 = scmp.eq.s32.totalorder %s1002_s10, 1 }
  0x18   : > { %s2122_s16 = scalar_select %p1650_p6, 1, 0 }
  0x19   : > { %p1003_p9 = scmp.ge.s32.totalorder %s1544_s30, 1  ;;  %p257_p10 = scmp.lt.s32.totalorder %s1544_s30, 3 }
  0x1a   : > { %p1657_p11 = por %p244_p7, %p42_p0  ;;  %p1661_p12 = por %p250_p8, %p48_p3 }
  0x1b   : > { %p1665_p13 = pnand %p1003_p9, %p257_p10  ;;  %s1546_s20 = smov [#allocation13]  }
  0x1c   : > { %s2123_s17 = scalar_select %p1657_p11, 1, 0 }
  0x1d   : > { %s2125_s18 = scalar_select %p1661_p12, 1, 0 }
  0x1e   : > { %2124 = sst [smem:[#allocation27_spill]] %s2123_s17  ;;  %p1143_p2 = pneg %p1665_p13 }
  0x1f   : > { %2126 = sst [smem:[#allocation28_spill]] %s2125_s18  ;;  %s281_s21 = sshll.u32 %s1546_s20, 4  ;;  %s282_s21 = int_to_ptr.vmem [resolvable:$true] %s281_s21 }
  0x20   : > { %s2127_s19 = scalar_select %p1665_p13, 1, 0 }
  0x21   : > { %p1175_p4 = scmp.lt.s32.totalorder %s1544_s30, 2  ;;  %p2128_p0 = scmp.eq.s32.totalorder %s1626_s9, 0 }
  0x22   : > { %s1687_s25 = sand.u32 1, %s1540_s29   ;;  %s2131_s7 = sld [smem:[#allocation32_spill]] }
  0x23   : > { %p1675_p7 = pnand %p1143_p2, %p2128_p0  ;;  %p1682_p3 = pnand %p1175_p4, %p1644_p5 }
  0x25   : > { %s2129_s22 = scalar_select %p1675_p7, 1, 0 }
  0x26   : > { %s2130_s24 = scalar_select %p1682_p3, 1, 0 }
  0x27   : > { %p2096_p9 = pneg %p1675_p7 }
  0x28   : > { %s1218_s12 = scalar_lea.hbm %s2131_s7, 64 }
  0x29   : > { %p1219_p8 = scmp.ne.s32.totalorder %s2131_s7, %s1218_s12  ;;  %p1225_p4 = scmp.lt.u32.totalorder %s1218_s12, %s2131_s7 }
  0x2b   : > { %p1221_p10 = pnand %p2096_p9, %p1219_p8 }
  0x2d   : > { %p1222_p2 = pneg %p1221_p10 }
  0x2f   : > { %p1227_p5 = pnand %p1225_p4, %p1222_p2 }
  0x31   : > { %1230 = shalt.err (!%p1227_p5)
}
  0x32   : > { %s1231_s14 = scalar_lea.vmem %s282_s21, 64  ;;  %p1239_p11 = scmp.lt.s32.totalorder %s282_s21, %s282_s21 }
  0x33   : > { %p1232_p0 = scmp.ne.s32.totalorder %s282_s21, %s1231_s14  ;;  %p1240_p6 = scmp.lt.s32.totalorder %s1231_s14, %s1231_s14 }
  0x35   : > { %p1234_p1 = pnand %p1232_p0, %p2096_p9  ;;  %p1241_p13 = por %p1240_p6, %p1239_p11 }
  0x37   : > { %p1235_p12 = pneg %p1234_p1 }
  0x39   : > { %p1242_p3 = pnand %p1241_p13, %p1235_p12 }
  0x3b   : > { %1245 = shalt.err (!%p1242_p3)
}
  0x3c   : > { %1149 = dma.hbm_to_vmem [thread:$0]  (!%p1675_p7), %s2131_s7, 64, %s282_s21, [#allocation6]  }
  0x3d   : > { %s2095_s23 = sshll.u32 %s1687_s25, 5  ;;  %s1040_s12 = sshll.u32 %s1544_s30, 9 }
  0x3e   : > { %s2132_s0 = sld [smem:[#allocation29_spill]]  ;;  %s296_s15 = scalar_lea.vmem [#allocation2], %s2095_s23 }
  0x3f   : > { %s303_s26 = sshll.u32 %s296_s15, 4  ;;  %s2133_s10 = sand.u32 1, %s1544_s30   ;;  %s1720_s26 = int_to_ptr.vmem [resolvable:$true] %s303_s26 }
  0x40   : > { %s1724_s29 = scalar_lea.sflag [#allocation3], %s2133_s10  ;;  %p2134_p11 = scmp.ne.s32.totalorder %s2130_s24, 0 }
  0x42   : > { %p1730_p12 = pneg %p2134_p11 }
  0x44   : > { %s1716_s14 = scalar_lea.hbm %s2132_s0, %s1040_s12  ;;  %s1251_s20 = scalar_lea.hbm %s2132_s0, 1024 }
  0x45   : > { %s1246_s21 = scalar_lea.hbm %s1716_s14, 512  ;;  %p1252_p3 = scmp.lt.u32.totalorder %s1716_s14, %s2132_s0 }
  0x46   : > { %p1247_p6 = scmp.ne.s32.totalorder %s1716_s14, %s1246_s21  ;;  %p1253_p8 = scmp.lt.u32.totalorder %s1251_s20, %s1246_s21 }
  0x47   : > { %s2135_s7 = scalar_select %p1730_p12, 1, 0 }
  0x48   : > { %p1249_p13 = pnand %p1730_p12, %p1247_p6  ;;  %p1254_p10 = por %p1253_p8, %p1252_p3 }
  0x49   : > { %p1255_p2 = scmp.lt.u32.totalorder %s1246_s21, %s1716_s14 }
  0x4a   : > { %p1250_p1 = pneg %p1249_p13 }
  0x4b   : > { %p1256_p4 = por %p1255_p2, %p1254_p10 }
  0x4d   : > { %p1257_p5 = pnand %p1256_p4, %p1250_p1 }
  0x4f   : > { %1260 = shalt.err (!%p1257_p5)
}
  0x50   : > { %s1261_s10 = scalar_lea.vmem %s1720_s26, 512  ;;  %s1547_s12 = smov [#allocation2]  }
  0x51   : > { %p1262_p0 = scmp.ne.s32.totalorder %s1720_s26, %s1261_s10  ;;  %s1266_s13 = sshll.u32 %s1547_s12, 4  ;;  %s1267_s13 = int_to_ptr.vmem [resolvable:$false] %s1266_s13 }
  0x52   : > { %s1268_s23 = scalar_lea.vmem %s1267_s13, 1024  ;;  %p1269_p9 = scmp.lt.s32.totalorder %s1720_s26, %s1267_s13 }
  0x53   : > { %p1264_p6 = pnand %p1262_p0, %p1730_p12  ;;  %p1270_p7 = scmp.lt.s32.totalorder %s1268_s23, %s1261_s10 }
  0x55   : > { %p1265_p13 = pneg %p1264_p6  ;;  %p1271_p3 = por %p1270_p7, %p1269_p9 }
  0x57   : > { %p1272_p8 = pnand %p1271_p3, %p1265_p13 }
  0x59   : > { %1275 = shalt.err (!%p1272_p8)
}
  0x5a   : > { %s2103_s21 = smov 64   ;;  %s2104_s20 = smov 4  }
  0x5b   : > { %1153 = dma.hbm_to_vmem [thread:$0]  (!%p2134_p11), %s1716_s14, 512, %s1720_s26, %s1724_s29, %s2103_s21, %s2103_s21, %s2104_s20  }
  0x5c   : > { %s2136_s15 = sshll.u32 %s1687_s25, 5  ;;  %s1762_s13 = sshll.u32 %s1544_s30, 4 }
  0x5d   : > { %s351_s10 = scalar_lea.vmem [#allocation10], %s2136_s15  ;;  %s316_s23 = scalar_lea.vmem [#allocation5], %s1687_s25 }
  0x5e   : > { %s358_s12 = sshll.u32 %s351_s10, 4  ;;  %s323_s0 = sshll.u32 %s316_s23, 4  ;;  %s1759_s12 = int_to_ptr.vmem [resolvable:$true] %s358_s12  ;;  %s324_s0 = int_to_ptr.vmem [resolvable:$true] %s323_s0 }
  0x5f   : > { %s2137_s1 = sld [smem:[#allocation30_spill]]  ;;  %s2138_s14 = sand.u32 1, %s1544_s30  }
  0x60   : > { %s1773_s26 = scalar_lea.sflag [#allocation6], %s2138_s14 }
  0x65   : > { %s1769_s27 = scalar_lea.hbm %s2137_s1, %s1762_s13  ;;  %s1281_s21 = scalar_lea.hbm %s2137_s1, 32 }
  0x66   : > { %s1276_s15 = scalar_lea.hbm %s1769_s27, 16  ;;  %p1282_p10 = scmp.lt.u32.totalorder %s1769_s27, %s2137_s1 }
  0x67   : > { %p1277_p7 = scmp.ne.s32.totalorder %s1769_s27, %s1276_s15  ;;  %p1283_p2 = scmp.lt.u32.totalorder %s1281_s21, %s1276_s15 }
  0x68   : > { %p1285_p5 = scmp.lt.u32.totalorder %s1276_s15, %s1769_s27 }
  0x69   : > { %p1279_p9 = pnand %p1277_p7, %p1730_p12  ;;  %p1284_p4 = por %p1283_p2, %p1282_p10 }
  0x6b   : > { %p1280_p1 = pneg %p1279_p9  ;;  %p1286_p0 = por %p1285_p5, %p1284_p4 }
  0x6d   : > { %p1287_p6 = pnand %p1286_p0, %p1280_p1 }
  0x6f   : > { %1290 = shalt.err (!%p1287_p6)
}
  0x70   : > { %s1291_s14 = scalar_lea.vmem %s324_s0, 16  ;;  %s1550_s20 = smov [#allocation5]  }
  0x71   : > { %p1292_p13 = scmp.ne.s32.totalorder %s324_s0, %s1291_s14  ;;  %s1296_s8 = sshll.u32 %s1550_s20, 4  ;;  %s1297_s8 = int_to_ptr.vmem [resolvable:$false] %s1296_s8 }
  0x72   : > { %s1298_s10 = scalar_lea.vmem %s1297_s8, 32  ;;  %p1299_p7 = scmp.lt.s32.totalorder %s324_s0, %s1297_s8 }
  0x73   : > { %p1294_p3 = pnand %p1292_p13, %p1730_p12  ;;  %p1300_p9 = scmp.lt.s32.totalorder %s1298_s10, %s1291_s14 }
  0x75   : > { %p1295_p8 = pneg %p1294_p3  ;;  %p1301_p11 = por %p1300_p9, %p1299_p7 }
  0x77   : > { %p1302_p2 = pnand %p1301_p11, %p1295_p8 }
  0x79   : > { %1305 = shalt.err (!%p1302_p2)
}
  0x7a   : > { %p2139_p10 = scmp.ne.s32.totalorder %s2130_s24, 0  ;;  %s2140_s2 = sld [smem:[#allocation31_spill]] }
  0x7b   : > { %s333_s8 = scalar_lea.vmem [#allocation7], %s1687_s25  ;;  %s1041_s11 = sshll.u32 %s1544_s30, 10 }
  0x7c   : > { %1156 = dma.hbm_to_vmem [thread:$0]  (!%p2139_p10), %s1769_s27, 16, %s324_s0, %s1773_s26  }
  0x7d   : > { %s340_s23 = sshll.u32 %s333_s8, 4  ;;  %s1804_s10 = scalar_lea.hbm %s2084_s4, %s1041_s11  ;;  %s341_s23 = int_to_ptr.vmem [resolvable:$true] %s340_s23 }
  0x80   : > { %s1797_s20 = scalar_lea.hbm %s2140_s2, %s1762_s13  ;;  %s1311_s21 = scalar_lea.hbm %s2140_s2, 32 }
  0x81   : > { %s1306_s1 = scalar_lea.hbm %s1797_s20, 16  ;;  %p1312_p5 = scmp.lt.u32.totalorder %s1797_s20, %s2140_s2 }
  0x82   : > { %p1307_p11 = scmp.ne.s32.totalorder %s1797_s20, %s1306_s1  ;;  %p1313_p0 = scmp.lt.u32.totalorder %s1311_s21, %s1306_s1 }
  0x83   : > { %p1315_p13 = scmp.lt.u32.totalorder %s1306_s1, %s1797_s20 }
  0x84   : > { %p1309_p1 = pnand %p1307_p11, %p1730_p12  ;;  %p1314_p6 = por %p1313_p0, %p1312_p5 }
  0x86   : > { %p1310_p4 = pneg %p1309_p1  ;;  %p1316_p3 = por %p1315_p13, %p1314_p6 }
  0x88   : > { %p1317_p8 = pnand %p1316_p3, %p1310_p4 }
  0x8a   : > { %1320 = shalt.err (!%p1317_p8)
}
  0x8b   : > { %s1321_s8 = scalar_lea.vmem %s341_s23, 16  ;;  %s1551_s11 = smov [#allocation7]  }
  0x8c   : > { %p1322_p7 = scmp.ne.s32.totalorder %s341_s23, %s1321_s8  ;;  %s1326_s18 = sshll.u32 %s1551_s11, 4  ;;  %s1327_s18 = int_to_ptr.vmem [resolvable:$false] %s1326_s18 }
  0x8d   : > { %s1328_s14 = scalar_lea.vmem %s1327_s18, 32  ;;  %p1329_p11 = scmp.lt.s32.totalorder %s341_s23, %s1327_s18 }
  0x8e   : > { %p1324_p9 = pnand %p1322_p7, %p1730_p12  ;;  %p1330_p1 = scmp.lt.s32.totalorder %s1328_s14, %s1321_s8 }
  0x90   : > { %p1325_p2 = pneg %p1324_p9  ;;  %p1331_p10 = por %p1330_p1, %p1329_p11 }
  0x92   : > { %p1332_p0 = pnand %p1331_p10, %p1325_p2 }
  0x94   : > { %1335 = shalt.err (!%p1332_p0)
}
  0x95   : > { %p2141_p5 = scmp.ne.s32.totalorder %s2130_s24, 0  ;;  %s1336_s1 = scalar_lea.hbm %s1804_s10, 512 }
  0x96   : > { %p1337_p4 = scmp.ne.s32.totalorder %s1804_s10, %s1336_s1  ;;  %s1341_s27 = scalar_lea.hbm %s2084_s4, 2048 }
  0x97   : > { %1159 = dma.hbm_to_vmem [thread:$0]  (!%p2141_p5), %s1797_s20, 16, %s341_s23, %s1773_s26  }
  0x98   : > { %p1339_p6 = pnand %p1337_p4, %p1730_p12  ;;  %p1342_p10 = scmp.lt.u32.totalorder %s1804_s10, %s2084_s4 }
  0x99   : > { %p1343_p3 = scmp.lt.u32.totalorder %s1341_s27, %s1336_s1  ;;  %p1345_p7 = scmp.lt.u32.totalorder %s1336_s1, %s1804_s10 }
  0x9a   : > { %p1340_p13 = pneg %p1339_p6 }
  0x9b   : > { %p1344_p8 = por %p1343_p3, %p1342_p10 }
  0x9d   : > { %p1346_p9 = por %p1345_p7, %p1344_p8 }
  0x9f   : > { %p1347_p2 = pnand %p1346_p9, %p1340_p13 }
  0xa1   : > { %1350 = shalt.err (!%p1347_p2)
}
  0xa2   : > { %s1351_s20 = scalar_lea.vmem %s1759_s12, 512  ;;  %s1552_s23 = smov [#allocation10]  }
  0xa3   : > { %p1352_p11 = scmp.ne.s32.totalorder %s1759_s12, %s1351_s20  ;;  %s1356_s8 = sshll.u32 %s1552_s23, 4  ;;  %s1357_s8 = int_to_ptr.vmem [resolvable:$false] %s1356_s8 }
  0xa4   : > { %s1358_s11 = scalar_lea.vmem %s1357_s8, 1024  ;;  %p1359_p4 = scmp.lt.s32.totalorder %s1759_s12, %s1357_s8 }
  0xa5   : > { %p1354_p1 = pnand %p1352_p11, %p1730_p12  ;;  %p1360_p6 = scmp.lt.s32.totalorder %s1358_s11, %s1351_s20 }
  0xa7   : > { %p1355_p0 = pneg %p1354_p1  ;;  %p1361_p10 = por %p1360_p6, %p1359_p4 }
  0xa9   : > { %p1362_p3 = pnand %p1361_p10, %p1355_p0 }
  0xab   : > { %1365 = shalt.err (!%p1362_p3)
}
  0xac   : > { %s1553_s18 = smov 128   ;;  %s2142_s14 = smov 4  }
  0xad   : > { %s2143_s1 = smov 64   ;;  %s1554_s17 = smov [#allocation8]  }
  0xae   : > { %1162 = dma.hbm_to_vmem [thread:$0]  (!%p2141_p5), %s1804_s10, 512, %s1759_s12, %s1724_s29, %s1553_s18, %s2143_s1, %s2142_s14  }
  0xaf   : > { %s270_s0 = sshll.u32 %s1554_s17, 4  ;;  %s1852_s15 = scalar_lea.hbm %s2085_s5, %s1762_s13  ;;  %s271_s0 = int_to_ptr.vmem [resolvable:$true] %s270_s0 }
  0xb0   : > { %s1366_s8 = scalar_lea.hbm %s2083_s3, 32  ;;  %p2144_p8 = scmp.ne.s32.totalorder %s2129_s22, 0 }
  0xb1   : > { %p1367_p13 = scmp.ne.s32.totalorder %s2083_s3, %s1366_s8  ;;  %p1373_p11 = scmp.lt.u32.totalorder %s1366_s8, %s2083_s3 }
  0xb2   : > { %p2145_p7 = pneg %p2144_p8 }
  0xb4   : > { %p1369_p9 = pnand %p1367_p13, %p2145_p7 }
  0xb6   : > { %p1370_p2 = pneg %p1369_p9 }
  0xb8   : > { %p1375_p1 = pnand %p1373_p11, %p1370_p2 }
  0xba   : > { %1378 = shalt.err (!%p1375_p1)
}
  0xbb   : > { %s1379_s18 = scalar_lea.vmem %s271_s0, 32  ;;  %p2146_p4 = pmov %p2145_p7 }
  0xbc   : > { %p1380_p0 = scmp.ne.s32.totalorder %s271_s0, %s1379_s18  ;;  %p1387_p3 = scmp.lt.s32.totalorder %s271_s0, %s271_s0 }
  0xbd   : > { %p1388_p5 = scmp.lt.s32.totalorder %s1379_s18, %s1379_s18 }
  0xbe   : > { %p1382_p6 = pnand %p1380_p0, %p2146_p4 }
  0xbf   : > { %p1389_p12 = por %p1388_p5, %p1387_p3 }
  0xc0   : > { %p1383_p10 = pneg %p1382_p6 }
  0xc2   : > { %p1390_p7 = pnand %p1389_p12, %p1383_p10 }
  0xc4   : > { %1393 = shalt.err (!%p1390_p7)
}
  0xc5   : > { %1146 = dma.hbm_to_vmem [thread:$0]  (!%p2144_p8), %s2083_s3, 32, %s271_s0, [#allocation9]  }
  0xc6   : > { %s371_s1 = scalar_lea.vmem [#allocation11], %s1687_s25  ;;  %s1879_s20 = scalar_lea.hbm %s2086_s6, %s1762_s13 }
  0xc7   : > { %s378_s17 = sshll.u32 %s371_s1, 4  ;;  %s1394_s22 = scalar_lea.hbm %s1852_s15, 16  ;;  %s379_s17 = int_to_ptr.vmem [resolvable:$true] %s378_s17 }
  0xc8   : > { %p1395_p12 = scmp.ne.s32.totalorder %s1852_s15, %s1394_s22  ;;  %p2147_p5 = scmp.ne.s32.totalorder %s2135_s7, 0 }
  0xc9   : > { %s1399_s11 = scalar_lea.hbm %s2085_s5, 32  ;;  %p1400_p8 = scmp.lt.u32.totalorder %s1852_s15, %s2085_s5 }
  0xca   : > { %p1397_p13 = pnand %p1395_p12, %p2147_p5  ;;  %p1401_p2 = scmp.lt.u32.totalorder %s1399_s11, %s1394_s22 }
  0xcb   : > { %p1403_p1 = scmp.lt.u32.totalorder %s1394_s22, %s1852_s15 }
  0xcc   : > { %p1398_p9 = pneg %p1397_p13  ;;  %p1402_p11 = por %p1401_p2, %p1400_p8 }
  0xce   : > { %p1404_p0 = por %p1403_p1, %p1402_p11 }
  0xd0   : > { %p1405_p4 = pnand %p1404_p0, %p1398_p9 }
  0xd2   : > { %1408 = shalt.err (!%p1405_p4)
}
  0xd3   : > { %s1409_s13 = scalar_lea.vmem %s379_s17, 16  ;;  %s1555_s0 = smov [#allocation11]  }
  0xd4   : > { %p1410_p6 = scmp.ne.s32.totalorder %s379_s17, %s1409_s13  ;;  %s1414_s18 = sshll.u32 %s1555_s0, 4  ;;  %s1415_s18 = int_to_ptr.vmem [resolvable:$false] %s1414_s18 }
  0xd5   : > { %s1416_s2 = scalar_lea.vmem %s1415_s18, 32  ;;  %p1417_p7 = scmp.lt.s32.totalorder %s379_s17, %s1415_s18 }
  0xd6   : > { %p1412_p10 = pnand %p1410_p6, %p2147_p5  ;;  %p1418_p12 = scmp.lt.s32.totalorder %s1416_s2, %s1409_s13 }
  0xd8   : > { %p1413_p3 = pneg %p1412_p10  ;;  %p1419_p13 = por %p1418_p12, %p1417_p7 }
  0xda   : > { %p1420_p2 = pnand %p1419_p13, %p1413_p3 }
  0xdc   : > { %1423 = shalt.err (!%p1420_p2)
}
  0xdd   : > { %p2148_p8 = scmp.ne.s32.totalorder %s2130_s24, 0  ;;  %s388_s14 = scalar_lea.vmem [#allocation12], %s1687_s25 }
  0xde   : > { %s395_s1 = sshll.u32 %s388_s14, 4  ;;  %s1424_s27 = scalar_lea.hbm %s1879_s20, 16  ;;  %s396_s1 = int_to_ptr.vmem [resolvable:$true] %s395_s1 }
  0xdf   : > { %1165 = dma.hbm_to_vmem [thread:$0]  (!%p2148_p8), %s1852_s15, 16, %s379_s17, %s1773_s26  }
  0xe0   : > { %p1425_p9 = scmp.ne.s32.totalorder %s1879_s20, %s1424_s27  ;;  %s1429_s23 = scalar_lea.hbm %s2086_s6, 32 }
  0xe1   : > { %p1430_p0 = scmp.lt.u32.totalorder %s1879_s20, %s2086_s6  ;;  %p1431_p4 = scmp.lt.u32.totalorder %s1429_s23, %s1424_s27 }
  0xe2   : > { %p1427_p11 = pnand %p1425_p9, %p2147_p5  ;;  %p1433_p10 = scmp.lt.u32.totalorder %s1424_s27, %s1879_s20 }
  0xe3   : > { %p1432_p6 = por %p1431_p4, %p1430_p0 }
  0xe4   : > { %p1428_p1 = pneg %p1427_p11 }
  0xe5   : > { %p1434_p3 = por %p1433_p10, %p1432_p6 }
  0xe7   : > { %p1435_p7 = pnand %p1434_p3, %p1428_p1 }
  0xe9   : > { %1438 = shalt.err (!%p1435_p7)
}
  0xea   : > { %s1439_s25 = scalar_lea.vmem %s396_s1, 16  ;;  %s1556_s26 = smov [#allocation12]  }
  0xeb   : > { %p1440_p12 = scmp.ne.s32.totalorder %s396_s1, %s1439_s25  ;;  %s1444_s15 = sshll.u32 %s1556_s26, 4  ;;  %s1445_s15 = int_to_ptr.vmem [resolvable:$false] %s1444_s15 }
  0xec   : > { %s1446_s17 = scalar_lea.vmem %s1445_s15, 32  ;;  %p1447_p9 = scmp.lt.s32.totalorder %s396_s1, %s1445_s15 }
  0xed   : > { %p1442_p13 = pnand %p1440_p12, %p2147_p5  ;;  %p1448_p11 = scmp.lt.s32.totalorder %s1446_s17, %s1439_s25 }
  0xef   : > { %p1443_p2 = pneg %p1442_p13  ;;  %p1449_p8 = por %p1448_p11, %p1447_p9 }
  0xf1   : > { %p1450_p0 = pnand %p1449_p8, %p1443_p2 }
  0xf3   : > { %1453 = shalt.err (!%p1450_p0)
}
  0xf4   : > { %p2149_p4 = scmp.ne.s32.totalorder %s2130_s24, 0  ;;  %p2150_p1 = scmp.ne.s32.totalorder %s2127_s19, 0 }
  0xf5   : > { %s406_s7 = sand.u32 (!%p2150_p1), 1, %s1626_s9   ;;  %s1922_s12 = sand.u32 (!%p2150_p1), 1, %s1536_s28  }
  0xf6   : > { %1168 = dma.hbm_to_vmem [thread:$0]  (!%p2149_p4), %s1879_s20, 16, %s396_s1, %s1724_s29  }
  0xf7   : > { %404 = sbr.rel (%p2150_p1) target bundleno = 526 (0x20e), region = 52  ;;  %s1018_s10 = sshll.u32 (!%p2150_p1), %s1922_s12, 5 }
  0xf8   : > { %s407_s13 = scalar_lea.sflag (!%p2150_p1), [#allocation3], %s406_s7  ;;  %s1925_s0 = scalar_lea.vmem (!%p2150_p1), [#allocation2], %s1018_s10 }
  0xf9   : > { %p2151_p5 = scmp.ne.s32.totalorder (!%p2150_p1), %s2122_s16, 0 }
  0xfe   : > { %1499 = dma.done.wait (%p2151_p5), %s407_s13, 512  }
  0xff   : > { %1501 = vsyncadd (%p2151_p5), %s407_s13, 4294966784  ;;  %s416_s29 = scalar_lea.sflag [#allocation6], %s406_s7  ;;  %s418_s19 = scalar_lea.vmem [#allocation5], %s1922_s12 }
 0x100   : > { %1503 = dma.done.wait (%p2151_p5), %s416_s29, 32  }
 0x101   : > { %1505 = vsyncadd (%p2151_p5), %s416_s29, 4294967264  ;;  %s426_s24 = scalar_lea.vmem [#allocation7], %s1922_s12  ;;  %p2152_p8 = scmp.eq.s32.totalorder %s1626_s9, 0 }
 0x103   : > { %1507 = dma.done.wait (%p2152_p8), [#allocation9], 32   ;;  %p2153_p6 = pmov %p2152_p8 }
 0x104   : > { %s1941_s20 = scalar_lea.vmem [#allocation10], %s1018_s10 }
 0x105   : > { %1509 = vsyncadd (%p2153_p6), [#allocation9], 4294967264 }
 0x106   : > { %1511 = dma.done.wait (%p2151_p5), %s407_s13, 512  }
 0x107   : > { %1513 = vsyncadd (%p2151_p5), %s407_s13, 4294966784  ;;  %s447_s18 = scalar_lea.vmem [#allocation11], %s1922_s12 }
 0x108   : > { %1515 = dma.done.wait (%p2151_p5), %s416_s29, 16  }
 0x109   : > { %1517 = vsyncadd (%p2151_p5), %s416_s29, 4294967280  ;;  %s455_s2 = scalar_lea.vmem [#allocation12], %s1922_s12 }
 0x10a   : > { %1519 = dma.done.wait (%p2151_p5), %s407_s13, 16  }
 0x10b   : > { %1521 = vsyncadd (%p2151_p5), %s407_s13, 4294967280  ;;  %p2154_p10 = pmov %p2153_p6 }
 0x10c   : > { %p2155_p3 = pmov %p2153_p6 }
 0x10d   : > { %1523 = dma.done.wait (%p2154_p10), [#allocation6], 64  }
 0x10e   : > { %1525 = vsyncadd (%p2155_p3), [#allocation6], 4294967232  ;;  %vm645_vm0 = vcmask 1043456   ;;  %vm727_vm1 = vcmask 1041408   ;;  %v631_v0 = vld [vmem:[#allocation13] sm:$0xf] }
 0x10f   : > { %v572_v1 = vld [vmem:[#allocation8] sm:$0x3]  ;;  %v1060_v2 = vld [vmem:[%s1941_s20] sm:$0xff]   ;;  %vm632_vm2 = vcmask 64512   ;;  %1119 = vmatprep.subr.msk.bf16.mxu1 %vm645_vm0, %v631_v0  ;;  %v647_v3 = vsel %vm645_vm0, %v631_v0, 0  ;;  %vm714_vm3 = vcmask 31744  }
 0x110   : > { %1120 = vmatprep.subr.msk.bf16.mxu0 %vm727_vm1, %v572_v1  ;;  %v729_v4 = vsel %vm727_vm1, %v572_v1, 0  ;;  %v1061_v5 = vunpack.c.l.bf16 %v1060_v2  ;;  %v1062_v6 = vunpack.c.h.bf16 %v1060_v2  ;;  %v1962_v7 = vld [vmem:[%s447_s18] ss:$0 sm:$0xff]  ;;  %1092 = vmatpush3.bf16.msra.mxu1 %v647_v3  ;;  %v1078_v15 = vld [vmem:[%s1941_s20 + $0x8] sm:$0xff]   ;;  %v1079_v30 = vld [vmem:[%s1941_s20 + $0x10] sm:$0xff]   ;;  %s1022_s16 = sshll.u32 %s1922_s12, 6 }
 0x111   : > { %1102 = vmatpush3.bf16.msra.mxu0 %v729_v4  ;;  %v1964_v8 = vld [vmem:[%s455_s2] ss:$0 sm:$0xff]  ;;  %v1075_v16 = vld [vmem:[%s1925_s0 + $0x8] sm:$0xff]   ;;  %v1065_v18 = vunpack.c.l.bf16 %v1078_v15  ;;  %v1066_v19 = vunpack.c.h.bf16 %v1078_v15  ;;  %v1076_v39 = vld [vmem:[%s1925_s0 + $0x10] sm:$0xff]   ;;  %v1069_v43 = vunpack.c.l.bf16 %v1079_v30  ;;  %v1070_v50 = vunpack.c.h.bf16 %v1079_v30  ;;  %s512_s14 = scalar_lea.vmem [#allocation14], %s1022_s16  ;;  %s1042_s1 = sshll.u32 %s1626_s9, 10 }
 0x112   : > { %v1044_v9 = vld [vmem:[%s1925_s0] sm:$0xff]   ;;  %v596_v11 = vmul.f32 %v1061_v5, %v1962_v7  ;;  %v597_v12 = vmul.f32 %v1062_v6, %v1962_v7  ;;  %v1049_v20 = vunpack.c.l.bf16 %v1075_v16  ;;  %v1050_v21 = vunpack.c.h.bf16 %v1075_v16  ;;  %v1077_v53 = vld [vmem:[%s1925_s0 + $0x18] sm:$0xff]   ;;  %s819_s27 = sshll.u32 %s512_s14, 4  ;;  %s2156_s21 = sld [smem:[#allocation27_spill]]  ;;  %s2033_s27 = int_to_ptr.vmem [resolvable:$true] %s819_s27 }
 0x113   : > { %v1969_v10 = vld [vmem:[%s418_s19] ss:$0 sm:$0xff]  ;;  %v1045_v13 = vunpack.c.l.bf16 %v1044_v9  ;;  %v1046_v14 = vunpack.c.h.bf16 %v1044_v9  ;;  %v598_v26 = vmul.f32 %v1065_v18, %v1962_v7  ;;  %v599_v27 = vmul.f32 %v1066_v19, %v1962_v7  ;;  %s2157_s8 = sld [smem:[#allocation33_spill]]  ;;  %s806_s9 = scalar_lea.sflag [#allocation4], %s1922_s12 }
 0x114   : > { %v1977_v17 = vld [vmem:[%s426_s24] ss:$0 sm:$0xff]  ;;  %v611_v22 = vadd.f32 %v1964_v8, %v596_v11  ;;  %v612_v23 = vadd.f32 %v1964_v8, %v597_v12  ;;  %v539_v28 = vmul.f32 %v1049_v20, %v1969_v10  ;;  %v540_v29 = vmul.f32 %v1050_v21, %v1969_v10  ;;  %s1454_s25 = scalar_lea.vmem %s2033_s27, 1024  ;;  %s1557_s26 = smov [#allocation14]  }
 0x115   : > { %v537_v24 = vmul.f32 %v1045_v13, %v1969_v10  ;;  %v538_v25 = vmul.f32 %v1046_v14, %v1969_v10  ;;  %v613_v35 = vadd.f32 %v1964_v8, %v598_v26  ;;  %v614_v36 = vadd.f32 %v1964_v8, %v599_v27  ;;  %v1080_v44 = vld [vmem:[%s1941_s20 + $0x18] sm:$0xff]   ;;  %p1455_p7 = scmp.ne.s32.totalorder %s2033_s27, %s1454_s25  ;;  %s1458_s15 = sshll.u32 %s1557_s26, 4  ;;  %s1459_s15 = int_to_ptr.vmem [resolvable:$false] %s1458_s15 }
 0x116   : > { %v619_v31 = vmax.f32 %v611_v22, 0.0  ;;  %v620_v32 = vmax.f32 %v612_v23, 0.0  ;;  %v554_v37 = vadd.f32 %v1977_v17, %v539_v28  ;;  %v555_v38 = vadd.f32 %v1977_v17, %v540_v29  ;;  %s1460_s17 = scalar_lea.vmem %s1459_s15, 2048  ;;  %p1461_p9 = scmp.lt.s32.totalorder %s2033_s27, %s1459_s15 }
 0x117   : > { %v552_v33 = vadd.f32 %v1977_v17, %v537_v24  ;;  %v553_v34 = vadd.f32 %v1977_v17, %v538_v25  ;;  %v621_v45 = vmax.f32 %v613_v35, 0.0  ;;  %v622_v46 = vmax.f32 %v614_v36, 0.0  ;;  %p1462_p11 = scmp.lt.s32.totalorder %s1460_s17, %s1454_s25 }
 0x118   : > { %v627_v40 = vpack.c.bf16 %v620_v32, %v619_v31  ;;  %v562_v47 = vmax.f32 %v554_v37, 0.0  ;;  %v563_v48 = vmax.f32 %v555_v38, 0.0  ;;  %v600_v51 = vmul.f32 %v1069_v43, %v1962_v7  ;;  %p2158_p12 = scmp.ne.s32.totalorder %s2156_s21, 0 }
 0x119   : > { %v560_v41 = vmax.f32 %v552_v33, 0.0  ;;  %v561_v42 = vmax.f32 %v553_v34, 0.0  ;;  %v1053_v52 = vunpack.c.l.bf16 %v1076_v39  ;;  %v628_v54 = vpack.c.bf16 %v622_v46, %v621_v45  ;;  %s2031_s11 = scalar_lea.hbm %s2157_s8, %s1042_s1  ;;  %p1463_p0 = por %p1462_p11, %p1461_p9 }
 0x11a   : > { %1093 = vmatprep.mubr.msk.bf16.mxu1 %vm632_vm2, %v627_v40  ;;  %v569_v55 = vpack.c.bf16 %v563_v48, %v562_v47  ;;  %v1054_v56 = vunpack.c.h.bf16 %v1076_v39  ;;  %v1073_v57 = vunpack.c.l.bf16 %v1080_v44  ;;  %v601_v58 = vmul.f32 %v1070_v50, %v1962_v7  ;;  %p1456_p13 = pnand %p1455_p7, %p2158_p12 }
 0x11b   : > { %v568_v49 = vpack.c.bf16 %v561_v42, %v560_v41  ;;  %v615_v59 = vadd.f32 %v1964_v8, %v600_v51  ;;  %v541_v60 = vmul.f32 %v1053_v52, %v1969_v10  ;;  %v1074_v61 = vunpack.c.h.bf16 %v1080_v44  ;;  %1094 = vmatmul.mubr.msk.bf16.vlgmr.msra.gmra.mrb[0].mxu1 %vm632_vm2, %v628_v54 }
 0x11c   : > { %v542_v62 = vmul.f32 %v1054_v56, %v1969_v10  ;;  %v602_v63 = vmul.f32 %v1073_v57, %v1962_v7  ;;  %v1057_v0 = vunpack.c.l.bf16 %v1077_v53  ;;  %v1058_v1 = vunpack.c.h.bf16 %v1077_v53  ;;  %p1457_p2 = pneg %p1456_p13 }
 0x11d   : > { %1103 = vmatprep.mubr.msk.bf16.mxu0 %vm714_vm3, %v568_v49  ;;  %v616_v2 = vadd.f32 %v1964_v8, %v601_v58  ;;  %v623_v3 = vmax.f32 %v615_v59, 0.0  ;;  %v556_v4 = vadd.f32 %v1977_v17, %v541_v60  ;;  %v603_v5 = vmul.f32 %v1074_v61, %v1962_v7 }
 0x11e   : > { %1104 = vmatmul.mubr.msk.bf16.vlgmr.msra.gmra.mrb[0].mxu0 %vm714_vm3, %v569_v55  ;;  %v557_v6 = vadd.f32 %v1977_v17, %v542_v62  ;;  %v617_v9 = vadd.f32 %v1964_v8, %v602_v63  ;;  %v543_v11 = vmul.f32 %v1057_v0, %v1969_v10  ;;  %v544_v12 = vmul.f32 %v1058_v1, %v1969_v10  ;;  %p1464_p4 = pnand %p1463_p0, %p1457_p2 }
 0x11f   : > { %v624_v13 = vmax.f32 %v616_v2, 0.0  ;;  %v564_v14 = vmax.f32 %v556_v4, 0.0  ;;  %v618_v15 = vadd.f32 %v1964_v8, %v603_v5  ;;  %vm796_vm4 = vcmask 130048  }
 0x120   : > { %v565_v16 = vmax.f32 %v557_v6, 0.0  ;;  %v625_v18 = vmax.f32 %v617_v9, 0.0  ;;  %v558_v19 = vadd.f32 %v1977_v17, %v543_v11  ;;  %v559_v20 = vadd.f32 %v1977_v17, %v544_v12 }
 0x121   : > { %v629_v7 = vpack.c.bf16 %v624_v13, %v623_v3  ;;  %v626_v21 = vmax.f32 %v618_v15, 0.0 }
 0x122   : > { %v570_v22 = vpack.c.bf16 %v565_v16, %v564_v14  ;;  %v566_v23 = vmax.f32 %v558_v19, 0.0  ;;  %v567_v24 = vmax.f32 %v559_v20, 0.0 }
 0x123   : > { %1097 = vmatprep.mubr.msk.bf16.mxu1 %vm632_vm2, %v629_v7  ;;  %v630_v25 = vpack.c.bf16 %v626_v21, %v625_v18 }
 0x124   : > { %1107 = vmatprep.mubr.msk.bf16.mxu0 %vm714_vm3, %v570_v22  ;;  %v571_v10 = vpack.c.bf16 %v567_v24, %v566_v23 }
 0x125   : > { %1098 = vmatmul.mubr.msk.bf16.gmra.mrb[4].mxu1 %vm632_vm2, %v630_v25 }
 0x126   : > { %1108 = vmatmul.mubr.msk.bf16.gmra.mrb[4].mxu0 %vm714_vm3, %v571_v10 }
 0x1ee   : > { %v1095_v8 = vpop.f32.mrb[0].mxu1 }
 0x1ef   : > { %v683_v27 = vpop.f32.mrb[1].mxu1 }
 0x1f0   : > { %v1096_v30 = vpop.f32.mrb[2].mxu1 }
 0x1f1   : > { %v1105_v26 = vpop.f32.mrb[0].mxu0  ;;  %v686_v33 = vpop.f32.mrb[3].mxu1 }
 0x1f2   : > { %v774_v17 = vadd.f32 %v1105_v26, %v1095_v8  ;;  %v765_v28 = vpop.f32.mrb[1].mxu0 }
 0x1f3   : > { %v766_v29 = vadd.f32 %v765_v28, %v683_v27  ;;  %v1106_v31 = vpop.f32.mrb[2].mxu0 }
 0x1f4   : > { %799 = vst.msk [vmem:[%s512_s14 + $0x10] sm:$0xff] %vm796_vm4, %v774_v17  ;;  %v777_v32 = vadd.f32 %v1106_v31, %v1096_v30  ;;  %v768_v34 = vpop.f32.mrb[3].mxu0 }
 0x1f5   : > { %797 = vst.msk [vmem:[%s512_s14] sm:$0xff] %vm796_vm4, %v766_v29  ;;  %v769_v35 = vadd.f32 %v768_v34, %v686_v33 }
 0x1f6   : > { %800 = vst.msk [vmem:[%s512_s14 + $0x18] sm:$0xff] %vm796_vm4, %v777_v32 }
 0x1f7   : > { %798 = vst.msk [vmem:[%s512_s14 + $0x8] sm:$0xff] %vm796_vm4, %v769_v35 }
 0x1f8   : > { %v1099_v36 = vpop.f32.mrb[4].mxu1 }
 0x1f9   : > { %v1109_v37 = vpop.f32.mrb[4].mxu0  ;;  %v699_v38 = vpop.f32.mrb[5].mxu1 }
 0x1fa   : > { %v790_v39 = vadd.f32 %v1109_v37, %v1099_v36  ;;  %v781_v40 = vpop.f32.mrb[5].mxu0  ;;  %v1100_v41 = vpop.f32.mrb[6].mxu1 }
 0x1fb   : > { %v782_v42 = vadd.f32 %v781_v40, %v699_v38  ;;  %v1110_v43 = vpop.f32.mrb[6].mxu0  ;;  %v702_v44 = vpop.f32.mrb[7].mxu1 }
 0x1fc   : > { %803 = vst.msk [vmem:[%s512_s14 + $0x30] sm:$0xff] %vm796_vm4, %v790_v39  ;;  %v793_v45 = vadd.f32 %v1110_v43, %v1100_v41  ;;  %v784_v46 = vpop.f32.mrb[7].mxu0 }
 0x1fd   : > { %801 = vst.msk [vmem:[%s512_s14 + $0x20] sm:$0xff] %vm796_vm4, %v782_v42  ;;  %v785_v47 = vadd.f32 %v784_v46, %v702_v44 }
 0x1fe   : > { %804 = vst.msk [vmem:[%s512_s14 + $0x38] sm:$0xff] %vm796_vm4, %v793_v45 }
 0x1ff   : > { %802 = vst.msk [vmem:[%s512_s14 + $0x28] sm:$0xff] %vm796_vm4, %v785_v47 }
 0x200   : > { %1467 = shalt.err (!%p1464_p4)
}
 0x201   : > { %s1468_s7 = scalar_lea.hbm %s2031_s11, 1024  ;;  %s1472_s0 = scalar_lea.hbm %s2157_s8, 2048 }
 0x202   : > { %p1469_p1 = scmp.ne.s32.totalorder %s2031_s11, %s1468_s7  ;;  %p1473_p6 = scmp.lt.u32.totalorder %s2031_s11, %s2157_s8 }
 0x203   : > { %p1474_p10 = scmp.lt.u32.totalorder %s1472_s0, %s1468_s7  ;;  %p1476_p7 = scmp.lt.u32.totalorder %s1468_s7, %s2031_s11 }
 0x204   : > { %p1470_p5 = pnand %p1469_p1, %p2158_p12 }
 0x205   : > { %p1475_p3 = por %p1474_p10, %p1473_p6 }
 0x206   : > { %p1471_p8 = pneg %p1470_p5 }
 0x207   : > { %p1477_p13 = por %p1476_p7, %p1475_p3 }
 0x209   : > { %p1478_p2 = pnand %p1477_p13, %p1471_p8 }
 0x20b   : > { %1481 = shalt.err (!%p1478_p2)
}
 0x20c   : > { %s1558_s24 = smov 128   ;;  %s1559_s20 = smov 8  }
 0x20d   : > { %1141 = dma.vmem_to_hbm [thread:$0]  (%p2158_p12), %s2033_s27, 1024, %s2031_s11, %s806_s9, %s1558_s24, %s1558_s24, %s1559_s20  }
 0x20e PF: > { %s2159_s18 = sld [smem:[#allocation23_spill]]  ;;  %s2160_s2 = sld [smem:[#allocation28_spill]] }
 0x20f   : > { %p2162_p11 = scmp.ge.s32.totalorder %s1544_s30, 2 }
 0x214   : > { %s834_s16 = sand.u32 1, %s2159_s18   ;;  %p2161_p9 = scmp.ne.s32.totalorder %s2160_s2, 0 }
 0x215   : > { %s835_s14 = scalar_lea.sflag [#allocation4], %s834_s16 }
 0x216   : > { %p1170_p0 = pnand %p2162_p11, %p2161_p9 }
 0x218   : > { %1527 = dma.done.wait (!%p1170_p0), %s835_s14, 1024  }
 0x219   : > { %1529 = vsyncadd (!%p1170_p0), %s835_s14, 4294966272  ;;  %s2163_s30 = sld [smem:[#allocation25_spill]]  ;;  %s2164_s1 = sld [smem:[#allocation24_spill]] }
 0x21a   : > { %s2165_s29 = sld [smem:[#allocation26_spill]]  ;;  %s2166_s27 = smov %s1536_s28 }
 0x21f   : > { %p25_p4 = scmp.ge.s32.totalorder %s2163_s30, 4   ;;  %s2167_s28 = smov %s2164_s1 }
 0x221   :  { %27 = sbr.rel (!%p25_p4) target bundleno = 14 (0xe), region = 162 }
 0x228   :  { %840 = vsyncpa [#allocation3], 1 }
 0x229   :  { %842 = vsyncpa [#allocation3 + $0x1], 1 }
 0x22a   :  { %843 = vsyncpa [#allocation6], 1 }
 0x22b   :  { %845 = vsyncpa [#allocation6 + $0x1], 1 }
 0x22c   :  { %846 = vsyncpa [#allocation9], 1 }
 0x22d   :  { %847 = vsyncpa [#allocation4], 1 }
 0x22e   :  { %849 = vsyncpa [#allocation4 + $0x1], 1 }

// kernel: resnetv2_block.9
= control target key start
LH: loop header
LB: loop body
LE: loop exit
PB: predicated region body
PF: predicated region fallthrough
CT: control target
= control target key end

     0   :  { %s5192_s0 = inlined_call_operand.hbm [shape: bf16[2,4,9,9,4], index: 0, kind: input, shape index: {}]   ;;  %s5193_s1 = inlined_call_operand.hbm [shape: f32[2,1,4], index: 1, kind: input, shape index: {}]   ;;  %s5194_s2 = inlined_call_operand.hbm [shape: f32[2,1,4], index: 2, kind: input, shape index: {}]   ;;  %s5195_s3 = inlined_call_operand.hbm [shape: f32[1,4,9,9,1], index: 3, kind: input, shape index: {}]   ;;  %s5196_s4 = inlined_call_operand.hbm [shape: bf16[9,4,4], index: 4, kind: input, shape index: {}]   ;;  %s5197_s5 = inlined_call_operand.hbm [shape: bf16[2,8,8,4], index: 5, kind: output, shape index: {}]  }
   0x1   :  { %5232 = sst [smem:[#allocation41_spill]] %s5193_s1 }
   0x2   :  { %5233 = sst [smem:[#allocation42_spill]] %s5195_s3 }
   0x3   :  { %10 = vsyncpa [#allocation4], 0 }
   0x4   :  { %12 = vsyncpa [#allocation4 + $0x1], 0 }
   0x5   :  { %13 = vsyncpa [#allocation7], 0 }
   0x6   :  { %15 = vsyncpa [#allocation7 + $0x1], 0 }
   0x7   :  { %16 = vsyncpa [#allocation10], 0 }
   0x8   :  { %17 = vsyncpa [#allocation5], 0 }
   0x9   :  { %19 = vsyncpa [#allocation5 + $0x1], 0  ;;  %s4035_s18 = smov 0   ;;  %s4037_s19 = smov 0  }
   0xa   :  { %s4039_s20 = smov 0   ;;  %s4041_s21 = smov 0  }
   0xb LB: > { %5234 = sst [smem:[#allocation17_spill]] %s3984_s20  ;;  %s4056_s22 = sadd.s32 4294967295, %s3988_s21   ;;  %s3988_s21 = sphi %s4041_s21, %s5368_s21   ;;  %s3984_s20 = sphi %s4039_s20, %s5370_s20   ;;  %s3980_s19 = sphi %s4037_s19, %s5372_s19   ;;  %s3976_s18 = sphi %s4035_s18, %s5371_s18  }
   0xc   : > { %s3202_s23 = sadd.s32 4294967294, %s3988_s21   ;;  %p45_p0 = scmp.ne.s32.totalorder %s3980_s19, %s3976_s18 }
   0xd   : > { %p5198_p1 = scmp.eq.s32.totalorder %s4056_s22, 0  ;;  %p169_p3 = scmp.eq.s32.totalorder %s3202_s23, 1 }
   0xe   : > { %p3203_p5 = scmp.ge.s32.totalorder %s3988_s21, 1  ;;  %p176_p7 = scmp.lt.s32.totalorder %s3988_s21, 3 }
   0xf   : > { %p4065_p4 = por %p5198_p1, %p45_p0  ;;  %p4070_p6 = por %p169_p3, %p45_p0 }
  0x10   : > { %p4075_p8 = pnand %p3203_p5, %p176_p7  ;;  %s3990_s27 = smov [#allocation9]  }
  0x11   : > { %s5235_s24 = scalar_select %p4065_p4, 1, 0 }
  0x12   : > { %s5236_s25 = scalar_select %p4070_p6, 1, 0 }
  0x13   : > { %s5237_s26 = scalar_select %p4075_p8, 1, 0 }
  0x14   : > { %s188_s28 = sshll.u32 %s3990_s27, 4  ;;  %p3668_p9 = pneg %p4075_p8  ;;  %s4079_s28 = int_to_ptr.vmem [resolvable:$true] %s188_s28 }
  0x15   : > { %s4091_s30 = sadd.s32 1, %s3988_s21   ;;  %s32_s6 = sadd.s32 1, %s3984_s20 }
  0x16   : > { %p4086_p11 = pnand %p3668_p9, %p5198_p1  ;;  %5239 = sst [smem:[#allocation18_spill]] %s4091_s30 }
  0x17   : > { %s29_s7 = ssub.s32 %s3988_s21, %s4091_s30  ;;  %s5240_s3 = sld [smem:[#allocation42_spill]] }
  0x18   : > { %s5238_s29 = scalar_select %p4086_p11, 1, 0 }
  0x19   : > { %p5199_p13 = pneg %p4086_p11 }
  0x1d   : > { %s3768_s10 = scalar_lea.hbm %s5240_s3, 9216 }
  0x1e   : > { %p3769_p12 = scmp.ne.s32.totalorder %s5240_s3, %s3768_s10  ;;  %p3775_p5 = scmp.lt.u32.totalorder %s3768_s10, %s5240_s3 }
  0x20   : > { %p3771_p0 = pnand %p5199_p13, %p3769_p12 }
  0x22   : > { %p3772_p3 = pneg %p3771_p0 }
  0x24   : > { %p3777_p7 = pnand %p3775_p5, %p3772_p3 }
  0x26   : > { %3780 = shalt.err (!%p3777_p7)
}
  0x27   : > { %s3781_s15 = scalar_lea.vmem %s4079_s28, 9216  ;;  %p3789_p2 = scmp.lt.s32.totalorder %s4079_s28, %s4079_s28 }
  0x28   : > { %p3782_p9 = scmp.ne.s32.totalorder %s4079_s28, %s3781_s15  ;;  %p3790_p12 = scmp.lt.s32.totalorder %s3781_s15, %s3781_s15 }
  0x2a   : > { %p3784_p10 = pnand %p3782_p9, %p5199_p13  ;;  %p3791_p0 = por %p3790_p12, %p3789_p2 }
  0x2c   : > { %p3785_p1 = pneg %p3784_p10 }
  0x2e   : > { %p3792_p6 = pnand %p3791_p0, %p3785_p1 }
  0x30   : > { %3795 = shalt.err (!%p3792_p6)
}
  0x31   : > { %s3991_s16 = smov 128   ;;  %s3992_s17 = smov 8  }
  0x32   : > { %3671 = dma.hbm_to_vmem [thread:$0]  (!%p4086_p11), %s5240_s3, 9216, %s4079_s28, [#allocation10], %s3991_s16, %s3991_s16, %s3992_s17  }
  0x33   : > { %p30_p1 = scmp.eq.s32.totalorder %s29_s7, 0  ;;  %p39_p2 = scmp.ne.s32.totalorder %s3984_s20, %s3980_s19 }
  0x34   : > { %p40_p6 = scmp.eq.s32.totalorder %s3988_s21, 0  ;;  %p3691_p10 = scmp.lt.s32.totalorder %s3988_s21, 2 }
  0x35   : > { %s4128_s8 = scalar_select %p30_p1, %s3984_s20, %s32_s6  }
  0x36   : > { %p41_p3 = por %p40_p6, %p39_p2  ;;  %p5242_p5 = scmp.eq.s32.totalorder %s4056_s22, 1 }
  0x37   : > { %5241 = sst [smem:[#allocation19_spill]] %s4128_s8  ;;  %s4137_s10 = sand.u32 1, %s3984_s20  }
  0x38   : > { %p4132_p7 = por %p5242_p5, %p39_p2  ;;  %s236_s11 = sand.u32 1, %s3988_s21  }
  0x39   : > { %p4140_p9 = pnand %p3691_p10, %p41_p3  ;;  %s3208_s28 = sshll.u32 %s3988_s21, 4 }
  0x3a   : > { %s5243_s9 = scalar_select %p4132_p7, 1, 0 }
  0x3b   : > { %s5244_s12 = scalar_select %p4140_p9, 1, 0 }
  0x3c   : > { %s5245_s1 = sld [smem:[#allocation41_spill]]  ;;  %s239_s14 = scalar_lea.vmem [#allocation6], %s4137_s10 }
  0x3d   : > { %s246_s15 = sshll.u32 %s239_s14, 4  ;;  %s4154_s23 = scalar_lea.hbm %s5194_s2, %s3208_s28  ;;  %s4156_s15 = int_to_ptr.vmem [resolvable:$true] %s246_s15 }
  0x3e   : > { %s4158_s27 = scalar_lea.sflag [#allocation7], %s236_s11  ;;  %p4164_p0 = pneg %p4140_p9 }
  0x40   : > { %s5246_s7 = scalar_select %p4164_p0, 1, 0 }
  0x42   : > { %s4148_s6 = scalar_lea.hbm %s5245_s1, %s3208_s28  ;;  %s3801_s28 = scalar_lea.hbm %s5245_s1, 32 }
  0x43   : > { %s3796_s3 = scalar_lea.hbm %s4148_s6, 16  ;;  %p3802_p6 = scmp.lt.u32.totalorder %s4148_s6, %s5245_s1 }
  0x44   : > { %p3797_p12 = scmp.ne.s32.totalorder %s4148_s6, %s3796_s3  ;;  %p3803_p10 = scmp.lt.u32.totalorder %s3801_s28, %s3796_s3 }
  0x45   : > { %p3805_p5 = scmp.lt.u32.totalorder %s3796_s3, %s4148_s6 }
  0x46   : > { %p3799_p1 = pnand %p4164_p0, %p3797_p12  ;;  %p3804_p3 = por %p3803_p10, %p3802_p6 }
  0x48   : > { %p3800_p2 = pneg %p3799_p1  ;;  %p3806_p13 = por %p3805_p5, %p3804_p3 }
  0x4a   : > { %p3807_p7 = pnand %p3806_p13, %p3800_p2 }
  0x4c   : > { %3810 = shalt.err (!%p3807_p7)
}
  0x4d   : > { %s3811_s11 = scalar_lea.vmem %s4156_s15, 16  ;;  %s3993_s13 = smov [#allocation6]  }
  0x4e   : > { %p3812_p12 = scmp.ne.s32.totalorder %s4156_s15, %s3811_s11  ;;  %s3816_s14 = sshll.u32 %s3993_s13, 4  ;;  %s3817_s14 = int_to_ptr.vmem [resolvable:$false] %s3816_s14 }
  0x4f   : > { %s3818_s16 = scalar_lea.vmem %s3817_s14, 32  ;;  %p3819_p8 = scmp.lt.s32.totalorder %s4156_s15, %s3817_s14 }
  0x50   : > { %p3814_p1 = pnand %p3812_p12, %p4164_p0  ;;  %p3820_p11 = scmp.lt.s32.totalorder %s3818_s16, %s3811_s11 }
  0x52   : > { %p3815_p4 = pneg %p3814_p1  ;;  %p3821_p6 = por %p3820_p11, %p3819_p8 }
  0x54   : > { %p3822_p10 = pnand %p3821_p6, %p3815_p4 }
  0x56   : > { %3825 = shalt.err (!%p3822_p10)
}
  0x57   : > { %3681 = dma.hbm_to_vmem [thread:$0]  (!%p4140_p9), %s4148_s6, 16, %s4156_s15, %s4158_s27  }
  0x58   : > { %s3994_s3 = smov [#allocation11]   ;;  %s3826_s13 = scalar_lea.hbm %s5196_s4, 288 }
  0x59   : > { %s201_s28 = sshll.u32 %s3994_s3, 4  ;;  %p3827_p8 = scmp.ne.s32.totalorder %s5196_s4, %s3826_s13  ;;  %s202_s28 = int_to_ptr.vmem [resolvable:$true] %s201_s28 }
  0x5a   : > { %p5247_p4 = scmp.ne.s32.totalorder %s5238_s29, 0  ;;  %p3833_p2 = scmp.lt.u32.totalorder %s3826_s13, %s5196_s4 }
  0x5c   : > { %p5248_p11 = pneg %p5247_p4 }
  0x5e   : > { %p3829_p13 = pnand %p3827_p8, %p5248_p11 }
  0x60   : > { %p3830_p7 = pneg %p3829_p13 }
  0x62   : > { %p3835_p3 = pnand %p3833_p2, %p3830_p7 }
  0x64   : > { %3838 = shalt.err (!%p3835_p3)
}
  0x65   : > { %s3839_s6 = scalar_lea.vmem %s202_s28, 288  ;;  %p5249_p12 = pmov %p5248_p11 }
  0x66   : > { %p3840_p5 = scmp.ne.s32.totalorder %s202_s28, %s3839_s6  ;;  %p3847_p10 = scmp.lt.s32.totalorder %s202_s28, %s202_s28 }
  0x67   : > { %p3848_p9 = scmp.lt.s32.totalorder %s3839_s6, %s3839_s6 }
  0x68   : > { %p3842_p1 = pnand %p3840_p5, %p5249_p12 }
  0x69   : > { %p3849_p0 = por %p3848_p9, %p3847_p10 }
  0x6a   : > { %p3843_p6 = pneg %p3842_p1 }
  0x6c   : > { %p3850_p8 = pnand %p3849_p0, %p3843_p6 }
  0x6e   : > { %3853 = shalt.err (!%p3850_p8)
}
  0x6f   : > { %s3995_s1 = smov 32   ;;  %s3996_s8 = smov 2  }
  0x70   : > { %3674 = dma.hbm_to_vmem [thread:$0]  (!%p5247_p4), %s5196_s4, 288, %s202_s28, [#allocation10], %s3995_s1, %s3995_s1, %s3996_s8  }
  0x71   : > { %s3649_s17 = smul.u32 288, %s4137_s10  ;;  %s216_s29 = scalar_lea.sflag [#allocation4], %s4137_s10 }
  0x72   : > { %s3650_s13 = smul.u32 4608, %s3988_s21  ;;  %p5250_p0 = scmp.ne.s32.totalorder %s5246_s7, 0 }
  0x73   : > { %s219_s6 = scalar_lea.vmem [#allocation3], %s3649_s17  ;;  %s3859_s8 = scalar_lea.hbm %s5192_s0, 9216 }
  0x74   : > { %s4213_s16 = scalar_lea.hbm %s5192_s0, %s3650_s13  ;;  %s226_s20 = sshll.u32 %s219_s6, 4  ;;  %s4215_s20 = int_to_ptr.vmem [resolvable:$true] %s226_s20 }
  0x75   : > { %s3854_s30 = scalar_lea.hbm %s4213_s16, 4608  ;;  %p3860_p13 = scmp.lt.u32.totalorder %s4213_s16, %s5192_s0 }
  0x76   : > { %p3855_p9 = scmp.ne.s32.totalorder %s4213_s16, %s3854_s30  ;;  %p3861_p7 = scmp.lt.u32.totalorder %s3859_s8, %s3854_s30 }
  0x77   : > { %p3863_p3 = scmp.lt.u32.totalorder %s3854_s30, %s4213_s16 }
  0x78   : > { %p3857_p4 = pnand %p3855_p9, %p5250_p0  ;;  %p3862_p2 = por %p3861_p7, %p3860_p13 }
  0x7a   : > { %p3858_p11 = pneg %p3857_p4  ;;  %p3864_p5 = por %p3863_p3, %p3862_p2 }
  0x7c   : > { %p3865_p12 = pnand %p3864_p5, %p3858_p11 }
  0x7e   : > { %3868 = shalt.err (!%p3865_p12)
}
  0x7f   : > { %s3869_s17 = scalar_lea.vmem %s4215_s20, 4608  ;;  %s3997_s13 = smov [#allocation3]  }
  0x80   : > { %p3870_p1 = scmp.ne.s32.totalorder %s4215_s20, %s3869_s17  ;;  %s3874_s14 = sshll.u32 %s3997_s13, 4  ;;  %s3875_s14 = int_to_ptr.vmem [resolvable:$false] %s3874_s14 }
  0x81   : > { %s3876_s11 = scalar_lea.vmem %s3875_s14, 9216  ;;  %p3877_p8 = scmp.lt.s32.totalorder %s4215_s20, %s3875_s14 }
  0x82   : > { %p3872_p6 = pnand %p3870_p1, %p5250_p0  ;;  %p3878_p9 = scmp.lt.s32.totalorder %s3876_s11, %s3869_s17 }
  0x84   : > { %p3873_p10 = pneg %p3872_p6  ;;  %p3879_p4 = por %p3878_p9, %p3877_p8 }
  0x86   : > { %p3880_p13 = pnand %p3879_p4, %p3873_p10 }
  0x88   : > { %3883 = shalt.err (!%p3880_p13)
}
  0x89   : > { %s3998_s30 = smov 64   ;;  %s3999_s6 = smov 4  }
  0x8a   : > { %p5251_p11 = scmp.ne.s32.totalorder %s5244_s12, 0  ;;  %s256_s28 = scalar_lea.vmem [#allocation8], %s4137_s10 }
  0x8b   : > { %s263_s1 = sshll.u32 %s256_s28, 4  ;;  %s3884_s8 = scalar_lea.hbm %s4154_s23, 16  ;;  %s264_s1 = int_to_ptr.vmem [resolvable:$true] %s263_s1 }
  0x8c   : > { %3678 = dma.hbm_to_vmem [thread:$0]  (!%p5251_p11), %s4213_s16, 4608, %s4215_s20, %s216_s29, %s3998_s30, %s3998_s30, %s3999_s6  }
  0x8d   : > { %p3885_p7 = scmp.ne.s32.totalorder %s4154_s23, %s3884_s8  ;;  %s3889_s17 = scalar_lea.hbm %s5194_s2, 32 }
  0x8e   : > { %p3890_p5 = scmp.lt.u32.totalorder %s4154_s23, %s5194_s2  ;;  %p3891_p12 = scmp.lt.u32.totalorder %s3889_s17, %s3884_s8 }
  0x8f   : > { %p3887_p2 = pnand %p3885_p7, %p5250_p0  ;;  %p3893_p6 = scmp.lt.u32.totalorder %s3884_s8, %s4154_s23 }
  0x90   : > { %p3892_p1 = por %p3891_p12, %p3890_p5 }
  0x91   : > { %p3888_p3 = pneg %p3887_p2 }
  0x92   : > { %p3894_p10 = por %p3893_p6, %p3892_p1 }
  0x94   : > { %p3895_p8 = pnand %p3894_p10, %p3888_p3 }
  0x96   : > { %3898 = shalt.err (!%p3895_p8)
}
  0x97   : > { %s3899_s20 = scalar_lea.vmem %s264_s1, 16  ;;  %s4000_s10 = smov [#allocation8]  }
  0x98   : > { %p3900_p9 = scmp.ne.s32.totalorder %s264_s1, %s3899_s20  ;;  %s3904_s16 = sshll.u32 %s4000_s10, 4  ;;  %s3905_s16 = int_to_ptr.vmem [resolvable:$false] %s3904_s16 }
  0x99   : > { %s3906_s29 = scalar_lea.vmem %s3905_s16, 32  ;;  %p3907_p7 = scmp.lt.s32.totalorder %s264_s1, %s3905_s16 }
  0x9a   : > { %p3902_p4 = pnand %p3900_p9, %p5250_p0  ;;  %p3908_p2 = scmp.lt.s32.totalorder %s3906_s29, %s3899_s20 }
  0x9c   : > { %p3903_p13 = pneg %p3902_p4  ;;  %p3909_p11 = por %p3908_p2, %p3907_p7 }
  0x9e   : > { %p3910_p5 = pnand %p3909_p11, %p3903_p13 }
  0xa0   : > { %3913 = shalt.err (!%p3910_p5)
}
  0xa1   : > { %p5252_p12 = scmp.ne.s32.totalorder %s5244_s12, 0  ;;  %p5253_p3 = scmp.ne.s32.totalorder %s5237_s26, 0 }
  0xa3   : > { %3684 = dma.hbm_to_vmem [thread:$0]  (!%p5252_p12), %s4154_s23, 16, %s264_s1, %s4158_s27  }
  0xa4   : > { %272 = sbr.rel (%p5253_p3) target bundleno = 693 (0x2b5), region = 40 }
  0xab   : > { %s4263_s7 = sand.u32 1, %s3980_s19   ;;  %p5254_p0 = scmp.ne.s32.totalorder %s5235_s24, 0 }
  0xac   : > { %s3651_s11 = smul.u32 288, %s4263_s7  ;;  %s275_s30 = scalar_lea.sflag [#allocation4], %s4263_s7 }
  0xae   : > { %s4267_s6 = scalar_lea.vmem [#allocation3], %s3651_s11 }
  0xaf   : > { %3959 = dma.done.wait (%p5254_p0), %s275_s30, 4608  }
  0xb0   : > { %3961 = vsyncadd (%p5254_p0), %s275_s30, 4294962688  ;;  %s283_s26 = sand.u32 1, %s4056_s22   ;;  %s286_s23 = scalar_lea.vmem [#allocation6], %s4263_s7 }
  0xb1   : > { %s284_s12 = scalar_lea.sflag [#allocation7], %s283_s26 }
  0xb2   : > { %3963 = dma.done.wait (%p5254_p0), %s284_s12, 32  }
  0xb3   : > { %3965 = vsyncadd (%p5254_p0), %s284_s12, 4294967264  ;;  %s294_s27 = scalar_lea.vmem [#allocation8], %s4263_s7  ;;  %p5255_p11 = scmp.eq.s32.totalorder %s4056_s22, 0 }
  0xb5   : > { %3967 = dma.done.wait (%p5255_p11), [#allocation10], 9504   ;;  %p5256_p1 = pmov %p5255_p11 }
  0xb6   : > { %v4001_v0 = vmov 0   ;;  %v766_v1 = vld [vmem:[#allocation9 + $0x1b0] sm:$0xff]  ;;  %v768_v3 = vld [vmem:[#allocation9 + $0x1c0] sm:$0xff]  ;;  %v751_v13 = vld [vmem:[#allocation9 + $0x138] sm:$0x1]  ;;  %vm1705_vm0 = vcmask 1041408  }
  0xb7   : > { %3969 = vsyncadd (%p5256_p1), [#allocation10], 4294957792  ;;  %3739 = vset.pattern.permute.xlu1 %v4001_v0  ;;  %3738 = vset.pattern.permute.xlu0 %v4001_v0  ;;  %v730_v2 = vld [vmem:[#allocation9 + $0x90] sm:$0xff]  ;;  %v732_v4 = vld [vmem:[#allocation9 + $0xa0] sm:$0xff]  ;;  %vm1504_vm1 = vcmask 27648   ;;  %vm1692_vm2 = vcmask 31744  }
  0xb8   : > { %1056 = vperm.xlu1 %3739, %v766_v1   ;;  %876 = vperm.xlu0 %3738, %v730_v2   ;;  %v736_v5 = vld [vmem:[#allocation9 + $0xc0] sm:$0xff]  ;;  %v734_v6 = vld [vmem:[#allocation9 + $0xb0] sm:$0xff]  ;;  %v749_v14 = vld [vmem:[#allocation9 + $0x128] sm:$0x1]  ;;  %vm1506_vm3 = vcmask 24576   ;;  %s3213_s24 = sshll.u32 %s4263_s7, 5 }
  0xb9   : > { %v772_v7 = vld [vmem:[#allocation9 + $0x1e0] sm:$0xff]  ;;  %v770_v8 = vld [vmem:[#allocation9 + $0x1d0] sm:$0xff]  ;;  %v755_v15 = vld [vmem:[#allocation9 + $0x158] sm:$0x1]  ;;  %vm1507_vm4 = vsmask.f32 256 }
  0xba   : > { %v750_v9 = vld [vmem:[#allocation9 + $0x130] sm:$0xff]  ;;  %v748_v10 = vld [vmem:[#allocation9 + $0x120] sm:$0xff]  ;;  %v753_v16 = vld [vmem:[#allocation9 + $0x148] sm:$0x1]  ;;  %vm1890_vm6 = vsmask.f32 3328 }
  0xbb   : > { %v754_v11 = vld [vmem:[#allocation9 + $0x150] sm:$0xff]  ;;  %v752_v12 = vld [vmem:[#allocation9 + $0x140] sm:$0xff]  ;;  %v2236_v18 = vld [vmem:[#allocation11 + $0x8] sm:$0x3]  ;;  %vm1891_vm7 = vsmask.f32 7440 }
  0xbc   : > { %1066 = vperm.xlu1 %3739, %v768_v3   ;;  %886 = vperm.xlu0 %3738, %v732_v4   ;;  %v1671_v17 = vld [vmem:[#allocation11 + $0x2] sm:$0x3]  ;;  %v738_v20 = vld [vmem:[#allocation9 + $0xd0] sm:$0xff]  ;;  %v4288_v22 = vsel %vm1705_vm0, %v2236_v18, 0  ;;  %v4291_v29 = vld [vmem:[#allocation11 + $0xa] sm:$0x3] }
  0xbd   : > { %3639 = vmatprep.subr.msk.bf16.mxu1 %vm1705_vm0, %v1671_v17  ;;  %3643 = vmatprep.subr.msk.bf16.mxu0 %vm1705_vm0, %v2236_v18  ;;  %v740_v19 = vld [vmem:[#allocation9 + $0xe0] sm:$0xff]  ;;  %v1707_v21 = vsel %vm1705_vm0, %v1671_v17, 0  ;;  %5257 = vst [vmem:[#allocation20_spill] sm:$0xff] %v4288_v22  ;;  %v742_v24 = vld [vmem:[#allocation9 + $0xf0] sm:$0xff]  ;;  %v759_v30 = vld [vmem:[#allocation9 + $0x178] sm:$0x1] }
  0xbe   : > { %v744_v23 = vld [vmem:[#allocation9 + $0x100] sm:$0xff]  ;;  %3484 = vmatpush3.bf16.msra.mxu1 %v1707_v21  ;;  %3524 = vmatpush3.bf16.msra.mxu0 %v4288_v22  ;;  %v758_v25 = vld [vmem:[#allocation9 + $0x170] sm:$0xff]  ;;  %v757_v31 = vld [vmem:[#allocation9 + $0x168] sm:$0x1]  ;;  %s336_s28 = scalar_lea.vmem [#allocation12], %s3213_s24  ;;  %s3437_s1 = sshll.u32 %s4056_s22, 9 }
  0xbf   : > { %v756_v26 = vld [vmem:[#allocation9 + $0x160] sm:$0xff]  ;;  %v762_v27 = vld [vmem:[#allocation9 + $0x190] sm:$0xff]  ;;  %3645 = vmatprep.subr.msk.bf16.mxu0 %vm1705_vm0, %v4291_v29  ;;  %v763_v32 = vld [vmem:[#allocation9 + $0x198] sm:$0x1]  ;;  %s3073_s8 = sshll.u32 %s336_s28, 4  ;;  %s5143_s17 = scalar_lea.hbm %s5197_s5, %s3437_s1  ;;  %s5145_s8 = int_to_ptr.vmem [resolvable:$true] %s3073_s8 }
  0xc0   : > { %906 = vperm.xlu1 %3739, %v736_v5   ;;  %896 = vperm.xlu0 %3738, %v734_v6   ;;  %v760_v28 = vld [vmem:[#allocation9 + $0x180] sm:$0xff]  ;;  %v761_v33 = vld [vmem:[#allocation9 + $0x188] sm:$0x1]  ;;  %v714_v34 = vld [vmem:[#allocation9 + $0x10] sm:$0xff]  ;;  %s3060_s22 = scalar_lea.sflag [#allocation5], %s4263_s7  ;;  %s3914_s13 = scalar_lea.vmem %s5145_s8, 512 }
  0xc1   : > { %v712_v35 = vld [vmem:[#allocation9] sm:$0xff]  ;;  %v718_v36 = vld [vmem:[#allocation9 + $0x30] sm:$0xff]  ;;  %v715_v43 = vld [vmem:[#allocation9 + $0x18] sm:$0x1]  ;;  %p3915_p6 = scmp.ne.s32.totalorder %s5145_s8, %s3914_s13  ;;  %p5365_p10 = scmp.ne.s32.totalorder %s5243_s9, 0 }
  0xc2   : > { %v716_v37 = vld [vmem:[#allocation9 + $0x20] sm:$0xff]  ;;  %v722_v38 = vld [vmem:[#allocation9 + $0x50] sm:$0xff]  ;;  %v713_v44 = vld [vmem:[#allocation9 + $0x8] sm:$0x1]  ;;  %s4002_s14 = smov [#allocation12]  }
  0xc3   : > { %v720_v39 = vld [vmem:[#allocation9 + $0x40] sm:$0xff]  ;;  %v726_v40 = vld [vmem:[#allocation9 + $0x70] sm:$0xff]  ;;  %v719_v46 = vld [vmem:[#allocation9 + $0x38] sm:$0x1]  ;;  %p3916_p8 = pnand %p3915_p6, %p5365_p10  ;;  %s3918_s20 = sshll.u32 %s4002_s14, 4  ;;  %s3919_s20 = int_to_ptr.vmem [resolvable:$false] %s3918_s20 }
  0xc4   : > { %1086 = vperm.xlu1 %3739, %v772_v7   ;;  %1076 = vperm.xlu0 %3738, %v770_v8   ;;  %v724_v41 = vld [vmem:[#allocation9 + $0x60] sm:$0xff]  ;;  %v717_v47 = vld [vmem:[#allocation9 + $0x28] sm:$0x1]  ;;  %v394_v48 = vld [vmem:[%s4267_s6 + $0x50] ss:$144 sps:$4 sm:$0xff]   ;;  %s3920_s10 = scalar_lea.vmem %s3919_s20, 1024  ;;  %p3921_p4 = scmp.lt.s32.totalorder %s5145_s8, %s3919_s20 }
  0xc5   : > { %v4295_v42 = vld [vmem:[#allocation11] sm:$0x3]  ;;  %v392_v45 = vld [vmem:[%s4267_s6 + $0x48] ss:$144 sps:$4 sm:$0xff]   ;;  %v4304_v52 = vld [vmem:[%s286_s23] ss:$0 sm:$0xff]  ;;  %v466_v53 = vunpack.c.h.bf16 %v394_v48  ;;  %v430_v54 = vunpack.c.l.bf16 %v394_v48  ;;  %p3917_p9 = pneg %p3916_p8  ;;  %p3922_p13 = scmp.lt.s32.totalorder %s3920_s10, %s3914_s13 }
  0xc6   : > { %3640 = vmatprep.subr.msk.bf16.mxu1 %vm1705_vm0, %v4295_v42  ;;  %v464_v49 = vunpack.c.h.bf16 %v392_v45  ;;  %v428_v50 = vunpack.c.l.bf16 %v392_v45  ;;  %v362_v51 = vld [vmem:[%s4267_s6 + $0x58] ss:$8 sps:$4 sm:$0xff]   ;;  %v723_v55 = vld [vmem:[#allocation9 + $0x58] sm:$0x1]  ;;  %v721_v56 = vld [vmem:[#allocation9 + $0x48] sm:$0x1] }
  0xc7   : > { %v398_v57 = vld [vmem:[%s4267_s6 + $0xe8] ss:$8 sps:$4 sm:$0xff]   ;;  %v434_v58 = vunpack.c.h.bf16 %v362_v51  ;;  %v432_v61 = vunpack.c.l.bf16 %v362_v51  ;;  %v4311_v62 = vld [vmem:[%s294_s27] ss:$0 sm:$0xff]  ;;  %v545_v63 = vmul.f32 %v4304_v52, %v466_v53  ;;  %v509_v0 = vmul.f32 %v4304_v52, %v430_v54  ;;  %v727_v3 = vld [vmem:[#allocation9 + $0x78] sm:$0x1]  ;;  %p3923_p7 = por %p3922_p13, %p3921_p4 }
  0xc8   : > { %976 = vperm.xlu1 %3739, %v750_v9   ;;  %966 = vperm.xlu0 %3738, %v748_v10   ;;  %v543_v59 = vmul.f32 %v4304_v52, %v464_v49  ;;  %v507_v60 = vmul.f32 %v4304_v52, %v428_v50  ;;  %v470_v1 = vunpack.c.h.bf16 %v398_v57  ;;  %v376_v2 = vld [vmem:[%s4267_s6 + $0x90] ss:$8 sps:$4 sm:$0xff]   ;;  %v725_v4 = vld [vmem:[#allocation9 + $0x68] sm:$0x1]  ;;  %v468_v5 = vunpack.c.l.bf16 %v398_v57  ;;  %v728_v17 = vld [vmem:[#allocation9 + $0x80] sm:$0xff] }
  0xc9   : > { %v513_v6 = vmul.f32 %v4304_v52, %v434_v58  ;;  %v511_v9 = vmul.f32 %v4304_v52, %v432_v61  ;;  %v448_v10 = vunpack.c.h.bf16 %v376_v2  ;;  %v384_v54 = vld [vmem:[%s4267_s6 + $0xb0] ss:$8 sps:$4 sm:$0xff]   ;;  %vm4736_vm5 = vmand %vm1506_vm3, %vm1507_vm4  ;;  %p3924_p2 = pnand %p3923_p7, %p3917_p9 }
  0xca   : > { %v4318_v7 = vadd.f32 %v4311_v62, %v543_v59  ;;  %v4321_v8 = vadd.f32 %v4311_v62, %v507_v60  ;;  %v547_v18 = vmul.f32 %v4304_v52, %v468_v5  ;;  %v778_v59 = vld [vmem:[#allocation9 + $0x210] sm:$0xff]  ;;  %v776_v60 = vld [vmem:[#allocation9 + $0x200] sm:$0xff]  ;;  %v4553_v22 = vld [vmem:[#allocation11 + $0xc] sm:$0x3] }
  0xcb   : > { %vm4790_vm8 = vmor %vm1890_vm6, %vm1891_vm7 }
  0xcc   : > { %996 = vperm.xlu1 %3739, %v754_v11   ;;  %986 = vperm.xlu0 %3738, %v752_v12   ;;  %v380_v11 = vld [vmem:[%s4267_s6 + $0xa0] ss:$8 sps:$4 sm:$0xff]   ;;  %v4326_v12 = vadd.f32 %v4311_v62, %v545_v63 }
  0xcd   : > { %v450_v21 = vunpack.c.l.bf16 %v380_v11 }
  0xd0   : > { %981 = vperm.xlu1 %3739, %v751_v13   ;;  %971 = vperm.xlu0 %3738, %v749_v14   ;;  %v4329_v13 = vadd.f32 %v4311_v62, %v509_v0  ;;  %v549_v14 = vmul.f32 %v4304_v52, %v470_v1 }
  0xd4   : > { %1001 = vperm.xlu1 %3739, %v755_v15   ;;  %991 = vperm.xlu0 %3738, %v753_v16   ;;  %v446_v15 = vunpack.c.l.bf16 %v376_v2  ;;  %v746_v16 = vld [vmem:[#allocation9 + $0x110] sm:$0xff]  ;;  %v388_v2 = vld [vmem:[%s4267_s6 + $0xc0] ss:$8 sps:$4 sm:$0xff]  }
  0xd8   : > { %926 = vperm.xlu1 %3739, %v740_v19   ;;  %916 = vperm.xlu0 %3738, %v738_v20   ;;  %v4334_v19 = vadd.f32 %v4311_v62, %v513_v6  ;;  %v452_v20 = vunpack.c.h.bf16 %v380_v11  ;;  %v456_v6 = vunpack.c.h.bf16 %v384_v54 }
  0xdc   : > { %946 = vperm.xlu1 %3739, %v744_v23   ;;  %936 = vperm.xlu0 %3738, %v742_v24   ;;  %v377_v23 = vld [vmem:[%s4267_s6 + $0x9c] sm:$0x1]  ;;  %v375_v24 = vld [vmem:[%s4267_s6 + $0x94] sm:$0x1] }
  0xe0   : > { %1016 = vperm.xlu1 %3739, %v758_v25   ;;  %1006 = vperm.xlu0 %3738, %v756_v26   ;;  %v381_v25 = vld [vmem:[%s4267_s6 + $0xac] sm:$0x1] }
  0xe1   : > { %v357_v26 = vld [vmem:[%s4267_s6 + $0x4c] sm:$0x1] }
  0xe4   : > { %1036 = vperm.xlu1 %3739, %v762_v27   ;;  %1026 = vperm.xlu0 %3738, %v760_v28   ;;  %v4342_v28 = vadd.f32 %v4311_v62, %v511_v9 }
  0xe8   : > { %1021 = vperm.xlu1 %3739, %v759_v30   ;;  %1011 = vperm.xlu0 %3738, %v757_v31   ;;  %v527_v30 = vmul.f32 %v4304_v52, %v448_v10  ;;  %v379_v31 = vld [vmem:[%s4267_s6 + $0xa4] sm:$0x1] }
  0xe9   : > { %v451_v48 = vunpack.c.l.bf16 %v379_v31  ;;  %v458_v31 = vunpack.c.l.bf16 %v388_v2 }
  0xea   : > { %v4361_v49 = vadd.f32 %v4311_v62, %v527_v30 }
  0xeb   : > { %v530_v5 = vmul.f32 %v4304_v52, %v451_v48  ;;  %v387_v48 = vld [vmem:[%s4267_s6 + $0xc4] sm:$0x1] }
  0xec   : > { %1041 = vperm.xlu1 %3739, %v763_v32   ;;  %1031 = vperm.xlu0 %3738, %v761_v33   ;;  %v771_v33 = vld [vmem:[#allocation9 + $0x1d8] sm:$0x1]  ;;  %v355_v32 = vld [vmem:[%s4267_s6 + $0x44] sm:$0x1] }
  0xf0   : > { %796 = vperm.xlu1 %3739, %v714_v34   ;;  %786 = vperm.xlu0 %3738, %v712_v35   ;;  %v4349_v34 = vadd.f32 %v4311_v62, %v549_v14  ;;  %v525_v35 = vmul.f32 %v4304_v52, %v446_v15  ;;  %v343_v15 = vld [vmem:[%s4267_s6 + $0x14] sm:$0x1] }
  0xf2   : > { %v4367_v57 = vadd.f32 %v4311_v62, %v525_v35  ;;  %v383_v35 = vld [vmem:[%s4267_s6 + $0xb4] sm:$0x1] }
  0xf4   : > { %816 = vperm.xlu1 %3739, %v718_v36   ;;  %806 = vperm.xlu0 %3738, %v716_v37   ;;  %v366_v36 = vld [vmem:[%s4267_s6 + $0x68] ss:$8 sps:$4 sm:$0xff]   ;;  %v370_v37 = vld [vmem:[%s4267_s6 + $0x78] ss:$8 sps:$4 sm:$0xff]  }
  0xf5   : > { %v438_v50 = vunpack.c.h.bf16 %v366_v36  ;;  %v436_v51 = vunpack.c.l.bf16 %v366_v36  ;;  %v442_v53 = vunpack.c.h.bf16 %v370_v37  ;;  %v440_v58 = vunpack.c.l.bf16 %v370_v37  ;;  %v345_v37 = vld [vmem:[%s4267_s6 + $0x1c] sm:$0x1] }
  0xf7   : > { %v517_v10 = vmul.f32 %v4304_v52, %v438_v50  ;;  %v515_v11 = vmul.f32 %v4304_v52, %v436_v51  ;;  %v521_v14 = vmul.f32 %v4304_v52, %v442_v53  ;;  %v735_v50 = vld [vmem:[#allocation9 + $0xb8] sm:$0x1] }
  0xf8   : > { %836 = vperm.xlu1 %3739, %v722_v38   ;;  %826 = vperm.xlu0 %3738, %v720_v39   ;;  %v774_v38 = vld [vmem:[#allocation9 + $0x1f0] sm:$0xff]  ;;  %v729_v39 = vld [vmem:[#allocation9 + $0x88] sm:$0x1] }
  0xfc   : > { %856 = vperm.xlu1 %3739, %v726_v40   ;;  %846 = vperm.xlu0 %3738, %v724_v41   ;;  %v4355_v40 = vadd.f32 %v4311_v62, %v547_v18  ;;  %v449_v41 = vunpack.c.l.bf16 %v377_v23  ;;  %v460_v18 = vunpack.c.h.bf16 %v388_v2  ;;  %v780_v23 = vld [vmem:[#allocation9 + $0x220] sm:$0xff] }
  0xfe   : > { %v528_v63 = vmul.f32 %v4304_v52, %v449_v41  ;;  %v4405_v41 = vadd.f32 %v4311_v62, %v517_v10  ;;  %v459_v10 = vunpack.c.l.bf16 %v387_v48  ;;  %v737_v48 = vld [vmem:[#allocation9 + $0xc8] sm:$0x1] }
 0x100   : > { %801 = vperm.xlu1 %3739, %v715_v43   ;;  %791 = vperm.xlu0 %3738, %v713_v44   ;;  %v447_v43 = vunpack.c.l.bf16 %v375_v24  ;;  %v453_v44 = vunpack.c.l.bf16 %v381_v25  ;;  %v4389_v24 = vadd.f32 %v4311_v62, %v528_v63  ;;  %v741_v63 = vld [vmem:[#allocation9 + $0xe8] sm:$0x1] }
 0x102   : > { %v526_v0 = vmul.f32 %v4304_v52, %v447_v43  ;;  %v532_v1 = vmul.f32 %v4304_v52, %v453_v44  ;;  %v4408_v43 = vadd.f32 %v4311_v62, %v515_v11  ;;  %v4411_v44 = vadd.f32 %v4311_v62, %v521_v14  ;;  %v340_v11 = vld [vmem:[%s4267_s6] ss:$8 sps:$4 sm:$0xff]  }
 0x104   : > { %821 = vperm.xlu1 %3739, %v719_v46   ;;  %811 = vperm.xlu0 %3738, %v717_v47   ;;  %v531_v46 = vmul.f32 %v4304_v52, %v452_v20  ;;  %v529_v47 = vmul.f32 %v4304_v52, %v450_v21  ;;  %v385_v20 = vld [vmem:[%s4267_s6 + $0xbc] sm:$0x1]  ;;  %v4392_v25 = vadd.f32 %v4311_v62, %v526_v0 }
 0x105   : > { %v731_v21 = vld [vmem:[#allocation9 + $0x98] sm:$0x1]  ;;  %v4395_v30 = vadd.f32 %v4311_v62, %v532_v1  ;;  %v537_v1 = vmul.f32 %v4304_v52, %v458_v31 }
 0x108   : > { %841 = vperm.xlu1 %3739, %v723_v55   ;;  %831 = vperm.xlu0 %3738, %v721_v56   ;;  %v745_v56 = vld [vmem:[#allocation9 + $0x108] sm:$0x1] }
 0x109   : > { %v765_v55 = vld [vmem:[#allocation9 + $0x1a8] sm:$0x1] }
 0x10c   : > { %861 = vperm.xlu1 %3739, %v727_v3   ;;  %851 = vperm.xlu0 %3738, %v725_v4   ;;  %v4375_v3 = vadd.f32 %v4311_v62, %v531_v46  ;;  %v4378_v4 = vadd.f32 %v4311_v62, %v529_v47  ;;  %v457_v46 = vunpack.c.l.bf16 %v385_v20  ;;  %v389_v47 = vld [vmem:[%s4267_s6 + $0xcc] sm:$0x1]  ;;  %v344_v20 = vld [vmem:[%s4267_s6 + $0x10] ss:$8 sps:$4 sm:$0xff]  }
 0x10d   : > { %v414_v2 = vunpack.c.l.bf16 %v344_v20 }
 0x110   : > { %956 = vperm.xlu1 %3739, %v746_v16   ;;  %866 = vperm.xlu0 %3738, %v728_v17   ;;  %v519_v16 = vmul.f32 %v4304_v52, %v440_v58  ;;  %v454_v17 = vunpack.c.l.bf16 %v384_v54  ;;  %v539_v54 = vmul.f32 %v4304_v52, %v460_v18  ;;  %v455_v58 = vunpack.c.l.bf16 %v383_v35 }
 0x111   : > { %v536_v18 = vmul.f32 %v4304_v52, %v457_v46  ;;  %v4448_v46 = vsel %vm1705_vm0, %v4291_v29, 0  ;;  %v341_v29 = vld [vmem:[%s4267_s6 + $0xc] sm:$0x1] }
 0x112   : > { %v4416_v51 = vadd.f32 %v4311_v62, %v519_v16  ;;  %v533_v53 = vmul.f32 %v4304_v52, %v454_v17  ;;  %v4439_v35 = vadd.f32 %v4311_v62, %v539_v54  ;;  %v4444_v17 = vadd.f32 %v4311_v62, %v537_v1 }
 0x113   : > { %v538_v16 = vmul.f32 %v4304_v52, %v459_v10  ;;  %v4455_v14 = vadd.f32 %v4311_v62, %v536_v18 }
 0x114   : > { %1096 = vperm.xlu1 %3739, %v774_v38   ;;  %871 = vperm.xlu0 %3738, %v729_v39   ;;  %v4401_v38 = vadd.f32 %v4311_v62, %v530_v5  ;;  %v535_v39 = vmul.f32 %v4304_v52, %v456_v6  ;;  %v461_v6 = vunpack.c.l.bf16 %v389_v47  ;;  %v4436_v31 = vadd.f32 %v4311_v62, %v533_v53  ;;  %v348_v47 = vld [vmem:[%s4267_s6 + $0x20] ss:$8 sps:$4 sm:$0xff]  }
 0x115   : > { %v420_v1 = vunpack.c.h.bf16 %v348_v47  ;;  %v418_v0 = vunpack.c.l.bf16 %v348_v47  ;;  %v4472_v53 = vadd.f32 %v4311_v62, %v538_v16 }
 0x116   : > { %v4426_v5 = vadd.f32 %v4311_v62, %v535_v39  ;;  %v534_v39 = vmul.f32 %v4304_v52, %v455_v58  ;;  %v540_v54 = vmul.f32 %v4304_v52, %v461_v6  ;;  %v416_v58 = vunpack.c.h.bf16 %v344_v20 }
 0x117   : > { %v413_v6 = vunpack.c.l.bf16 %v341_v29  ;;  %v493_v20 = vmul.f32 %v4304_v52, %v414_v2  ;;  %v747_v29 = vld [vmem:[#allocation9 + $0x118] sm:$0x1] }
 0x118   : > { %1116 = vperm.xlu1 %3739, %v778_v59   ;;  %1106 = vperm.xlu0 %3738, %v776_v60   ;;  %v733_v59 = vld [vmem:[#allocation9 + $0xa8] sm:$0x1]  ;;  %v4461_v10 = vadd.f32 %v4311_v62, %v534_v39  ;;  %v4469_v36 = vadd.f32 %v4311_v62, %v540_v54  ;;  %v495_v39 = vmul.f32 %v4304_v52, %v416_v58  ;;  %v417_v58 = vunpack.c.l.bf16 %v345_v37 }
 0x119   : > { %v492_v37 = vmul.f32 %v4304_v52, %v413_v6 }
 0x11c   : > { %881 = vperm.xlu1 %3739, %v731_v21   ;;  %1126 = vperm.xlu0 %3738, %v780_v23   ;;  %v739_v21 = vld [vmem:[#allocation9 + $0xd8] sm:$0x1]  ;;  %v352_v23 = vld [vmem:[%s4267_s6 + $0x30] ss:$8 sps:$4 sm:$0xff]  }
 0x11d   : > { %v424_v18 = vunpack.c.h.bf16 %v352_v23 }
 0x11f   : > { %v503_v16 = vmul.f32 %v4304_v52, %v424_v18  ;;  %v4493_v18 = vadd.f32 %v4311_v62, %v495_v39 }
 0x120   : > { %901 = vperm.xlu1 %3739, %v735_v50   ;;  %891 = vperm.xlu0 %3738, %v733_v59   ;;  %v412_v50 = vunpack.c.h.bf16 %v340_v11  ;;  %v410_v59 = vunpack.c.l.bf16 %v340_v11  ;;  %v743_v11 = vld [vmem:[#allocation9 + $0xf8] sm:$0x1] }
 0x121   : > { %v4508_v39 = vadd.f32 %v4311_v62, %v503_v16  ;;  %v402_v16 = vld [vmem:[%s4267_s6 + $0x100] ss:$16 sps:$4 sm:$0xff]  }
 0x122   : > { %v491_v60 = vmul.f32 %v4304_v52, %v412_v50  ;;  %v489_v47 = vmul.f32 %v4304_v52, %v410_v59  ;;  %v499_v50 = vmul.f32 %v4304_v52, %v420_v1  ;;  %v349_v59 = vld [vmem:[%s4267_s6 + $0x2c] sm:$0x1]  ;;  %v415_v1 = vunpack.c.l.bf16 %v343_v15 }
 0x123   : > { %5261 = vst [vmem:[#allocation24_spill] sm:$0xff] %v4508_v39 }
 0x124   : > { %921 = vperm.xlu1 %3739, %v739_v21   ;;  %911 = vperm.xlu0 %3738, %v737_v48   ;;  %v422_v21 = vunpack.c.l.bf16 %v352_v23  ;;  %v339_v48 = vld [vmem:[%s4267_s6 + $0x4] sm:$0x1]  ;;  %v497_v23 = vmul.f32 %v4304_v52, %v418_v0  ;;  %v4484_v9 = vadd.f32 %v4311_v62, %v491_v60  ;;  %v4487_v2 = vadd.f32 %v4311_v62, %v489_v47 }
 0x125   : > { %v411_v61 = vunpack.c.l.bf16 %v339_v48  ;;  %v421_v48 = vunpack.c.l.bf16 %v349_v59  ;;  %v4498_v60 = vadd.f32 %v4311_v62, %v493_v20  ;;  %v4501_v47 = vadd.f32 %v4311_v62, %v499_v50  ;;  %v351_v20 = vld [vmem:[%s4267_s6 + $0x34] sm:$0x1]  ;;  %v400_v50 = vld [vmem:[%s4267_s6 + $0xf8] ss:$16 sps:$4 sm:$0xff]  }
 0x126   : > { %v501_v0 = vmul.f32 %v4304_v52, %v422_v21  ;;  %v4504_v15 = vadd.f32 %v4311_v62, %v497_v23  ;;  %v353_v21 = vld [vmem:[%s4267_s6 + $0x3c] sm:$0x1]  ;;  %v496_v59 = vmul.f32 %v4304_v52, %v417_v58  ;;  %v769_v23 = vld [vmem:[#allocation9 + $0x1c8] sm:$0x1]  ;;  %v472_v39 = vunpack.c.l.bf16 %v400_v50 }
 0x127   : > { %5258 = vst [vmem:[#allocation21_spill] sm:$0xff] %v4498_v60  ;;  %5259 = vst [vmem:[#allocation22_spill] sm:$0xff] %v4501_v47  ;;  %v490_v6 = vmul.f32 %v4304_v52, %v411_v61  ;;  %v4521_v61 = vadd.f32 %v4311_v62, %v492_v37  ;;  %v500_v58 = vmul.f32 %v4304_v52, %v421_v48  ;;  %v429_v47 = vunpack.c.l.bf16 %v357_v26  ;;  %v779_v60 = vld [vmem:[#allocation9 + $0x218] sm:$0x1] }
 0x128   : > { %941 = vperm.xlu1 %3739, %v743_v11   ;;  %931 = vperm.xlu0 %3738, %v741_v63   ;;  %v347_v11 = vld [vmem:[%s4267_s6 + $0x24] sm:$0x1]  ;;  %5260 = vst [vmem:[#allocation23_spill] sm:$0xff] %v4504_v15  ;;  %v767_v63 = vld [vmem:[#allocation9 + $0x1b8] sm:$0x1]  ;;  %v4516_v45 = vadd.f32 %v4311_v62, %v501_v0  ;;  %v4533_v48 = vadd.f32 %v4311_v62, %v496_v59 }
 0x129   : > { %v419_v54 = vunpack.c.l.bf16 %v347_v11  ;;  %5263 = vst [vmem:[#allocation26_spill] sm:$0xff] %v4521_v61  ;;  %v372_v11 = vld [vmem:[%s4267_s6 + $0x40] ss:$72 sps:$4 sm:$0xff]   ;;  %v4530_v37 = vadd.f32 %v4311_v62, %v490_v6  ;;  %v4549_v0 = vadd.f32 %v4311_v62, %v500_v58  ;;  %v474_v61 = vunpack.c.l.bf16 %v402_v16 }
 0x12a   : > { %5262 = vst [vmem:[#allocation25_spill] sm:$0xff] %v4516_v45  ;;  %5265 = vst [vmem:[#allocation28_spill] sm:$0xff] %v4533_v48  ;;  %v444_v6 = vunpack.c.h.bf16 %v372_v11  ;;  %v426_v27 = vunpack.c.l.bf16 %v372_v11  ;;  %v476_v45 = vunpack.c.h.bf16 %v400_v50  ;;  %v773_v11 = vld [vmem:[#allocation9 + $0x1e8] sm:$0x1]  ;;  %v551_v26 = vmul.f32 %v4304_v52, %v472_v39 }
 0x12b   : > { %5264 = vst [vmem:[#allocation27_spill] sm:$0xff] %v4530_v37  ;;  %5267 = vst [vmem:[#allocation30_spill] sm:$0xff] %v4549_v0  ;;  %v5269_v50 = vmax.f32 %v4318_v7, 0.0  ;;  %v777_v39 = vld [vmem:[#allocation9 + $0x208] sm:$0x1]  ;;  %v508_v7 = vmul.f32 %v4304_v52, %v429_v47 }
 0x12c   : > { %961 = vperm.xlu1 %3739, %v747_v29   ;;  %951 = vperm.xlu0 %3738, %v745_v56   ;;  %v494_v56 = vmul.f32 %v4304_v52, %v415_v1  ;;  %v425_v29 = vunpack.c.l.bf16 %v353_v21  ;;  %v423_v1 = vunpack.c.l.bf16 %v351_v20  ;;  %v498_v21 = vmul.f32 %v4304_v52, %v419_v54 }
 0x12d   : > { %v4540_v20 = vsel %vm1705_vm0, %v4295_v42, 0  ;;  %v505_v59 = vmul.f32 %v4304_v52, %v426_v27  ;;  %v781_v27 = vld [vmem:[#allocation9 + $0x228] sm:$0x1] }
 0x12e   : > { %v504_v54 = vmul.f32 %v4304_v52, %v425_v29  ;;  %v502_v42 = vmul.f32 %v4304_v52, %v423_v1  ;;  %v4559_v58 = vadd.f32 %v4311_v62, %v498_v21  ;;  %v775_v29 = vld [vmem:[#allocation9 + $0x1f8] sm:$0x1]  ;;  %v523_v1 = vmul.f32 %v4304_v52, %v444_v6 }
 0x12f   : > { %v555_v6 = vmul.f32 %v4304_v52, %v476_v45 }
 0x130   : > { %1061 = vperm.xlu1 %3739, %v767_v63   ;;  %1051 = vperm.xlu0 %3738, %v765_v55   ;;  %v4544_v63 = vadd.f32 %v4311_v62, %v494_v56  ;;  %v427_v55 = vunpack.c.l.bf16 %v355_v32  ;;  %5268 = vst [vmem:[#allocation31_spill] sm:$0xff] %v4559_v58  ;;  %v478_v32 = vunpack.c.h.bf16 %v402_v16  ;;  %v4571_v21 = vadd.f32 %v4311_v62, %v504_v54 }
 0x131   : > { %v4575_v15 = vadd.f32 %v4311_v62, %v502_v42  ;;  %v5270_v54 = vmax.f32 %v4321_v8, 0.0  ;;  %v553_v42 = vmul.f32 %v4304_v52, %v474_v61  ;;  %v4592_v45 = vadd.f32 %v4311_v62, %v523_v1  ;;  %v359_v61 = vld [vmem:[%s4267_s6 + $0x54] sm:$0x1] }
 0x132   : > { %5266 = vst [vmem:[#allocation29_spill] sm:$0xff] %v4544_v63  ;;  %v506_v16 = vmul.f32 %v4304_v52, %v427_v55  ;;  %v361_v63 = vld [vmem:[%s4267_s6 + $0x5c] sm:$0x1]  ;;  %v557_v8 = vmul.f32 %v4304_v52, %v478_v32  ;;  %v4602_v58 = vadd.f32 %v4311_v62, %v551_v26  ;;  %v4608_v47 = vadd.f32 %v4311_v62, %v555_v6  ;;  %v782_v26 = vld [vmem:[#allocation9 + $0x230] sm:$0xff] }
 0x133   : > { %v783_v32 = vld [vmem:[#allocation9 + $0x238] sm:$0x1]  ;;  %v4620_v6 = vadd.f32 %v4311_v62, %v553_v42 }
 0x134   : > { %1081 = vperm.xlu1 %3739, %v771_v33   ;;  %1071 = vperm.xlu0 %3738, %v769_v23   ;;  %v4565_v33 = vsel %vm1705_vm0, %v4553_v22, 0  ;;  %v4568_v23 = vld [vmem:[#allocation11 + $0x4] sm:$0x3]  ;;  %5272 = vst [vmem:[#allocation33_spill] sm:$0xff] %v4602_v58  ;;  %v4605_v1 = vadd.f32 %v4311_v62, %v506_v16  ;;  %5274 = vst [vmem:[#allocation35_spill] sm:$0xff] %v4608_v47 }
 0x135   : > { %v4589_v55 = vsel %vm1705_vm0, %v4568_v23, 0  ;;  %v4617_v16 = vld [vmem:[#allocation11 + $0xe] sm:$0x3]  ;;  %5277 = vst [vmem:[#allocation36_spill] sm:$0xff] %v4620_v6 }
 0x136   : > { %5273 = vst [vmem:[#allocation34_spill] sm:$0xff] %v4605_v1  ;;  %v371_v1 = vld [vmem:[%s4267_s6 + $0x84] sm:$0x1] }
 0x137   : > { %v1057_v56 = vpop.permute.xlu1 %1056  ;;  %v877_v48 = vpop.permute.xlu0 %876 }
 0x138   : > { %v1198_v0 = vmul.f32 %v1057_v56, %v5269_v50  ;;  %v1162_v37 = vmul.f32 %v877_v48, %v5270_v54  ;;  %1101 = vperm.xlu1 %3739, %v775_v29   ;;  %1091 = vperm.xlu0 %3738, %v773_v11   ;;  %v4597_v29 = vadd.f32 %v4311_v62, %v505_v59  ;;  %v433_v11 = vunpack.c.l.bf16 %v361_v63 }
 0x139   : > { %v5276_v63 = vmax.f32 %v4329_v13, 0.0  ;;  %v4629_v13 = vadd.f32 %v4311_v62, %v557_v8  ;;  %v373_v8 = vld [vmem:[%s4267_s6 + $0x8c] sm:$0x1] }
 0x13a   : > { %v3419_v48 = vpack.c.bf16 %v1198_v0, %v1198_v0  ;;  %v3383_v56 = vpack.c.bf16 %v1162_v37, %v1162_v37  ;;  %5271 = vst [vmem:[#allocation32_spill] sm:$0xff] %v4597_v29  ;;  %v5275_v0 = vmax.f32 %v4326_v12, 0.0  ;;  %v4626_v12 = vadd.f32 %v4311_v62, %v508_v7 }
 0x13b   : > { %v1067_v50 = vpop.permute.xlu1 %1066  ;;  %v887_v54 = vpop.permute.xlu0 %886  ;;  %5279 = vst [vmem:[#allocation38_spill] sm:$0xff] %v4629_v13  ;;  %v512_v42 = vmul.f32 %v4304_v52, %v433_v11  ;;  %v4637_v7 = vsel %vm1705_vm0, %v4617_v16, 0  ;;  %v5280_v11 = vmax.f32 %v4334_v19, 0.0  ;;  %v5284_v19 = vmax.f32 %v4355_v40, 0.0  ;;  %v393_v40 = vld [vmem:[%s4267_s6 + $0xdc] sm:$0x1] }
 0x13c   : > { %1616 = vst.msk [vmem:[#allocation2 + $0xd8] sm:$0xf] %vm1504_vm1, %v3419_v48  ;;  %1544 = vst.msk [vmem:[#allocation2 + $0x48] sm:$0xf] %vm1504_vm1, %v3383_v56  ;;  %v1200_v37 = vmul.f32 %v1067_v50, %v5275_v0  ;;  %v1164_v59 = vmul.f32 %v887_v54, %v5276_v63  ;;  %1121 = vperm.xlu1 %3739, %v779_v60   ;;  %1111 = vperm.xlu0 %3738, %v777_v39   ;;  %v4623_v56 = vld [vmem:[#allocation11 + $0x6] sm:$0x3]  ;;  %v431_v60 = vunpack.c.l.bf16 %v359_v61 }
 0x13d   : > { %5278 = vst [vmem:[#allocation37_spill] sm:$0xff] %v4626_v12  ;;  %v764_v48 = vld [vmem:[#allocation9 + $0x1a0] sm:$0xff]  ;;  %v367_v54 = vld [vmem:[%s4267_s6 + $0x74] sm:$0x1]  ;;  %v445_v58 = vunpack.c.l.bf16 %v373_v8 }
 0x13e   : > { %v3421_v39 = vpack.c.bf16 %v1200_v37, %v1200_v37  ;;  %v3385_v50 = vpack.c.bf16 %v1164_v59, %v1164_v59  ;;  %v5281_v37 = vmax.f32 %v4342_v28, 0.0  ;;  %v510_v28 = vmul.f32 %v4304_v52, %v431_v60 }
 0x13f   : > { %v907_v0 = vpop.permute.xlu1 %906  ;;  %v897_v63 = vpop.permute.xlu0 %896 }
 0x140   : > { %1620 = vst.msk [vmem:[#allocation2 + $0xe0] sm:$0xf] %vm1504_vm1, %v3421_v39  ;;  %1548 = vst.msk [vmem:[#allocation2 + $0x50] sm:$0xf] %vm1504_vm1, %v3385_v50  ;;  %v1168_v61 = vmul.f32 %v907_v0, %v5280_v11  ;;  %v1166_v59 = vmul.f32 %v897_v63, %v5281_v37  ;;  %1141 = vperm.xlu1 %3739, %v783_v32   ;;  %1131 = vperm.xlu0 %3738, %v781_v27   ;;  %v4649_v39 = vsel %vm1705_vm0, %v4623_v56, 0 }
 0x141   : > { %5282 = vst [vmem:[#allocation39_spill] sm:$0xff] %v4649_v39  ;;  %v365_v0 = vld [vmem:[%s4267_s6 + $0x6c] sm:$0x1]  ;;  %v363_v63 = vld [vmem:[%s4267_s6 + $0x64] sm:$0x1]  ;;  %v4657_v27 = vadd.f32 %v4311_v62, %v512_v42  ;;  %v5283_v50 = vmax.f32 %v4349_v34, 0.0  ;;  %v4670_v13 = vadd.f32 %v4311_v62, %v510_v28  ;;  %v439_v39 = vunpack.c.l.bf16 %v367_v54 }
 0x142   : > { %v3389_v32 = vpack.c.bf16 %v1168_v61, %v1168_v61  ;;  %v3387_v11 = vpack.c.bf16 %v1166_v59, %v1166_v59  ;;  %v369_v37 = vld [vmem:[%s4267_s6 + $0x7c] sm:$0x1]  ;;  %v437_v42 = vunpack.c.l.bf16 %v365_v0  ;;  %v435_v59 = vunpack.c.l.bf16 %v363_v63 }
 0x143   : > { %v1087_v6 = vpop.permute.xlu1 %1086  ;;  %v1077_v47 = vpop.permute.xlu0 %1076  ;;  %v441_v12 = vunpack.c.l.bf16 %v369_v37  ;;  %v5286_v54 = vmax.f32 %v4367_v57, 0.0  ;;  %v524_v37 = vmul.f32 %v4304_v52, %v445_v58  ;;  %v5287_v58 = vmax.f32 %v4375_v3, 0.0 }
 0x144   : > { %1556 = vst.msk [vmem:[#allocation2 + $0x60] sm:$0xf] %vm1504_vm1, %v3389_v32  ;;  %1552 = vst.msk [vmem:[#allocation2 + $0x58] sm:$0xf] %vm1504_vm1, %v3387_v11  ;;  %v1204_v60 = vmul.f32 %v1087_v6, %v5283_v50  ;;  %v1202_v61 = vmul.f32 %v1077_v47, %v5284_v19  ;;  %1136 = vperm.xlu1 %3739, %v782_v26   ;;  %1046 = vperm.xlu0 %3738, %v764_v48   ;;  %v443_v6 = vunpack.c.l.bf16 %v371_v1 }
 0x145   : > { %v5285_v48 = vmax.f32 %v4361_v49, 0.0  ;;  %v516_v0 = vmul.f32 %v4304_v52, %v437_v42  ;;  %v514_v63 = vmul.f32 %v4304_v52, %v435_v59  ;;  %v520_v1 = vmul.f32 %v4304_v52, %v441_v12 }
 0x146   : > { %v3425_v32 = vpack.c.bf16 %v1204_v60, %v1204_v60  ;;  %v3423_v29 = vpack.c.bf16 %v1202_v61, %v1202_v61  ;;  %v518_v11 = vmul.f32 %v4304_v52, %v439_v39  ;;  %v4688_v61 = vld [vmem:[#allocation11 + $0x10] sm:$0x3]  ;;  %v522_v42 = vmul.f32 %v4304_v52, %v443_v6 }
 0x147   : > { %v977_v50 = vpop.permute.xlu1 %976  ;;  %v967_v47 = vpop.permute.xlu0 %966  ;;  %v3740_v26 = vld [vmem:[#allocation2 + $0x48] ss:$8 sps:$4 sm:$0xff]   ;;  %v3741_v28 = vld [vmem:[#allocation2 + $0xd8] ss:$8 sps:$4 sm:$0xff]   ;;  %v5288_v39 = vmax.f32 %v4378_v4, 0.0  ;;  %v4712_v3 = vadd.f32 %v4311_v62, %v524_v37 }
 0x148   : > { %1628 = vst.msk [vmem:[#allocation2 + $0xf0] sm:$0xf] %vm1504_vm1, %v3425_v32  ;;  %1624 = vst.msk [vmem:[#allocation2 + $0xe8] sm:$0xf] %vm1504_vm1, %v3423_v29  ;;  %v1182_v19 = vmul.f32 %v977_v50, %v5285_v48  ;;  %v1180_v8 = vmul.f32 %v967_v47, %v5286_v54  ;;  %3485 = vmatprep.mubr.msk.bf16.mxu1 %vm1692_vm2, %v3740_v26  ;;  %v465_v29 = vunpack.c.l.bf16 %v393_v40  ;;  %3525 = vmatprep.mubr.msk.bf16.mxu0 %vm1692_vm2, %v3741_v28  ;;  %v391_v6 = vld [vmem:[%s4267_s6 + $0xd4] sm:$0x1] }
 0x149   : > { %v4698_v47 = vadd.f32 %v4311_v62, %v516_v0  ;;  %v4701_v26 = vadd.f32 %v4311_v62, %v514_v63  ;;  %v4706_v48 = vadd.f32 %v4311_v62, %v520_v1  ;;  %v4718_v28 = vsel %vm1705_vm0, %v4688_v61, 0  ;;  %v397_v63 = vld [vmem:[%s4267_s6 + $0xec] sm:$0x1] }
 0x14a   : > { %v3403_v49 = vpack.c.bf16 %v1182_v19, %v1182_v19  ;;  %v3401_v60 = vpack.c.bf16 %v1180_v8, %v1180_v8  ;;  %v4709_v19 = vadd.f32 %v4311_v62, %v518_v11  ;;  %v544_v4 = vmul.f32 %v4304_v52, %v465_v29 }
 0x14b   : > { %v997_v59 = vpop.permute.xlu1 %996  ;;  %v987_v32 = vpop.permute.xlu0 %986  ;;  %v3742_v50 = vld [vmem:[#allocation2 + $0x58] ss:$8 sps:$4 sm:$0xff]   ;;  %v4721_v0 = vadd.f32 %v4311_v62, %v522_v42  ;;  %v463_v37 = vunpack.c.l.bf16 %v391_v6  ;;  %v5289_v29 = vmax.f32 %v4389_v24, 0.0 }
 0x14c   : > { %1584 = vst.msk [vmem:[#allocation2 + $0x98] sm:$0xf] %vm1504_vm1, %v3403_v49  ;;  %1580 = vst.msk [vmem:[#allocation2 + $0x90] sm:$0xf] %vm1504_vm1, %v3401_v60  ;;  %v1186_v12 = vmul.f32 %v997_v59, %v5287_v58  ;;  %v1184_v40 = vmul.f32 %v987_v32, %v5288_v39  ;;  %3486 = vmatmul.mubr.msk.bf16.vlgmr.msra.gmra.mrb[0].mxu1 %vm1692_vm2, %v3742_v50  ;;  %v5290_v59 = vmax.f32 %v4392_v25, 0.0 }
 0x14d   : > { %3494 = vmatpush3.bf16.msra.mxu1 %v4540_v20  ;;  %v1585_v20 = vld [vmem:[#allocation2 + $0x9c] sm:$0x1]  ;;  %v1581_v58 = vld [vmem:[#allocation2 + $0x94] sm:$0x1]  ;;  %v4745_v39 = vadd.f32 %v4311_v62, %v544_v4  ;;  %v1593_v4 = vld [vmem:[#allocation2 + $0xac] sm:$0x1] }
 0x14e   : > { %v3407_v54 = vpack.c.bf16 %v1186_v12, %v1186_v12  ;;  %v3405_v8 = vpack.c.bf16 %v1184_v40, %v1184_v40  ;;  %3641 = vmatprep.subr.msk.bf16.mxu1 %vm1705_vm0, %v4568_v23 }
 0x14f   : > { %v982_v1 = vpop.permute.xlu1 %981  ;;  %v972_v11 = vpop.permute.xlu0 %971  ;;  %v3743_v49 = vld [vmem:[#allocation2 + $0xe8] ss:$8 sps:$4 sm:$0xff]   ;;  %5293 = vst [vmem:[#allocation40_spill] sm:$0xff] %v4745_v39 }
 0x150   : > { %1592 = vst.msk [vmem:[#allocation2 + $0xa8] sm:$0xf] %vm1504_vm1, %v3407_v54  ;;  %1588 = vst.msk [vmem:[#allocation2 + $0xa0] sm:$0xf] %vm1504_vm1, %v3405_v8  ;;  %v1183_v60 = vmul.f32 %v982_v1, %v5289_v29  ;;  %v1181_v42 = vmul.f32 %v972_v11, %v5290_v59  ;;  %3526 = vmatmul.mubr.msk.bf16.vlgmr.msra.gmra.mrb[0].mxu0 %vm1692_vm2, %v3743_v49  ;;  %v469_v8 = vunpack.c.l.bf16 %v397_v63  ;;  %v5294_v63 = vmax.f32 %v4395_v30, 0.0 }
 0x151   : > { %3534 = vmatpush3.bf16.msra.mxu0 %v4448_v46  ;;  %v4752_v59 = vmul.f32 %v4304_v52, %v463_v37  ;;  %v401_v30 = vld [vmem:[%s4267_s6 + $0xfc] sm:$0x1] }
 0x152   : > { %v3404_v40 = vpack.c.bf16 %v1183_v60, %v1183_v60  ;;  %v3402_v6 = vpack.c.bf16 %v1181_v42, %v1181_v42  ;;  %3646 = vmatprep.subr.msk.bf16.mxu0 %vm1705_vm0, %v4553_v22  ;;  %v5295_v42 = vmax.f32 %v4401_v38, 0.0  ;;  %v1589_v22 = vld [vmem:[#allocation2 + $0xa4] sm:$0x1] }
 0x153   : > { %v1002_v1 = vpop.permute.xlu1 %1001  ;;  %v992_v11 = vpop.permute.xlu0 %991  ;;  %v2345_v49 = vld [vmem:[#allocation2 + $0x90] sm:$0xf]  ;;  %v2347_v29 = vld [vmem:[#allocation2 + $0x98] sm:$0xf] }
 0x154   : > { %v1586_v62 = vsel %vm4736_vm5, %v3404_v40, %v1585_v20  ;;  %v1582_v46 = vsel %vm4736_vm5, %v3402_v6, %v1581_v58  ;;  %v1187_v60 = vmul.f32 %v1002_v1, %v5294_v63  ;;  %v1185_v54 = vmul.f32 %v992_v11, %v5295_v42  ;;  %v395_v6 = vld [vmem:[%s4267_s6 + $0xe4] sm:$0x1] }
 0x155   : > { %1587 = vst [vmem:[#allocation2 + $0x9c] sm:$0x1] %v1586_v62  ;;  %1583 = vst [vmem:[#allocation2 + $0x94] sm:$0x1] %v1582_v46  ;;  %v2362_v37 = vshrl.u32 %v2345_v49, 16  ;;  %v2365_v25 = vshll.u32 %v2345_v49, 16  ;;  %v4764_v58 = vmul.f32 %v4304_v52, %v469_v8 }
 0x156   : > { %v2376_v24 = vshrl.u32 %v2347_v29, 16  ;;  %v2379_v12 = vshll.u32 %v2347_v29, 16  ;;  %v3408_v20 = vpack.c.bf16 %v1187_v60, %v1187_v60  ;;  %v3406_v40 = vpack.c.bf16 %v1185_v54, %v1185_v54 }
 0x157   : > { %v927_v1 = vpop.permute.xlu1 %926  ;;  %v917_v63 = vpop.permute.xlu0 %916  ;;  %v2364_v38 = vrot.slane %v2362_v37, 4  ;;  %v2367_v11 = vrot.slane %v2365_v25, 5  ;;  %v2349_v42 = vld [vmem:[#allocation2 + $0xa0] sm:$0xf]  ;;  %v5296_v29 = vmax.f32 %v4405_v41, 0.0  ;;  %v5297_v52 = vmax.f32 %v4408_v43, 0.0 }
 0x158   : > { %v2378_v62 = vrot.slane %v2376_v24, 4  ;;  %v2381_v46 = vrot.slane %v2379_v12, 5  ;;  %v1594_v49 = vsel %vm4736_vm5, %v3408_v20, %v1593_v4  ;;  %v1590_v54 = vsel %vm4736_vm5, %v3406_v40, %v1589_v22  ;;  %v2351_v50 = vld [vmem:[#allocation2 + $0xa8] sm:$0xf] }
 0x159   : > { %v1172_v60 = vmul.f32 %v927_v1, %v5296_v29  ;;  %v1170_v8 = vmul.f32 %v917_v63, %v5297_v52  ;;  %1595 = vst [vmem:[#allocation2 + $0xac] sm:$0x1] %v1594_v49  ;;  %1591 = vst [vmem:[#allocation2 + $0xa4] sm:$0x1] %v1590_v54  ;;  %v2390_v37 = vshrl.u32 %v2349_v42, 16  ;;  %v2393_v25 = vshll.u32 %v2349_v42, 16 }
 0x15a   : > { %v467_v24 = vunpack.c.l.bf16 %v395_v6  ;;  %v473_v12 = vunpack.c.l.bf16 %v401_v30  ;;  %v2404_v34 = vshrl.u32 %v2351_v50, 16  ;;  %v2407_v4 = vshll.u32 %v2351_v50, 16 }
 0x15b   : > { %v3393_v32 = vpack.c.bf16 %v1172_v60, %v1172_v60  ;;  %v3391_v57 = vpack.c.bf16 %v1170_v8, %v1170_v8  ;;  %v947_v20 = vpop.permute.xlu1 %946  ;;  %v937_v39 = vpop.permute.xlu0 %936  ;;  %v2368_v22 = vor.u32 %v2367_v11, %v2364_v38  ;;  %v2382_v41 = vor.u32 %v2381_v46, %v2378_v62  ;;  %v4784_v62 = vld [vmem:[%s286_s23] ss:$0 sm:$0xff]  ;;  %v399_v46 = vld [vmem:[%s4267_s6 + $0xf4] sm:$0x1] }
 0x15c   : > { %v2392_v40 = vrot.slane %v2390_v37, 4  ;;  %v2395_v43 = vrot.slane %v2393_v25, 5  ;;  %v5298_v1 = vmax.f32 %v4411_v44, 0.0  ;;  %v5299_v30 = vmax.f32 %v4416_v51, 0.0  ;;  %v2346_v42 = vld [vmem:[#allocation2 + $0x94] sm:$0x1] }
 0x15d   : > { %1564 = vst.msk [vmem:[#allocation2 + $0x70] sm:$0xf] %vm1504_vm1, %v3393_v32  ;;  %1560 = vst.msk [vmem:[#allocation2 + $0x68] sm:$0xf] %vm1504_vm1, %v3391_v57  ;;  %v2348_v50 = vld [vmem:[#allocation2 + $0x9c] sm:$0x1]  ;;  %v546_v32 = vmul.f32 %v4784_v62, %v467_v24 }
 0x15e   : > { %v1176_v6 = vmul.f32 %v947_v20, %v5298_v1  ;;  %v1174_v63 = vmul.f32 %v937_v39, %v5299_v30  ;;  %v2406_v49 = vrot.slane %v2404_v34, 4  ;;  %v2409_v54 = vrot.slane %v2407_v4, 5 }
 0x15f   : > { %v2371_v29 = vshll.u32 %v2346_v42, 16  ;;  %v2385_v38 = vshll.u32 %v2348_v50, 16  ;;  %v2396_v11 = vor.u32 %v2395_v43, %v2392_v40  ;;  %v552_v34 = vmul.f32 %v4784_v62, %v473_v12  ;;  %v1017_v39 = vpop.permute.xlu1 %1016  ;;  %v1007_v52 = vpop.permute.xlu0 %1006 }
 0x160   : > { %v3397_v57 = vpack.c.bf16 %v1176_v6, %v1176_v6  ;;  %v3395_v60 = vpack.c.bf16 %v1174_v63, %v1174_v63  ;;  %v2410_v51 = vor.u32 %v2409_v54, %v2406_v49  ;;  %v2369_v8 = vrot.slane %v2368_v22, 4  ;;  %v2350_v1 = vld [vmem:[#allocation2 + $0xa4] sm:$0x1]  ;;  %v2352_v12 = vld [vmem:[#allocation2 + $0xac] sm:$0x1] }
 0x161   : > { %v2373_v37 = vrot.slane %v2371_v29, 5  ;;  %v2383_v25 = vrot.slane %v2382_v41, 4  ;;  %v2387_v4 = vrot.slane %v2385_v38, 5  ;;  %v5302_v24 = vmax.f32 %v4426_v5, 0.0  ;;  %v405_v29 = vld [vmem:[%s4267_s6 + $0x10c] sm:$0x1] }
 0x162   : > { %1572 = vst.msk [vmem:[#allocation2 + $0x80] sm:$0xf] %vm1504_vm1, %v3397_v57  ;;  %1568 = vst.msk [vmem:[#allocation2 + $0x78] sm:$0xf] %vm1504_vm1, %v3395_v60  ;;  %v5303_v40 = vmax.f32 %v4436_v31, 0.0  ;;  %v2397_v6 = vrot.slane %v2396_v11, 4  ;;  %v471_v30 = vunpack.c.l.bf16 %v399_v46 }
 0x163   : > { %v1190_v20 = vmul.f32 %v1017_v39, %v5302_v24  ;;  %v2374_v22 = vsel %vm4790_vm8, %v2369_v8, %v2373_v37  ;;  %v2388_v41 = vsel %vm4790_vm8, %v2383_v25, %v2387_v4  ;;  %v2399_v63 = vshll.u32 %v2350_v1, 16  ;;  %v1037_v31 = vpop.permute.xlu1 %1036  ;;  %v1027_v38 = vpop.permute.xlu0 %1026  ;;  %v4808_v60 = vld [vmem:[%s294_s27] ss:$0 sm:$0xff]  ;;  %v1601_v1 = vld [vmem:[#allocation2 + $0xbc] sm:$0x1] }
 0x164   : > { %v1188_v43 = vmul.f32 %v1007_v52, %v5303_v40  ;;  %v2413_v42 = vshll.u32 %v2352_v12, 16  ;;  %v3328_v5 = vcombine.low %v2374_v22, %v2388_v41  ;;  %v2411_v54 = vrot.slane %v2410_v51, 4  ;;  %v3744_v57 = vld [vmem:[#allocation2 + $0x68] ss:$8 sps:$4 sm:$0xff]  }
 0x165   : > { %v3411_v50 = vpack.c.bf16 %v1190_v20, %v1190_v20  ;;  %v4812_v11 = vadd.f32 %v4808_v60, %v4752_v59  ;;  %v4816_v46 = vadd.f32 %v4808_v60, %v4764_v58  ;;  %v5304_v51 = vmax.f32 %v4439_v35, 0.0  ;;  %3489 = vmatprep.mubr.msk.bf16.mxu1 %vm1692_vm2, %v3744_v57 }
 0x166   : > { %v3409_v49 = vpack.c.bf16 %v1188_v43, %v1188_v43  ;;  %v5305_v52 = vmax.f32 %v4444_v17, 0.0  ;;  %3535 = vmatprep.mubr.msk.bf16.mxu0 %vm1692_vm2, %v3328_v5  ;;  %v2401_v37 = vrot.slane %v2399_v63, 5  ;;  %v2415_v59 = vrot.slane %v2413_v42, 5  ;;  %v4838_v43 = vld [vmem:[%s4267_s6 + $0x104] sm:$0x1] }
 0x167   : > { %1600 = vst.msk [vmem:[#allocation2 + $0xb8] sm:$0xf] %vm1504_vm1, %v3411_v50  ;;  %v1194_v39 = vmul.f32 %v1037_v31, %v5304_v51  ;;  %v4827_v58 = vadd.f32 %v4808_v60, %v546_v32  ;;  %v4830_v25 = vadd.f32 %v4808_v60, %v552_v34  ;;  %v550_v4 = vmul.f32 %v4784_v62, %v471_v30  ;;  %v1022_v32 = vpop.permute.xlu1 %1021  ;;  %v1012_v12 = vpop.permute.xlu0 %1011  ;;  %v409_v42 = vld [vmem:[%s4267_s6 + $0x11c] sm:$0x1]  ;;  %v1597_v50 = vld [vmem:[#allocation2 + $0xb4] sm:$0x1] }
 0x168   : > { %1596 = vst.msk [vmem:[#allocation2 + $0xb0] sm:$0xf] %vm1504_vm1, %v3409_v49  ;;  %v1192_v8 = vmul.f32 %v1027_v38, %v5305_v52  ;;  %v477_v35 = vunpack.c.l.bf16 %v405_v29  ;;  %v2402_v17 = vsel %vm4790_vm8, %v2397_v6, %v2401_v37  ;;  %v2416_v40 = vsel %vm4790_vm8, %v2411_v54, %v2415_v59 }
 0x169   : > { %v3415_v24 = vpack.c.bf16 %v1194_v39, %v1194_v39  ;;  %v3329_v22 = vcombine.low %v2402_v17, %v2416_v40  ;;  %v3745_v34 = vld [vmem:[#allocation2 + $0x78] ss:$8 sps:$4 sm:$0xff]   ;;  %v5306_v30 = vmax.f32 %v4455_v14, 0.0  ;;  %v5307_v63 = vmax.f32 %v4461_v10, 0.0  ;;  %v1605_v40 = vld [vmem:[#allocation2 + $0xc4] sm:$0x1] }
 0x16a   : > { %v3413_v20 = vpack.c.bf16 %v1192_v8, %v1192_v8  ;;  %3490 = vmatmul.mubr.msk.bf16.gmra.mrb[4].mxu1 %vm1692_vm2, %v3745_v34  ;;  %v693_v49 = vmax.f32 %v4812_v11, 0.0  ;;  %v699_v5 = vmax.f32 %v4816_v46, 0.0  ;;  %v697_v54 = vmax.f32 %v4827_v58, 0.0  ;;  %v1625_v11 = vld [vmem:[#allocation2 + $0xec] sm:$0x1] }
 0x16b   : > { %1608 = vst.msk [vmem:[#allocation2 + $0xc8] sm:$0xf] %vm1504_vm1, %v3415_v24  ;;  %v1191_v41 = vmul.f32 %v1022_v32, %v5306_v30  ;;  %v1189_v6 = vmul.f32 %v1012_v12, %v5307_v63  ;;  %3536 = vmatmul.mubr.msk.bf16.vlgmr.msra.gmra.mrb[0].mxu0 %vm1692_vm2, %v3329_v22  ;;  %v703_v29 = vmax.f32 %v4830_v25, 0.0  ;;  %v4855_v10 = vadd.f32 %v4808_v60, %v550_v4  ;;  %v1042_v57 = vpop.permute.xlu1 %1041  ;;  %v1032_v51 = vpop.permute.xlu0 %1031  ;;  %v1609_v4 = vld [vmem:[#allocation2 + $0xcc] sm:$0x1] }
 0x16c   : > { %1604 = vst.msk [vmem:[#allocation2 + $0xc0] sm:$0xf] %vm1504_vm1, %v3413_v20  ;;  %3544 = vmatpush3.bf16.msra.mxu0 %v4565_v33  ;;  %v556_v38 = vmul.f32 %v4784_v62, %v477_v35  ;;  %v475_v8 = vunpack.c.l.bf16 %v4838_v43  ;;  %v481_v37 = vunpack.c.l.bf16 %v409_v42  ;;  %v5308_v24 = vmax.f32 %v4469_v36, 0.0 }
 0x16d   : > { %v3412_v31 = vpack.c.bf16 %v1191_v41, %v1191_v41  ;;  %v3410_v14 = vpack.c.bf16 %v1189_v6, %v1189_v6  ;;  %3647 = vmatprep.subr.msk.bf16.mxu0 %vm1705_vm0, %v4617_v16  ;;  %v5309_v20 = vmax.f32 %v4472_v53, 0.0 }
 0x16e   : > { %v2355_v52 = vld [vmem:[#allocation2 + $0xb8] sm:$0xf]  ;;  %v1195_v35 = vmul.f32 %v1042_v57, %v5308_v24  ;;  %v4871_v30 = vadd.f32 %v4808_v60, %v556_v38  ;;  %v5310_v57 = vmax.f32 %v4484_v9, 0.0  ;;  %v554_v24 = vmul.f32 %v4784_v62, %v475_v8  ;;  %v5313_v8 = vld [vmem:[#allocation21_spill] sm:$0xff] }
 0x16f   : > { %v2353_v39 = vld [vmem:[#allocation2 + $0xb0] sm:$0xf]  ;;  %v1602_v59 = vsel %vm4736_vm5, %v3412_v31, %v1601_v1  ;;  %v1598_v33 = vsel %vm4736_vm5, %v3410_v14, %v1597_v50  ;;  %v1193_v17 = vmul.f32 %v1032_v51, %v5309_v20  ;;  %v2432_v43 = vshrl.u32 %v2355_v52, 16  ;;  %v797_v41 = vpop.permute.xlu1 %796  ;;  %v787_v36 = vpop.permute.xlu0 %786 }
 0x170   : > { %1603 = vst [vmem:[#allocation2 + $0xbc] sm:$0x1] %v1602_v59  ;;  %1599 = vst [vmem:[#allocation2 + $0xb4] sm:$0x1] %v1598_v33  ;;  %v2418_v16 = vshrl.u32 %v2353_v39, 16  ;;  %v2421_v32 = vshll.u32 %v2353_v39, 16  ;;  %v3416_v22 = vpack.c.bf16 %v1195_v35, %v1195_v35  ;;  %v1146_v51 = vmul.f32 %v797_v41, %v5310_v57 }
 0x171   : > { %v2435_v12 = vshll.u32 %v2355_v52, 16  ;;  %v3414_v34 = vpack.c.bf16 %v1193_v17, %v1193_v17  ;;  %v701_v1 = vmax.f32 %v4855_v10, 0.0  ;;  %v2434_v53 = vrot.slane %v2432_v43, 4 }
 0x172   : > { %v2420_v63 = vrot.slane %v2418_v16, 4  ;;  %v2423_v6 = vrot.slane %v2421_v32, 5  ;;  %v1610_v31 = vsel %vm4736_vm5, %v3416_v22, %v1609_v4  ;;  %v5311_v39 = vmax.f32 %v4487_v2, 0.0  ;;  %v2359_v52 = vld [vmem:[#allocation2 + $0xc8] sm:$0xf] }
 0x173   : > { %v2437_v42 = vrot.slane %v2435_v12, 5  ;;  %v2357_v50 = vld [vmem:[#allocation2 + $0xc0] sm:$0xf]  ;;  %v1606_v14 = vsel %vm4736_vm5, %v3414_v34, %v1605_v40  ;;  %1611 = vst [vmem:[#allocation2 + $0xcc] sm:$0x1] %v1610_v31  ;;  %v560_v35 = vmul.f32 %v4784_v62, %v481_v37  ;;  %v3367_v20 = vpack.c.bf16 %v1146_v51, %v1146_v51  ;;  %v817_v40 = vpop.permute.xlu1 %816  ;;  %v807_v32 = vpop.permute.xlu0 %806 }
 0x174   : > { %v1144_v38 = vmul.f32 %v787_v36, %v5311_v39  ;;  %1607 = vst [vmem:[#allocation2 + $0xc4] sm:$0x1] %v1606_v14  ;;  %v2446_v59 = vshrl.u32 %v2357_v50, 16  ;;  %v2449_v33 = vshll.u32 %v2357_v50, 16  ;;  %v2460_v17 = vshrl.u32 %v2359_v52, 16 }
 0x175   : > { %v2463_v16 = vshll.u32 %v2359_v52, 16  ;;  %v2424_v9 = vor.u32 %v2423_v6, %v2420_v63  ;;  %v2438_v43 = vor.u32 %v2437_v42, %v2434_v53  ;;  %1512 = vst.msk [vmem:[#allocation2 + $0x8] sm:$0xf] %vm1504_vm1, %v3367_v20  ;;  %v5312_v22 = vmax.f32 %v4493_v18, 0.0 }
 0x176   : > { %v3365_v4 = vpack.c.bf16 %v1144_v38, %v1144_v38  ;;  %v2448_v12 = vrot.slane %v2446_v59, 4  ;;  %v2451_v2 = vrot.slane %v2449_v33, 5  ;;  %v5314_v41 = vmax.f32 %v5313_v8, 0.0 }
 0x177   : > { %v1150_v34 = vmul.f32 %v817_v40, %v5312_v22  ;;  %v2354_v36 = vld [vmem:[#allocation2 + $0xb4] sm:$0x1]  ;;  %v2356_v50 = vld [vmem:[#allocation2 + $0xbc] sm:$0x1]  ;;  %v2462_v31 = vrot.slane %v2460_v17, 4  ;;  %v2465_v14 = vrot.slane %v2463_v16, 5  ;;  %v4891_v38 = vadd.f32 %v4808_v60, %v554_v24  ;;  %v837_v18 = vpop.permute.xlu1 %836  ;;  %v827_v52 = vpop.permute.xlu0 %826 }
 0x178   : > { %1505 = vst.msk [vmem:[#allocation2] sm:$0xf] %vm1504_vm1, %v3365_v4  ;;  %v1148_v37 = vmul.f32 %v807_v32, %v5314_v41  ;;  %v2427_v57 = vshll.u32 %v2354_v36, 16  ;;  %v2441_v51 = vshll.u32 %v2356_v50, 16  ;;  %v2452_v63 = vor.u32 %v2451_v2, %v2448_v12  ;;  %v5315_v17 = vld [vmem:[#allocation22_spill] sm:$0xff]  ;;  %v5317_v32 = vld [vmem:[#allocation23_spill] sm:$0xff] }
 0x179   : > { %v707_v6 = vmax.f32 %v4871_v30, 0.0  ;;  %v3371_v53 = vpack.c.bf16 %v1150_v34, %v1150_v34  ;;  %v2466_v39 = vor.u32 %v2465_v14, %v2462_v31  ;;  %v2425_v59 = vrot.slane %v2424_v9, 4 }
 0x17a   : > { %v3369_v42 = vpack.c.bf16 %v1148_v37, %v1148_v37  ;;  %v2429_v33 = vrot.slane %v2427_v57, 5  ;;  %v2439_v20 = vrot.slane %v2438_v43, 4  ;;  %v2443_v4 = vrot.slane %v2441_v51, 5  ;;  %v2360_v34 = vld [vmem:[#allocation2 + $0xcc] sm:$0x1] }
 0x17b   : > { %1520 = vst.msk [vmem:[#allocation2 + $0x18] sm:$0xf] %vm1504_vm1, %v3371_v53  ;;  %v5316_v16 = vmax.f32 %v5315_v17, 0.0  ;;  %v5318_v12 = vmax.f32 %v5317_v32, 0.0  ;;  %v2358_v22 = vld [vmem:[#allocation2 + $0xc4] sm:$0x1]  ;;  %v4900_v8 = vadd.f32 %v4808_v60, %v560_v35  ;;  %v857_v57 = vpop.permute.xlu1 %856  ;;  %v847_v51 = vpop.permute.xlu0 %846 }
 0x17c   : > { %1516 = vst.msk [vmem:[#allocation2 + $0x10] sm:$0xf] %vm1504_vm1, %v3369_v42  ;;  %v2453_v24 = vrot.slane %v2452_v63, 4  ;;  %v2430_v9 = vsel %vm4790_vm8, %v2425_v59, %v2429_v33  ;;  %v2444_v43 = vsel %vm4790_vm8, %v2439_v20, %v2443_v4  ;;  %v2455_v41 = vshll.u32 %v2358_v22, 16  ;;  %v5319_v35 = vld [vmem:[#allocation24_spill] sm:$0xff] }
 0x17d   : > { %v1154_v40 = vmul.f32 %v837_v18, %v5316_v16  ;;  %v1152_v2 = vmul.f32 %v827_v52, %v5318_v12  ;;  %v2469_v37 = vshll.u32 %v2360_v34, 16  ;;  %v3330_v31 = vcombine.low %v2430_v9, %v2444_v43  ;;  %v5321_v18 = vld [vmem:[#allocation25_spill] sm:$0xff]  ;;  %v1876_v34 = vld [vmem:[#allocation2 + $0x8] sm:$0xf]  ;;  %v407_v9 = vld [vmem:[%s4267_s6 + $0x114] sm:$0x1] }
 0x17e   : > { %v2467_v14 = vrot.slane %v2466_v39, 4  ;;  %v5320_v63 = vmax.f32 %v5319_v35, 0.0  ;;  %v5322_v52 = vmax.f32 %v5321_v18, 0.0  ;;  %v2457_v33 = vrot.slane %v2455_v41, 5  ;;  %v1513_v43 = vld [vmem:[#allocation2 + $0xc] sm:$0x1] }
 0x17f   : > { %v3375_v36 = vpack.c.bf16 %v1154_v40, %v1154_v40  ;;  %v3373_v50 = vpack.c.bf16 %v1152_v2, %v1152_v2  ;;  %v3746_v53 = vld [vmem:[#allocation2] ss:$8 sps:$4 sm:$0xff]   ;;  %3539 = vmatprep.mubr.msk.bf16.mxu0 %vm1692_vm2, %v3330_v31  ;;  %v2471_v20 = vrot.slane %v2469_v37, 5  ;;  %v705_v16 = vmax.f32 %v4891_v38, 0.0  ;;  %v802_v41 = vpop.permute.xlu1 %801  ;;  %v1509_v37 = vld [vmem:[#allocation2 + $0x4] sm:$0x1] }
 0x180   : > { %v1158_v42 = vmul.f32 %v857_v57, %v5320_v63  ;;  %v1156_v59 = vmul.f32 %v847_v51, %v5322_v52  ;;  %v1874_v4 = vld [vmem:[#allocation2] sm:$0xf]  ;;  %3495 = vmatprep.mubr.msk.bf16.mxu1 %vm1692_vm2, %v3746_v53  ;;  %v2458_v2 = vsel %vm4790_vm8, %v2453_v24, %v2457_v33  ;;  %v5323_v57 = vld [vmem:[#allocation26_spill] sm:$0xff]  ;;  %v5325_v35 = vld [vmem:[#allocation27_spill] sm:$0xff]  ;;  %v1908_v52 = vshrl.u32 %v1876_v34, 16 }
 0x181   : > { %1528 = vst.msk [vmem:[#allocation2 + $0x28] sm:$0xf] %vm1504_vm1, %v3375_v36  ;;  %1524 = vst.msk [vmem:[#allocation2 + $0x20] sm:$0xf] %vm1504_vm1, %v3373_v50  ;;  %v1894_v39 = vshrl.u32 %v1874_v4, 16  ;;  %v1897_v17 = vshll.u32 %v1874_v4, 16  ;;  %v2472_v22 = vsel %vm4790_vm8, %v2467_v14, %v2471_v20  ;;  %v792_v36 = vpop.permute.xlu0 %791 }
 0x182   : > { %v3379_v32 = vpack.c.bf16 %v1158_v42, %v1158_v42  ;;  %v3377_v12 = vpack.c.bf16 %v1156_v59, %v1156_v59  ;;  %v3331_v50 = vcombine.low %v2458_v2, %v2472_v22  ;;  %v5324_v51 = vmax.f32 %v5323_v57, 0.0  ;;  %v1521_v22 = vld [vmem:[#allocation2 + $0x1c] sm:$0x1]  ;;  %v1525_v40 = vld [vmem:[#allocation2 + $0x24] sm:$0x1] }
 0x183   : > { %v3747_v31 = vld [vmem:[#allocation2 + $0x10] ss:$8 sps:$4 sm:$0xff]   ;;  %v5326_v24 = vmax.f32 %v5325_v35, 0.0  ;;  %v1896_v14 = vrot.slane %v1894_v39, 4  ;;  %v1899_v18 = vrot.slane %v1897_v17, 5  ;;  %v1911_v59 = vshll.u32 %v1876_v34, 16 }
 0x184   : > { %1536 = vst.msk [vmem:[#allocation2 + $0x38] sm:$0xf] %vm1504_vm1, %v3379_v32  ;;  %1532 = vst.msk [vmem:[#allocation2 + $0x30] sm:$0xf] %vm1504_vm1, %v3377_v12  ;;  %v1147_v53 = vmul.f32 %v802_v41, %v5324_v51  ;;  %v3748_v42 = vld [vmem:[#allocation2 + $0x8] ss:$8 sps:$4 sm:$0xff]   ;;  %3540 = vmatmul.mubr.msk.bf16.gmra.mrb[4].mxu0 %vm1692_vm2, %v3331_v50  ;;  %3496 = vmatmul.mubr.msk.bf16.vlgmr.msra.gmra.mrb[0].mxu1 %vm1692_vm2, %v3747_v31  ;;  %v822_v41 = vpop.permute.xlu1 %821  ;;  %v479_v39 = vunpack.c.l.bf16 %v407_v9 }
 0x185   : > { %v1145_v63 = vmul.f32 %v792_v36, %v5326_v24  ;;  %v1878_v33 = vld [vmem:[#allocation2 + $0x10] sm:$0xf]  ;;  %3545 = vmatprep.mubr.msk.bf16.mxu0 %vm1692_vm2, %v3748_v42  ;;  %3504 = vmatpush3.bf16.msra.mxu1 %v4589_v55  ;;  %v1880_v32 = vld [vmem:[#allocation2 + $0x18] sm:$0xf]  ;;  %v812_v36 = vpop.permute.xlu0 %811  ;;  %v1900_v57 = vor.u32 %v1899_v18, %v1896_v14  ;;  %v5329_v35 = vld [vmem:[#allocation29_spill] sm:$0xff]  ;;  %v1910_v9 = vrot.slane %v1908_v52, 4 }
 0x186   : > { %v3368_v20 = vpack.c.bf16 %v1147_v53, %v1147_v53  ;;  %v1922_v12 = vshrl.u32 %v1878_v33, 16  ;;  %v1925_v2 = vshll.u32 %v1878_v33, 16  ;;  %3642 = vmatprep.subr.msk.bf16.mxu1 %vm1705_vm0, %v4623_v56  ;;  %v5327_v31 = vld [vmem:[#allocation28_spill] sm:$0xff]  ;;  %v1517_v53 = vld [vmem:[#allocation2 + $0x14] sm:$0x1]  ;;  %v5330_v24 = vmax.f32 %v5329_v35, 0.0 }
 0x187   : > { %v3366_v4 = vpack.c.bf16 %v1145_v63, %v1145_v63  ;;  %v5328_v55 = vmax.f32 %v5327_v31, 0.0  ;;  %v4942_v56 = vrot.slane %v1900_v57, 4  ;;  %v1913_v14 = vrot.slane %v1911_v59, 5  ;;  %v1529_v31 = vld [vmem:[#allocation2 + $0x2c] sm:$0x1]  ;;  %v5333_v57 = vld [vmem:[#allocation31_spill] sm:$0xff] }
 0x188   : > { %v3749_v50 = vld [vmem:[#allocation2 + $0x20] ss:$8 sps:$4 sm:$0xff]   ;;  %v1514_v17 = vsel %vm4736_vm5, %v3368_v20, %v1513_v43  ;;  %v1149_v63 = vmul.f32 %v812_v36, %v5330_v24  ;;  %v1924_v43 = vrot.slane %v1922_v12, 4  ;;  %v1936_v20 = vshrl.u32 %v1880_v32, 16 }
 0x189   : > { %v1510_v34 = vsel %vm4736_vm5, %v3366_v4, %v1509_v37  ;;  %v1151_v51 = vmul.f32 %v822_v41, %v5328_v55  ;;  %1515 = vst [vmem:[#allocation2 + $0xc] sm:$0x1] %v1514_v17  ;;  %3499 = vmatprep.mubr.msk.bf16.mxu1 %vm1692_vm2, %v3749_v50  ;;  %v3750_v42 = vld [vmem:[#allocation2 + $0x18] ss:$8 sps:$4 sm:$0xff]   ;;  %v1927_v37 = vrot.slane %v1925_v2, 5  ;;  %v842_v55 = vpop.permute.xlu1 %841  ;;  %v832_v35 = vpop.permute.xlu0 %831  ;;  %v1914_v17 = vor.u32 %v1913_v14, %v1910_v9  ;;  %v5331_v59 = vld [vmem:[#allocation30_spill] sm:$0xff] }
 0x18a   : > { %1511 = vst [vmem:[#allocation2 + $0x4] sm:$0x1] %v1510_v34  ;;  %v3370_v33 = vpack.c.bf16 %v1149_v63, %v1149_v63  ;;  %v1882_v4 = vld [vmem:[#allocation2 + $0x20] sm:$0xf]  ;;  %v1884_v41 = vld [vmem:[#allocation2 + $0x28] sm:$0xf]  ;;  %v4945_v34 = vmul.f32 %v4784_v62, %v479_v39 }
 0x18b   : > { %v3372_v18 = vpack.c.bf16 %v1151_v51, %v1151_v51  ;;  %v3751_v36 = vld [vmem:[#allocation2 + $0x30] ss:$8 sps:$4 sm:$0xff]   ;;  %v5332_v12 = vmax.f32 %v5331_v59, 0.0  ;;  %v5334_v51 = vmax.f32 %v5333_v57, 0.0  ;;  %v1915_v62 = vrot.slane %v1914_v17, 4 }
 0x18c   : > { %v1518_v52 = vsel %vm4736_vm5, %v3370_v33, %v1517_v53  ;;  %v3752_v63 = vld [vmem:[#allocation2 + $0x28] ss:$8 sps:$4 sm:$0xff]   ;;  %3546 = vmatmul.mubr.msk.bf16.vlgmr.msra.gmra.mrb[0].mxu0 %vm1692_vm2, %v3750_v42  ;;  %3500 = vmatmul.mubr.msk.bf16.gmra.mrb[4].mxu1 %vm1692_vm2, %v3751_v36  ;;  %v1928_v39 = vor.u32 %v1927_v37, %v1924_v43  ;;  %v1939_v9 = vshll.u32 %v1880_v32, 16  ;;  %v1953_v33 = vshll.u32 %v1882_v4, 16  ;;  %v1537_v37 = vld [vmem:[#allocation2 + $0x3c] sm:$0x1] }
 0x18d   : > { %v1522_v50 = vsel %vm4736_vm5, %v3372_v18, %v1521_v22  ;;  %v1155_v2 = vmul.f32 %v842_v55, %v5332_v12  ;;  %v1153_v24 = vmul.f32 %v832_v35, %v5334_v51  ;;  %1519 = vst [vmem:[#allocation2 + $0x14] sm:$0x1] %v1518_v52  ;;  %v1938_v22 = vrot.slane %v1936_v20, 4  ;;  %3549 = vmatprep.mubr.msk.bf16.mxu0 %vm1692_vm2, %v3752_v63  ;;  %v862_v55 = vpop.permute.xlu1 %861  ;;  %v852_v35 = vpop.permute.xlu0 %851 }
 0x18e   : > { %1523 = vst [vmem:[#allocation2 + $0x1c] sm:$0x1] %v1522_v50  ;;  %3554 = vmatpush3.bf16.msra.mxu0 %v4637_v7  ;;  %v1950_v18 = vshrl.u32 %v1882_v4, 16  ;;  %v4959_v50 = vrot.slane %v1928_v39, 4  ;;  %v1941_v52 = vrot.slane %v1939_v9, 5  ;;  %v1964_v42 = vshrl.u32 %v1884_v41, 16 }
 0x18f   : > { %v3376_v14 = vpack.c.bf16 %v1155_v2, %v1155_v2  ;;  %v3374_v53 = vpack.c.bf16 %v1153_v24, %v1153_v24  ;;  %v1967_v59 = vshll.u32 %v1884_v41, 16  ;;  %3648 = vmatprep.subr.msk.bf16.mxu0 %vm1705_vm0, %v4688_v61  ;;  %v5335_v7 = vmax.f32 %v4571_v21, 0.0  ;;  %v1533_v41 = vld [vmem:[#allocation2 + $0x34] sm:$0x1] }
 0x190   : > { %v5336_v4 = vmax.f32 %v4575_v15, 0.0  ;;  %v1877_v12 = vld [vmem:[#allocation2 + $0xc] sm:$0x1]  ;;  %v1942_v57 = vor.u32 %v1941_v52, %v1938_v22  ;;  %v1952_v51 = vrot.slane %v1950_v18, 4  ;;  %v1955_v63 = vrot.slane %v1953_v33, 5  ;;  %v5338_v18 = vld [vmem:[#allocation32_spill] sm:$0xff] }
 0x191   : > { %v1530_v32 = vsel %vm4736_vm5, %v3376_v14, %v1529_v31  ;;  %v1526_v43 = vsel %vm4736_vm5, %v3374_v53, %v1525_v40  ;;  %v1159_v20 = vmul.f32 %v862_v55, %v5335_v7  ;;  %v1875_v17 = vld [vmem:[#allocation2 + $0x4] sm:$0x1]  ;;  %v1917_v61 = vshll.u32 %v1877_v12, 16  ;;  %v957_v39 = vpop.permute.xlu1 %956  ;;  %v867_v9 = vpop.permute.xlu0 %866  ;;  %v1886_v7 = vld [vmem:[#allocation2 + $0x30] sm:$0xf] }
 0x192   : > { %v1157_v36 = vmul.f32 %v852_v35, %v5336_v4  ;;  %1531 = vst [vmem:[#allocation2 + $0x2c] sm:$0x1] %v1530_v32  ;;  %1527 = vst [vmem:[#allocation2 + $0x24] sm:$0x1] %v1526_v43  ;;  %v1903_v2 = vshll.u32 %v1875_v17, 16  ;;  %v1966_v40 = vrot.slane %v1964_v42, 4  ;;  %v1956_v12 = vor.u32 %v1955_v63, %v1952_v51 }
 0x193   : > { %v3380_v31 = vpack.c.bf16 %v1159_v20, %v1159_v20  ;;  %v1919_v14 = vrot.slane %v1917_v61, 5  ;;  %v1943_v53 = vrot.slane %v1942_v57, 4  ;;  %v1969_v15 = vrot.slane %v1967_v59, 5 }
 0x194   : > { %v3378_v24 = vpack.c.bf16 %v1157_v36, %v1157_v36  ;;  %v1905_v21 = vrot.slane %v1903_v2, 5  ;;  %v5337_v32 = vmax.f32 %v4592_v45, 0.0  ;;  %v5339_v52 = vmax.f32 %v5338_v18, 0.0  ;;  %v1879_v33 = vld [vmem:[#allocation2 + $0x14] sm:$0x1] }
 0x195   : > { %v1538_v55 = vsel %vm4736_vm5, %v3380_v31, %v1537_v37  ;;  %v1881_v42 = vld [vmem:[#allocation2 + $0x1c] sm:$0x1]  ;;  %v1920_v37 = vsel %vm4790_vm8, %v1915_v62, %v1919_v14  ;;  %v1931_v20 = vshll.u32 %v1879_v33, 16  ;;  %v872_v2 = vpop.permute.xlu0 %871  ;;  %v1970_v31 = vor.u32 %v1969_v15, %v1966_v40 }
 0x196   : > { %v1534_v35 = vsel %vm4736_vm5, %v3378_v24, %v1533_v41  ;;  %v1178_v22 = vmul.f32 %v957_v39, %v5337_v32  ;;  %v1160_v43 = vmul.f32 %v867_v9, %v5339_v52  ;;  %1539 = vst [vmem:[#allocation2 + $0x3c] sm:$0x1] %v1538_v55  ;;  %v1906_v59 = vsel %vm4790_vm8, %v4942_v56, %v1905_v21  ;;  %v1097_v41 = vpop.permute.xlu1 %1096  ;;  %v1888_v24 = vld [vmem:[#allocation2 + $0x38] sm:$0xf]  ;;  %v5340_v56 = vld [vmem:[#allocation33_spill] sm:$0xff]  ;;  %v5342_v21 = vld [vmem:[#allocation34_spill] sm:$0xff] }
 0x197   : > { %1535 = vst [vmem:[#allocation2 + $0x34] sm:$0x1] %v1534_v35  ;;  %v1945_v4 = vshll.u32 %v1881_v42, 16  ;;  %v3304_v17 = vcombine.low %v1906_v59, %v1920_v37  ;;  %v1933_v61 = vrot.slane %v1931_v20, 5  ;;  %v1978_v39 = vshrl.u32 %v1886_v7, 16 }
 0x198   : > { %v3399_v36 = vpack.c.bf16 %v1178_v22, %v1178_v22  ;;  %v3381_v45 = vpack.c.bf16 %v1160_v43, %v1160_v43  ;;  %v5341_v9 = vmax.f32 %v5340_v56, 0.0  ;;  %v5343_v14 = vmax.f32 %v5342_v21, 0.0  ;;  %v1541_v22 = vld [vmem:[#allocation2 + $0x44] sm:$0x1]  ;;  %v5348_v56 = vld [vmem:[#allocation39_spill] sm:$0xff] }
 0x199   : > { %v1947_v57 = vrot.slane %v1945_v4, 5  ;;  %3505 = vmatprep.mubr.msk.bf16.mxu1 %vm1692_vm2, %v3304_v17  ;;  %v1883_v51 = vld [vmem:[#allocation2 + $0x24] sm:$0x1]  ;;  %v1885_v63 = vld [vmem:[#allocation2 + $0x2c] sm:$0x1]  ;;  %v1957_v35 = vrot.slane %v1956_v12, 4  ;;  %v1934_v40 = vsel %vm4790_vm8, %v4959_v50, %v1933_v61  ;;  %v1107_v20 = vpop.permute.xlu0 %1106 }
 0x19a   : > { %1576 = vst.msk [vmem:[#allocation2 + $0x88] sm:$0xf] %vm1504_vm1, %v3399_v36  ;;  %1540 = vst.msk [vmem:[#allocation2 + $0x40] sm:$0xf] %vm1504_vm1, %v3381_v45  ;;  %v1206_v62 = vmul.f32 %v1097_v41, %v5341_v9  ;;  %v1161_v55 = vmul.f32 %v872_v2, %v5343_v14  ;;  %v1981_v32 = vshll.u32 %v1886_v7, 16  ;;  %v1959_v18 = vshll.u32 %v1883_v51, 16  ;;  %v1117_v37 = vpop.permute.xlu1 %1116 }
 0x19b   : > { %v1948_v15 = vsel %vm4790_vm8, %v1943_v53, %v1947_v57  ;;  %v1971_v52 = vrot.slane %v1970_v31, 4  ;;  %v1973_v59 = vshll.u32 %v1885_v63, 16  ;;  %v1980_v36 = vrot.slane %v1978_v39, 4  ;;  %v5344_v17 = vld [vmem:[#allocation35_spill] sm:$0xff]  ;;  %v5346_v41 = vld [vmem:[#allocation36_spill] sm:$0xff] }
 0x19c   : > { %v3427_v43 = vpack.c.bf16 %v1206_v62, %v1206_v62  ;;  %v3382_v33 = vpack.c.bf16 %v1161_v55, %v1161_v55  ;;  %v3305_v42 = vcombine.low %v1934_v40, %v1948_v15  ;;  %v1961_v4 = vrot.slane %v1959_v18, 5  ;;  %v3766_v40 = vld [vmem:[#allocation11 + $0x8] sm:$0x3]  ;;  %v2813_v15 = vld [vmem:[#allocation2 + $0x8] sm:$0xf] }
 0x19d   : > { %v1983_v45 = vrot.slane %v1981_v32, 5  ;;  %v1992_v7 = vshrl.u32 %v1888_v24, 16  ;;  %v5345_v12 = vmax.f32 %v5344_v17, 0.0  ;;  %v5347_v2 = vmax.f32 %v5346_v41, 0.0  ;;  %v1889_v9 = vld [vmem:[#allocation2 + $0x3c] sm:$0x1] }
 0x19e   : > { %1632 = vst.msk [vmem:[#allocation2 + $0xf8] sm:$0xf] %vm1504_vm1, %v3427_v43  ;;  %v1542_v50 = vsel %vm4736_vm5, %v3382_v33, %v1541_v22  ;;  %3506 = vmatmul.mubr.msk.bf16.vlgmr.msra.gmra.mrb[0].mxu1 %vm1692_vm2, %v3305_v42  ;;  %v1975_v57 = vrot.slane %v1973_v59, 5  ;;  %v1887_v31 = vld [vmem:[#allocation2 + $0x34] sm:$0x1]  ;;  %v1962_v39 = vsel %vm4790_vm8, %v1957_v35, %v1961_v4  ;;  %v1995_v22 = vshll.u32 %v1888_v24, 16  ;;  %v882_v43 = vpop.permute.xlu1 %881  ;;  %v1127_v33 = vpop.permute.xlu0 %1126 }
 0x19f   : > { %v1210_v53 = vmul.f32 %v1117_v37, %v5345_v12  ;;  %v1208_v61 = vmul.f32 %v1107_v20, %v5347_v2  ;;  %1543 = vst [vmem:[#allocation2 + $0x44] sm:$0x1] %v1542_v50  ;;  %3514 = vmatpush3.bf16.msra.mxu1 %v5348_v56  ;;  %v1984_v62 = vor.u32 %v1983_v45, %v1980_v36  ;;  %v1987_v21 = vshll.u32 %v1887_v31, 16  ;;  %v3754_v32 = vld [vmem:[#allocation2 + $0x50] ss:$8 sps:$4 sm:$0xff]   ;;  %v5349_v20 = vld [vmem:[#allocation37_spill] sm:$0xff] }
 0x1a0   : > { %v1994_v14 = vrot.slane %v1992_v7, 4  ;;  %v1976_v63 = vsel %vm4790_vm8, %v1971_v52, %v1975_v57  ;;  %3644 = vmatprep.subr.msk.bf16.mxu1 %vm1705_vm0, %v3766_v40  ;;  %v2815_v18 = vld [vmem:[#allocation2 + $0x10] sm:$0xf]  ;;  %v5350_v4 = vmax.f32 %v5349_v20, 0.0  ;;  %v5351_v36 = vld [vmem:[#allocation38_spill] sm:$0xff]  ;;  %v1997_v7 = vrot.slane %v1995_v22, 5 }
 0x1a1   : > { %v3431_v55 = vpack.c.bf16 %v1210_v53, %v1210_v53  ;;  %v3429_v51 = vpack.c.bf16 %v1208_v61, %v1208_v61  ;;  %v3306_v42 = vcombine.low %v1962_v39, %v1976_v63  ;;  %v3753_v35 = vld [vmem:[#allocation2 + $0x38] ss:$8 sps:$4 sm:$0xff]   ;;  %v1985_v59 = vrot.slane %v1984_v62, 4  ;;  %v2814_v17 = vld [vmem:[#allocation2 + $0xc] sm:$0x1] }
 0x1a2   : > { %v1989_v37 = vrot.slane %v1987_v21, 5  ;;  %v1163_v52 = vmul.f32 %v882_v43, %v5350_v4  ;;  %v5352_v24 = vmax.f32 %v5351_v36, 0.0  ;;  %v2001_v50 = vshll.u32 %v1889_v9, 16  ;;  %v1545_v12 = vld [vmem:[#allocation2 + $0x4c] sm:$0x1]  ;;  %3550 = vmatmul.mubr.msk.bf16.gmra.mrb[4].mxu0 %vm1692_vm2, %v3753_v35  ;;  %v902_v21 = vpop.permute.xlu1 %901 }
 0x1a3   : > { %1640 = vst.msk [vmem:[#allocation2 + $0x108] sm:$0xf] %vm1504_vm1, %v3431_v55  ;;  %1636 = vst.msk [vmem:[#allocation2 + $0x100] sm:$0xf] %vm1504_vm1, %v3429_v51  ;;  %3509 = vmatprep.mubr.msk.bf16.mxu1 %vm1692_vm2, %v3306_v42  ;;  %v2830_v41 = vshrl.u32 %v2813_v15, 16  ;;  %v2833_v2 = vshll.u32 %v2813_v15, 16  ;;  %v5022_v61 = vadd.f32 %v4808_v60, %v4945_v34  ;;  %3555 = vmatprep.mubr.msk.bf16.mxu0 %vm1692_vm2, %v3754_v32  ;;  %v892_v55 = vpop.permute.xlu0 %891 }
 0x1a4   : > { %v1212_v45 = vmul.f32 %v1127_v33, %v5352_v24  ;;  %v1990_v53 = vsel %vm4790_vm8, %v1985_v59, %v1989_v37  ;;  %v3384_v57 = vpack.c.bf16 %v1163_v52, %v1163_v52  ;;  %v1998_v56 = vor.u32 %v1997_v7, %v1994_v14  ;;  %v2816_v9 = vld [vmem:[#allocation2 + $0x14] sm:$0x1]  ;;  %v2817_v62 = vld [vmem:[#allocation2 + $0x18] sm:$0xf]  ;;  %v1553_v60 = vld [vmem:[#allocation2 + $0x5c] sm:$0x1] }
 0x1a5   : > { %v2003_v39 = vrot.slane %v2001_v50, 5  ;;  %v2832_v51 = vrot.slane %v2830_v41, 4  ;;  %v2835_v63 = vrot.slane %v2833_v2, 5  ;;  %v2839_v22 = vshll.u32 %v2814_v17, 16  ;;  %v1549_v42 = vld [vmem:[#allocation2 + $0x54] sm:$0x1] }
 0x1a6   : > { %v3433_v31 = vpack.c.bf16 %v1212_v45, %v1212_v45  ;;  %v2844_v40 = vshrl.u32 %v2815_v18, 16  ;;  %v1546_v15 = vsel %vm4736_vm5, %v3384_v57, %v1545_v12  ;;  %v5353_v34 = vmax.f32 %v4657_v27, 0.0  ;;  %v3756_v24 = vld [vmem:[#allocation2 + $0x60] ss:$8 sps:$4 sm:$0xff]   ;;  %v1561_v27 = vld [vmem:[#allocation2 + $0x6c] sm:$0x1]  ;;  %v922_v50 = vpop.permute.xlu1 %921 }
 0x1a7   : > { %v5354_v14 = vmax.f32 %v4670_v13, 0.0  ;;  %v1999_v33 = vrot.slane %v1998_v56, 4  ;;  %1547 = vst [vmem:[#allocation2 + $0x4c] sm:$0x1] %v1546_v15  ;;  %v2836_v35 = vor.u32 %v2835_v63, %v2832_v51  ;;  %v2847_v37 = vshll.u32 %v2815_v18, 16  ;;  %v912_v13 = vpop.permute.xlu0 %911 }
 0x1a8   : > { %1644 = vst.msk [vmem:[#allocation2 + $0x110] sm:$0xf] %vm1504_vm1, %v3433_v31  ;;  %v1167_v43 = vmul.f32 %v902_v21, %v5353_v34  ;;  %v2846_v59 = vrot.slane %v2844_v40, 4  ;;  %v2853_v20 = vshll.u32 %v2816_v9, 16  ;;  %v2858_v45 = vshrl.u32 %v2817_v62, 16 }
 0x1a9   : > { %v1165_v32 = vmul.f32 %v892_v55, %v5354_v14  ;;  %v2004_v36 = vsel %vm4790_vm8, %v1999_v33, %v2003_v39  ;;  %v1557_v17 = vld [vmem:[#allocation2 + $0x64] sm:$0x1]  ;;  %v2841_v12 = vrot.slane %v2839_v22, 5  ;;  %v2849_v41 = vrot.slane %v2847_v37, 5  ;;  %v2819_v2 = vld [vmem:[#allocation2 + $0x20] sm:$0xf] }
 0x1aa   : > { %v3388_v4 = vpack.c.bf16 %v1167_v43, %v1167_v43  ;;  %v3307_v7 = vcombine.low %v1990_v53, %v2004_v36  ;;  %v3755_v31 = vld [vmem:[#allocation2 + $0x90] ss:$8 sps:$4 sm:$0xff]   ;;  %v5355_v56 = vmax.f32 %v4698_v47, 0.0  ;;  %v5356_v9 = vmax.f32 %v4701_v26, 0.0  ;;  %v2818_v21 = vld [vmem:[#allocation2 + $0x1c] sm:$0x1]  ;;  %3556 = vmatmul.mubr.msk.bf16.vlgmr.msra.gmra.mrb[0].mxu0 %vm1692_vm2, %v3756_v24  ;;  %v942_v43 = vpop.permute.xlu1 %941 }
 0x1ab   : > { %v3386_v52 = vpack.c.bf16 %v1165_v32, %v1165_v32  ;;  %v3757_v55 = vld [vmem:[#allocation2 + $0x70] ss:$8 sps:$4 sm:$0xff]   ;;  %v2837_v51 = vrot.slane %v2836_v35, 4  ;;  %v2850_v63 = vor.u32 %v2849_v41, %v2846_v59  ;;  %v2855_v22 = vrot.slane %v2853_v20, 5  ;;  %3564 = vmatpush3.bf16.msra.mxu0 %v4718_v28  ;;  %v2820_v26 = vld [vmem:[#allocation2 + $0x24] sm:$0x1]  ;;  %v932_v14 = vpop.permute.xlu0 %931 }
 0x1ac   : > { %v1554_v57 = vsel %vm4736_vm5, %v3388_v4, %v1553_v60  ;;  %v1171_v39 = vmul.f32 %v922_v50, %v5355_v56  ;;  %v1169_v53 = vmul.f32 %v912_v13, %v5356_v9  ;;  %3510 = vmatmul.mubr.msk.bf16.gmra.mrb[4].mxu1 %vm1692_vm2, %v3307_v7  ;;  %v2861_v40 = vshll.u32 %v2817_v62, 16  ;;  %3559 = vmatprep.mubr.msk.bf16.mxu0 %vm1692_vm2, %v3757_v55  ;;  %v1569_v36 = vld [vmem:[#allocation2 + $0x7c] sm:$0x1]  ;;  %v1565_v24 = vld [vmem:[#allocation2 + $0x74] sm:$0x1] }
 0x1ad   : > { %v1550_v18 = vsel %vm4736_vm5, %v3386_v52, %v1549_v42  ;;  %1555 = vst [vmem:[#allocation2 + $0x5c] sm:$0x1] %v1554_v57  ;;  %3515 = vmatprep.mubr.msk.bf16.mxu1 %vm1692_vm2, %v3755_v31  ;;  %v2860_v60 = vrot.slane %v2858_v45, 4  ;;  %v2872_v34 = vshrl.u32 %v2819_v2, 16  ;;  %v2851_v32 = vrot.slane %v2850_v63, 4 }
 0x1ae   : > { %1551 = vst [vmem:[#allocation2 + $0x54] sm:$0x1] %v1550_v18  ;;  %v3392_v15 = vpack.c.bf16 %v1171_v39, %v1171_v39  ;;  %v3390_v47 = vpack.c.bf16 %v1169_v53, %v1169_v53  ;;  %v2863_v33 = vrot.slane %v2861_v40, 5  ;;  %v2867_v42 = vshll.u32 %v2818_v21, 16  ;;  %v2821_v52 = vld [vmem:[#allocation2 + $0x28] sm:$0xf]  ;;  %v962_v57 = vpop.permute.xlu1 %961 }
 0x1af   : > { %v2875_v35 = vshll.u32 %v2819_v2, 16  ;;  %v5357_v37 = vmax.f32 %v4706_v48, 0.0  ;;  %v5358_v20 = vmax.f32 %v4709_v19, 0.0  ;;  %v2842_v45 = vsel %vm4790_vm8, %v2837_v51, %v2841_v12  ;;  %v3758_v48 = vld [vmem:[#allocation2 + $0xa0] ss:$8 sps:$4 sm:$0xff]   ;;  %v952_v18 = vpop.permute.xlu0 %951 }
 0x1b0   : > { %v1562_v62 = vsel %vm4736_vm5, %v3392_v15, %v1561_v27  ;;  %v1558_v59 = vsel %vm4736_vm5, %v3390_v47, %v1557_v17  ;;  %v2856_v7 = vsel %vm4790_vm8, %v2851_v32, %v2855_v22  ;;  %v2874_v27 = vrot.slane %v2872_v34, 4  ;;  %v2823_v19 = vld [vmem:[#allocation2 + $0x30] sm:$0xf]  ;;  %v3760_v31 = vld [vmem:[#allocation2 + $0x80] ss:$8 sps:$4 sm:$0xff]   ;;  %v5361_v32 = vld [vmem:[#allocation20_spill] sm:$0xff] }
 0x1b1   : > { %v1175_v28 = vmul.f32 %v942_v43, %v5357_v37  ;;  %v1173_v4 = vmul.f32 %v932_v14, %v5358_v20  ;;  %1563 = vst [vmem:[#allocation2 + $0x6c] sm:$0x1] %v1562_v62  ;;  %1559 = vst [vmem:[#allocation2 + $0x64] sm:$0x1] %v1558_v59  ;;  %v2881_v50 = vshll.u32 %v2820_v26, 16  ;;  %v2864_v41 = vor.u32 %v2863_v33, %v2860_v60 }
 0x1b2   : > { %v2877_v2 = vrot.slane %v2875_v35, 5  ;;  %v3352_v56 = vcombine.low %v2842_v45, %v2856_v7  ;;  %v2869_v39 = vrot.slane %v2867_v42, 5  ;;  %v2886_v9 = vshrl.u32 %v2821_v52, 16  ;;  %v3759_v55 = vld [vmem:[#allocation2 + $0xb0] ss:$8 sps:$4 sm:$0xff]   ;;  %3560 = vmatmul.mubr.msk.bf16.gmra.mrb[4].mxu0 %vm1692_vm2, %v3760_v31  ;;  %v1062_v62 = vpop.permute.xlu1 %1061 }
 0x1b3   : > { %v3396_v17 = vpack.c.bf16 %v1175_v28, %v1175_v28  ;;  %v3394_v13 = vpack.c.bf16 %v1173_v4, %v1173_v4  ;;  %v2889_v53 = vshll.u32 %v2821_v52, 16  ;;  %v1577_v51 = vld [vmem:[#allocation2 + $0x8c] sm:$0x1]  ;;  %v5359_v63 = vmax.f32 %v4712_v3, 0.0  ;;  %v1573_v26 = vld [vmem:[#allocation2 + $0x84] sm:$0x1]  ;;  %v1052_v59 = vpop.permute.xlu0 %1051 }
 0x1b4   : > { %v5360_v40 = vmax.f32 %v4721_v0, 0.0  ;;  %v2822_v47 = vld [vmem:[#allocation2 + $0x2c] sm:$0x1]  ;;  %3516 = vmatmul.mubr.msk.bf16.vlgmr.msra.gmra.mrb[0].mxu1 %vm1692_vm2, %v3758_v48  ;;  %v2878_v60 = vor.u32 %v2877_v2, %v2874_v27  ;;  %v2883_v34 = vrot.slane %v2881_v50, 5  ;;  %v2888_v43 = vrot.slane %v2886_v9, 4  ;;  %3565 = vmatprep.mubr.msk.bf16.mxu0 %vm1692_vm2, %v3352_v56 }
 0x1b5   : > { %v1570_v12 = vsel %vm4736_vm5, %v3396_v17, %v1569_v36  ;;  %v1566_v21 = vsel %vm4736_vm5, %v3394_v13, %v1565_v24  ;;  %v1179_v22 = vmul.f32 %v962_v57, %v5359_v63  ;;  %v2891_v14 = vrot.slane %v2889_v53, 5  ;;  %3519 = vmatprep.mubr.msk.bf16.mxu1 %vm1692_vm2, %v3759_v55  ;;  %3574 = vmatpush3.bf16.msra.mxu1 %v5361_v32  ;;  %v2824_v42 = vld [vmem:[#allocation2 + $0x34] sm:$0x1]  ;;  %v5362_v24 = vld [vmem:[#allocation40_spill] sm:$0xff]  ;;  %v3761_v31 = vld [vmem:[#allocation2 + $0xc0] ss:$8 sps:$4 sm:$0xff]  }
 0x1b6   : > { %v1177_v15 = vmul.f32 %v952_v18, %v5360_v40  ;;  %1571 = vst [vmem:[#allocation2 + $0x7c] sm:$0x1] %v1570_v12  ;;  %1567 = vst [vmem:[#allocation2 + $0x74] sm:$0x1] %v1566_v21  ;;  %v2865_v0 = vrot.slane %v2864_v41, 4  ;;  %v2900_v35 = vshrl.u32 %v2823_v19, 16  ;;  %v1197_v27 = vmul.f32 %v1052_v59, %v693_v49  ;;  %v1082_v49 = vpop.permute.xlu1 %1081 }
 0x1b7   : > { %v3400_v3 = vpack.c.bf16 %v1179_v22, %v1179_v22  ;;  %v2879_v37 = vrot.slane %v2878_v60, 4  ;;  %v2892_v28 = vor.u32 %v2891_v14, %v2888_v43  ;;  %v2895_v20 = vshll.u32 %v2822_v47, 16  ;;  %v2825_v50 = vld [vmem:[#allocation2 + $0x38] sm:$0xf]  ;;  %v1617_v17 = vld [vmem:[#allocation2 + $0xdc] sm:$0x1]  ;;  %v1072_v53 = vpop.permute.xlu0 %1071 }
 0x1b8   : > { %v3398_v33 = vpack.c.bf16 %v1177_v15, %v1177_v15  ;;  %v2903_v4 = vshll.u32 %v2823_v19, 16  ;;  %v5363_v45 = vmax.f32 %v5362_v24, 0.0  ;;  %v1613_v13 = vld [vmem:[#allocation2 + $0xd4] sm:$0x1]  ;;  %v2870_v48 = vsel %vm4790_vm8, %v2865_v0, %v2869_v39  ;;  %v2827_v55 = vld [vmem:[#allocation2 + $0x40] sm:$0xf] }
 0x1b9   : > { %v1578_v52 = vsel %vm4736_vm5, %v3400_v3, %v1577_v51  ;;  %v2884_v41 = vsel %vm4790_vm8, %v2879_v37, %v2883_v34  ;;  %v2902_v2 = vrot.slane %v2900_v35, 4  ;;  %v2909_v19 = vshll.u32 %v2824_v42, 16  ;;  %v3762_v40 = vld [vmem:[#allocation2 + $0xf8] ss:$8 sps:$4 sm:$0xff]   ;;  %v2828_v60 = vld [vmem:[#allocation2 + $0x44] sm:$0x1] }
 0x1ba   : > { %v1574_v36 = vsel %vm4736_vm5, %v3398_v33, %v1573_v26  ;;  %v1199_v7 = vmul.f32 %v1062_v62, %v5363_v45  ;;  %1579 = vst [vmem:[#allocation2 + $0x8c] sm:$0x1] %v1578_v52  ;;  %v3418_v18 = vpack.c.bf16 %v1197_v27, %v1197_v27  ;;  %v2893_v56 = vrot.slane %v2892_v28, 4  ;;  %v2826_v26 = vld [vmem:[#allocation2 + $0x3c] sm:$0x1] }
 0x1bb   : > { %1575 = vst [vmem:[#allocation2 + $0x84] sm:$0x1] %v1574_v36  ;;  %v2905_v9 = vrot.slane %v2903_v4, 5  ;;  %v3353_v12 = vcombine.low %v2870_v48, %v2884_v41  ;;  %v2897_v21 = vrot.slane %v2895_v20, 5  ;;  %v2914_v51 = vshrl.u32 %v2825_v50, 16  ;;  %v1092_v0 = vpop.permute.xlu0 %1091 }
 0x1bc   : > { %v3420_v57 = vpack.c.bf16 %v1199_v7, %v1199_v7  ;;  %v2917_v63 = vshll.u32 %v2825_v50, 16  ;;  %v1614_v22 = vsel %vm4736_vm5, %v3418_v18, %v1613_v13  ;;  %v1203_v15 = vmul.f32 %v1082_v49, %v699_v5  ;;  %3520 = vmatmul.mubr.msk.bf16.gmra.mrb[4].mxu1 %vm1692_vm2, %v3761_v31  ;;  %v1621_v34 = vld [vmem:[#allocation2 + $0xe4] sm:$0x1]  ;;  %v1633_v52 = vld [vmem:[#allocation2 + $0xfc] sm:$0x1] }
 0x1bd   : > { %v1201_v47 = vmul.f32 %v1072_v53, %v697_v54  ;;  %1615 = vst [vmem:[#allocation2 + $0xd4] sm:$0x1] %v1614_v22  ;;  %3566 = vmatmul.mubr.msk.bf16.vlgmr.msra.gmra.mrb[0].mxu0 %vm1692_vm2, %v3353_v12  ;;  %v2906_v43 = vor.u32 %v2905_v9, %v2902_v2  ;;  %v2911_v14 = vrot.slane %v2909_v19, 5  ;;  %v2916_v32 = vrot.slane %v2914_v51, 4  ;;  %3529 = vmatprep.mubr.msk.bf16.mxu1 %vm1692_vm2, %v3762_v40  ;;  %v1102_v54 = vpop.permute.xlu1 %1101  ;;  %v1629_v36 = vld [vmem:[#allocation2 + $0xf4] sm:$0x1] }
 0x1be   : > { %v1618_v39 = vsel %vm4736_vm5, %v3420_v57, %v1617_v17  ;;  %v2919_v3 = vrot.slane %v2917_v63, 5  ;;  %v3424_v46 = vpack.c.bf16 %v1203_v15, %v1203_v15  ;;  %v2928_v33 = vshrl.u32 %v2827_v55, 16  ;;  %v1641_v19 = vld [vmem:[#allocation2 + $0x10c] sm:$0x1]  ;;  %v1637_v31 = vld [vmem:[#allocation2 + $0x104] sm:$0x1] }
 0x1bf   : > { %1619 = vst [vmem:[#allocation2 + $0xdc] sm:$0x1] %v1618_v39  ;;  %v3422_v5 = vpack.c.bf16 %v1201_v47, %v1201_v47  ;;  %v2931_v58 = vshll.u32 %v2827_v55, 16  ;;  %v2898_v42 = vsel %vm4790_vm8, %v2893_v56, %v2897_v21  ;;  %v2907_v35 = vrot.slane %v2906_v43, 4  ;;  %v1112_v41 = vpop.permute.xlu0 %1111  ;;  %v3763_v12 = vld [vmem:[#allocation2 + $0x108] ss:$8 sps:$4 sm:$0xff]  }
 0x1c0   : > { %v2923_v62 = vshll.u32 %v2826_v26, 16  ;;  %v2937_v59 = vshll.u32 %v2828_v60, 16  ;;  %v1626_v37 = vsel %vm4736_vm5, %v3424_v46, %v1625_v11  ;;  %v1207_v20 = vmul.f32 %v1102_v54, %v703_v29  ;;  %v1649_v39 = vld [vmem:[#allocation2 + $0x11c] sm:$0x1]  ;;  %v1645_v40 = vld [vmem:[#allocation2 + $0x114] sm:$0x1] }
 0x1c1   : > { %v1622_v28 = vsel %vm4736_vm5, %v3422_v5, %v1621_v34  ;;  %v1205_v4 = vmul.f32 %v1092_v0, %v701_v1  ;;  %1627 = vst [vmem:[#allocation2 + $0xec] sm:$0x1] %v1626_v37  ;;  %v2912_v24 = vsel %vm4790_vm8, %v2907_v35, %v2911_v14  ;;  %v2920_v45 = vor.u32 %v2919_v3, %v2916_v32  ;;  %v1122_v48 = vpop.permute.xlu1 %1121 }
 0x1c2   : > { %1623 = vst [vmem:[#allocation2 + $0xe4] sm:$0x1] %v1622_v28  ;;  %v2930_v7 = vrot.slane %v2928_v33, 4  ;;  %v2933_v27 = vrot.slane %v2931_v58, 5  ;;  %v3428_v50 = vpack.c.bf16 %v1207_v20, %v1207_v20  ;;  %v3354_v13 = vcombine.low %v2898_v42, %v2912_v24 }
 0x1c3   : > { %v3426_v17 = vpack.c.bf16 %v1205_v4, %v1205_v4  ;;  %v2925_v25 = vrot.slane %v2923_v62, 5  ;;  %v2939_v2 = vrot.slane %v2937_v59, 5  ;;  %v1211_v57 = vmul.f32 %v1122_v48, %v707_v6  ;;  %v1132_v55 = vpop.permute.xlu0 %1131 }
 0x1c4   : > { %v2934_v29 = vor.u32 %v2933_v27, %v2930_v7  ;;  %v1634_v10 = vsel %vm4736_vm5, %v3428_v50, %v1633_v52  ;;  %3569 = vmatprep.mubr.msk.bf16.mxu0 %vm1692_vm2, %v3354_v13  ;;  %v1209_v18 = vmul.f32 %v1112_v41, %v705_v16  ;;  %v2921_v56 = vrot.slane %v2920_v45, 4 }
 0x1c5   : > { %v1630_v1 = vsel %vm4736_vm5, %v3426_v17, %v1629_v36  ;;  %1635 = vst [vmem:[#allocation2 + $0xfc] sm:$0x1] %v1634_v10  ;;  %v709_v11 = vmax.f32 %v5022_v61, 0.0  ;;  %v3432_v49 = vpack.c.bf16 %v1211_v57, %v1211_v57  ;;  %v1142_v6 = vpop.permute.xlu1 %1141  ;;  %v5364_v61 = vmax.f32 %v4900_v8, 0.0 }
 0x1c6   : > { %1631 = vst [vmem:[#allocation2 + $0xf4] sm:$0x1] %v1630_v1  ;;  %v2935_v9 = vrot.slane %v2934_v29, 4  ;;  %v3430_v53 = vpack.c.bf16 %v1209_v18, %v1209_v18  ;;  %v2926_v21 = vsel %vm4790_vm8, %v2921_v56, %v2925_v25 }
 0x1c7   : > { %v1642_v38 = vsel %vm4736_vm5, %v3432_v49, %v1641_v19  ;;  %v1215_v63 = vmul.f32 %v1142_v6, %v5364_v61  ;;  %v1213_v44 = vmul.f32 %v1132_v55, %v709_v11  ;;  %v1047_v26 = vpop.permute.xlu0 %1046 }
 0x1c8   : > { %v2940_v30 = vsel %vm4790_vm8, %v2935_v9, %v2939_v2  ;;  %v1638_v16 = vsel %vm4736_vm5, %v3430_v53, %v1637_v31  ;;  %1643 = vst [vmem:[#allocation2 + $0x10c] sm:$0x1] %v1642_v38  ;;  %3530 = vmatmul.mubr.msk.bf16.vlgmr.msra.gmra.mrb[4].mxu1 %vm1692_vm2, %v3763_v12 }
 0x1c9   : > { %v3355_v51 = vcombine.low %v2926_v21, %v2940_v30  ;;  %1639 = vst [vmem:[#allocation2 + $0x104] sm:$0x1] %v1638_v16  ;;  %v3436_v22 = vpack.c.bf16 %v1215_v63, %v1215_v63  ;;  %v3434_v15 = vpack.c.bf16 %v1213_v44, %v1213_v44  ;;  %v1137_v47 = vpop.permute.xlu1 %1136 }
 0x1cb   : > { %3570 = vmatmul.mubr.msk.bf16.gmra.mrb[4].mxu0 %vm1692_vm2, %v3355_v51  ;;  %v1650_v60 = vsel %vm4736_vm5, %v3436_v22, %v1649_v39  ;;  %v1646_v8 = vsel %vm4736_vm5, %v3434_v15, %v1645_v40 }
 0x1cc   : > { %1651 = vst [vmem:[#allocation2 + $0x11c] sm:$0x1] %v1650_v60  ;;  %1647 = vst [vmem:[#allocation2 + $0x114] sm:$0x1] %v1646_v8 }
 0x287   : > { %v3517_v34 = vpop.f32.mrb[0].mxu1 }
 0x288   : > { %v2187_v43 = vpop.f32.mrb[1].mxu1 }
 0x289   : > { %v3518_v14 = vpop.f32.mrb[2].mxu1 }
 0x28a   : > { %v2190_v32 = vpop.f32.mrb[3].mxu1 }
 0x290   : > { %v3567_v3 = vpop.f32.mrb[0].mxu0 }
 0x291   : > { %v3575_v46 = vadd.f32 %v3567_v3, %v3517_v34  ;;  %v3004_v5 = vpop.f32.mrb[1].mxu0 }
 0x292   : > { %v3576_v33 = vadd.f32 %v3004_v5, %v2187_v43  ;;  %v3568_v58 = vpop.f32.mrb[2].mxu0 }
 0x293   : > { %v3045_v54 = vpack.c.bf16 %v3575_v46, %v3575_v46  ;;  %v3577_v0 = vadd.f32 %v3568_v58, %v3518_v14  ;;  %v3007_v42 = vpop.f32.mrb[3].mxu0 }
 0x294   : > { %v3043_v35 = vpack.c.bf16 %v3576_v33, %v3576_v33  ;;  %v3578_v62 = vadd.f32 %v3007_v42, %v2190_v32 }
 0x295   : > { %3053 = vst.msk [vmem:[%s336_s28 + $0x8] sm:$0xf] %vm1504_vm1, %v3045_v54  ;;  %v3046_v23 = vpack.c.bf16 %v3577_v0, %v3577_v0 }
 0x296   : > { %3051 = vst.msk [vmem:[%s336_s28] sm:$0xf] %vm1504_vm1, %v3043_v35  ;;  %v3044_v59 = vpack.c.bf16 %v3578_v62, %v3578_v62 }
 0x297   : > { %3054 = vst.msk [vmem:[%s336_s28 + $0xc] sm:$0xf] %vm1504_vm1, %v3046_v23 }
 0x298   : > { %3052 = vst.msk [vmem:[%s336_s28 + $0x4] sm:$0xf] %vm1504_vm1, %v3044_v59 }
 0x29b   : > { %v3531_v37 = vpop.f32.mrb[4].mxu1 }
 0x29c   : > { %v2322_v28 = vpop.f32.mrb[5].mxu1 }
 0x29d   : > { %v3532_v4 = vpop.f32.mrb[6].mxu1 }
 0x29e   : > { %v3571_v20 = vpop.f32.mrb[4].mxu0  ;;  %v2325_v24 = vpop.f32.mrb[7].mxu1 }
 0x29f   : > { %v3579_v52 = vadd.f32 %v3571_v20, %v3531_v37  ;;  %v3020_v36 = vpop.f32.mrb[5].mxu0 }
 0x2a0   : > { %v3580_v45 = vadd.f32 %v3020_v36, %v2322_v28  ;;  %v3572_v7 = vpop.f32.mrb[6].mxu0 }
 0x2a1   : > { %v3049_v27 = vpack.c.bf16 %v3579_v52, %v3579_v52  ;;  %v3581_v50 = vadd.f32 %v3572_v7, %v3532_v4  ;;  %v3023_v17 = vpop.f32.mrb[7].mxu0 }
 0x2a2   : > { %v3047_v13 = vpack.c.bf16 %v3580_v45, %v3580_v45  ;;  %v3582_v48 = vadd.f32 %v3023_v17, %v2325_v24 }
 0x2a3   : > { %3057 = vst.msk [vmem:[%s336_s28 + $0x18] sm:$0xf] %vm1504_vm1, %v3049_v27  ;;  %v3050_v41 = vpack.c.bf16 %v3581_v50, %v3581_v50 }
 0x2a4   : > { %3055 = vst.msk [vmem:[%s336_s28 + $0x10] sm:$0xf] %vm1504_vm1, %v3047_v13  ;;  %v3048_v25 = vpack.c.bf16 %v3582_v48, %v3582_v48 }
 0x2a5   : > { %3058 = vst.msk [vmem:[%s336_s28 + $0x1c] sm:$0xf] %vm1504_vm1, %v3050_v41 }
 0x2a6   : > { %3056 = vst.msk [vmem:[%s336_s28 + $0x14] sm:$0xf] %vm1504_vm1, %v3048_v25 }
 0x2a7   : > { %3927 = shalt.err (!%p3924_p2)
}
 0x2a8   : > { %s3928_s16 = scalar_lea.hbm %s5143_s17, 512  ;;  %s3932_s30 = scalar_lea.hbm %s5197_s5, 1024 }
 0x2a9   : > { %p3929_p5 = scmp.ne.s32.totalorder %s5143_s17, %s3928_s16  ;;  %p3933_p0 = scmp.lt.u32.totalorder %s5143_s17, %s5197_s5 }
 0x2aa   : > { %p3934_p11 = scmp.lt.u32.totalorder %s3932_s30, %s3928_s16  ;;  %p3936_p6 = scmp.lt.u32.totalorder %s3928_s16, %s5143_s17 }
 0x2ab   : > { %p3930_p12 = pnand %p3929_p5, %p5365_p10 }
 0x2ac   : > { %p3935_p1 = por %p3934_p11, %p3933_p0 }
 0x2ad   : > { %p3931_p3 = pneg %p3930_p12 }
 0x2ae   : > { %p3937_p8 = por %p3936_p6, %p3935_p1 }
 0x2b0   : > { %p3938_p9 = pnand %p3937_p8, %p3931_p3 }
 0x2b2   : > { %3941 = shalt.err (!%p3938_p9)
}
 0x2b3   : > { %s4003_s12 = smov 64   ;;  %s4004_s23 = smov 4  }
 0x2b4   : > { %3666 = dma.vmem_to_hbm [thread:$0]  (%p5365_p10), %s5145_s8, 512, %s5143_s17, %s3060_s22, %s4003_s12, %s4003_s12, %s4004_s23  }
 0x2b5 PF: > { %s3088_s27 = sand.u32 1, %s3976_s18   ;;  %p5366_p4 = scmp.ne.s32.totalorder %s5236_s25, 0 }
 0x2b6   : > { %p5367_p13 = scmp.ge.s32.totalorder %s3988_s21, 2  ;;  %s3089_s24 = scalar_lea.sflag [#allocation5], %s3088_s27 }
 0x2b8   : > { %p3686_p7 = pnand %p5367_p13, %p5366_p4 }
 0x2ba   : > { %3971 = dma.done.wait (!%p3686_p7), %s3089_s24, 512  }
 0x2bb   : > { %3973 = vsyncadd (!%p3686_p7), %s3089_s24, 4294966784  ;;  %s5368_s21 = sld [smem:[#allocation18_spill]]  ;;  %s5369_s28 = sld [smem:[#allocation17_spill]] }
 0x2bc   : > { %s5370_s20 = sld [smem:[#allocation19_spill]]  ;;  %s5371_s18 = smov %s3980_s19 }
 0x2c1   : > { %p22_p2 = scmp.ge.s32.totalorder %s5368_s21, 4   ;;  %s5372_s19 = smov %s5369_s28 }
 0x2c3   :  { %24 = sbr.rel (!%p22_p2) target bundleno = 11 (0xb), region = 130 }
 0x2ca   :  { %3094 = vsyncpa [#allocation4], 1 }
 0x2cb   :  { %3096 = vsyncpa [#allocation4 + $0x1], 1 }
 0x2cc   :  { %3097 = vsyncpa [#allocation7], 1 }
 0x2cd   :  { %3099 = vsyncpa [#allocation7 + $0x1], 1 }
 0x2ce   :  { %3100 = vsyncpa [#allocation10], 1 }
 0x2cf   :  { %3101 = vsyncpa [#allocation5], 1 }
 0x2d0   :  { %3103 = vsyncpa [#allocation5 + $0x1], 1 }

</bundles_post_ra>
